<compile_context>
chip_gen: v7x
topology: tpu7x:2x2x1
jax: 0.10.0
libtpu: 0.0.40
codegen_flags: <defaults>
</compile_context>

<pallas_src>
import functools
import math

import jax
import jax.numpy as jnp
from jax.experimental import pallas as pl
from jax.experimental.pallas import tpu as pltpu


_EPS = 1e-5
_SLOPE = 0.2
_VMEM_LIMIT = 32 * 1024 * 1024        # safe on v5e/v6e/v7x scoped limits
_TILE_BUDGET = 8 * 1024 * 1024        # per-call working-set budget for grid=1


# ----------------------------- Pallas kernels -----------------------------

def _conv_epi_kernel(*refs, n_src, has_bias, act):
    """(cout_p, tile_m) = sum_i W_i @ cols_i [+ b], optional sigmoid epilogue."""
    cols = refs[:n_src]
    ws = refs[n_src:2 * n_src]
    idx = 2 * n_src
    b_ref = refs[idx] if has_bias else None
    o_ref = refs[idx + (1 if has_bias else 0)]

    y = jnp.dot(ws[0][...], cols[0][...], preferred_element_type=jnp.float32)
    for i in range(1, n_src):
        y = y + jnp.dot(ws[i][...], cols[i][...], preferred_element_type=jnp.float32)
    if has_bias:
        y = y + b_ref[...]
    if act == "sigmoid":
        y = 1.0 / (1.0 + jnp.exp(-y))          # exact f32 epilogue (final output)
    o_ref[...] = y.astype(o_ref.dtype)


def _conv_bn_kernel(*refs, n_src, tile_m, m_total, eps, slope):
    """Fused conv + BatchNorm(batch stats, gamma=1, beta=0) + LeakyReLU(0.2).

    Streaming-statistics variant: pre-BN tiles are written straight into the
    resident output block (constant index_map) while per-channel sum and
    sum-of-squares accumulate into tiny (cout, 1) scratches; the last grid
    step normalizes the resident block in place.  No bias input — a
    per-channel constant is cancelled exactly by the BN mean subtraction.
    """
    cols = refs[:n_src]
    ws = refs[n_src:2 * n_src]
    o_ref = refs[2 * n_src]
    single = (tile_m == m_total)               # static (Python) branch

    m = pl.program_id(0)
    y = jnp.dot(ws[0][...], cols[0][...], preferred_element_type=jnp.float32)
    for i in range(1, n_src):
        y = y + jnp.dot(ws[i][...], cols[i][...], preferred_element_type=jnp.float32)

    if single:
        # Whole M extent in one step: two-pass stats directly on the f32 tile.
        mu = jnp.mean(y, axis=1, keepdims=True)
        var = jnp.mean((y - mu) * (y - mu), axis=1, keepdims=True)
        z = (y - mu) * jax.lax.rsqrt(var + eps)
        o_ref[...] = jnp.where(z >= 0, z, slope * z).astype(o_ref.dtype)
    else:
        sum_ref = refs[2 * n_src + 1]
        ssq_ref = refs[2 * n_src + 2]

        @pl.when(m == 0)
        def _():
            sum_ref[...] = jnp.zeros_like(sum_ref)
            ssq_ref[...] = jnp.zeros_like(ssq_ref)

        sum_ref[...] += jnp.sum(y, axis=1, keepdims=True)
        ssq_ref[...] += jnp.sum(y * y, axis=1, keepdims=True)

        start = pl.multiple_of(m * tile_m, tile_m)
        o_ref[:, pl.ds(start, tile_m)] = y.astype(o_ref.dtype)

        @pl.when(m == pl.num_programs(0) - 1)
        def _():
            inv_m = 1.0 / float(m_total)
            mu = sum_ref[...] * inv_m
            var = jnp.maximum(ssq_ref[...] * inv_m - mu * mu, 0.0)
            scale = jax.lax.rsqrt(var + eps)
            a = o_ref[...].astype(jnp.float32)
            z = (a - mu) * scale
            o_ref[...] = jnp.where(z >= 0, z, slope * z).astype(o_ref.dtype)


def _concat_conv_conv_bn_kernel(ca_ref, cb_ref, wa_ref, wb_ref, w1_ref, o_ref,
                                *, eps, slope):
    """One kernel for: Concat (K-split) 3x3 conv + BN + LReLU, then 1x1 conv +
    BN + LReLU.  Single grid step; the intermediate activation stays in VMEM."""
    y1 = jnp.dot(wa_ref[...], ca_ref[...], preferred_element_type=jnp.float32)
    y1 = y1 + jnp.dot(wb_ref[...], cb_ref[...], preferred_element_type=jnp.float32)
    mu1 = jnp.mean(y1, axis=1, keepdims=True)
    var1 = jnp.mean((y1 - mu1) * (y1 - mu1), axis=1, keepdims=True)
    z1 = (y1 - mu1) * jax.lax.rsqrt(var1 + eps)
    h = jnp.where(z1 >= 0, z1, slope * z1)

    y2 = jnp.dot(w1_ref[...], h.astype(w1_ref.dtype),
                 preferred_element_type=jnp.float32)
    mu2 = jnp.mean(y2, axis=1, keepdims=True)
    var2 = jnp.mean((y2 - mu2) * (y2 - mu2), axis=1, keepdims=True)
    z2 = (y2 - mu2) * jax.lax.rsqrt(var2 + eps)
    o_ref[...] = jnp.where(z2 >= 0, z2, slope * z2).astype(o_ref.dtype)


# --------------------------- kernel dispatcher -----------------------------

def _round8(n):
    return max(8, -(-n // 8) * 8)


def _act_dtype(m):
    """bf16 intermediate activations on lane-aligned layers, f32 otherwise."""
    return jnp.bfloat16 if m % 128 == 0 else jnp.float32


def _pick_tile_m(m, k_total, cout_p, budget=_TILE_BUDGET):
    """tile_m = M (grid of 1) whenever the rough working set fits the budget,
    else the largest lane-aligned divisor of M that does."""
    def wset(t):
        cols = 2 * k_total * t * 2            # double-buffered bf16 cols
        wts = 2 * cout_p * k_total * 2
        out = cout_p * m * 4 + cout_p * t * 4  # resident out + f32 tile
        return cols + wts + out
    if m % 128 != 0 or wset(m) <= budget:
        return m
    best, t = 128, 128
    while t <= m:
        if m % t == 0 and wset(t) <= budget:
            best = t
        t += 128
    return best


def matmul_t_fused(cols_list, w_list, act, out_dtype, b=None):
    """Lane-dense fused conv matmul: (cout_p, M) = sum_i W_i @ cols_i [+ b] + epi.

    cols_i: (K_i, M) bf16; w_i: (cout, K_i) bf16; b: (cout,) f32 or None.
    act in {"none", "sigmoid", "bn_lrelu"}.  cout is zero-padded to a multiple
    of 8 here; the result is (cout_p, M) and the caller slices [:cout].
    """
    M = cols_list[0].shape[1]
    cout = w_list[0].shape[0]
    cout_p = _round8(cout)
    if cout_p != cout:
        w_list = [jnp.pad(w, ((0, cout_p - cout), (0, 0))) for w in w_list]
        if b is not None:
            b = jnp.pad(b, (0, cout_p - cout))

    n_src = len(cols_list)
    k_total = sum(c.shape[0] for c in cols_list)
    tile_m = _pick_tile_m(M, k_total, cout_p)
    grid = (M // tile_m,)
    single = (tile_m == M)

    cols_specs = [pl.BlockSpec((c.shape[0], tile_m), lambda m: (0, m))
                  for c in cols_list]
    w_specs = [pl.BlockSpec((w.shape[0], w.shape[1]), lambda m: (0, 0))
               for w in w_list]

    if act == "bn_lrelu":
        kernel = functools.partial(_conv_bn_kernel, n_src=n_src, tile_m=tile_m,
                                   m_total=M, eps=_EPS, slope=_SLOPE)
        in_specs = cols_specs + w_specs
        args = (*cols_list, *w_list)
        out_specs = pl.BlockSpec((cout_p, M), lambda m: (0, 0))   # resident output
        scratch = [] if single else [pltpu.VMEM((cout_p, 1), jnp.float32),
                                     pltpu.VMEM((cout_p, 1), jnp.float32)]
        semantics = ("arbitrary",)            # cross-tile BN statistics
    else:
        has_bias = b is not None
        kernel = functools.partial(_conv_epi_kernel, n_src=n_src,
                                   has_bias=has_bias, act=act)
        in_specs = cols_specs + w_specs
        args = (*cols_list, *w_list)
        if has_bias:
            b2 = b.reshape(cout_p, 1).astype(jnp.float32)
            in_specs = in_specs + [pl.BlockSpec((cout_p, 1), lambda m: (0, 0))]
            args = args + (b2,)
        out_specs = pl.BlockSpec((cout_p, tile_m), lambda m: (0, m))
        scratch = []
        semantics = ("parallel",) if grid[0] > 1 else ("arbitrary",)

    return pl.pallas_call(
        kernel,
        grid_spec=pltpu.PrefetchScalarGridSpec(
            num_scalar_prefetch=0, grid=grid,
            in_specs=in_specs, out_specs=out_specs, scratch_shapes=scratch),
        out_shape=jax.ShapeDtypeStruct((cout_p, M), out_dtype),
        compiler_params=pltpu.CompilerParams(
            dimension_semantics=semantics,
            vmem_limit_bytes=_VMEM_LIMIT),
    )(*args)


# ------------------------------ conv wrappers ------------------------------
# Activations are channel-major (C, N, H, W) between layers (bf16 where
# lane-aligned), so no per-layer transposes are needed.

def _reflect_pad(x, p):
    return jnp.pad(x, ((0, 0), (0, 0), (p, p), (p, p)), mode="reflect")


def _im2col(x, k, stride):
    """Channel-major im2col: pre-padded (cin,n,hp,wp) -> (k*k*cin, n*ho*wo) bf16."""
    cin, n, hp, wp = x.shape
    ho = (hp - k) // stride + 1
    wo = (wp - k) // stride + 1
    taps = []
    for a in range(k):
        for c in range(k):
            taps.append(x[:, :, a:a + stride * (ho - 1) + 1:stride,
                          c:c + stride * (wo - 1) + 1:stride])
    cols = jnp.stack(taps, axis=0).reshape(k * k * cin, n * ho * wo)
    return cols.astype(jnp.bfloat16), ho, wo


def _w_t(w):
    """(kh,kw,cin,cout) -> (cout, kh*kw*cin) bf16, matching _im2col's K order."""
    kh, kw, cin, cout = w.shape
    return jnp.transpose(w, (3, 0, 1, 2)).reshape(cout, kh * kw * cin).astype(jnp.bfloat16)


def conv_block(x, p, k, stride=1, act="none"):
    """ConvBlock (ReflectionPad + Conv2d), fused with BN+LReLU / Sigmoid epilogue."""
    pad = (k - 1) // 2
    if pad:
        x = _reflect_pad(x, pad)
    cols, ho, wo = _im2col(x, k, stride)
    cout = p["w"].shape[-1]
    M = cols.shape[1]
    out_dtype = jnp.float32 if act == "sigmoid" else _act_dtype(M)
    bias = None if act == "bn_lrelu" else p["b"]   # BN cancels a per-channel bias
    y = matmul_t_fused([cols], [_w_t(p["w"])], act, out_dtype, b=bias)
    return y[:cout].reshape(cout, x.shape[1], ho, wo)


def conv_concat_block(xa, xb, p, k, act):
    """Fallback path: Concat(channel) + ConvBlock, concat fused via K-split."""
    pad = (k - 1) // 2
    if pad:
        xa = _reflect_pad(xa, pad)
        xb = _reflect_pad(xb, pad)
    cols_a, ho, wo = _im2col(xa, k, 1)
    cols_b, _, _ = _im2col(xb, k, 1)
    ca = xa.shape[0]
    cout = p["w"].shape[-1]
    M = cols_a.shape[1]
    out_dtype = jnp.float32 if act == "sigmoid" else _act_dtype(M)
    bias = None if act == "bn_lrelu" else p["b"]
    w_a = _w_t(p["w"][:, :, :ca, :])
    w_b = _w_t(p["w"][:, :, ca:, :])
    y = matmul_t_fused([cols_a, cols_b], [w_a, w_b], act, out_dtype, b=bias)
    return y[:cout].reshape(cout, xa.shape[1], ho, wo)


def concat_conv3_conv1(d, s, p3, p1):
    """Concat(dim=channel)([deeper, skip]) crop-to-min assumed done by caller;
    then 3x3 ConvBlock+BN+LReLU then 1x1 ConvBlock+BN+LReLU — fused into ONE
    Pallas kernel (the concat becomes a K-split; the 1x1 conv consumes the
    intermediate straight from VMEM)."""
    xa = _reflect_pad(d, 1)
    xb = _reflect_pad(s, 1)
    cols_a, ho, wo = _im2col(xa, 3, 1)
    cols_b, _, _ = _im2col(xb, 3, 1)
    n = d.shape[1]
    ca = d.shape[0]
    c1 = p3["w"].shape[-1]
    c2 = p1["w"].shape[-1]
    M = cols_a.shape[1]
    c1p, c2p = _round8(c1), _round8(c2)
    k_total = cols_a.shape[0] + cols_b.shape[0]

    # Rough single-step working set: cols (double-buffered) + f32 intermediates.
    wset = 2 * k_total * M * 2 + 2 * max(c1p, c2p) * M * 4 + c2p * M * 2
    if wset > _TILE_BUDGET:
        # Tiled fallback: two separate (still fused-epilogue) kernels.
        y = conv_concat_block(d, s, p3, 3, "bn_lrelu")
        return conv_block(y, p1, 1, act="bn_lrelu")

    w_a = jnp.pad(_w_t(p3["w"][:, :, :ca, :]), ((0, c1p - c1), (0, 0)))
    w_b = jnp.pad(_w_t(p3["w"][:, :, ca:, :]), ((0, c1p - c1), (0, 0)))
    w1 = jnp.pad(_w_t(p1["w"]), ((0, c2p - c2), (0, c1p - c1)))
    out_dtype = _act_dtype(M)

    kernel = functools.partial(_concat_conv_conv_bn_kernel, eps=_EPS, slope=_SLOPE)
    y = pl.pallas_call(
        kernel,
        grid_spec=pltpu.PrefetchScalarGridSpec(
            num_scalar_prefetch=0, grid=(1,),
            in_specs=[pl.BlockSpec(cols_a.shape, lambda m: (0, 0)),
                      pl.BlockSpec(cols_b.shape, lambda m: (0, 0)),
                      pl.BlockSpec(w_a.shape, lambda m: (0, 0)),
                      pl.BlockSpec(w_b.shape, lambda m: (0, 0)),
                      pl.BlockSpec(w1.shape, lambda m: (0, 0))],
            out_specs=pl.BlockSpec((c2p, M), lambda m: (0, 0)),
            scratch_shapes=[]),
        out_shape=jax.ShapeDtypeStruct((c2p, M), out_dtype),
        compiler_params=pltpu.CompilerParams(
            dimension_semantics=("arbitrary",),
            vmem_limit_bytes=_VMEM_LIMIT),
    )(cols_a, cols_b, w_a, w_b, w1)
    return y[:c2].reshape(c2, n, ho, wo)


def conv_transpose2x(x, p):
    """ConvTranspose2d(3, stride=2, padding=1, output_padding=1), evaluated as a
    4-phase sub-pixel decomposition packed into a single matmul on the original
    input (no zero-dilated HBM tensor, no multiply-by-zero MXU work)."""
    cin, n, h, w = x.shape
    W = p["w"]                                            # (3, 3, cin, cout)
    cout = W.shape[-1]
    xp = jnp.pad(x, ((0, 0), (0, 0), (0, 1), (0, 1)))     # zero pad bottom/right
    taps = [xp[:, :, 0:h, 0:w], xp[:, :, 0:h, 1:w + 1],
            xp[:, :, 1:h + 1, 0:w], xp[:, :, 1:h + 1, 1:w + 1]]
    cols = jnp.stack(taps, axis=0).reshape(4 * cin, n * h * w).astype(jnp.bfloat16)

    def wt(a, b):
        return jnp.transpose(W[a, b], (1, 0))             # (cout, cin)
    zero = jnp.zeros((cout, cin), W.dtype)
    rows = [[wt(1, 1), zero,     zero,     zero],         # out[2i,   2j]
            [wt(1, 0), wt(1, 2), zero,     zero],         # out[2i,   2j+1]
            [wt(0, 1), zero,     wt(2, 1), zero],         # out[2i+1, 2j]
            [wt(0, 0), wt(0, 2), wt(2, 0), wt(2, 2)]]     # out[2i+1, 2j+1]
    w_packed = jnp.concatenate([jnp.concatenate(r, axis=1) for r in rows],
                               axis=0).astype(jnp.bfloat16)        # (4*cout, 4*cin)
    b_packed = jnp.tile(p["b"], 4)

    M = cols.shape[1]
    y = matmul_t_fused([cols], [w_packed], "none", _act_dtype(M), b=b_packed)
    y = y[:4 * cout].reshape(2, 2, cout, n, h, w)
    # TODO(synk): store the 4 sub-pixel phases interleaved from the kernel (or
    # let the next conv's im2col consume the phase-major layout) to avoid this
    # XLA de-interleave transpose.
    return jnp.transpose(y, (2, 3, 4, 0, 5, 1)).reshape(cout, n, 2 * h, 2 * w)


def _center_crop(x, th, tw):
    _, _, h, w = x.shape
    dh, dw = (h - th) // 2, (w - tw) // 2
    return x[:, :, dh:dh + th, dw:dw + tw]


# ----------------------------- SkipNet forward -----------------------------

def skip_block_fwd(x, p):
    # deeper branch: SkipDown -> submodule -> SkipUp
    d = x
    for cp in p["down_mcb"]:                     # MultiConvBlock: 2 x (conv+BN+LReLU)
        d = conv_block(d, cp, 3, act="bn_lrelu")
    d = conv_block(d, p["down_conv"], 3, stride=2, act="none")   # stride-2 ConvBlock
    if p["sub"] is not None:
        d = skip_block_fwd(d, p["sub"])
    d = conv_transpose2x(d, p["deconv"])         # SkipUp deconv (no BN/act)
    for cp in p["up_mcb"]:                       # MultiConvBlock(ch, ch)
        d = conv_block(d, cp, 3, act="bn_lrelu")
    # skip branch: 1x1 ConvBlock + BN + LReLU
    s = conv_block(x, p["skip"], 1, act="bn_lrelu")
    # Concat(dim=channel): crop-to-min + concat, then fused (post3 + post1) kernel
    th = min(d.shape[2], s.shape[2])
    tw = min(d.shape[3], s.shape[3])
    d = _center_crop(d, th, tw)
    s = _center_crop(s, th, tw)
    return concat_conv3_conv1(d, s, p["post3"], p["post1"])


def skipnet_fwd(x_nchw, params):
    x = jnp.transpose(x_nchw, (1, 0, 2, 3)).astype(jnp.bfloat16)  # channel-major
    y = skip_block_fwd(x, params["block"])
    y = conv_block(y, params["post"], 1, act="sigmoid")  # postnet: 1x1 conv + Sigmoid
    return jnp.transpose(y, (1, 0, 2, 3))        # back to NCHW (f32)


# ----------------------------- parameter init ------------------------------

def conv_p(key, k, cin, cout):
    kw_, kb = jax.random.split(key)
    bound = 1.0 / math.sqrt(k * k * cin)
    return {"w": jax.random.uniform(kw_, (k, k, cin, cout), jnp.float32, -bound, bound),
            "b": jax.random.uniform(kb, (cout,), jnp.float32, -bound, bound)}


def build_scb(key, in_ch, ch, skip_ch, sub):
    ks = jax.random.split(key, 9)
    return {
        "down_mcb": [conv_p(ks[0], 3, in_ch, in_ch), conv_p(ks[1], 3, in_ch, in_ch)],
        "down_conv": conv_p(ks[2], 3, in_ch, ch),
        "sub": sub,
        "deconv": conv_p(ks[3], 3, ch, ch),   # equivalent-conv weights of transpose conv
        "up_mcb": [conv_p(ks[4], 3, ch, ch), conv_p(ks[5], 3, ch, ch)],
        "skip": conv_p(ks[6], 1, in_ch, skip_ch),
        "post3": conv_p(ks[7], 3, ch + skip_ch, in_ch),
        "post1": conv_p(ks[8], 1, in_ch, in_ch),
    }


def build_skipnet(key, in_channels, out_channels, nf=4, nf_ratios=2, skip_channels=4):
    r = [nf_ratios] * 5
    sk = [skip_channels] * 5
    levels = [(in_channels, nf * r[0], sk[0])]
    for i in range(1, 5):
        levels.append((nf * r[i - 1], nf * r[i], sk[i]))
    ks = jax.random.split(key, 6)
    sub = None
    for i in reversed(range(5)):      # build innermost -> outermost
        in_ch, ch, s = levels[i]
        sub = build_scb(ks[i], in_ch, ch, s, sub)
    return {"block": sub, "post": conv_p(ks[5], 1, in_channels, out_channels)}


# ---------------------------------- main ------------------------------------

if __name__ == "__main__":
    key = jax.random.PRNGKey(0)
    kp, kx = jax.random.split(key)

    in_channels, out_channels = 4, 3
    # small config: nf=4, nf_ratios=2 -> 8 feature channels at every level
    params = build_skipnet(kp, in_channels, out_channels,
                           nf=4, nf_ratios=2, skip_channels=4)

    # PyTorch-style NCHW input; spatial 32 so the 5 stride-2 levels divide cleanly
    # (innermost reflect-pad sees spatial size 2, the PyTorch minimum).
    x = jax.random.normal(kx, (2, in_channels, 32, 32), jnp.float32)

    fwd = jax.jit(lambda inp: skipnet_fwd(inp, params))
    y = jax.block_until_ready(fwd(x))

    assert y.shape == (2, out_channels, 32, 32), y.shape
    assert bool(jnp.all(jnp.isfinite(y)))
    assert bool(jnp.all((y >= 0.0) & (y <= 1.0)))   # sigmoid output range
    print("KERNEL_OK")
</pallas_src>

<mosaic_0001>
module attributes {stable_mosaic.version = 11 : i64} {
  func.func @_conv_bn_kernel(%arg0: i32, %arg1: memref<4x2048xbf16, #tpu.memory_space<vmem>>, %arg2: memref<8x4xbf16, #tpu.memory_space<vmem>>, %arg3: memref<8x2048xbf16, #tpu.memory_space<vmem>>) attributes {dimension_semantics = [#tpu.dimension_semantics<arbitrary>], iteration_bounds = array<i64: 1>, scalar_prefetch = 0 : i64, scratch_operands = 0 : i64, tpu.core_type = #tpu.core_type<tc>, window_params = [{transform_indices = @transform_0, window_bounds = array<i64: 4, 2048>}, {pipeline_mode = #tpu.pipeline_mode<synchronous>, transform_indices = @transform_1, window_bounds = array<i64: 8, 4>}, {pipeline_mode = #tpu.pipeline_mode<synchronous>, transform_indices = @transform_2, window_bounds = array<i64: 8, 2048>}]} {
    %c0 = arith.constant 0 : index
    %c0_0 = arith.constant 0 : index
    %0 = vector.load %arg2[%c0, %c0_0] : memref<8x4xbf16, #tpu.memory_space<vmem>>, vector<8x4xbf16>
    %c0_1 = arith.constant 0 : index
    %c0_2 = arith.constant 0 : index
    %1 = vector.load %arg1[%c0_1, %c0_2] : memref<4x2048xbf16, #tpu.memory_space<vmem>>, vector<4x2048xbf16>
    %cst = arith.constant dense<0.000000e+00> : vector<8x2048xf32>
    %2 = tpu.matmul %0, %1, %cst {dimension_numbers = #tpu.dot_dimension_numbers<[1], [0], [0], [1], [0, 0, 1, 1], [], []>} : vector<8x4xbf16>, vector<4x2048xbf16>, vector<8x2048xf32> -> vector<8x2048xf32>
    %cst_3 = arith.constant dense<0.000000e+00> : vector<8xf32>
    %3 = vector.multi_reduction <add>, %2, %cst_3 [1] : vector<8x2048xf32> to vector<8xf32>
    %4 = vector.shape_cast %3 : vector<8xf32> to vector<8x1xf32>
    %cst_4 = arith.constant 2.048000e+03 : f32
    %5 = vector.broadcast %cst_4 : f32 to vector<8x1xf32>
    %6 = arith.divf %4, %5 : vector<8x1xf32>
    %7 = vector.broadcast %6 : vector<8x1xf32> to vector<8x2048xf32>
    %8 = arith.subf %2, %7 : vector<8x2048xf32>
    %9 = vector.broadcast %6 : vector<8x1xf32> to vector<8x2048xf32>
    %10 = arith.subf %2, %9 : vector<8x2048xf32>
    %11 = arith.mulf %8, %10 : vector<8x2048xf32>
    %cst_5 = arith.constant dense<0.000000e+00> : vector<8xf32>
    %12 = vector.multi_reduction <add>, %11, %cst_5 [1] : vector<8x2048xf32> to vector<8xf32>
    %13 = vector.shape_cast %12 : vector<8xf32> to vector<8x1xf32>
    %cst_6 = arith.constant 2.048000e+03 : f32
    %14 = vector.broadcast %cst_6 : f32 to vector<8x1xf32>
    %15 = arith.divf %13, %14 : vector<8x1xf32>
    %16 = vector.broadcast %6 : vector<8x1xf32> to vector<8x2048xf32>
    %17 = arith.subf %2, %16 : vector<8x2048xf32>
    %cst_7 = arith.constant 9.99999974E-6 : f32
    %18 = vector.broadcast %cst_7 : f32 to vector<8x1xf32>
    %19 = arith.addf %15, %18 : vector<8x1xf32>
    %20 = math.rsqrt %19 : vector<8x1xf32>
    %21 = vector.broadcast %20 : vector<8x1xf32> to vector<8x2048xf32>
    %22 = arith.mulf %17, %21 : vector<8x2048xf32>
    %cst_8 = arith.constant 0.000000e+00 : f32
    %23 = vector.broadcast %cst_8 : f32 to vector<8x2048xf32>
    %24 = arith.cmpf oge, %22, %23 : vector<8x2048xf32>
    %cst_9 = arith.constant 2.000000e-01 : f32
    %25 = vector.broadcast %cst_9 : f32 to vector<8x2048xf32>
    %26 = arith.mulf %25, %22 : vector<8x2048xf32>
    %27 = arith.select %24, %22, %26 : vector<8x2048xi1>, vector<8x2048xf32>
    %28 = arith.truncf %27 : vector<8x2048xf32> to vector<8x2048xbf16>
    %c0_10 = arith.constant 0 : index
    %c0_11 = arith.constant 0 : index
    %29 = vector.load %arg3[%c0_10, %c0_11] : memref<8x2048xbf16, #tpu.memory_space<vmem>>, vector<8x2048xbf16>
    tpu.vector_store %arg3[%c0_10, %c0_11], %28 {strides = array<i32>} : memref<8x2048xbf16, #tpu.memory_space<vmem>>, vector<8x2048xbf16>,
    return
  }
  func.func @transform_0(%arg0: i32) -> (i32, i32) {
    %c0_i32 = arith.constant 0 : i32
    %c0_i32_0 = arith.constant 0 : i32
    return %c0_i32, %arg0 : i32, i32
  }
  func.func @transform_1(%arg0: i32) -> (i32, i32) {
    %c0_i32 = arith.constant 0 : i32
    %c0_i32_0 = arith.constant 0 : i32
    %c0_i32_1 = arith.constant 0 : i32
    return %c0_i32, %c0_i32_0 : i32, i32
  }
  func.func @transform_2(%arg0: i32) -> (i32, i32) {
    %c0_i32 = arith.constant 0 : i32
    %c0_i32_0 = arith.constant 0 : i32
    %c0_i32_1 = arith.constant 0 : i32
    return %c0_i32, %c0_i32_0 : i32, i32
  }
}

module attributes {stable_mosaic.version = 11 : i64} {
  func.func @_conv_bn_kernel(%arg0: i32, %arg1: memref<36x2048xbf16, #tpu.memory_space<vmem>>, %arg2: memref<8x36xbf16, #tpu.memory_space<vmem>>, %arg3: memref<8x2048xbf16, #tpu.memory_space<vmem>>) attributes {dimension_semantics = [#tpu.dimension_semantics<arbitrary>], iteration_bounds = array<i64: 1>, scalar_prefetch = 0 : i64, scratch_operands = 0 : i64, tpu.core_type = #tpu.core_type<tc>, window_params = [{transform_indices = @transform_0, window_bounds = array<i64: 36, 2048>}, {pipeline_mode = #tpu.pipeline_mode<synchronous>, transform_indices = @transform_1, window_bounds = array<i64: 8, 36>}, {pipeline_mode = #tpu.pipeline_mode<synchronous>, transform_indices = @transform_2, window_bounds = array<i64: 8, 2048>}]} {
    %c0 = arith.constant 0 : index
    %c0_0 = arith.constant 0 : index
    %0 = vector.load %arg2[%c0, %c0_0] : memref<8x36xbf16, #tpu.memory_space<vmem>>, vector<8x36xbf16>
    %c0_1 = arith.constant 0 : index
    %c0_2 = arith.constant 0 : index
    %1 = vector.load %arg1[%c0_1, %c0_2] : memref<36x2048xbf16, #tpu.memory_space<vmem>>, vector<36x2048xbf16>
    %cst = arith.constant dense<0.000000e+00> : vector<8x2048xf32>
    %2 = tpu.matmul %0, %1, %cst {dimension_numbers = #tpu.dot_dimension_numbers<[1], [0], [0], [1], [0, 0, 1, 1], [], []>} : vector<8x36xbf16>, vector<36x2048xbf16>, vector<8x2048xf32> -> vector<8x2048xf32>
    %cst_3 = arith.constant dense<0.000000e+00> : vector<8xf32>
    %3 = vector.multi_reduction <add>, %2, %cst_3 [1] : vector<8x2048xf32> to vector<8xf32>
    %4 = vector.shape_cast %3 : vector<8xf32> to vector<8x1xf32>
    %cst_4 = arith.constant 2.048000e+03 : f32
    %5 = vector.broadcast %cst_4 : f32 to vector<8x1xf32>
    %6 = arith.divf %4, %5 : vector<8x1xf32>
    %7 = vector.broadcast %6 : vector<8x1xf32> to vector<8x2048xf32>
    %8 = arith.subf %2, %7 : vector<8x2048xf32>
    %9 = vector.broadcast %6 : vector<8x1xf32> to vector<8x2048xf32>
    %10 = arith.subf %2, %9 : vector<8x2048xf32>
    %11 = arith.mulf %8, %10 : vector<8x2048xf32>
    %cst_5 = arith.constant dense<0.000000e+00> : vector<8xf32>
    %12 = vector.multi_reduction <add>, %11, %cst_5 [1] : vector<8x2048xf32> to vector<8xf32>
    %13 = vector.shape_cast %12 : vector<8xf32> to vector<8x1xf32>
    %cst_6 = arith.constant 2.048000e+03 : f32
    %14 = vector.broadcast %cst_6 : f32 to vector<8x1xf32>
    %15 = arith.divf %13, %14 : vector<8x1xf32>
    %16 = vector.broadcast %6 : vector<8x1xf32> to vector<8x2048xf32>
    %17 = arith.subf %2, %16 : vector<8x2048xf32>
    %cst_7 = arith.constant 9.99999974E-6 : f32
    %18 = vector.broadcast %cst_7 : f32 to vector<8x1xf32>
    %19 = arith.addf %15, %18 : vector<8x1xf32>
    %20 = math.rsqrt %19 : vector<8x1xf32>
    %21 = vector.broadcast %20 : vector<8x1xf32> to vector<8x2048xf32>
    %22 = arith.mulf %17, %21 : vector<8x2048xf32>
    %cst_8 = arith.constant 0.000000e+00 : f32
    %23 = vector.broadcast %cst_8 : f32 to vector<8x2048xf32>
    %24 = arith.cmpf oge, %22, %23 : vector<8x2048xf32>
    %cst_9 = arith.constant 2.000000e-01 : f32
    %25 = vector.broadcast %cst_9 : f32 to vector<8x2048xf32>
    %26 = arith.mulf %25, %22 : vector<8x2048xf32>
    %27 = arith.select %24, %22, %26 : vector<8x2048xi1>, vector<8x2048xf32>
    %28 = arith.truncf %27 : vector<8x2048xf32> to vector<8x2048xbf16>
    %c0_10 = arith.constant 0 : index
    %c0_11 = arith.constant 0 : index
    %29 = vector.load %arg3[%c0_10, %c0_11] : memref<8x2048xbf16, #tpu.memory_space<vmem>>, vector<8x2048xbf16>
    tpu.vector_store %arg3[%c0_10, %c0_11], %28 {strides = array<i32>} : memref<8x2048xbf16, #tpu.memory_space<vmem>>, vector<8x2048xbf16>,
    return
  }
  func.func @transform_0(%arg0: i32) -> (i32, i32) {
    %c0_i32 = arith.constant 0 : i32
    %c0_i32_0 = arith.constant 0 : i32
    return %c0_i32, %arg0 : i32, i32
  }
  func.func @transform_1(%arg0: i32) -> (i32, i32) {
    %c0_i32 = arith.constant 0 : i32
    %c0_i32_0 = arith.constant 0 : i32
    %c0_i32_1 = arith.constant 0 : i32
    return %c0_i32, %c0_i32_0 : i32, i32
  }
  func.func @transform_2(%arg0: i32) -> (i32, i32) {
    %c0_i32 = arith.constant 0 : i32
    %c0_i32_0 = arith.constant 0 : i32
    %c0_i32_1 = arith.constant 0 : i32
    return %c0_i32, %c0_i32_0 : i32, i32
  }
}

module attributes {stable_mosaic.version = 11 : i64} {
  func.func @_conv_bn_kernel(%arg0: i32, %arg1: memref<8x512xbf16, #tpu.memory_space<vmem>>, %arg2: memref<8x8xbf16, #tpu.memory_space<vmem>>, %arg3: memref<8x512xbf16, #tpu.memory_space<vmem>>) attributes {dimension_semantics = [#tpu.dimension_semantics<arbitrary>], iteration_bounds = array<i64: 1>, scalar_prefetch = 0 : i64, scratch_operands = 0 : i64, tpu.core_type = #tpu.core_type<tc>, window_params = [{transform_indices = @transform_0, window_bounds = array<i64: 8, 512>}, {pipeline_mode = #tpu.pipeline_mode<synchronous>, transform_indices = @transform_1, window_bounds = array<i64: 8, 8>}, {pipeline_mode = #tpu.pipeline_mode<synchronous>, transform_indices = @transform_2, window_bounds = array<i64: 8, 512>}]} {
    %c0 = arith.constant 0 : index
    %c0_0 = arith.constant 0 : index
    %0 = vector.load %arg2[%c0, %c0_0] : memref<8x8xbf16, #tpu.memory_space<vmem>>, vector<8x8xbf16>
    %c0_1 = arith.constant 0 : index
    %c0_2 = arith.constant 0 : index
    %1 = vector.load %arg1[%c0_1, %c0_2] : memref<8x512xbf16, #tpu.memory_space<vmem>>, vector<8x512xbf16>
    %cst = arith.constant dense<0.000000e+00> : vector<8x512xf32>
    %2 = tpu.matmul %0, %1, %cst {dimension_numbers = #tpu.dot_dimension_numbers<[1], [0], [0], [1], [0, 0, 1, 1], [], []>} : vector<8x8xbf16>, vector<8x512xbf16>, vector<8x512xf32> -> vector<8x512xf32>
    %cst_3 = arith.constant dense<0.000000e+00> : vector<8xf32>
    %3 = vector.multi_reduction <add>, %2, %cst_3 [1] : vector<8x512xf32> to vector<8xf32>
    %4 = vector.shape_cast %3 : vector<8xf32> to vector<8x1xf32>
    %cst_4 = arith.constant 5.120000e+02 : f32
    %5 = vector.broadcast %cst_4 : f32 to vector<8x1xf32>
    %6 = arith.divf %4, %5 : vector<8x1xf32>
    %7 = vector.broadcast %6 : vector<8x1xf32> to vector<8x512xf32>
    %8 = arith.subf %2, %7 : vector<8x512xf32>
    %9 = vector.broadcast %6 : vector<8x1xf32> to vector<8x512xf32>
    %10 = arith.subf %2, %9 : vector<8x512xf32>
    %11 = arith.mulf %8, %10 : vector<8x512xf32>
    %cst_5 = arith.constant dense<0.000000e+00> : vector<8xf32>
    %12 = vector.multi_reduction <add>, %11, %cst_5 [1] : vector<8x512xf32> to vector<8xf32>
    %13 = vector.shape_cast %12 : vector<8xf32> to vector<8x1xf32>
    %cst_6 = arith.constant 5.120000e+02 : f32
    %14 = vector.broadcast %cst_6 : f32 to vector<8x1xf32>
    %15 = arith.divf %13, %14 : vector<8x1xf32>
    %16 = vector.broadcast %6 : vector<8x1xf32> to vector<8x512xf32>
    %17 = arith.subf %2, %16 : vector<8x512xf32>
    %cst_7 = arith.constant 9.99999974E-6 : f32
    %18 = vector.broadcast %cst_7 : f32 to vector<8x1xf32>
    %19 = arith.addf %15, %18 : vector<8x1xf32>
    %20 = math.rsqrt %19 : vector<8x1xf32>
    %21 = vector.broadcast %20 : vector<8x1xf32> to vector<8x512xf32>
    %22 = arith.mulf %17, %21 : vector<8x512xf32>
    %cst_8 = arith.constant 0.000000e+00 : f32
    %23 = vector.broadcast %cst_8 : f32 to vector<8x512xf32>
    %24 = arith.cmpf oge, %22, %23 : vector<8x512xf32>
    %cst_9 = arith.constant 2.000000e-01 : f32
    %25 = vector.broadcast %cst_9 : f32 to vector<8x512xf32>
    %26 = arith.mulf %25, %22 : vector<8x512xf32>
    %27 = arith.select %24, %22, %26 : vector<8x512xi1>, vector<8x512xf32>
    %28 = arith.truncf %27 : vector<8x512xf32> to vector<8x512xbf16>
    %c0_10 = arith.constant 0 : index
    %c0_11 = arith.constant 0 : index
    %29 = vector.load %arg3[%c0_10, %c0_11] : memref<8x512xbf16, #tpu.memory_space<vmem>>, vector<8x512xbf16>
    tpu.vector_store %arg3[%c0_10, %c0_11], %28 {strides = array<i32>} : memref<8x512xbf16, #tpu.memory_space<vmem>>, vector<8x512xbf16>,
    return
  }
  func.func @transform_0(%arg0: i32) -> (i32, i32) {
    %c0_i32 = arith.constant 0 : i32
    %c0_i32_0 = arith.constant 0 : i32
    return %c0_i32, %arg0 : i32, i32
  }
  func.func @transform_1(%arg0: i32) -> (i32, i32) {
    %c0_i32 = arith.constant 0 : i32
    %c0_i32_0 = arith.constant 0 : i32
    %c0_i32_1 = arith.constant 0 : i32
    return %c0_i32, %c0_i32_0 : i32, i32
  }
  func.func @transform_2(%arg0: i32) -> (i32, i32) {
    %c0_i32 = arith.constant 0 : i32
    %c0_i32_0 = arith.constant 0 : i32
    %c0_i32_1 = arith.constant 0 : i32
    return %c0_i32, %c0_i32_0 : i32, i32
  }
}

module attributes {stable_mosaic.version = 11 : i64} {
  func.func @_conv_epi_kernel(%arg0: i32, %arg1: memref<36x512xbf16, #tpu.memory_space<vmem>>, %arg2: memref<8x36xbf16, #tpu.memory_space<vmem>>, %arg3: memref<8x1xf32, #tpu.memory_space<vmem>>, %arg4: memref<8x512xbf16, #tpu.memory_space<vmem>>) attributes {dimension_semantics = [#tpu.dimension_semantics<arbitrary>], iteration_bounds = array<i64: 1>, scalar_prefetch = 0 : i64, scratch_operands = 0 : i64, tpu.core_type = #tpu.core_type<tc>, window_params = [{transform_indices = @transform_0, window_bounds = array<i64: 36, 512>}, {pipeline_mode = #tpu.pipeline_mode<synchronous>, transform_indices = @transform_1, window_bounds = array<i64: 8, 36>}, {pipeline_mode = #tpu.pipeline_mode<synchronous>, transform_indices = @transform_2, window_bounds = array<i64: 8, 1>}, {transform_indices = @transform_3, window_bounds = array<i64: 8, 512>}]} {
    %c0 = arith.constant 0 : index
    %c0_0 = arith.constant 0 : index
    %0 = vector.load %arg2[%c0, %c0_0] : memref<8x36xbf16, #tpu.memory_space<vmem>>, vector<8x36xbf16>
    %c0_1 = arith.constant 0 : index
    %c0_2 = arith.constant 0 : index
    %1 = vector.load %arg1[%c0_1, %c0_2] : memref<36x512xbf16, #tpu.memory_space<vmem>>, vector<36x512xbf16>
    %cst = arith.constant dense<0.000000e+00> : vector<8x512xf32>
    %2 = tpu.matmul %0, %1, %cst {dimension_numbers = #tpu.dot_dimension_numbers<[1], [0], [0], [1], [0, 0, 1, 1], [], []>} : vector<8x36xbf16>, vector<36x512xbf16>, vector<8x512xf32> -> vector<8x512xf32>
    %c0_3 = arith.constant 0 : index
    %c0_4 = arith.constant 0 : index
    %3 = vector.load %arg3[%c0_3, %c0_4] : memref<8x1xf32, #tpu.memory_space<vmem>>, vector<8x1xf32>
    %4 = vector.broadcast %3 : vector<8x1xf32> to vector<8x512xf32>
    %5 = arith.addf %2, %4 : vector<8x512xf32>
    %6 = arith.truncf %5 : vector<8x512xf32> to vector<8x512xbf16>
    %c0_5 = arith.constant 0 : index
    %c0_6 = arith.constant 0 : index
    %7 = vector.load %arg4[%c0_5, %c0_6] : memref<8x512xbf16, #tpu.memory_space<vmem>>, vector<8x512xbf16>
    tpu.vector_store %arg4[%c0_5, %c0_6], %6 {strides = array<i32>} : memref<8x512xbf16, #tpu.memory_space<vmem>>, vector<8x512xbf16>,
    return
  }
  func.func @transform_0(%arg0: i32) -> (i32, i32) {
    %c0_i32 = arith.constant 0 : i32
    %c0_i32_0 = arith.constant 0 : i32
    return %c0_i32, %arg0 : i32, i32
  }
  func.func @transform_1(%arg0: i32) -> (i32, i32) {
    %c0_i32 = arith.constant 0 : i32
    %c0_i32_0 = arith.constant 0 : i32
    %c0_i32_1 = arith.constant 0 : i32
    return %c0_i32, %c0_i32_0 : i32, i32
  }
  func.func @transform_2(%arg0: i32) -> (i32, i32) {
    %c0_i32 = arith.constant 0 : i32
    %c0_i32_0 = arith.constant 0 : i32
    %c0_i32_1 = arith.constant 0 : i32
    return %c0_i32, %c0_i32_0 : i32, i32
  }
  func.func @transform_3(%arg0: i32) -> (i32, i32) {
    %c0_i32 = arith.constant 0 : i32
    %c0_i32_0 = arith.constant 0 : i32
    return %c0_i32, %arg0 : i32, i32
  }
}

module attributes {stable_mosaic.version = 11 : i64} {
  func.func @_conv_bn_kernel(%arg0: i32, %arg1: memref<72x512xbf16, #tpu.memory_space<vmem>>, %arg2: memref<8x72xbf16, #tpu.memory_space<vmem>>, %arg3: memref<8x512xbf16, #tpu.memory_space<vmem>>) attributes {dimension_semantics = [#tpu.dimension_semantics<arbitrary>], iteration_bounds = array<i64: 1>, scalar_prefetch = 0 : i64, scratch_operands = 0 : i64, tpu.core_type = #tpu.core_type<tc>, window_params = [{transform_indices = @transform_0, window_bounds = array<i64: 72, 512>}, {pipeline_mode = #tpu.pipeline_mode<synchronous>, transform_indices = @transform_1, window_bounds = array<i64: 8, 72>}, {pipeline_mode = #tpu.pipeline_mode<synchronous>, transform_indices = @transform_2, window_bounds = array<i64: 8, 512>}]} {
    %c0 = arith.constant 0 : index
    %c0_0 = arith.constant 0 : index
    %0 = vector.load %arg2[%c0, %c0_0] : memref<8x72xbf16, #tpu.memory_space<vmem>>, vector<8x72xbf16>
    %c0_1 = arith.constant 0 : index
    %c0_2 = arith.constant 0 : index
    %1 = vector.load %arg1[%c0_1, %c0_2] : memref<72x512xbf16, #tpu.memory_space<vmem>>, vector<72x512xbf16>
    %cst = arith.constant dense<0.000000e+00> : vector<8x512xf32>
    %2 = tpu.matmul %0, %1, %cst {dimension_numbers = #tpu.dot_dimension_numbers<[1], [0], [0], [1], [0, 0, 1, 1], [], []>} : vector<8x72xbf16>, vector<72x512xbf16>, vector<8x512xf32> -> vector<8x512xf32>
    %cst_3 = arith.constant dense<0.000000e+00> : vector<8xf32>
    %3 = vector.multi_reduction <add>, %2, %cst_3 [1] : vector<8x512xf32> to vector<8xf32>
    %4 = vector.shape_cast %3 : vector<8xf32> to vector<8x1xf32>
    %cst_4 = arith.constant 5.120000e+02 : f32
    %5 = vector.broadcast %cst_4 : f32 to vector<8x1xf32>
    %6 = arith.divf %4, %5 : vector<8x1xf32>
    %7 = vector.broadcast %6 : vector<8x1xf32> to vector<8x512xf32>
    %8 = arith.subf %2, %7 : vector<8x512xf32>
    %9 = vector.broadcast %6 : vector<8x1xf32> to vector<8x512xf32>
    %10 = arith.subf %2, %9 : vector<8x512xf32>
    %11 = arith.mulf %8, %10 : vector<8x512xf32>
    %cst_5 = arith.constant dense<0.000000e+00> : vector<8xf32>
    %12 = vector.multi_reduction <add>, %11, %cst_5 [1] : vector<8x512xf32> to vector<8xf32>
    %13 = vector.shape_cast %12 : vector<8xf32> to vector<8x1xf32>
    %cst_6 = arith.constant 5.120000e+02 : f32
    %14 = vector.broadcast %cst_6 : f32 to vector<8x1xf32>
    %15 = arith.divf %13, %14 : vector<8x1xf32>
    %16 = vector.broadcast %6 : vector<8x1xf32> to vector<8x512xf32>
    %17 = arith.subf %2, %16 : vector<8x512xf32>
    %cst_7 = arith.constant 9.99999974E-6 : f32
    %18 = vector.broadcast %cst_7 : f32 to vector<8x1xf32>
    %19 = arith.addf %15, %18 : vector<8x1xf32>
    %20 = math.rsqrt %19 : vector<8x1xf32>
    %21 = vector.broadcast %20 : vector<8x1xf32> to vector<8x512xf32>
    %22 = arith.mulf %17, %21 : vector<8x512xf32>
    %cst_8 = arith.constant 0.000000e+00 : f32
    %23 = vector.broadcast %cst_8 : f32 to vector<8x512xf32>
    %24 = arith.cmpf oge, %22, %23 : vector<8x512xf32>
    %cst_9 = arith.constant 2.000000e-01 : f32
    %25 = vector.broadcast %cst_9 : f32 to vector<8x512xf32>
    %26 = arith.mulf %25, %22 : vector<8x512xf32>
    %27 = arith.select %24, %22, %26 : vector<8x512xi1>, vector<8x512xf32>
    %28 = arith.truncf %27 : vector<8x512xf32> to vector<8x512xbf16>
    %c0_10 = arith.constant 0 : index
    %c0_11 = arith.constant 0 : index
    %29 = vector.load %arg3[%c0_10, %c0_11] : memref<8x512xbf16, #tpu.memory_space<vmem>>, vector<8x512xbf16>
    tpu.vector_store %arg3[%c0_10, %c0_11], %28 {strides = array<i32>} : memref<8x512xbf16, #tpu.memory_space<vmem>>, vector<8x512xbf16>,
    return
  }
  func.func @transform_0(%arg0: i32) -> (i32, i32) {
    %c0_i32 = arith.constant 0 : i32
    %c0_i32_0 = arith.constant 0 : i32
    return %c0_i32, %arg0 : i32, i32
  }
  func.func @transform_1(%arg0: i32) -> (i32, i32) {
    %c0_i32 = arith.constant 0 : i32
    %c0_i32_0 = arith.constant 0 : i32
    %c0_i32_1 = arith.constant 0 : i32
    return %c0_i32, %c0_i32_0 : i32, i32
  }
  func.func @transform_2(%arg0: i32) -> (i32, i32) {
    %c0_i32 = arith.constant 0 : i32
    %c0_i32_0 = arith.constant 0 : i32
    %c0_i32_1 = arith.constant 0 : i32
    return %c0_i32, %c0_i32_0 : i32, i32
  }
}

module attributes {stable_mosaic.version = 11 : i64} {
  func.func @_conv_epi_kernel(%arg0: i32, %arg1: memref<72x128xbf16, #tpu.memory_space<vmem>>, %arg2: memref<8x72xbf16, #tpu.memory_space<vmem>>, %arg3: memref<8x1xf32, #tpu.memory_space<vmem>>, %arg4: memref<8x128xbf16, #tpu.memory_space<vmem>>) attributes {dimension_semantics = [#tpu.dimension_semantics<arbitrary>], iteration_bounds = array<i64: 1>, scalar_prefetch = 0 : i64, scratch_operands = 0 : i64, tpu.core_type = #tpu.core_type<tc>, window_params = [{transform_indices = @transform_0, window_bounds = array<i64: 72, 128>}, {pipeline_mode = #tpu.pipeline_mode<synchronous>, transform_indices = @transform_1, window_bounds = array<i64: 8, 72>}, {pipeline_mode = #tpu.pipeline_mode<synchronous>, transform_indices = @transform_2, window_bounds = array<i64: 8, 1>}, {transform_indices = @transform_3, window_bounds = array<i64: 8, 128>}]} {
    %c0 = arith.constant 0 : index
    %c0_0 = arith.constant 0 : index
    %0 = vector.load %arg2[%c0, %c0_0] : memref<8x72xbf16, #tpu.memory_space<vmem>>, vector<8x72xbf16>
    %c0_1 = arith.constant 0 : index
    %c0_2 = arith.constant 0 : index
    %1 = vector.load %arg1[%c0_1, %c0_2] : memref<72x128xbf16, #tpu.memory_space<vmem>>, vector<72x128xbf16>
    %cst = arith.constant dense<0.000000e+00> : vector<8x128xf32>
    %2 = tpu.matmul %0, %1, %cst {dimension_numbers = #tpu.dot_dimension_numbers<[1], [0], [0], [1], [0, 0, 1, 1], [], []>} : vector<8x72xbf16>, vector<72x128xbf16>, vector<8x128xf32> -> vector<8x128xf32>
    %c0_3 = arith.constant 0 : index
    %c0_4 = arith.constant 0 : index
    %3 = vector.load %arg3[%c0_3, %c0_4] : memref<8x1xf32, #tpu.memory_space<vmem>>, vector<8x1xf32>
    %4 = vector.broadcast %3 : vector<8x1xf32> to vector<8x128xf32>
    %5 = arith.addf %2, %4 : vector<8x128xf32>
    %6 = arith.truncf %5 : vector<8x128xf32> to vector<8x128xbf16>
    %c0_5 = arith.constant 0 : index
    %c0_6 = arith.constant 0 : index
    %7 = vector.load %arg4[%c0_5, %c0_6] : memref<8x128xbf16, #tpu.memory_space<vmem>>, vector<8x128xbf16>
    tpu.vector_store %arg4[%c0_5, %c0_6], %6 {strides = array<i32>} : memref<8x128xbf16, #tpu.memory_space<vmem>>, vector<8x128xbf16>,
    return
  }
  func.func @transform_0(%arg0: i32) -> (i32, i32) {
    %c0_i32 = arith.constant 0 : i32
    %c0_i32_0 = arith.constant 0 : i32
    return %c0_i32, %arg0 : i32, i32
  }
  func.func @transform_1(%arg0: i32) -> (i32, i32) {
    %c0_i32 = arith.constant 0 : i32
    %c0_i32_0 = arith.constant 0 : i32
    %c0_i32_1 = arith.constant 0 : i32
    return %c0_i32, %c0_i32_0 : i32, i32
  }
  func.func @transform_2(%arg0: i32) -> (i32, i32) {
    %c0_i32 = arith.constant 0 : i32
    %c0_i32_0 = arith.constant 0 : i32
    %c0_i32_1 = arith.constant 0 : i32
    return %c0_i32, %c0_i32_0 : i32, i32
  }
  func.func @transform_3(%arg0: i32) -> (i32, i32) {
    %c0_i32 = arith.constant 0 : i32
    %c0_i32_0 = arith.constant 0 : i32
    return %c0_i32, %arg0 : i32, i32
  }
}

module attributes {stable_mosaic.version = 11 : i64} {
  func.func @_conv_bn_kernel(%arg0: i32, %arg1: memref<8x128xbf16, #tpu.memory_space<vmem>>, %arg2: memref<8x8xbf16, #tpu.memory_space<vmem>>, %arg3: memref<8x128xbf16, #tpu.memory_space<vmem>>) attributes {dimension_semantics = [#tpu.dimension_semantics<arbitrary>], iteration_bounds = array<i64: 1>, scalar_prefetch = 0 : i64, scratch_operands = 0 : i64, tpu.core_type = #tpu.core_type<tc>, window_params = [{transform_indices = @transform_0, window_bounds = array<i64: 8, 128>}, {pipeline_mode = #tpu.pipeline_mode<synchronous>, transform_indices = @transform_1, window_bounds = array<i64: 8, 8>}, {pipeline_mode = #tpu.pipeline_mode<synchronous>, transform_indices = @transform_2, window_bounds = array<i64: 8, 128>}]} {
    %c0 = arith.constant 0 : index
    %c0_0 = arith.constant 0 : index
    %0 = vector.load %arg2[%c0, %c0_0] : memref<8x8xbf16, #tpu.memory_space<vmem>>, vector<8x8xbf16>
    %c0_1 = arith.constant 0 : index
    %c0_2 = arith.constant 0 : index
    %1 = vector.load %arg1[%c0_1, %c0_2] : memref<8x128xbf16, #tpu.memory_space<vmem>>, vector<8x128xbf16>
    %cst = arith.constant dense<0.000000e+00> : vector<8x128xf32>
    %2 = tpu.matmul %0, %1, %cst {dimension_numbers = #tpu.dot_dimension_numbers<[1], [0], [0], [1], [0, 0, 1, 1], [], []>} : vector<8x8xbf16>, vector<8x128xbf16>, vector<8x128xf32> -> vector<8x128xf32>
    %cst_3 = arith.constant dense<0.000000e+00> : vector<8xf32>
    %3 = vector.multi_reduction <add>, %2, %cst_3 [1] : vector<8x128xf32> to vector<8xf32>
    %4 = vector.shape_cast %3 : vector<8xf32> to vector<8x1xf32>
    %cst_4 = arith.constant 1.280000e+02 : f32
    %5 = vector.broadcast %cst_4 : f32 to vector<8x1xf32>
    %6 = arith.divf %4, %5 : vector<8x1xf32>
    %7 = vector.broadcast %6 : vector<8x1xf32> to vector<8x128xf32>
    %8 = arith.subf %2, %7 : vector<8x128xf32>
    %9 = vector.broadcast %6 : vector<8x1xf32> to vector<8x128xf32>
    %10 = arith.subf %2, %9 : vector<8x128xf32>
    %11 = arith.mulf %8, %10 : vector<8x128xf32>
    %cst_5 = arith.constant dense<0.000000e+00> : vector<8xf32>
    %12 = vector.multi_reduction <add>, %11, %cst_5 [1] : vector<8x128xf32> to vector<8xf32>
    %13 = vector.shape_cast %12 : vector<8xf32> to vector<8x1xf32>
    %cst_6 = arith.constant 1.280000e+02 : f32
    %14 = vector.broadcast %cst_6 : f32 to vector<8x1xf32>
    %15 = arith.divf %13, %14 : vector<8x1xf32>
    %16 = vector.broadcast %6 : vector<8x1xf32> to vector<8x128xf32>
    %17 = arith.subf %2, %16 : vector<8x128xf32>
    %cst_7 = arith.constant 9.99999974E-6 : f32
    %18 = vector.broadcast %cst_7 : f32 to vector<8x1xf32>
    %19 = arith.addf %15, %18 : vector<8x1xf32>
    %20 = math.rsqrt %19 : vector<8x1xf32>
    %21 = vector.broadcast %20 : vector<8x1xf32> to vector<8x128xf32>
    %22 = arith.mulf %17, %21 : vector<8x128xf32>
    %cst_8 = arith.constant 0.000000e+00 : f32
    %23 = vector.broadcast %cst_8 : f32 to vector<8x128xf32>
    %24 = arith.cmpf oge, %22, %23 : vector<8x128xf32>
    %cst_9 = arith.constant 2.000000e-01 : f32
    %25 = vector.broadcast %cst_9 : f32 to vector<8x128xf32>
    %26 = arith.mulf %25, %22 : vector<8x128xf32>
    %27 = arith.select %24, %22, %26 : vector<8x128xi1>, vector<8x128xf32>
    %28 = arith.truncf %27 : vector<8x128xf32> to vector<8x128xbf16>
    %c0_10 = arith.constant 0 : index
    %c0_11 = arith.constant 0 : index
    %29 = vector.load %arg3[%c0_10, %c0_11] : memref<8x128xbf16, #tpu.memory_space<vmem>>, vector<8x128xbf16>
    tpu.vector_store %arg3[%c0_10, %c0_11], %28 {strides = array<i32>} : memref<8x128xbf16, #tpu.memory_space<vmem>>, vector<8x128xbf16>,
    return
  }
  func.func @transform_0(%arg0: i32) -> (i32, i32) {
    %c0_i32 = arith.constant 0 : i32
    %c0_i32_0 = arith.constant 0 : i32
    return %c0_i32, %arg0 : i32, i32
  }
  func.func @transform_1(%arg0: i32) -> (i32, i32) {
    %c0_i32 = arith.constant 0 : i32
    %c0_i32_0 = arith.constant 0 : i32
    %c0_i32_1 = arith.constant 0 : i32
    return %c0_i32, %c0_i32_0 : i32, i32
  }
  func.func @transform_2(%arg0: i32) -> (i32, i32) {
    %c0_i32 = arith.constant 0 : i32
    %c0_i32_0 = arith.constant 0 : i32
    %c0_i32_1 = arith.constant 0 : i32
    return %c0_i32, %c0_i32_0 : i32, i32
  }
}

module attributes {stable_mosaic.version = 11 : i64} {
  func.func @_conv_bn_kernel(%arg0: i32, %arg1: memref<72x128xbf16, #tpu.memory_space<vmem>>, %arg2: memref<8x72xbf16, #tpu.memory_space<vmem>>, %arg3: memref<8x128xbf16, #tpu.memory_space<vmem>>) attributes {dimension_semantics = [#tpu.dimension_semantics<arbitrary>], iteration_bounds = array<i64: 1>, scalar_prefetch = 0 : i64, scratch_operands = 0 : i64, tpu.core_type = #tpu.core_type<tc>, window_params = [{transform_indices = @transform_0, window_bounds = array<i64: 72, 128>}, {pipeline_mode = #tpu.pipeline_mode<synchronous>, transform_indices = @transform_1, window_bounds = array<i64: 8, 72>}, {pipeline_mode = #tpu.pipeline_mode<synchronous>, transform_indices = @transform_2, window_bounds = array<i64: 8, 128>}]} {
    %c0 = arith.constant 0 : index
    %c0_0 = arith.constant 0 : index
    %0 = vector.load %arg2[%c0, %c0_0] : memref<8x72xbf16, #tpu.memory_space<vmem>>, vector<8x72xbf16>
    %c0_1 = arith.constant 0 : index
    %c0_2 = arith.constant 0 : index
    %1 = vector.load %arg1[%c0_1, %c0_2] : memref<72x128xbf16, #tpu.memory_space<vmem>>, vector<72x128xbf16>
    %cst = arith.constant dense<0.000000e+00> : vector<8x128xf32>
    %2 = tpu.matmul %0, %1, %cst {dimension_numbers = #tpu.dot_dimension_numbers<[1], [0], [0], [1], [0, 0, 1, 1], [], []>} : vector<8x72xbf16>, vector<72x128xbf16>, vector<8x128xf32> -> vector<8x128xf32>
    %cst_3 = arith.constant dense<0.000000e+00> : vector<8xf32>
    %3 = vector.multi_reduction <add>, %2, %cst_3 [1] : vector<8x128xf32> to vector<8xf32>
    %4 = vector.shape_cast %3 : vector<8xf32> to vector<8x1xf32>
    %cst_4 = arith.constant 1.280000e+02 : f32
    %5 = vector.broadcast %cst_4 : f32 to vector<8x1xf32>
    %6 = arith.divf %4, %5 : vector<8x1xf32>
    %7 = vector.broadcast %6 : vector<8x1xf32> to vector<8x128xf32>
    %8 = arith.subf %2, %7 : vector<8x128xf32>
    %9 = vector.broadcast %6 : vector<8x1xf32> to vector<8x128xf32>
    %10 = arith.subf %2, %9 : vector<8x128xf32>
    %11 = arith.mulf %8, %10 : vector<8x128xf32>
    %cst_5 = arith.constant dense<0.000000e+00> : vector<8xf32>
    %12 = vector.multi_reduction <add>, %11, %cst_5 [1] : vector<8x128xf32> to vector<8xf32>
    %13 = vector.shape_cast %12 : vector<8xf32> to vector<8x1xf32>
    %cst_6 = arith.constant 1.280000e+02 : f32
    %14 = vector.broadcast %cst_6 : f32 to vector<8x1xf32>
    %15 = arith.divf %13, %14 : vector<8x1xf32>
    %16 = vector.broadcast %6 : vector<8x1xf32> to vector<8x128xf32>
    %17 = arith.subf %2, %16 : vector<8x128xf32>
    %cst_7 = arith.constant 9.99999974E-6 : f32
    %18 = vector.broadcast %cst_7 : f32 to vector<8x1xf32>
    %19 = arith.addf %15, %18 : vector<8x1xf32>
    %20 = math.rsqrt %19 : vector<8x1xf32>
    %21 = vector.broadcast %20 : vector<8x1xf32> to vector<8x128xf32>
    %22 = arith.mulf %17, %21 : vector<8x128xf32>
    %cst_8 = arith.constant 0.000000e+00 : f32
    %23 = vector.broadcast %cst_8 : f32 to vector<8x128xf32>
    %24 = arith.cmpf oge, %22, %23 : vector<8x128xf32>
    %cst_9 = arith.constant 2.000000e-01 : f32
    %25 = vector.broadcast %cst_9 : f32 to vector<8x128xf32>
    %26 = arith.mulf %25, %22 : vector<8x128xf32>
    %27 = arith.select %24, %22, %26 : vector<8x128xi1>, vector<8x128xf32>
    %28 = arith.truncf %27 : vector<8x128xf32> to vector<8x128xbf16>
    %c0_10 = arith.constant 0 : index
    %c0_11 = arith.constant 0 : index
    %29 = vector.load %arg3[%c0_10, %c0_11] : memref<8x128xbf16, #tpu.memory_space<vmem>>, vector<8x128xbf16>
    tpu.vector_store %arg3[%c0_10, %c0_11], %28 {strides = array<i32>} : memref<8x128xbf16, #tpu.memory_space<vmem>>, vector<8x128xbf16>,
    return
  }
  func.func @transform_0(%arg0: i32) -> (i32, i32) {
    %c0_i32 = arith.constant 0 : i32
    %c0_i32_0 = arith.constant 0 : i32
    return %c0_i32, %arg0 : i32, i32
  }
  func.func @transform_1(%arg0: i32) -> (i32, i32) {
    %c0_i32 = arith.constant 0 : i32
    %c0_i32_0 = arith.constant 0 : i32
    %c0_i32_1 = arith.constant 0 : i32
    return %c0_i32, %c0_i32_0 : i32, i32
  }
  func.func @transform_2(%arg0: i32) -> (i32, i32) {
    %c0_i32 = arith.constant 0 : i32
    %c0_i32_0 = arith.constant 0 : i32
    %c0_i32_1 = arith.constant 0 : i32
    return %c0_i32, %c0_i32_0 : i32, i32
  }
}

module attributes {stable_mosaic.version = 11 : i64} {
  func.func @_conv_epi_kernel(%arg0: i32, %arg1: memref<72x32xbf16, #tpu.memory_space<vmem>>, %arg2: memref<8x72xbf16, #tpu.memory_space<vmem>>, %arg3: memref<8x1xf32, #tpu.memory_space<vmem>>, %arg4: memref<8x32xf32, #tpu.memory_space<vmem>>) attributes {dimension_semantics = [#tpu.dimension_semantics<arbitrary>], iteration_bounds = array<i64: 1>, scalar_prefetch = 0 : i64, scratch_operands = 0 : i64, tpu.core_type = #tpu.core_type<tc>, window_params = [{transform_indices = @transform_0, window_bounds = array<i64: 72, 32>}, {pipeline_mode = #tpu.pipeline_mode<synchronous>, transform_indices = @transform_1, window_bounds = array<i64: 8, 72>}, {pipeline_mode = #tpu.pipeline_mode<synchronous>, transform_indices = @transform_2, window_bounds = array<i64: 8, 1>}, {transform_indices = @transform_3, window_bounds = array<i64: 8, 32>}]} {
    %c0 = arith.constant 0 : index
    %c0_0 = arith.constant 0 : index
    %0 = vector.load %arg2[%c0, %c0_0] : memref<8x72xbf16, #tpu.memory_space<vmem>>, vector<8x72xbf16>
    %c0_1 = arith.constant 0 : index
    %c0_2 = arith.constant 0 : index
    %1 = vector.load %arg1[%c0_1, %c0_2] : memref<72x32xbf16, #tpu.memory_space<vmem>>, vector<72x32xbf16>
    %cst = arith.constant dense<0.000000e+00> : vector<8x32xf32>
    %2 = tpu.matmul %0, %1, %cst {dimension_numbers = #tpu.dot_dimension_numbers<[1], [0], [0], [1], [0, 0, 1, 1], [], []>} : vector<8x72xbf16>, vector<72x32xbf16>, vector<8x32xf32> -> vector<8x32xf32>
    %c0_3 = arith.constant 0 : index
    %c0_4 = arith.constant 0 : index
    %3 = vector.load %arg3[%c0_3, %c0_4] : memref<8x1xf32, #tpu.memory_space<vmem>>, vector<8x1xf32>
    %4 = vector.broadcast %3 : vector<8x1xf32> to vector<8x32xf32>
    %5 = arith.addf %2, %4 : vector<8x32xf32>
    %c0_5 = arith.constant 0 : index
    %c0_6 = arith.constant 0 : index
    %6 = vector.load %arg4[%c0_5, %c0_6] : memref<8x32xf32, #tpu.memory_space<vmem>>, vector<8x32xf32>
    tpu.vector_store %arg4[%c0_5, %c0_6], %5 {strides = array<i32>} : memref<8x32xf32, #tpu.memory_space<vmem>>, vector<8x32xf32>,
    return
  }
  func.func @transform_0(%arg0: i32) -> (i32, i32) {
    %c0_i32 = arith.constant 0 : i32
    %c0_i32_0 = arith.constant 0 : i32
    return %c0_i32, %arg0 : i32, i32
  }
  func.func @transform_1(%arg0: i32) -> (i32, i32) {
    %c0_i32 = arith.constant 0 : i32
    %c0_i32_0 = arith.constant 0 : i32
    %c0_i32_1 = arith.constant 0 : i32
    return %c0_i32, %c0_i32_0 : i32, i32
  }
  func.func @transform_2(%arg0: i32) -> (i32, i32) {
    %c0_i32 = arith.constant 0 : i32
    %c0_i32_0 = arith.constant 0 : i32
    %c0_i32_1 = arith.constant 0 : i32
    return %c0_i32, %c0_i32_0 : i32, i32
  }
  func.func @transform_3(%arg0: i32) -> (i32, i32) {
    %c0_i32 = arith.constant 0 : i32
    %c0_i32_0 = arith.constant 0 : i32
    return %c0_i32, %arg0 : i32, i32
  }
}

module attributes {stable_mosaic.version = 11 : i64} {
  func.func @_conv_bn_kernel(%arg0: i32, %arg1: memref<8x32xbf16, #tpu.memory_space<vmem>>, %arg2: memref<8x8xbf16, #tpu.memory_space<vmem>>, %arg3: memref<8x32xf32, #tpu.memory_space<vmem>>) attributes {dimension_semantics = [#tpu.dimension_semantics<arbitrary>], iteration_bounds = array<i64: 1>, scalar_prefetch = 0 : i64, scratch_operands = 0 : i64, tpu.core_type = #tpu.core_type<tc>, window_params = [{transform_indices = @transform_0, window_bounds = array<i64: 8, 32>}, {pipeline_mode = #tpu.pipeline_mode<synchronous>, transform_indices = @transform_1, window_bounds = array<i64: 8, 8>}, {pipeline_mode = #tpu.pipeline_mode<synchronous>, transform_indices = @transform_2, window_bounds = array<i64: 8, 32>}]} {
    %c0 = arith.constant 0 : index
    %c0_0 = arith.constant 0 : index
    %0 = vector.load %arg2[%c0, %c0_0] : memref<8x8xbf16, #tpu.memory_space<vmem>>, vector<8x8xbf16>
    %c0_1 = arith.constant 0 : index
    %c0_2 = arith.constant 0 : index
    %1 = vector.load %arg1[%c0_1, %c0_2] : memref<8x32xbf16, #tpu.memory_space<vmem>>, vector<8x32xbf16>
    %cst = arith.constant dense<0.000000e+00> : vector<8x32xf32>
    %2 = tpu.matmul %0, %1, %cst {dimension_numbers = #tpu.dot_dimension_numbers<[1], [0], [0], [1], [0, 0, 1, 1], [], []>} : vector<8x8xbf16>, vector<8x32xbf16>, vector<8x32xf32> -> vector<8x32xf32>
    %cst_3 = arith.constant dense<0.000000e+00> : vector<8xf32>
    %3 = vector.multi_reduction <add>, %2, %cst_3 [1] : vector<8x32xf32> to vector<8xf32>
    %4 = vector.shape_cast %3 : vector<8xf32> to vector<8x1xf32>
    %cst_4 = arith.constant 3.200000e+01 : f32
    %5 = vector.broadcast %cst_4 : f32 to vector<8x1xf32>
    %6 = arith.divf %4, %5 : vector<8x1xf32>
    %7 = vector.broadcast %6 : vector<8x1xf32> to vector<8x32xf32>
    %8 = arith.subf %2, %7 : vector<8x32xf32>
    %9 = vector.broadcast %6 : vector<8x1xf32> to vector<8x32xf32>
    %10 = arith.subf %2, %9 : vector<8x32xf32>
    %11 = arith.mulf %8, %10 : vector<8x32xf32>
    %cst_5 = arith.constant dense<0.000000e+00> : vector<8xf32>
    %12 = vector.multi_reduction <add>, %11, %cst_5 [1] : vector<8x32xf32> to vector<8xf32>
    %13 = vector.shape_cast %12 : vector<8xf32> to vector<8x1xf32>
    %cst_6 = arith.constant 3.200000e+01 : f32
    %14 = vector.broadcast %cst_6 : f32 to vector<8x1xf32>
    %15 = arith.divf %13, %14 : vector<8x1xf32>
    %16 = vector.broadcast %6 : vector<8x1xf32> to vector<8x32xf32>
    %17 = arith.subf %2, %16 : vector<8x32xf32>
    %cst_7 = arith.constant 9.99999974E-6 : f32
    %18 = vector.broadcast %cst_7 : f32 to vector<8x1xf32>
    %19 = arith.addf %15, %18 : vector<8x1xf32>
    %20 = math.rsqrt %19 : vector<8x1xf32>
    %21 = vector.broadcast %20 : vector<8x1xf32> to vector<8x32xf32>
    %22 = arith.mulf %17, %21 : vector<8x32xf32>
    %cst_8 = arith.constant 0.000000e+00 : f32
    %23 = vector.broadcast %cst_8 : f32 to vector<8x32xf32>
    %24 = arith.cmpf oge, %22, %23 : vector<8x32xf32>
    %cst_9 = arith.constant 2.000000e-01 : f32
    %25 = vector.broadcast %cst_9 : f32 to vector<8x32xf32>
    %26 = arith.mulf %25, %22 : vector<8x32xf32>
    %27 = arith.select %24, %22, %26 : vector<8x32xi1>, vector<8x32xf32>
    %c0_10 = arith.constant 0 : index
    %c0_11 = arith.constant 0 : index
    %28 = vector.load %arg3[%c0_10, %c0_11] : memref<8x32xf32, #tpu.memory_space<vmem>>, vector<8x32xf32>
    tpu.vector_store %arg3[%c0_10, %c0_11], %27 {strides = array<i32>} : memref<8x32xf32, #tpu.memory_space<vmem>>, vector<8x32xf32>,
    return
  }
  func.func @transform_0(%arg0: i32) -> (i32, i32) {
    %c0_i32 = arith.constant 0 : i32
    %c0_i32_0 = arith.constant 0 : i32
    return %c0_i32, %arg0 : i32, i32
  }
  func.func @transform_1(%arg0: i32) -> (i32, i32) {
    %c0_i32 = arith.constant 0 : i32
    %c0_i32_0 = arith.constant 0 : i32
    %c0_i32_1 = arith.constant 0 : i32
    return %c0_i32, %c0_i32_0 : i32, i32
  }
  func.func @transform_2(%arg0: i32) -> (i32, i32) {
    %c0_i32 = arith.constant 0 : i32
    %c0_i32_0 = arith.constant 0 : i32
    %c0_i32_1 = arith.constant 0 : i32
    return %c0_i32, %c0_i32_0 : i32, i32
  }
}

module attributes {stable_mosaic.version = 11 : i64} {
  func.func @_conv_bn_kernel(%arg0: i32, %arg1: memref<72x32xbf16, #tpu.memory_space<vmem>>, %arg2: memref<8x72xbf16, #tpu.memory_space<vmem>>, %arg3: memref<8x32xf32, #tpu.memory_space<vmem>>) attributes {dimension_semantics = [#tpu.dimension_semantics<arbitrary>], iteration_bounds = array<i64: 1>, scalar_prefetch = 0 : i64, scratch_operands = 0 : i64, tpu.core_type = #tpu.core_type<tc>, window_params = [{transform_indices = @transform_0, window_bounds = array<i64: 72, 32>}, {pipeline_mode = #tpu.pipeline_mode<synchronous>, transform_indices = @transform_1, window_bounds = array<i64: 8, 72>}, {pipeline_mode = #tpu.pipeline_mode<synchronous>, transform_indices = @transform_2, window_bounds = array<i64: 8, 32>}]} {
    %c0 = arith.constant 0 : index
    %c0_0 = arith.constant 0 : index
    %0 = vector.load %arg2[%c0, %c0_0] : memref<8x72xbf16, #tpu.memory_space<vmem>>, vector<8x72xbf16>
    %c0_1 = arith.constant 0 : index
    %c0_2 = arith.constant 0 : index
    %1 = vector.load %arg1[%c0_1, %c0_2] : memref<72x32xbf16, #tpu.memory_space<vmem>>, vector<72x32xbf16>
    %cst = arith.constant dense<0.000000e+00> : vector<8x32xf32>
    %2 = tpu.matmul %0, %1, %cst {dimension_numbers = #tpu.dot_dimension_numbers<[1], [0], [0], [1], [0, 0, 1, 1], [], []>} : vector<8x72xbf16>, vector<72x32xbf16>, vector<8x32xf32> -> vector<8x32xf32>
    %cst_3 = arith.constant dense<0.000000e+00> : vector<8xf32>
    %3 = vector.multi_reduction <add>, %2, %cst_3 [1] : vector<8x32xf32> to vector<8xf32>
    %4 = vector.shape_cast %3 : vector<8xf32> to vector<8x1xf32>
    %cst_4 = arith.constant 3.200000e+01 : f32
    %5 = vector.broadcast %cst_4 : f32 to vector<8x1xf32>
    %6 = arith.divf %4, %5 : vector<8x1xf32>
    %7 = vector.broadcast %6 : vector<8x1xf32> to vector<8x32xf32>
    %8 = arith.subf %2, %7 : vector<8x32xf32>
    %9 = vector.broadcast %6 : vector<8x1xf32> to vector<8x32xf32>
    %10 = arith.subf %2, %9 : vector<8x32xf32>
    %11 = arith.mulf %8, %10 : vector<8x32xf32>
    %cst_5 = arith.constant dense<0.000000e+00> : vector<8xf32>
    %12 = vector.multi_reduction <add>, %11, %cst_5 [1] : vector<8x32xf32> to vector<8xf32>
    %13 = vector.shape_cast %12 : vector<8xf32> to vector<8x1xf32>
    %cst_6 = arith.constant 3.200000e+01 : f32
    %14 = vector.broadcast %cst_6 : f32 to vector<8x1xf32>
    %15 = arith.divf %13, %14 : vector<8x1xf32>
    %16 = vector.broadcast %6 : vector<8x1xf32> to vector<8x32xf32>
    %17 = arith.subf %2, %16 : vector<8x32xf32>
    %cst_7 = arith.constant 9.99999974E-6 : f32
    %18 = vector.broadcast %cst_7 : f32 to vector<8x1xf32>
    %19 = arith.addf %15, %18 : vector<8x1xf32>
    %20 = math.rsqrt %19 : vector<8x1xf32>
    %21 = vector.broadcast %20 : vector<8x1xf32> to vector<8x32xf32>
    %22 = arith.mulf %17, %21 : vector<8x32xf32>
    %cst_8 = arith.constant 0.000000e+00 : f32
    %23 = vector.broadcast %cst_8 : f32 to vector<8x32xf32>
    %24 = arith.cmpf oge, %22, %23 : vector<8x32xf32>
    %cst_9 = arith.constant 2.000000e-01 : f32
    %25 = vector.broadcast %cst_9 : f32 to vector<8x32xf32>
    %26 = arith.mulf %25, %22 : vector<8x32xf32>
    %27 = arith.select %24, %22, %26 : vector<8x32xi1>, vector<8x32xf32>
    %c0_10 = arith.constant 0 : index
    %c0_11 = arith.constant 0 : index
    %28 = vector.load %arg3[%c0_10, %c0_11] : memref<8x32xf32, #tpu.memory_space<vmem>>, vector<8x32xf32>
    tpu.vector_store %arg3[%c0_10, %c0_11], %27 {strides = array<i32>} : memref<8x32xf32, #tpu.memory_space<vmem>>, vector<8x32xf32>,
    return
  }
  func.func @transform_0(%arg0: i32) -> (i32, i32) {
    %c0_i32 = arith.constant 0 : i32
    %c0_i32_0 = arith.constant 0 : i32
    return %c0_i32, %arg0 : i32, i32
  }
  func.func @transform_1(%arg0: i32) -> (i32, i32) {
    %c0_i32 = arith.constant 0 : i32
    %c0_i32_0 = arith.constant 0 : i32
    %c0_i32_1 = arith.constant 0 : i32
    return %c0_i32, %c0_i32_0 : i32, i32
  }
  func.func @transform_2(%arg0: i32) -> (i32, i32) {
    %c0_i32 = arith.constant 0 : i32
    %c0_i32_0 = arith.constant 0 : i32
    %c0_i32_1 = arith.constant 0 : i32
    return %c0_i32, %c0_i32_0 : i32, i32
  }
}

module attributes {stable_mosaic.version = 11 : i64} {
  func.func @_conv_epi_kernel(%arg0: i32, %arg1: memref<72x8xbf16, #tpu.memory_space<vmem>>, %arg2: memref<8x72xbf16, #tpu.memory_space<vmem>>, %arg3: memref<8x1xf32, #tpu.memory_space<vmem>>, %arg4: memref<8x8xf32, #tpu.memory_space<vmem>>) attributes {dimension_semantics = [#tpu.dimension_semantics<arbitrary>], iteration_bounds = array<i64: 1>, scalar_prefetch = 0 : i64, scratch_operands = 0 : i64, tpu.core_type = #tpu.core_type<tc>, window_params = [{transform_indices = @transform_0, window_bounds = array<i64: 72, 8>}, {pipeline_mode = #tpu.pipeline_mode<synchronous>, transform_indices = @transform_1, window_bounds = array<i64: 8, 72>}, {pipeline_mode = #tpu.pipeline_mode<synchronous>, transform_indices = @transform_2, window_bounds = array<i64: 8, 1>}, {transform_indices = @transform_3, window_bounds = array<i64: 8, 8>}]} {
    %c0 = arith.constant 0 : index
    %c0_0 = arith.constant 0 : index
    %0 = vector.load %arg2[%c0, %c0_0] : memref<8x72xbf16, #tpu.memory_space<vmem>>, vector<8x72xbf16>
    %c0_1 = arith.constant 0 : index
    %c0_2 = arith.constant 0 : index
    %1 = vector.load %arg1[%c0_1, %c0_2] : memref<72x8xbf16, #tpu.memory_space<vmem>>, vector<72x8xbf16>
    %cst = arith.constant dense<0.000000e+00> : vector<8x8xf32>
    %2 = tpu.matmul %0, %1, %cst {dimension_numbers = #tpu.dot_dimension_numbers<[1], [0], [0], [1], [0, 0, 1, 1], [], []>} : vector<8x72xbf16>, vector<72x8xbf16>, vector<8x8xf32> -> vector<8x8xf32>
    %c0_3 = arith.constant 0 : index
    %c0_4 = arith.constant 0 : index
    %3 = vector.load %arg3[%c0_3, %c0_4] : memref<8x1xf32, #tpu.memory_space<vmem>>, vector<8x1xf32>
    %4 = vector.broadcast %3 : vector<8x1xf32> to vector<8x8xf32>
    %5 = arith.addf %2, %4 : vector<8x8xf32>
    %c0_5 = arith.constant 0 : index
    %c0_6 = arith.constant 0 : index
    %6 = vector.load %arg4[%c0_5, %c0_6] : memref<8x8xf32, #tpu.memory_space<vmem>>, vector<8x8xf32>
    tpu.vector_store %arg4[%c0_5, %c0_6], %5 {strides = array<i32>} : memref<8x8xf32, #tpu.memory_space<vmem>>, vector<8x8xf32>,
    return
  }
  func.func @transform_0(%arg0: i32) -> (i32, i32) {
    %c0_i32 = arith.constant 0 : i32
    %c0_i32_0 = arith.constant 0 : i32
    return %c0_i32, %arg0 : i32, i32
  }
  func.func @transform_1(%arg0: i32) -> (i32, i32) {
    %c0_i32 = arith.constant 0 : i32
    %c0_i32_0 = arith.constant 0 : i32
    %c0_i32_1 = arith.constant 0 : i32
    return %c0_i32, %c0_i32_0 : i32, i32
  }
  func.func @transform_2(%arg0: i32) -> (i32, i32) {
    %c0_i32 = arith.constant 0 : i32
    %c0_i32_0 = arith.constant 0 : i32
    %c0_i32_1 = arith.constant 0 : i32
    return %c0_i32, %c0_i32_0 : i32, i32
  }
  func.func @transform_3(%arg0: i32) -> (i32, i32) {
    %c0_i32 = arith.constant 0 : i32
    %c0_i32_0 = arith.constant 0 : i32
    return %c0_i32, %arg0 : i32, i32
  }
}

module attributes {stable_mosaic.version = 11 : i64} {
  func.func @_conv_bn_kernel(%arg0: i32, %arg1: memref<8x8xbf16, #tpu.memory_space<vmem>>, %arg2: memref<8x8xbf16, #tpu.memory_space<vmem>>, %arg3: memref<8x8xf32, #tpu.memory_space<vmem>>) attributes {dimension_semantics = [#tpu.dimension_semantics<arbitrary>], iteration_bounds = array<i64: 1>, scalar_prefetch = 0 : i64, scratch_operands = 0 : i64, tpu.core_type = #tpu.core_type<tc>, window_params = [{transform_indices = @transform_0, window_bounds = array<i64: 8, 8>}, {pipeline_mode = #tpu.pipeline_mode<synchronous>, transform_indices = @transform_1, window_bounds = array<i64: 8, 8>}, {pipeline_mode = #tpu.pipeline_mode<synchronous>, transform_indices = @transform_2, window_bounds = array<i64: 8, 8>}]} {
    %c0 = arith.constant 0 : index
    %c0_0 = arith.constant 0 : index
    %0 = vector.load %arg2[%c0, %c0_0] : memref<8x8xbf16, #tpu.memory_space<vmem>>, vector<8x8xbf16>
    %c0_1 = arith.constant 0 : index
    %c0_2 = arith.constant 0 : index
    %1 = vector.load %arg1[%c0_1, %c0_2] : memref<8x8xbf16, #tpu.memory_space<vmem>>, vector<8x8xbf16>
    %cst = arith.constant dense<0.000000e+00> : vector<8x8xf32>
    %2 = tpu.matmul %0, %1, %cst {dimension_numbers = #tpu.dot_dimension_numbers<[1], [0], [0], [1], [0, 0, 1, 1], [], []>} : vector<8x8xbf16>, vector<8x8xbf16>, vector<8x8xf32> -> vector<8x8xf32>
    %cst_3 = arith.constant dense<0.000000e+00> : vector<8xf32>
    %3 = vector.multi_reduction <add>, %2, %cst_3 [1] : vector<8x8xf32> to vector<8xf32>
    %4 = vector.shape_cast %3 : vector<8xf32> to vector<8x1xf32>
    %cst_4 = arith.constant 8.000000e+00 : f32
    %5 = vector.broadcast %cst_4 : f32 to vector<8x1xf32>
    %6 = arith.divf %4, %5 : vector<8x1xf32>
    %7 = vector.broadcast %6 : vector<8x1xf32> to vector<8x8xf32>
    %8 = arith.subf %2, %7 : vector<8x8xf32>
    %9 = vector.broadcast %6 : vector<8x1xf32> to vector<8x8xf32>
    %10 = arith.subf %2, %9 : vector<8x8xf32>
    %11 = arith.mulf %8, %10 : vector<8x8xf32>
    %cst_5 = arith.constant dense<0.000000e+00> : vector<8xf32>
    %12 = vector.multi_reduction <add>, %11, %cst_5 [1] : vector<8x8xf32> to vector<8xf32>
    %13 = vector.shape_cast %12 : vector<8xf32> to vector<8x1xf32>
    %cst_6 = arith.constant 8.000000e+00 : f32
    %14 = vector.broadcast %cst_6 : f32 to vector<8x1xf32>
    %15 = arith.divf %13, %14 : vector<8x1xf32>
    %16 = vector.broadcast %6 : vector<8x1xf32> to vector<8x8xf32>
    %17 = arith.subf %2, %16 : vector<8x8xf32>
    %cst_7 = arith.constant 9.99999974E-6 : f32
    %18 = vector.broadcast %cst_7 : f32 to vector<8x1xf32>
    %19 = arith.addf %15, %18 : vector<8x1xf32>
    %20 = math.rsqrt %19 : vector<8x1xf32>
    %21 = vector.broadcast %20 : vector<8x1xf32> to vector<8x8xf32>
    %22 = arith.mulf %17, %21 : vector<8x8xf32>
    %cst_8 = arith.constant 0.000000e+00 : f32
    %23 = vector.broadcast %cst_8 : f32 to vector<8x8xf32>
    %24 = arith.cmpf oge, %22, %23 : vector<8x8xf32>
    %cst_9 = arith.constant 2.000000e-01 : f32
    %25 = vector.broadcast %cst_9 : f32 to vector<8x8xf32>
    %26 = arith.mulf %25, %22 : vector<8x8xf32>
    %27 = arith.select %24, %22, %26 : vector<8x8xi1>, vector<8x8xf32>
    %c0_10 = arith.constant 0 : index
    %c0_11 = arith.constant 0 : index
    %28 = vector.load %arg3[%c0_10, %c0_11] : memref<8x8xf32, #tpu.memory_space<vmem>>, vector<8x8xf32>
    tpu.vector_store %arg3[%c0_10, %c0_11], %27 {strides = array<i32>} : memref<8x8xf32, #tpu.memory_space<vmem>>, vector<8x8xf32>,
    return
  }
  func.func @transform_0(%arg0: i32) -> (i32, i32) {
    %c0_i32 = arith.constant 0 : i32
    %c0_i32_0 = arith.constant 0 : i32
    return %c0_i32, %arg0 : i32, i32
  }
  func.func @transform_1(%arg0: i32) -> (i32, i32) {
    %c0_i32 = arith.constant 0 : i32
    %c0_i32_0 = arith.constant 0 : i32
    %c0_i32_1 = arith.constant 0 : i32
    return %c0_i32, %c0_i32_0 : i32, i32
  }
  func.func @transform_2(%arg0: i32) -> (i32, i32) {
    %c0_i32 = arith.constant 0 : i32
    %c0_i32_0 = arith.constant 0 : i32
    %c0_i32_1 = arith.constant 0 : i32
    return %c0_i32, %c0_i32_0 : i32, i32
  }
}

module attributes {stable_mosaic.version = 11 : i64} {
  func.func @_conv_bn_kernel(%arg0: i32, %arg1: memref<72x8xbf16, #tpu.memory_space<vmem>>, %arg2: memref<8x72xbf16, #tpu.memory_space<vmem>>, %arg3: memref<8x8xf32, #tpu.memory_space<vmem>>) attributes {dimension_semantics = [#tpu.dimension_semantics<arbitrary>], iteration_bounds = array<i64: 1>, scalar_prefetch = 0 : i64, scratch_operands = 0 : i64, tpu.core_type = #tpu.core_type<tc>, window_params = [{transform_indices = @transform_0, window_bounds = array<i64: 72, 8>}, {pipeline_mode = #tpu.pipeline_mode<synchronous>, transform_indices = @transform_1, window_bounds = array<i64: 8, 72>}, {pipeline_mode = #tpu.pipeline_mode<synchronous>, transform_indices = @transform_2, window_bounds = array<i64: 8, 8>}]} {
    %c0 = arith.constant 0 : index
    %c0_0 = arith.constant 0 : index
    %0 = vector.load %arg2[%c0, %c0_0] : memref<8x72xbf16, #tpu.memory_space<vmem>>, vector<8x72xbf16>
    %c0_1 = arith.constant 0 : index
    %c0_2 = arith.constant 0 : index
    %1 = vector.load %arg1[%c0_1, %c0_2] : memref<72x8xbf16, #tpu.memory_space<vmem>>, vector<72x8xbf16>
    %cst = arith.constant dense<0.000000e+00> : vector<8x8xf32>
    %2 = tpu.matmul %0, %1, %cst {dimension_numbers = #tpu.dot_dimension_numbers<[1], [0], [0], [1], [0, 0, 1, 1], [], []>} : vector<8x72xbf16>, vector<72x8xbf16>, vector<8x8xf32> -> vector<8x8xf32>
    %cst_3 = arith.constant dense<0.000000e+00> : vector<8xf32>
    %3 = vector.multi_reduction <add>, %2, %cst_3 [1] : vector<8x8xf32> to vector<8xf32>
    %4 = vector.shape_cast %3 : vector<8xf32> to vector<8x1xf32>
    %cst_4 = arith.constant 8.000000e+00 : f32
    %5 = vector.broadcast %cst_4 : f32 to vector<8x1xf32>
    %6 = arith.divf %4, %5 : vector<8x1xf32>
    %7 = vector.broadcast %6 : vector<8x1xf32> to vector<8x8xf32>
    %8 = arith.subf %2, %7 : vector<8x8xf32>
    %9 = vector.broadcast %6 : vector<8x1xf32> to vector<8x8xf32>
    %10 = arith.subf %2, %9 : vector<8x8xf32>
    %11 = arith.mulf %8, %10 : vector<8x8xf32>
    %cst_5 = arith.constant dense<0.000000e+00> : vector<8xf32>
    %12 = vector.multi_reduction <add>, %11, %cst_5 [1] : vector<8x8xf32> to vector<8xf32>
    %13 = vector.shape_cast %12 : vector<8xf32> to vector<8x1xf32>
    %cst_6 = arith.constant 8.000000e+00 : f32
    %14 = vector.broadcast %cst_6 : f32 to vector<8x1xf32>
    %15 = arith.divf %13, %14 : vector<8x1xf32>
    %16 = vector.broadcast %6 : vector<8x1xf32> to vector<8x8xf32>
    %17 = arith.subf %2, %16 : vector<8x8xf32>
    %cst_7 = arith.constant 9.99999974E-6 : f32
    %18 = vector.broadcast %cst_7 : f32 to vector<8x1xf32>
    %19 = arith.addf %15, %18 : vector<8x1xf32>
    %20 = math.rsqrt %19 : vector<8x1xf32>
    %21 = vector.broadcast %20 : vector<8x1xf32> to vector<8x8xf32>
    %22 = arith.mulf %17, %21 : vector<8x8xf32>
    %cst_8 = arith.constant 0.000000e+00 : f32
    %23 = vector.broadcast %cst_8 : f32 to vector<8x8xf32>
    %24 = arith.cmpf oge, %22, %23 : vector<8x8xf32>
    %cst_9 = arith.constant 2.000000e-01 : f32
    %25 = vector.broadcast %cst_9 : f32 to vector<8x8xf32>
    %26 = arith.mulf %25, %22 : vector<8x8xf32>
    %27 = arith.select %24, %22, %26 : vector<8x8xi1>, vector<8x8xf32>
    %c0_10 = arith.constant 0 : index
    %c0_11 = arith.constant 0 : index
    %28 = vector.load %arg3[%c0_10, %c0_11] : memref<8x8xf32, #tpu.memory_space<vmem>>, vector<8x8xf32>
    tpu.vector_store %arg3[%c0_10, %c0_11], %27 {strides = array<i32>} : memref<8x8xf32, #tpu.memory_space<vmem>>, vector<8x8xf32>,
    return
  }
  func.func @transform_0(%arg0: i32) -> (i32, i32) {
    %c0_i32 = arith.constant 0 : i32
    %c0_i32_0 = arith.constant 0 : i32
    return %c0_i32, %arg0 : i32, i32
  }
  func.func @transform_1(%arg0: i32) -> (i32, i32) {
    %c0_i32 = arith.constant 0 : i32
    %c0_i32_0 = arith.constant 0 : i32
    %c0_i32_1 = arith.constant 0 : i32
    return %c0_i32, %c0_i32_0 : i32, i32
  }
  func.func @transform_2(%arg0: i32) -> (i32, i32) {
    %c0_i32 = arith.constant 0 : i32
    %c0_i32_0 = arith.constant 0 : i32
    %c0_i32_1 = arith.constant 0 : i32
    return %c0_i32, %c0_i32_0 : i32, i32
  }
}

module attributes {stable_mosaic.version = 11 : i64} {
  func.func @_conv_epi_kernel(%arg0: i32, %arg1: memref<72x2xbf16, #tpu.memory_space<vmem>>, %arg2: memref<8x72xbf16, #tpu.memory_space<vmem>>, %arg3: memref<8x1xf32, #tpu.memory_space<vmem>>, %arg4: memref<8x2xf32, #tpu.memory_space<vmem>>) attributes {dimension_semantics = [#tpu.dimension_semantics<arbitrary>], iteration_bounds = array<i64: 1>, scalar_prefetch = 0 : i64, scratch_operands = 0 : i64, tpu.core_type = #tpu.core_type<tc>, window_params = [{transform_indices = @transform_0, window_bounds = array<i64: 72, 2>}, {pipeline_mode = #tpu.pipeline_mode<synchronous>, transform_indices = @transform_1, window_bounds = array<i64: 8, 72>}, {pipeline_mode = #tpu.pipeline_mode<synchronous>, transform_indices = @transform_2, window_bounds = array<i64: 8, 1>}, {transform_indices = @transform_3, window_bounds = array<i64: 8, 2>}]} {
    %c0 = arith.constant 0 : index
    %c0_0 = arith.constant 0 : index
    %0 = vector.load %arg2[%c0, %c0_0] : memref<8x72xbf16, #tpu.memory_space<vmem>>, vector<8x72xbf16>
    %c0_1 = arith.constant 0 : index
    %c0_2 = arith.constant 0 : index
    %1 = vector.load %arg1[%c0_1, %c0_2] : memref<72x2xbf16, #tpu.memory_space<vmem>>, vector<72x2xbf16>
    %cst = arith.constant dense<0.000000e+00> : vector<8x2xf32>
    %2 = tpu.matmul %0, %1, %cst {dimension_numbers = #tpu.dot_dimension_numbers<[1], [0], [0], [1], [0, 0, 1, 1], [], []>} : vector<8x72xbf16>, vector<72x2xbf16>, vector<8x2xf32> -> vector<8x2xf32>
    %c0_3 = arith.constant 0 : index
    %c0_4 = arith.constant 0 : index
    %3 = vector.load %arg3[%c0_3, %c0_4] : memref<8x1xf32, #tpu.memory_space<vmem>>, vector<8x1xf32>
    %4 = vector.broadcast %3 : vector<8x1xf32> to vector<8x2xf32>
    %5 = arith.addf %2, %4 : vector<8x2xf32>
    %c0_5 = arith.constant 0 : index
    %c0_6 = arith.constant 0 : index
    %6 = vector.load %arg4[%c0_5, %c0_6] : memref<8x2xf32, #tpu.memory_space<vmem>>, vector<8x2xf32>
    tpu.vector_store %arg4[%c0_5, %c0_6], %5 {strides = array<i32>} : memref<8x2xf32, #tpu.memory_space<vmem>>, vector<8x2xf32>,
    return
  }
  func.func @transform_0(%arg0: i32) -> (i32, i32) {
    %c0_i32 = arith.constant 0 : i32
    %c0_i32_0 = arith.constant 0 : i32
    return %c0_i32, %arg0 : i32, i32
  }
  func.func @transform_1(%arg0: i32) -> (i32, i32) {
    %c0_i32 = arith.constant 0 : i32
    %c0_i32_0 = arith.constant 0 : i32
    %c0_i32_1 = arith.constant 0 : i32
    return %c0_i32, %c0_i32_0 : i32, i32
  }
  func.func @transform_2(%arg0: i32) -> (i32, i32) {
    %c0_i32 = arith.constant 0 : i32
    %c0_i32_0 = arith.constant 0 : i32
    %c0_i32_1 = arith.constant 0 : i32
    return %c0_i32, %c0_i32_0 : i32, i32
  }
  func.func @transform_3(%arg0: i32) -> (i32, i32) {
    %c0_i32 = arith.constant 0 : i32
    %c0_i32_0 = arith.constant 0 : i32
    return %c0_i32, %arg0 : i32, i32
  }
}

module attributes {stable_mosaic.version = 11 : i64} {
  func.func @_conv_epi_kernel(%arg0: i32, %arg1: memref<32x2xbf16, #tpu.memory_space<vmem>>, %arg2: memref<32x32xbf16, #tpu.memory_space<vmem>>, %arg3: memref<32x1xf32, #tpu.memory_space<vmem>>, %arg4: memref<32x2xf32, #tpu.memory_space<vmem>>) attributes {dimension_semantics = [#tpu.dimension_semantics<arbitrary>], iteration_bounds = array<i64: 1>, scalar_prefetch = 0 : i64, scratch_operands = 0 : i64, tpu.core_type = #tpu.core_type<tc>, window_params = [{transform_indices = @transform_0, window_bounds = array<i64: 32, 2>}, {pipeline_mode = #tpu.pipeline_mode<synchronous>, transform_indices = @transform_1, window_bounds = array<i64: 32, 32>}, {pipeline_mode = #tpu.pipeline_mode<synchronous>, transform_indices = @transform_2, window_bounds = array<i64: 32, 1>}, {transform_indices = @transform_3, window_bounds = array<i64: 32, 2>}]} {
    %c0 = arith.constant 0 : index
    %c0_0 = arith.constant 0 : index
    %0 = vector.load %arg2[%c0, %c0_0] : memref<32x32xbf16, #tpu.memory_space<vmem>>, vector<32x32xbf16>
    %c0_1 = arith.constant 0 : index
    %c0_2 = arith.constant 0 : index
    %1 = vector.load %arg1[%c0_1, %c0_2] : memref<32x2xbf16, #tpu.memory_space<vmem>>, vector<32x2xbf16>
    %cst = arith.constant dense<0.000000e+00> : vector<32x2xf32>
    %2 = tpu.matmul %0, %1, %cst {dimension_numbers = #tpu.dot_dimension_numbers<[1], [0], [0], [1], [0, 0, 1, 1], [], []>} : vector<32x32xbf16>, vector<32x2xbf16>, vector<32x2xf32> -> vector<32x2xf32>
    %c0_3 = arith.constant 0 : index
    %c0_4 = arith.constant 0 : index
    %3 = vector.load %arg3[%c0_3, %c0_4] : memref<32x1xf32, #tpu.memory_space<vmem>>, vector<32x1xf32>
    %4 = vector.broadcast %3 : vector<32x1xf32> to vector<32x2xf32>
    %5 = arith.addf %2, %4 : vector<32x2xf32>
    %c0_5 = arith.constant 0 : index
    %c0_6 = arith.constant 0 : index
    %6 = vector.load %arg4[%c0_5, %c0_6] : memref<32x2xf32, #tpu.memory_space<vmem>>, vector<32x2xf32>
    tpu.vector_store %arg4[%c0_5, %c0_6], %5 {strides = array<i32>} : memref<32x2xf32, #tpu.memory_space<vmem>>, vector<32x2xf32>,
    return
  }
  func.func @transform_0(%arg0: i32) -> (i32, i32) {
    %c0_i32 = arith.constant 0 : i32
    %c0_i32_0 = arith.constant 0 : i32
    return %c0_i32, %arg0 : i32, i32
  }
  func.func @transform_1(%arg0: i32) -> (i32, i32) {
    %c0_i32 = arith.constant 0 : i32
    %c0_i32_0 = arith.constant 0 : i32
    %c0_i32_1 = arith.constant 0 : i32
    return %c0_i32, %c0_i32_0 : i32, i32
  }
  func.func @transform_2(%arg0: i32) -> (i32, i32) {
    %c0_i32 = arith.constant 0 : i32
    %c0_i32_0 = arith.constant 0 : i32
    %c0_i32_1 = arith.constant 0 : i32
    return %c0_i32, %c0_i32_0 : i32, i32
  }
  func.func @transform_3(%arg0: i32) -> (i32, i32) {
    %c0_i32 = arith.constant 0 : i32
    %c0_i32_0 = arith.constant 0 : i32
    return %c0_i32, %arg0 : i32, i32
  }
}

module attributes {stable_mosaic.version = 11 : i64} {
  func.func @_concat_conv_conv_bn_kernel(%arg0: i32, %arg1: memref<72x8xbf16, #tpu.memory_space<vmem>>, %arg2: memref<36x8xbf16, #tpu.memory_space<vmem>>, %arg3: memref<8x72xbf16, #tpu.memory_space<vmem>>, %arg4: memref<8x36xbf16, #tpu.memory_space<vmem>>, %arg5: memref<8x8xbf16, #tpu.memory_space<vmem>>, %arg6: memref<8x8xf32, #tpu.memory_space<vmem>>) attributes {dimension_semantics = [#tpu.dimension_semantics<arbitrary>], iteration_bounds = array<i64: 1>, scalar_prefetch = 0 : i64, scratch_operands = 0 : i64, tpu.core_type = #tpu.core_type<tc>, window_params = [{pipeline_mode = #tpu.pipeline_mode<synchronous>, transform_indices = @transform_0, window_bounds = array<i64: 72, 8>}, {pipeline_mode = #tpu.pipeline_mode<synchronous>, transform_indices = @transform_1, window_bounds = array<i64: 36, 8>}, {pipeline_mode = #tpu.pipeline_mode<synchronous>, transform_indices = @transform_2, window_bounds = array<i64: 8, 72>}, {pipeline_mode = #tpu.pipeline_mode<synchronous>, transform_indices = @transform_3, window_bounds = array<i64: 8, 36>}, {pipeline_mode = #tpu.pipeline_mode<synchronous>, transform_indices = @transform_4, window_bounds = array<i64: 8, 8>}, {pipeline_mode = #tpu.pipeline_mode<synchronous>, transform_indices = @transform_5, window_bounds = array<i64: 8, 8>}]} {
    %c0 = arith.constant 0 : index
    %c0_0 = arith.constant 0 : index
    %0 = vector.load %arg3[%c0, %c0_0] : memref<8x72xbf16, #tpu.memory_space<vmem>>, vector<8x72xbf16>
    %c0_1 = arith.constant 0 : index
    %c0_2 = arith.constant 0 : index
    %1 = vector.load %arg1[%c0_1, %c0_2] : memref<72x8xbf16, #tpu.memory_space<vmem>>, vector<72x8xbf16>
    %cst = arith.constant dense<0.000000e+00> : vector<8x8xf32>
    %2 = tpu.matmul %0, %1, %cst {dimension_numbers = #tpu.dot_dimension_numbers<[1], [0], [0], [1], [0, 0, 1, 1], [], []>} : vector<8x72xbf16>, vector<72x8xbf16>, vector<8x8xf32> -> vector<8x8xf32>
    %c0_3 = arith.constant 0 : index
    %c0_4 = arith.constant 0 : index
    %3 = vector.load %arg4[%c0_3, %c0_4] : memref<8x36xbf16, #tpu.memory_space<vmem>>, vector<8x36xbf16>
    %c0_5 = arith.constant 0 : index
    %c0_6 = arith.constant 0 : index
    %4 = vector.load %arg2[%c0_5, %c0_6] : memref<36x8xbf16, #tpu.memory_space<vmem>>, vector<36x8xbf16>
    %cst_7 = arith.constant dense<0.000000e+00> : vector<8x8xf32>
    %5 = tpu.matmul %3, %4, %cst_7 {dimension_numbers = #tpu.dot_dimension_numbers<[1], [0], [0], [1], [0, 0, 1, 1], [], []>} : vector<8x36xbf16>, vector<36x8xbf16>, vector<8x8xf32> -> vector<8x8xf32>
    %6 = arith.addf %2, %5 : vector<8x8xf32>
    %cst_8 = arith.constant dense<0.000000e+00> : vector<8xf32>
    %7 = vector.multi_reduction <add>, %6, %cst_8 [1] : vector<8x8xf32> to vector<8xf32>
    %8 = vector.shape_cast %7 : vector<8xf32> to vector<8x1xf32>
    %cst_9 = arith.constant 8.000000e+00 : f32
    %9 = vector.broadcast %cst_9 : f32 to vector<8x1xf32>
    %10 = arith.divf %8, %9 : vector<8x1xf32>
    %11 = vector.broadcast %10 : vector<8x1xf32> to vector<8x8xf32>
    %12 = arith.subf %6, %11 : vector<8x8xf32>
    %13 = vector.broadcast %10 : vector<8x1xf32> to vector<8x8xf32>
    %14 = arith.subf %6, %13 : vector<8x8xf32>
    %15 = arith.mulf %12, %14 : vector<8x8xf32>
    %cst_10 = arith.constant dense<0.000000e+00> : vector<8xf32>
    %16 = vector.multi_reduction <add>, %15, %cst_10 [1] : vector<8x8xf32> to vector<8xf32>
    %17 = vector.shape_cast %16 : vector<8xf32> to vector<8x1xf32>
    %cst_11 = arith.constant 8.000000e+00 : f32
    %18 = vector.broadcast %cst_11 : f32 to vector<8x1xf32>
    %19 = arith.divf %17, %18 : vector<8x1xf32>
    %20 = vector.broadcast %10 : vector<8x1xf32> to vector<8x8xf32>
    %21 = arith.subf %6, %20 : vector<8x8xf32>
    %cst_12 = arith.constant 9.99999974E-6 : f32
    %22 = vector.broadcast %cst_12 : f32 to vector<8x1xf32>
    %23 = arith.addf %19, %22 : vector<8x1xf32>
    %24 = math.rsqrt %23 : vector<8x1xf32>
    %25 = vector.broadcast %24 : vector<8x1xf32> to vector<8x8xf32>
    %26 = arith.mulf %21, %25 : vector<8x8xf32>
    %cst_13 = arith.constant 0.000000e+00 : f32
    %27 = vector.broadcast %cst_13 : f32 to vector<8x8xf32>
    %28 = arith.cmpf oge, %26, %27 : vector<8x8xf32>
    %cst_14 = arith.constant 2.000000e-01 : f32
    %29 = vector.broadcast %cst_14 : f32 to vector<8x8xf32>
    %30 = arith.mulf %29, %26 : vector<8x8xf32>
    %31 = arith.select %28, %26, %30 : vector<8x8xi1>, vector<8x8xf32>
    %c0_15 = arith.constant 0 : index
    %c0_16 = arith.constant 0 : index
    %32 = vector.load %arg5[%c0_15, %c0_16] : memref<8x8xbf16, #tpu.memory_space<vmem>>, vector<8x8xbf16>
    %33 = arith.truncf %31 : vector<8x8xf32> to vector<8x8xbf16>
    %cst_17 = arith.constant dense<0.000000e+00> : vector<8x8xf32>
    %34 = tpu.matmul %32, %33, %cst_17 {dimension_numbers = #tpu.dot_dimension_numbers<[1], [0], [0], [1], [0, 0, 1, 1], [], []>} : vector<8x8xbf16>, vector<8x8xbf16>, vector<8x8xf32> -> vector<8x8xf32>
    %cst_18 = arith.constant dense<0.000000e+00> : vector<8xf32>
    %35 = vector.multi_reduction <add>, %34, %cst_18 [1] : vector<8x8xf32> to vector<8xf32>
    %36 = vector.shape_cast %35 : vector<8xf32> to vector<8x1xf32>
    %cst_19 = arith.constant 8.000000e+00 : f32
    %37 = vector.broadcast %cst_19 : f32 to vector<8x1xf32>
    %38 = arith.divf %36, %37 : vector<8x1xf32>
    %39 = vector.broadcast %38 : vector<8x1xf32> to vector<8x8xf32>
    %40 = arith.subf %34, %39 : vector<8x8xf32>
    %41 = vector.broadcast %38 : vector<8x1xf32> to vector<8x8xf32>
    %42 = arith.subf %34, %41 : vector<8x8xf32>
    %43 = arith.mulf %40, %42 : vector<8x8xf32>
    %cst_20 = arith.constant dense<0.000000e+00> : vector<8xf32>
    %44 = vector.multi_reduction <add>, %43, %cst_20 [1] : vector<8x8xf32> to vector<8xf32>
    %45 = vector.shape_cast %44 : vector<8xf32> to vector<8x1xf32>
    %cst_21 = arith.constant 8.000000e+00 : f32
    %46 = vector.broadcast %cst_21 : f32 to vector<8x1xf32>
    %47 = arith.divf %45, %46 : vector<8x1xf32>
    %48 = vector.broadcast %38 : vector<8x1xf32> to vector<8x8xf32>
    %49 = arith.subf %34, %48 : vector<8x8xf32>
    %cst_22 = arith.constant 9.99999974E-6 : f32
    %50 = vector.broadcast %cst_22 : f32 to vector<8x1xf32>
    %51 = arith.addf %47, %50 : vector<8x1xf32>
    %52 = math.rsqrt %51 : vector<8x1xf32>
    %53 = vector.broadcast %52 : vector<8x1xf32> to vector<8x8xf32>
    %54 = arith.mulf %49, %53 : vector<8x8xf32>
    %cst_23 = arith.constant 0.000000e+00 : f32
    %55 = vector.broadcast %cst_23 : f32 to vector<8x8xf32>
    %56 = arith.cmpf oge, %54, %55 : vector<8x8xf32>
    %cst_24 = arith.constant 2.000000e-01 : f32
    %57 = vector.broadcast %cst_24 : f32 to vector<8x8xf32>
    %58 = arith.mulf %57, %54 : vector<8x8xf32>
    %59 = arith.select %56, %54, %58 : vector<8x8xi1>, vector<8x8xf32>
    %c0_25 = arith.constant 0 : index
    %c0_26 = arith.constant 0 : index
    %60 = vector.load %arg6[%c0_25, %c0_26] : memref<8x8xf32, #tpu.memory_space<vmem>>, vector<8x8xf32>
    tpu.vector_store %arg6[%c0_25, %c0_26], %59 {strides = array<i32>} : memref<8x8xf32, #tpu.memory_space<vmem>>, vector<8x8xf32>,
    return
  }
  func.func @transform_0(%arg0: i32) -> (i32, i32) {
    %c0_i32 = arith.constant 0 : i32
    %c0_i32_0 = arith.constant 0 : i32
    %c0_i32_1 = arith.constant 0 : i32
    return %c0_i32, %c0_i32_0 : i32, i32
  }
  func.func @transform_1(%arg0: i32) -> (i32, i32) {
    %c0_i32 = arith.constant 0 : i32
    %c0_i32_0 = arith.constant 0 : i32
    %c0_i32_1 = arith.constant 0 : i32
    return %c0_i32, %c0_i32_0 : i32, i32
  }
  func.func @transform_2(%arg0: i32) -> (i32, i32) {
    %c0_i32 = arith.constant 0 : i32
    %c0_i32_0 = arith.constant 0 : i32
    %c0_i32_1 = arith.constant 0 : i32
    return %c0_i32, %c0_i32_0 : i32, i32
  }
  func.func @transform_3(%arg0: i32) -> (i32, i32) {
    %c0_i32 = arith.constant 0 : i32
    %c0_i32_0 = arith.constant 0 : i32
    %c0_i32_1 = arith.constant 0 : i32
    return %c0_i32, %c0_i32_0 : i32, i32
  }
  func.func @transform_4(%arg0: i32) -> (i32, i32) {
    %c0_i32 = arith.constant 0 : i32
    %c0_i32_0 = arith.constant 0 : i32
    %c0_i32_1 = arith.constant 0 : i32
    return %c0_i32, %c0_i32_0 : i32, i32
  }
  func.func @transform_5(%arg0: i32) -> (i32, i32) {
    %c0_i32 = arith.constant 0 : i32
    %c0_i32_0 = arith.constant 0 : i32
    %c0_i32_1 = arith.constant 0 : i32
    return %c0_i32, %c0_i32_0 : i32, i32
  }
}

module attributes {stable_mosaic.version = 11 : i64} {
  func.func @_conv_epi_kernel(%arg0: i32, %arg1: memref<32x8xbf16, #tpu.memory_space<vmem>>, %arg2: memref<32x32xbf16, #tpu.memory_space<vmem>>, %arg3: memref<32x1xf32, #tpu.memory_space<vmem>>, %arg4: memref<32x8xf32, #tpu.memory_space<vmem>>) attributes {dimension_semantics = [#tpu.dimension_semantics<arbitrary>], iteration_bounds = array<i64: 1>, scalar_prefetch = 0 : i64, scratch_operands = 0 : i64, tpu.core_type = #tpu.core_type<tc>, window_params = [{transform_indices = @transform_0, window_bounds = array<i64: 32, 8>}, {pipeline_mode = #tpu.pipeline_mode<synchronous>, transform_indices = @transform_1, window_bounds = array<i64: 32, 32>}, {pipeline_mode = #tpu.pipeline_mode<synchronous>, transform_indices = @transform_2, window_bounds = array<i64: 32, 1>}, {transform_indices = @transform_3, window_bounds = array<i64: 32, 8>}]} {
    %c0 = arith.constant 0 : index
    %c0_0 = arith.constant 0 : index
    %0 = vector.load %arg2[%c0, %c0_0] : memref<32x32xbf16, #tpu.memory_space<vmem>>, vector<32x32xbf16>
    %c0_1 = arith.constant 0 : index
    %c0_2 = arith.constant 0 : index
    %1 = vector.load %arg1[%c0_1, %c0_2] : memref<32x8xbf16, #tpu.memory_space<vmem>>, vector<32x8xbf16>
    %cst = arith.constant dense<0.000000e+00> : vector<32x8xf32>
    %2 = tpu.matmul %0, %1, %cst {dimension_numbers = #tpu.dot_dimension_numbers<[1], [0], [0], [1], [0, 0, 1, 1], [], []>} : vector<32x32xbf16>, vector<32x8xbf16>, vector<32x8xf32> -> vector<32x8xf32>
    %c0_3 = arith.constant 0 : index
    %c0_4 = arith.constant 0 : index
    %3 = vector.load %arg3[%c0_3, %c0_4] : memref<32x1xf32, #tpu.memory_space<vmem>>, vector<32x1xf32>
    %4 = vector.broadcast %3 : vector<32x1xf32> to vector<32x8xf32>
    %5 = arith.addf %2, %4 : vector<32x8xf32>
    %c0_5 = arith.constant 0 : index
    %c0_6 = arith.constant 0 : index
    %6 = vector.load %arg4[%c0_5, %c0_6] : memref<32x8xf32, #tpu.memory_space<vmem>>, vector<32x8xf32>
    tpu.vector_store %arg4[%c0_5, %c0_6], %5 {strides = array<i32>} : memref<32x8xf32, #tpu.memory_space<vmem>>, vector<32x8xf32>,
    return
  }
  func.func @transform_0(%arg0: i32) -> (i32, i32) {
    %c0_i32 = arith.constant 0 : i32
    %c0_i32_0 = arith.constant 0 : i32
    return %c0_i32, %arg0 : i32, i32
  }
  func.func @transform_1(%arg0: i32) -> (i32, i32) {
    %c0_i32 = arith.constant 0 : i32
    %c0_i32_0 = arith.constant 0 : i32
    %c0_i32_1 = arith.constant 0 : i32
    return %c0_i32, %c0_i32_0 : i32, i32
  }
  func.func @transform_2(%arg0: i32) -> (i32, i32) {
    %c0_i32 = arith.constant 0 : i32
    %c0_i32_0 = arith.constant 0 : i32
    %c0_i32_1 = arith.constant 0 : i32
    return %c0_i32, %c0_i32_0 : i32, i32
  }
  func.func @transform_3(%arg0: i32) -> (i32, i32) {
    %c0_i32 = arith.constant 0 : i32
    %c0_i32_0 = arith.constant 0 : i32
    return %c0_i32, %arg0 : i32, i32
  }
}

module attributes {stable_mosaic.version = 11 : i64} {
  func.func @_concat_conv_conv_bn_kernel(%arg0: i32, %arg1: memref<72x32xbf16, #tpu.memory_space<vmem>>, %arg2: memref<36x32xbf16, #tpu.memory_space<vmem>>, %arg3: memref<8x72xbf16, #tpu.memory_space<vmem>>, %arg4: memref<8x36xbf16, #tpu.memory_space<vmem>>, %arg5: memref<8x8xbf16, #tpu.memory_space<vmem>>, %arg6: memref<8x32xf32, #tpu.memory_space<vmem>>) attributes {dimension_semantics = [#tpu.dimension_semantics<arbitrary>], iteration_bounds = array<i64: 1>, scalar_prefetch = 0 : i64, scratch_operands = 0 : i64, tpu.core_type = #tpu.core_type<tc>, window_params = [{pipeline_mode = #tpu.pipeline_mode<synchronous>, transform_indices = @transform_0, window_bounds = array<i64: 72, 32>}, {pipeline_mode = #tpu.pipeline_mode<synchronous>, transform_indices = @transform_1, window_bounds = array<i64: 36, 32>}, {pipeline_mode = #tpu.pipeline_mode<synchronous>, transform_indices = @transform_2, window_bounds = array<i64: 8, 72>}, {pipeline_mode = #tpu.pipeline_mode<synchronous>, transform_indices = @transform_3, window_bounds = array<i64: 8, 36>}, {pipeline_mode = #tpu.pipeline_mode<synchronous>, transform_indices = @transform_4, window_bounds = array<i64: 8, 8>}, {pipeline_mode = #tpu.pipeline_mode<synchronous>, transform_indices = @transform_5, window_bounds = array<i64: 8, 32>}]} {
    %c0 = arith.constant 0 : index
    %c0_0 = arith.constant 0 : index
    %0 = vector.load %arg3[%c0, %c0_0] : memref<8x72xbf16, #tpu.memory_space<vmem>>, vector<8x72xbf16>
    %c0_1 = arith.constant 0 : index
    %c0_2 = arith.constant 0 : index
    %1 = vector.load %arg1[%c0_1, %c0_2] : memref<72x32xbf16, #tpu.memory_space<vmem>>, vector<72x32xbf16>
    %cst = arith.constant dense<0.000000e+00> : vector<8x32xf32>
    %2 = tpu.matmul %0, %1, %cst {dimension_numbers = #tpu.dot_dimension_numbers<[1], [0], [0], [1], [0, 0, 1, 1], [], []>} : vector<8x72xbf16>, vector<72x32xbf16>, vector<8x32xf32> -> vector<8x32xf32>
    %c0_3 = arith.constant 0 : index
    %c0_4 = arith.constant 0 : index
    %3 = vector.load %arg4[%c0_3, %c0_4] : memref<8x36xbf16, #tpu.memory_space<vmem>>, vector<8x36xbf16>
    %c0_5 = arith.constant 0 : index
    %c0_6 = arith.constant 0 : index
    %4 = vector.load %arg2[%c0_5, %c0_6] : memref<36x32xbf16, #tpu.memory_space<vmem>>, vector<36x32xbf16>
    %cst_7 = arith.constant dense<0.000000e+00> : vector<8x32xf32>
    %5 = tpu.matmul %3, %4, %cst_7 {dimension_numbers = #tpu.dot_dimension_numbers<[1], [0], [0], [1], [0, 0, 1, 1], [], []>} : vector<8x36xbf16>, vector<36x32xbf16>, vector<8x32xf32> -> vector<8x32xf32>
    %6 = arith.addf %2, %5 : vector<8x32xf32>
    %cst_8 = arith.constant dense<0.000000e+00> : vector<8xf32>
    %7 = vector.multi_reduction <add>, %6, %cst_8 [1] : vector<8x32xf32> to vector<8xf32>
    %8 = vector.shape_cast %7 : vector<8xf32> to vector<8x1xf32>
    %cst_9 = arith.constant 3.200000e+01 : f32
    %9 = vector.broadcast %cst_9 : f32 to vector<8x1xf32>
    %10 = arith.divf %8, %9 : vector<8x1xf32>
    %11 = vector.broadcast %10 : vector<8x1xf32> to vector<8x32xf32>
    %12 = arith.subf %6, %11 : vector<8x32xf32>
    %13 = vector.broadcast %10 : vector<8x1xf32> to vector<8x32xf32>
    %14 = arith.subf %6, %13 : vector<8x32xf32>
    %15 = arith.mulf %12, %14 : vector<8x32xf32>
    %cst_10 = arith.constant dense<0.000000e+00> : vector<8xf32>
    %16 = vector.multi_reduction <add>, %15, %cst_10 [1] : vector<8x32xf32> to vector<8xf32>
    %17 = vector.shape_cast %16 : vector<8xf32> to vector<8x1xf32>
    %cst_11 = arith.constant 3.200000e+01 : f32
    %18 = vector.broadcast %cst_11 : f32 to vector<8x1xf32>
    %19 = arith.divf %17, %18 : vector<8x1xf32>
    %20 = vector.broadcast %10 : vector<8x1xf32> to vector<8x32xf32>
    %21 = arith.subf %6, %20 : vector<8x32xf32>
    %cst_12 = arith.constant 9.99999974E-6 : f32
    %22 = vector.broadcast %cst_12 : f32 to vector<8x1xf32>
    %23 = arith.addf %19, %22 : vector<8x1xf32>
    %24 = math.rsqrt %23 : vector<8x1xf32>
    %25 = vector.broadcast %24 : vector<8x1xf32> to vector<8x32xf32>
    %26 = arith.mulf %21, %25 : vector<8x32xf32>
    %cst_13 = arith.constant 0.000000e+00 : f32
    %27 = vector.broadcast %cst_13 : f32 to vector<8x32xf32>
    %28 = arith.cmpf oge, %26, %27 : vector<8x32xf32>
    %cst_14 = arith.constant 2.000000e-01 : f32
    %29 = vector.broadcast %cst_14 : f32 to vector<8x32xf32>
    %30 = arith.mulf %29, %26 : vector<8x32xf32>
    %31 = arith.select %28, %26, %30 : vector<8x32xi1>, vector<8x32xf32>
    %c0_15 = arith.constant 0 : index
    %c0_16 = arith.constant 0 : index
    %32 = vector.load %arg5[%c0_15, %c0_16] : memref<8x8xbf16, #tpu.memory_space<vmem>>, vector<8x8xbf16>
    %33 = arith.truncf %31 : vector<8x32xf32> to vector<8x32xbf16>
    %cst_17 = arith.constant dense<0.000000e+00> : vector<8x32xf32>
    %34 = tpu.matmul %32, %33, %cst_17 {dimension_numbers = #tpu.dot_dimension_numbers<[1], [0], [0], [1], [0, 0, 1, 1], [], []>} : vector<8x8xbf16>, vector<8x32xbf16>, vector<8x32xf32> -> vector<8x32xf32>
    %cst_18 = arith.constant dense<0.000000e+00> : vector<8xf32>
    %35 = vector.multi_reduction <add>, %34, %cst_18 [1] : vector<8x32xf32> to vector<8xf32>
    %36 = vector.shape_cast %35 : vector<8xf32> to vector<8x1xf32>
    %cst_19 = arith.constant 3.200000e+01 : f32
    %37 = vector.broadcast %cst_19 : f32 to vector<8x1xf32>
    %38 = arith.divf %36, %37 : vector<8x1xf32>
    %39 = vector.broadcast %38 : vector<8x1xf32> to vector<8x32xf32>
    %40 = arith.subf %34, %39 : vector<8x32xf32>
    %41 = vector.broadcast %38 : vector<8x1xf32> to vector<8x32xf32>
    %42 = arith.subf %34, %41 : vector<8x32xf32>
    %43 = arith.mulf %40, %42 : vector<8x32xf32>
    %cst_20 = arith.constant dense<0.000000e+00> : vector<8xf32>
    %44 = vector.multi_reduction <add>, %43, %cst_20 [1] : vector<8x32xf32> to vector<8xf32>
    %45 = vector.shape_cast %44 : vector<8xf32> to vector<8x1xf32>
    %cst_21 = arith.constant 3.200000e+01 : f32
    %46 = vector.broadcast %cst_21 : f32 to vector<8x1xf32>
    %47 = arith.divf %45, %46 : vector<8x1xf32>
    %48 = vector.broadcast %38 : vector<8x1xf32> to vector<8x32xf32>
    %49 = arith.subf %34, %48 : vector<8x32xf32>
    %cst_22 = arith.constant 9.99999974E-6 : f32
    %50 = vector.broadcast %cst_22 : f32 to vector<8x1xf32>
    %51 = arith.addf %47, %50 : vector<8x1xf32>
    %52 = math.rsqrt %51 : vector<8x1xf32>
    %53 = vector.broadcast %52 : vector<8x1xf32> to vector<8x32xf32>
    %54 = arith.mulf %49, %53 : vector<8x32xf32>
    %cst_23 = arith.constant 0.000000e+00 : f32
    %55 = vector.broadcast %cst_23 : f32 to vector<8x32xf32>
    %56 = arith.cmpf oge, %54, %55 : vector<8x32xf32>
    %cst_24 = arith.constant 2.000000e-01 : f32
    %57 = vector.broadcast %cst_24 : f32 to vector<8x32xf32>
    %58 = arith.mulf %57, %54 : vector<8x32xf32>
    %59 = arith.select %56, %54, %58 : vector<8x32xi1>, vector<8x32xf32>
    %c0_25 = arith.constant 0 : index
    %c0_26 = arith.constant 0 : index
    %60 = vector.load %arg6[%c0_25, %c0_26] : memref<8x32xf32, #tpu.memory_space<vmem>>, vector<8x32xf32>
    tpu.vector_store %arg6[%c0_25, %c0_26], %59 {strides = array<i32>} : memref<8x32xf32, #tpu.memory_space<vmem>>, vector<8x32xf32>,
    return
  }
  func.func @transform_0(%arg0: i32) -> (i32, i32) {
    %c0_i32 = arith.constant 0 : i32
    %c0_i32_0 = arith.constant 0 : i32
    %c0_i32_1 = arith.constant 0 : i32
    return %c0_i32, %c0_i32_0 : i32, i32
  }
  func.func @transform_1(%arg0: i32) -> (i32, i32) {
    %c0_i32 = arith.constant 0 : i32
    %c0_i32_0 = arith.constant 0 : i32
    %c0_i32_1 = arith.constant 0 : i32
    return %c0_i32, %c0_i32_0 : i32, i32
  }
  func.func @transform_2(%arg0: i32) -> (i32, i32) {
    %c0_i32 = arith.constant 0 : i32
    %c0_i32_0 = arith.constant 0 : i32
    %c0_i32_1 = arith.constant 0 : i32
    return %c0_i32, %c0_i32_0 : i32, i32
  }
  func.func @transform_3(%arg0: i32) -> (i32, i32) {
    %c0_i32 = arith.constant 0 : i32
    %c0_i32_0 = arith.constant 0 : i32
    %c0_i32_1 = arith.constant 0 : i32
    return %c0_i32, %c0_i32_0 : i32, i32
  }
  func.func @transform_4(%arg0: i32) -> (i32, i32) {
    %c0_i32 = arith.constant 0 : i32
    %c0_i32_0 = arith.constant 0 : i32
    %c0_i32_1 = arith.constant 0 : i32
    return %c0_i32, %c0_i32_0 : i32, i32
  }
  func.func @transform_5(%arg0: i32) -> (i32, i32) {
    %c0_i32 = arith.constant 0 : i32
    %c0_i32_0 = arith.constant 0 : i32
    %c0_i32_1 = arith.constant 0 : i32
    return %c0_i32, %c0_i32_0 : i32, i32
  }
}

module attributes {stable_mosaic.version = 11 : i64} {
  func.func @_conv_epi_kernel(%arg0: i32, %arg1: memref<32x32xbf16, #tpu.memory_space<vmem>>, %arg2: memref<32x32xbf16, #tpu.memory_space<vmem>>, %arg3: memref<32x1xf32, #tpu.memory_space<vmem>>, %arg4: memref<32x32xf32, #tpu.memory_space<vmem>>) attributes {dimension_semantics = [#tpu.dimension_semantics<arbitrary>], iteration_bounds = array<i64: 1>, scalar_prefetch = 0 : i64, scratch_operands = 0 : i64, tpu.core_type = #tpu.core_type<tc>, window_params = [{transform_indices = @transform_0, window_bounds = array<i64: 32, 32>}, {pipeline_mode = #tpu.pipeline_mode<synchronous>, transform_indices = @transform_1, window_bounds = array<i64: 32, 32>}, {pipeline_mode = #tpu.pipeline_mode<synchronous>, transform_indices = @transform_2, window_bounds = array<i64: 32, 1>}, {transform_indices = @transform_3, window_bounds = array<i64: 32, 32>}]} {
    %c0 = arith.constant 0 : index
    %c0_0 = arith.constant 0 : index
    %0 = vector.load %arg2[%c0, %c0_0] : memref<32x32xbf16, #tpu.memory_space<vmem>>, vector<32x32xbf16>
    %c0_1 = arith.constant 0 : index
    %c0_2 = arith.constant 0 : index
    %1 = vector.load %arg1[%c0_1, %c0_2] : memref<32x32xbf16, #tpu.memory_space<vmem>>, vector<32x32xbf16>
    %cst = arith.constant dense<0.000000e+00> : vector<32x32xf32>
    %2 = tpu.matmul %0, %1, %cst {dimension_numbers = #tpu.dot_dimension_numbers<[1], [0], [0], [1], [0, 0, 1, 1], [], []>} : vector<32x32xbf16>, vector<32x32xbf16>, vector<32x32xf32> -> vector<32x32xf32>
    %c0_3 = arith.constant 0 : index
    %c0_4 = arith.constant 0 : index
    %3 = vector.load %arg3[%c0_3, %c0_4] : memref<32x1xf32, #tpu.memory_space<vmem>>, vector<32x1xf32>
    %4 = vector.broadcast %3 : vector<32x1xf32> to vector<32x32xf32>
    %5 = arith.addf %2, %4 : vector<32x32xf32>
    %c0_5 = arith.constant 0 : index
    %c0_6 = arith.constant 0 : index
    %6 = vector.load %arg4[%c0_5, %c0_6] : memref<32x32xf32, #tpu.memory_space<vmem>>, vector<32x32xf32>
    tpu.vector_store %arg4[%c0_5, %c0_6], %5 {strides = array<i32>} : memref<32x32xf32, #tpu.memory_space<vmem>>, vector<32x32xf32>,
    return
  }
  func.func @transform_0(%arg0: i32) -> (i32, i32) {
    %c0_i32 = arith.constant 0 : i32
    %c0_i32_0 = arith.constant 0 : i32
    return %c0_i32, %arg0 : i32, i32
  }
  func.func @transform_1(%arg0: i32) -> (i32, i32) {
    %c0_i32 = arith.constant 0 : i32
    %c0_i32_0 = arith.constant 0 : i32
    %c0_i32_1 = arith.constant 0 : i32
    return %c0_i32, %c0_i32_0 : i32, i32
  }
  func.func @transform_2(%arg0: i32) -> (i32, i32) {
    %c0_i32 = arith.constant 0 : i32
    %c0_i32_0 = arith.constant 0 : i32
    %c0_i32_1 = arith.constant 0 : i32
    return %c0_i32, %c0_i32_0 : i32, i32
  }
  func.func @transform_3(%arg0: i32) -> (i32, i32) {
    %c0_i32 = arith.constant 0 : i32
    %c0_i32_0 = arith.constant 0 : i32
    return %c0_i32, %arg0 : i32, i32
  }
}

module attributes {stable_mosaic.version = 11 : i64} {
  func.func @_concat_conv_conv_bn_kernel(%arg0: i32, %arg1: memref<72x128xbf16, #tpu.memory_space<vmem>>, %arg2: memref<36x128xbf16, #tpu.memory_space<vmem>>, %arg3: memref<8x72xbf16, #tpu.memory_space<vmem>>, %arg4: memref<8x36xbf16, #tpu.memory_space<vmem>>, %arg5: memref<8x8xbf16, #tpu.memory_space<vmem>>, %arg6: memref<8x128xbf16, #tpu.memory_space<vmem>>) attributes {dimension_semantics = [#tpu.dimension_semantics<arbitrary>], iteration_bounds = array<i64: 1>, scalar_prefetch = 0 : i64, scratch_operands = 0 : i64, tpu.core_type = #tpu.core_type<tc>, window_params = [{pipeline_mode = #tpu.pipeline_mode<synchronous>, transform_indices = @transform_0, window_bounds = array<i64: 72, 128>}, {pipeline_mode = #tpu.pipeline_mode<synchronous>, transform_indices = @transform_1, window_bounds = array<i64: 36, 128>}, {pipeline_mode = #tpu.pipeline_mode<synchronous>, transform_indices = @transform_2, window_bounds = array<i64: 8, 72>}, {pipeline_mode = #tpu.pipeline_mode<synchronous>, transform_indices = @transform_3, window_bounds = array<i64: 8, 36>}, {pipeline_mode = #tpu.pipeline_mode<synchronous>, transform_indices = @transform_4, window_bounds = array<i64: 8, 8>}, {pipeline_mode = #tpu.pipeline_mode<synchronous>, transform_indices = @transform_5, window_bounds = array<i64: 8, 128>}]} {
    %c0 = arith.constant 0 : index
    %c0_0 = arith.constant 0 : index
    %0 = vector.load %arg3[%c0, %c0_0] : memref<8x72xbf16, #tpu.memory_space<vmem>>, vector<8x72xbf16>
    %c0_1 = arith.constant 0 : index
    %c0_2 = arith.constant 0 : index
    %1 = vector.load %arg1[%c0_1, %c0_2] : memref<72x128xbf16, #tpu.memory_space<vmem>>, vector<72x128xbf16>
    %cst = arith.constant dense<0.000000e+00> : vector<8x128xf32>
    %2 = tpu.matmul %0, %1, %cst {dimension_numbers = #tpu.dot_dimension_numbers<[1], [0], [0], [1], [0, 0, 1, 1], [], []>} : vector<8x72xbf16>, vector<72x128xbf16>, vector<8x128xf32> -> vector<8x128xf32>
    %c0_3 = arith.constant 0 : index
    %c0_4 = arith.constant 0 : index
    %3 = vector.load %arg4[%c0_3, %c0_4] : memref<8x36xbf16, #tpu.memory_space<vmem>>, vector<8x36xbf16>
    %c0_5 = arith.constant 0 : index
    %c0_6 = arith.constant 0 : index
    %4 = vector.load %arg2[%c0_5, %c0_6] : memref<36x128xbf16, #tpu.memory_space<vmem>>, vector<36x128xbf16>
    %cst_7 = arith.constant dense<0.000000e+00> : vector<8x128xf32>
    %5 = tpu.matmul %3, %4, %cst_7 {dimension_numbers = #tpu.dot_dimension_numbers<[1], [0], [0], [1], [0, 0, 1, 1], [], []>} : vector<8x36xbf16>, vector<36x128xbf16>, vector<8x128xf32> -> vector<8x128xf32>
    %6 = arith.addf %2, %5 : vector<8x128xf32>
    %cst_8 = arith.constant dense<0.000000e+00> : vector<8xf32>
    %7 = vector.multi_reduction <add>, %6, %cst_8 [1] : vector<8x128xf32> to vector<8xf32>
    %8 = vector.shape_cast %7 : vector<8xf32> to vector<8x1xf32>
    %cst_9 = arith.constant 1.280000e+02 : f32
    %9 = vector.broadcast %cst_9 : f32 to vector<8x1xf32>
    %10 = arith.divf %8, %9 : vector<8x1xf32>
    %11 = vector.broadcast %10 : vector<8x1xf32> to vector<8x128xf32>
    %12 = arith.subf %6, %11 : vector<8x128xf32>
    %13 = vector.broadcast %10 : vector<8x1xf32> to vector<8x128xf32>
    %14 = arith.subf %6, %13 : vector<8x128xf32>
    %15 = arith.mulf %12, %14 : vector<8x128xf32>
    %cst_10 = arith.constant dense<0.000000e+00> : vector<8xf32>
    %16 = vector.multi_reduction <add>, %15, %cst_10 [1] : vector<8x128xf32> to vector<8xf32>
    %17 = vector.shape_cast %16 : vector<8xf32> to vector<8x1xf32>
    %cst_11 = arith.constant 1.280000e+02 : f32
    %18 = vector.broadcast %cst_11 : f32 to vector<8x1xf32>
    %19 = arith.divf %17, %18 : vector<8x1xf32>
    %20 = vector.broadcast %10 : vector<8x1xf32> to vector<8x128xf32>
    %21 = arith.subf %6, %20 : vector<8x128xf32>
    %cst_12 = arith.constant 9.99999974E-6 : f32
    %22 = vector.broadcast %cst_12 : f32 to vector<8x1xf32>
    %23 = arith.addf %19, %22 : vector<8x1xf32>
    %24 = math.rsqrt %23 : vector<8x1xf32>
    %25 = vector.broadcast %24 : vector<8x1xf32> to vector<8x128xf32>
    %26 = arith.mulf %21, %25 : vector<8x128xf32>
    %cst_13 = arith.constant 0.000000e+00 : f32
    %27 = vector.broadcast %cst_13 : f32 to vector<8x128xf32>
    %28 = arith.cmpf oge, %26, %27 : vector<8x128xf32>
    %cst_14 = arith.constant 2.000000e-01 : f32
    %29 = vector.broadcast %cst_14 : f32 to vector<8x128xf32>
    %30 = arith.mulf %29, %26 : vector<8x128xf32>
    %31 = arith.select %28, %26, %30 : vector<8x128xi1>, vector<8x128xf32>
    %c0_15 = arith.constant 0 : index
    %c0_16 = arith.constant 0 : index
    %32 = vector.load %arg5[%c0_15, %c0_16] : memref<8x8xbf16, #tpu.memory_space<vmem>>, vector<8x8xbf16>
    %33 = arith.truncf %31 : vector<8x128xf32> to vector<8x128xbf16>
    %cst_17 = arith.constant dense<0.000000e+00> : vector<8x128xf32>
    %34 = tpu.matmul %32, %33, %cst_17 {dimension_numbers = #tpu.dot_dimension_numbers<[1], [0], [0], [1], [0, 0, 1, 1], [], []>} : vector<8x8xbf16>, vector<8x128xbf16>, vector<8x128xf32> -> vector<8x128xf32>
    %cst_18 = arith.constant dense<0.000000e+00> : vector<8xf32>
    %35 = vector.multi_reduction <add>, %34, %cst_18 [1] : vector<8x128xf32> to vector<8xf32>
    %36 = vector.shape_cast %35 : vector<8xf32> to vector<8x1xf32>
    %cst_19 = arith.constant 1.280000e+02 : f32
    %37 = vector.broadcast %cst_19 : f32 to vector<8x1xf32>
    %38 = arith.divf %36, %37 : vector<8x1xf32>
    %39 = vector.broadcast %38 : vector<8x1xf32> to vector<8x128xf32>
    %40 = arith.subf %34, %39 : vector<8x128xf32>
    %41 = vector.broadcast %38 : vector<8x1xf32> to vector<8x128xf32>
    %42 = arith.subf %34, %41 : vector<8x128xf32>
    %43 = arith.mulf %40, %42 : vector<8x128xf32>
    %cst_20 = arith.constant dense<0.000000e+00> : vector<8xf32>
    %44 = vector.multi_reduction <add>, %43, %cst_20 [1] : vector<8x128xf32> to vector<8xf32>
    %45 = vector.shape_cast %44 : vector<8xf32> to vector<8x1xf32>
    %cst_21 = arith.constant 1.280000e+02 : f32
    %46 = vector.broadcast %cst_21 : f32 to vector<8x1xf32>
    %47 = arith.divf %45, %46 : vector<8x1xf32>
    %48 = vector.broadcast %38 : vector<8x1xf32> to vector<8x128xf32>
    %49 = arith.subf %34, %48 : vector<8x128xf32>
    %cst_22 = arith.constant 9.99999974E-6 : f32
    %50 = vector.broadcast %cst_22 : f32 to vector<8x1xf32>
    %51 = arith.addf %47, %50 : vector<8x1xf32>
    %52 = math.rsqrt %51 : vector<8x1xf32>
    %53 = vector.broadcast %52 : vector<8x1xf32> to vector<8x128xf32>
    %54 = arith.mulf %49, %53 : vector<8x128xf32>
    %cst_23 = arith.constant 0.000000e+00 : f32
    %55 = vector.broadcast %cst_23 : f32 to vector<8x128xf32>
    %56 = arith.cmpf oge, %54, %55 : vector<8x128xf32>
    %cst_24 = arith.constant 2.000000e-01 : f32
    %57 = vector.broadcast %cst_24 : f32 to vector<8x128xf32>
    %58 = arith.mulf %57, %54 : vector<8x128xf32>
    %59 = arith.select %56, %54, %58 : vector<8x128xi1>, vector<8x128xf32>
    %60 = arith.truncf %59 : vector<8x128xf32> to vector<8x128xbf16>
    %c0_25 = arith.constant 0 : index
    %c0_26 = arith.constant 0 : index
    %61 = vector.load %arg6[%c0_25, %c0_26] : memref<8x128xbf16, #tpu.memory_space<vmem>>, vector<8x128xbf16>
    tpu.vector_store %arg6[%c0_25, %c0_26], %60 {strides = array<i32>} : memref<8x128xbf16, #tpu.memory_space<vmem>>, vector<8x128xbf16>,
    return
  }
  func.func @transform_0(%arg0: i32) -> (i32, i32) {
    %c0_i32 = arith.constant 0 : i32
    %c0_i32_0 = arith.constant 0 : i32
    %c0_i32_1 = arith.constant 0 : i32
    return %c0_i32, %c0_i32_0 : i32, i32
  }
  func.func @transform_1(%arg0: i32) -> (i32, i32) {
    %c0_i32 = arith.constant 0 : i32
    %c0_i32_0 = arith.constant 0 : i32
    %c0_i32_1 = arith.constant 0 : i32
    return %c0_i32, %c0_i32_0 : i32, i32
  }
  func.func @transform_2(%arg0: i32) -> (i32, i32) {
    %c0_i32 = arith.constant 0 : i32
    %c0_i32_0 = arith.constant 0 : i32
    %c0_i32_1 = arith.constant 0 : i32
    return %c0_i32, %c0_i32_0 : i32, i32
  }
  func.func @transform_3(%arg0: i32) -> (i32, i32) {
    %c0_i32 = arith.constant 0 : i32
    %c0_i32_0 = arith.constant 0 : i32
    %c0_i32_1 = arith.constant 0 : i32
    return %c0_i32, %c0_i32_0 : i32, i32
  }
  func.func @transform_4(%arg0: i32) -> (i32, i32) {
    %c0_i32 = arith.constant 0 : i32
    %c0_i32_0 = arith.constant 0 : i32
    %c0_i32_1 = arith.constant 0 : i32
    return %c0_i32, %c0_i32_0 : i32, i32
  }
  func.func @transform_5(%arg0: i32) -> (i32, i32) {
    %c0_i32 = arith.constant 0 : i32
    %c0_i32_0 = arith.constant 0 : i32
    %c0_i32_1 = arith.constant 0 : i32
    return %c0_i32, %c0_i32_0 : i32, i32
  }
}

module attributes {stable_mosaic.version = 11 : i64} {
  func.func @_conv_epi_kernel(%arg0: i32, %arg1: memref<32x128xbf16, #tpu.memory_space<vmem>>, %arg2: memref<32x32xbf16, #tpu.memory_space<vmem>>, %arg3: memref<32x1xf32, #tpu.memory_space<vmem>>, %arg4: memref<32x128xbf16, #tpu.memory_space<vmem>>) attributes {dimension_semantics = [#tpu.dimension_semantics<arbitrary>], iteration_bounds = array<i64: 1>, scalar_prefetch = 0 : i64, scratch_operands = 0 : i64, tpu.core_type = #tpu.core_type<tc>, window_params = [{transform_indices = @transform_0, window_bounds = array<i64: 32, 128>}, {pipeline_mode = #tpu.pipeline_mode<synchronous>, transform_indices = @transform_1, window_bounds = array<i64: 32, 32>}, {pipeline_mode = #tpu.pipeline_mode<synchronous>, transform_indices = @transform_2, window_bounds = array<i64: 32, 1>}, {transform_indices = @transform_3, window_bounds = array<i64: 32, 128>}]} {
    %c0 = arith.constant 0 : index
    %c0_0 = arith.constant 0 : index
    %0 = vector.load %arg2[%c0, %c0_0] : memref<32x32xbf16, #tpu.memory_space<vmem>>, vector<32x32xbf16>
    %c0_1 = arith.constant 0 : index
    %c0_2 = arith.constant 0 : index
    %1 = vector.load %arg1[%c0_1, %c0_2] : memref<32x128xbf16, #tpu.memory_space<vmem>>, vector<32x128xbf16>
    %cst = arith.constant dense<0.000000e+00> : vector<32x128xf32>
    %2 = tpu.matmul %0, %1, %cst {dimension_numbers = #tpu.dot_dimension_numbers<[1], [0], [0], [1], [0, 0, 1, 1], [], []>} : vector<32x32xbf16>, vector<32x128xbf16>, vector<32x128xf32> -> vector<32x128xf32>
    %c0_3 = arith.constant 0 : index
    %c0_4 = arith.constant 0 : index
    %3 = vector.load %arg3[%c0_3, %c0_4] : memref<32x1xf32, #tpu.memory_space<vmem>>, vector<32x1xf32>
    %4 = vector.broadcast %3 : vector<32x1xf32> to vector<32x128xf32>
    %5 = arith.addf %2, %4 : vector<32x128xf32>
    %6 = arith.truncf %5 : vector<32x128xf32> to vector<32x128xbf16>
    %c0_5 = arith.constant 0 : index
    %c0_6 = arith.constant 0 : index
    %7 = vector.load %arg4[%c0_5, %c0_6] : memref<32x128xbf16, #tpu.memory_space<vmem>>, vector<32x128xbf16>
    tpu.vector_store %arg4[%c0_5, %c0_6], %6 {strides = array<i32>} : memref<32x128xbf16, #tpu.memory_space<vmem>>, vector<32x128xbf16>,
    return
  }
  func.func @transform_0(%arg0: i32) -> (i32, i32) {
    %c0_i32 = arith.constant 0 : i32
    %c0_i32_0 = arith.constant 0 : i32
    return %c0_i32, %arg0 : i32, i32
  }
  func.func @transform_1(%arg0: i32) -> (i32, i32) {
    %c0_i32 = arith.constant 0 : i32
    %c0_i32_0 = arith.constant 0 : i32
    %c0_i32_1 = arith.constant 0 : i32
    return %c0_i32, %c0_i32_0 : i32, i32
  }
  func.func @transform_2(%arg0: i32) -> (i32, i32) {
    %c0_i32 = arith.constant 0 : i32
    %c0_i32_0 = arith.constant 0 : i32
    %c0_i32_1 = arith.constant 0 : i32
    return %c0_i32, %c0_i32_0 : i32, i32
  }
  func.func @transform_3(%arg0: i32) -> (i32, i32) {
    %c0_i32 = arith.constant 0 : i32
    %c0_i32_0 = arith.constant 0 : i32
    return %c0_i32, %arg0 : i32, i32
  }
}

module attributes {stable_mosaic.version = 11 : i64} {
  func.func @_concat_conv_conv_bn_kernel(%arg0: i32, %arg1: memref<72x512xbf16, #tpu.memory_space<vmem>>, %arg2: memref<36x512xbf16, #tpu.memory_space<vmem>>, %arg3: memref<8x72xbf16, #tpu.memory_space<vmem>>, %arg4: memref<8x36xbf16, #tpu.memory_space<vmem>>, %arg5: memref<8x8xbf16, #tpu.memory_space<vmem>>, %arg6: memref<8x512xbf16, #tpu.memory_space<vmem>>) attributes {dimension_semantics = [#tpu.dimension_semantics<arbitrary>], iteration_bounds = array<i64: 1>, scalar_prefetch = 0 : i64, scratch_operands = 0 : i64, tpu.core_type = #tpu.core_type<tc>, window_params = [{pipeline_mode = #tpu.pipeline_mode<synchronous>, transform_indices = @transform_0, window_bounds = array<i64: 72, 512>}, {pipeline_mode = #tpu.pipeline_mode<synchronous>, transform_indices = @transform_1, window_bounds = array<i64: 36, 512>}, {pipeline_mode = #tpu.pipeline_mode<synchronous>, transform_indices = @transform_2, window_bounds = array<i64: 8, 72>}, {pipeline_mode = #tpu.pipeline_mode<synchronous>, transform_indices = @transform_3, window_bounds = array<i64: 8, 36>}, {pipeline_mode = #tpu.pipeline_mode<synchronous>, transform_indices = @transform_4, window_bounds = array<i64: 8, 8>}, {pipeline_mode = #tpu.pipeline_mode<synchronous>, transform_indices = @transform_5, window_bounds = array<i64: 8, 512>}]} {
    %c0 = arith.constant 0 : index
    %c0_0 = arith.constant 0 : index
    %0 = vector.load %arg3[%c0, %c0_0] : memref<8x72xbf16, #tpu.memory_space<vmem>>, vector<8x72xbf16>
    %c0_1 = arith.constant 0 : index
    %c0_2 = arith.constant 0 : index
    %1 = vector.load %arg1[%c0_1, %c0_2] : memref<72x512xbf16, #tpu.memory_space<vmem>>, vector<72x512xbf16>
    %cst = arith.constant dense<0.000000e+00> : vector<8x512xf32>
    %2 = tpu.matmul %0, %1, %cst {dimension_numbers = #tpu.dot_dimension_numbers<[1], [0], [0], [1], [0, 0, 1, 1], [], []>} : vector<8x72xbf16>, vector<72x512xbf16>, vector<8x512xf32> -> vector<8x512xf32>
    %c0_3 = arith.constant 0 : index
    %c0_4 = arith.constant 0 : index
    %3 = vector.load %arg4[%c0_3, %c0_4] : memref<8x36xbf16, #tpu.memory_space<vmem>>, vector<8x36xbf16>
    %c0_5 = arith.constant 0 : index
    %c0_6 = arith.constant 0 : index
    %4 = vector.load %arg2[%c0_5, %c0_6] : memref<36x512xbf16, #tpu.memory_space<vmem>>, vector<36x512xbf16>
    %cst_7 = arith.constant dense<0.000000e+00> : vector<8x512xf32>
    %5 = tpu.matmul %3, %4, %cst_7 {dimension_numbers = #tpu.dot_dimension_numbers<[1], [0], [0], [1], [0, 0, 1, 1], [], []>} : vector<8x36xbf16>, vector<36x512xbf16>, vector<8x512xf32> -> vector<8x512xf32>
    %6 = arith.addf %2, %5 : vector<8x512xf32>
    %cst_8 = arith.constant dense<0.000000e+00> : vector<8xf32>
    %7 = vector.multi_reduction <add>, %6, %cst_8 [1] : vector<8x512xf32> to vector<8xf32>
    %8 = vector.shape_cast %7 : vector<8xf32> to vector<8x1xf32>
    %cst_9 = arith.constant 5.120000e+02 : f32
    %9 = vector.broadcast %cst_9 : f32 to vector<8x1xf32>
    %10 = arith.divf %8, %9 : vector<8x1xf32>
    %11 = vector.broadcast %10 : vector<8x1xf32> to vector<8x512xf32>
    %12 = arith.subf %6, %11 : vector<8x512xf32>
    %13 = vector.broadcast %10 : vector<8x1xf32> to vector<8x512xf32>
    %14 = arith.subf %6, %13 : vector<8x512xf32>
    %15 = arith.mulf %12, %14 : vector<8x512xf32>
    %cst_10 = arith.constant dense<0.000000e+00> : vector<8xf32>
    %16 = vector.multi_reduction <add>, %15, %cst_10 [1] : vector<8x512xf32> to vector<8xf32>
    %17 = vector.shape_cast %16 : vector<8xf32> to vector<8x1xf32>
    %cst_11 = arith.constant 5.120000e+02 : f32
    %18 = vector.broadcast %cst_11 : f32 to vector<8x1xf32>
    %19 = arith.divf %17, %18 : vector<8x1xf32>
    %20 = vector.broadcast %10 : vector<8x1xf32> to vector<8x512xf32>
    %21 = arith.subf %6, %20 : vector<8x512xf32>
    %cst_12 = arith.constant 9.99999974E-6 : f32
    %22 = vector.broadcast %cst_12 : f32 to vector<8x1xf32>
    %23 = arith.addf %19, %22 : vector<8x1xf32>
    %24 = math.rsqrt %23 : vector<8x1xf32>
    %25 = vector.broadcast %24 : vector<8x1xf32> to vector<8x512xf32>
    %26 = arith.mulf %21, %25 : vector<8x512xf32>
    %cst_13 = arith.constant 0.000000e+00 : f32
    %27 = vector.broadcast %cst_13 : f32 to vector<8x512xf32>
    %28 = arith.cmpf oge, %26, %27 : vector<8x512xf32>
    %cst_14 = arith.constant 2.000000e-01 : f32
    %29 = vector.broadcast %cst_14 : f32 to vector<8x512xf32>
    %30 = arith.mulf %29, %26 : vector<8x512xf32>
    %31 = arith.select %28, %26, %30 : vector<8x512xi1>, vector<8x512xf32>
    %c0_15 = arith.constant 0 : index
    %c0_16 = arith.constant 0 : index
    %32 = vector.load %arg5[%c0_15, %c0_16] : memref<8x8xbf16, #tpu.memory_space<vmem>>, vector<8x8xbf16>
    %33 = arith.truncf %31 : vector<8x512xf32> to vector<8x512xbf16>
    %cst_17 = arith.constant dense<0.000000e+00> : vector<8x512xf32>
    %34 = tpu.matmul %32, %33, %cst_17 {dimension_numbers = #tpu.dot_dimension_numbers<[1], [0], [0], [1], [0, 0, 1, 1], [], []>} : vector<8x8xbf16>, vector<8x512xbf16>, vector<8x512xf32> -> vector<8x512xf32>
    %cst_18 = arith.constant dense<0.000000e+00> : vector<8xf32>
    %35 = vector.multi_reduction <add>, %34, %cst_18 [1] : vector<8x512xf32> to vector<8xf32>
    %36 = vector.shape_cast %35 : vector<8xf32> to vector<8x1xf32>
    %cst_19 = arith.constant 5.120000e+02 : f32
    %37 = vector.broadcast %cst_19 : f32 to vector<8x1xf32>
    %38 = arith.divf %36, %37 : vector<8x1xf32>
    %39 = vector.broadcast %38 : vector<8x1xf32> to vector<8x512xf32>
    %40 = arith.subf %34, %39 : vector<8x512xf32>
    %41 = vector.broadcast %38 : vector<8x1xf32> to vector<8x512xf32>
    %42 = arith.subf %34, %41 : vector<8x512xf32>
    %43 = arith.mulf %40, %42 : vector<8x512xf32>
    %cst_20 = arith.constant dense<0.000000e+00> : vector<8xf32>
    %44 = vector.multi_reduction <add>, %43, %cst_20 [1] : vector<8x512xf32> to vector<8xf32>
    %45 = vector.shape_cast %44 : vector<8xf32> to vector<8x1xf32>
    %cst_21 = arith.constant 5.120000e+02 : f32
    %46 = vector.broadcast %cst_21 : f32 to vector<8x1xf32>
    %47 = arith.divf %45, %46 : vector<8x1xf32>
    %48 = vector.broadcast %38 : vector<8x1xf32> to vector<8x512xf32>
    %49 = arith.subf %34, %48 : vector<8x512xf32>
    %cst_22 = arith.constant 9.99999974E-6 : f32
    %50 = vector.broadcast %cst_22 : f32 to vector<8x1xf32>
    %51 = arith.addf %47, %50 : vector<8x1xf32>
    %52 = math.rsqrt %51 : vector<8x1xf32>
    %53 = vector.broadcast %52 : vector<8x1xf32> to vector<8x512xf32>
    %54 = arith.mulf %49, %53 : vector<8x512xf32>
    %cst_23 = arith.constant 0.000000e+00 : f32
    %55 = vector.broadcast %cst_23 : f32 to vector<8x512xf32>
    %56 = arith.cmpf oge, %54, %55 : vector<8x512xf32>
    %cst_24 = arith.constant 2.000000e-01 : f32
    %57 = vector.broadcast %cst_24 : f32 to vector<8x512xf32>
    %58 = arith.mulf %57, %54 : vector<8x512xf32>
    %59 = arith.select %56, %54, %58 : vector<8x512xi1>, vector<8x512xf32>
    %60 = arith.truncf %59 : vector<8x512xf32> to vector<8x512xbf16>
    %c0_25 = arith.constant 0 : index
    %c0_26 = arith.constant 0 : index
    %61 = vector.load %arg6[%c0_25, %c0_26] : memref<8x512xbf16, #tpu.memory_space<vmem>>, vector<8x512xbf16>
    tpu.vector_store %arg6[%c0_25, %c0_26], %60 {strides = array<i32>} : memref<8x512xbf16, #tpu.memory_space<vmem>>, vector<8x512xbf16>,
    return
  }
  func.func @transform_0(%arg0: i32) -> (i32, i32) {
    %c0_i32 = arith.constant 0 : i32
    %c0_i32_0 = arith.constant 0 : i32
    %c0_i32_1 = arith.constant 0 : i32
    return %c0_i32, %c0_i32_0 : i32, i32
  }
  func.func @transform_1(%arg0: i32) -> (i32, i32) {
    %c0_i32 = arith.constant 0 : i32
    %c0_i32_0 = arith.constant 0 : i32
    %c0_i32_1 = arith.constant 0 : i32
    return %c0_i32, %c0_i32_0 : i32, i32
  }
  func.func @transform_2(%arg0: i32) -> (i32, i32) {
    %c0_i32 = arith.constant 0 : i32
    %c0_i32_0 = arith.constant 0 : i32
    %c0_i32_1 = arith.constant 0 : i32
    return %c0_i32, %c0_i32_0 : i32, i32
  }
  func.func @transform_3(%arg0: i32) -> (i32, i32) {
    %c0_i32 = arith.constant 0 : i32
    %c0_i32_0 = arith.constant 0 : i32
    %c0_i32_1 = arith.constant 0 : i32
    return %c0_i32, %c0_i32_0 : i32, i32
  }
  func.func @transform_4(%arg0: i32) -> (i32, i32) {
    %c0_i32 = arith.constant 0 : i32
    %c0_i32_0 = arith.constant 0 : i32
    %c0_i32_1 = arith.constant 0 : i32
    return %c0_i32, %c0_i32_0 : i32, i32
  }
  func.func @transform_5(%arg0: i32) -> (i32, i32) {
    %c0_i32 = arith.constant 0 : i32
    %c0_i32_0 = arith.constant 0 : i32
    %c0_i32_1 = arith.constant 0 : i32
    return %c0_i32, %c0_i32_0 : i32, i32
  }
}

module attributes {stable_mosaic.version = 11 : i64} {
  func.func @_conv_epi_kernel(%arg0: i32, %arg1: memref<32x512xbf16, #tpu.memory_space<vmem>>, %arg2: memref<32x32xbf16, #tpu.memory_space<vmem>>, %arg3: memref<32x1xf32, #tpu.memory_space<vmem>>, %arg4: memref<32x512xbf16, #tpu.memory_space<vmem>>) attributes {dimension_semantics = [#tpu.dimension_semantics<arbitrary>], iteration_bounds = array<i64: 1>, scalar_prefetch = 0 : i64, scratch_operands = 0 : i64, tpu.core_type = #tpu.core_type<tc>, window_params = [{transform_indices = @transform_0, window_bounds = array<i64: 32, 512>}, {pipeline_mode = #tpu.pipeline_mode<synchronous>, transform_indices = @transform_1, window_bounds = array<i64: 32, 32>}, {pipeline_mode = #tpu.pipeline_mode<synchronous>, transform_indices = @transform_2, window_bounds = array<i64: 32, 1>}, {transform_indices = @transform_3, window_bounds = array<i64: 32, 512>}]} {
    %c0 = arith.constant 0 : index
    %c0_0 = arith.constant 0 : index
    %0 = vector.load %arg2[%c0, %c0_0] : memref<32x32xbf16, #tpu.memory_space<vmem>>, vector<32x32xbf16>
    %c0_1 = arith.constant 0 : index
    %c0_2 = arith.constant 0 : index
    %1 = vector.load %arg1[%c0_1, %c0_2] : memref<32x512xbf16, #tpu.memory_space<vmem>>, vector<32x512xbf16>
    %cst = arith.constant dense<0.000000e+00> : vector<32x512xf32>
    %2 = tpu.matmul %0, %1, %cst {dimension_numbers = #tpu.dot_dimension_numbers<[1], [0], [0], [1], [0, 0, 1, 1], [], []>} : vector<32x32xbf16>, vector<32x512xbf16>, vector<32x512xf32> -> vector<32x512xf32>
    %c0_3 = arith.constant 0 : index
    %c0_4 = arith.constant 0 : index
    %3 = vector.load %arg3[%c0_3, %c0_4] : memref<32x1xf32, #tpu.memory_space<vmem>>, vector<32x1xf32>
    %4 = vector.broadcast %3 : vector<32x1xf32> to vector<32x512xf32>
    %5 = arith.addf %2, %4 : vector<32x512xf32>
    %6 = arith.truncf %5 : vector<32x512xf32> to vector<32x512xbf16>
    %c0_5 = arith.constant 0 : index
    %c0_6 = arith.constant 0 : index
    %7 = vector.load %arg4[%c0_5, %c0_6] : memref<32x512xbf16, #tpu.memory_space<vmem>>, vector<32x512xbf16>
    tpu.vector_store %arg4[%c0_5, %c0_6], %6 {strides = array<i32>} : memref<32x512xbf16, #tpu.memory_space<vmem>>, vector<32x512xbf16>,
    return
  }
  func.func @transform_0(%arg0: i32) -> (i32, i32) {
    %c0_i32 = arith.constant 0 : i32
    %c0_i32_0 = arith.constant 0 : i32
    return %c0_i32, %arg0 : i32, i32
  }
  func.func @transform_1(%arg0: i32) -> (i32, i32) {
    %c0_i32 = arith.constant 0 : i32
    %c0_i32_0 = arith.constant 0 : i32
    %c0_i32_1 = arith.constant 0 : i32
    return %c0_i32, %c0_i32_0 : i32, i32
  }
  func.func @transform_2(%arg0: i32) -> (i32, i32) {
    %c0_i32 = arith.constant 0 : i32
    %c0_i32_0 = arith.constant 0 : i32
    %c0_i32_1 = arith.constant 0 : i32
    return %c0_i32, %c0_i32_0 : i32, i32
  }
  func.func @transform_3(%arg0: i32) -> (i32, i32) {
    %c0_i32 = arith.constant 0 : i32
    %c0_i32_0 = arith.constant 0 : i32
    return %c0_i32, %arg0 : i32, i32
  }
}

module attributes {stable_mosaic.version = 11 : i64} {
  func.func @_conv_bn_kernel(%arg0: i32, %arg1: memref<72x2048xbf16, #tpu.memory_space<vmem>>, %arg2: memref<8x72xbf16, #tpu.memory_space<vmem>>, %arg3: memref<8x2048xbf16, #tpu.memory_space<vmem>>) attributes {dimension_semantics = [#tpu.dimension_semantics<arbitrary>], iteration_bounds = array<i64: 1>, scalar_prefetch = 0 : i64, scratch_operands = 0 : i64, tpu.core_type = #tpu.core_type<tc>, window_params = [{transform_indices = @transform_0, window_bounds = array<i64: 72, 2048>}, {pipeline_mode = #tpu.pipeline_mode<synchronous>, transform_indices = @transform_1, window_bounds = array<i64: 8, 72>}, {pipeline_mode = #tpu.pipeline_mode<synchronous>, transform_indices = @transform_2, window_bounds = array<i64: 8, 2048>}]} {
    %c0 = arith.constant 0 : index
    %c0_0 = arith.constant 0 : index
    %0 = vector.load %arg2[%c0, %c0_0] : memref<8x72xbf16, #tpu.memory_space<vmem>>, vector<8x72xbf16>
    %c0_1 = arith.constant 0 : index
    %c0_2 = arith.constant 0 : index
    %1 = vector.load %arg1[%c0_1, %c0_2] : memref<72x2048xbf16, #tpu.memory_space<vmem>>, vector<72x2048xbf16>
    %cst = arith.constant dense<0.000000e+00> : vector<8x2048xf32>
    %2 = tpu.matmul %0, %1, %cst {dimension_numbers = #tpu.dot_dimension_numbers<[1], [0], [0], [1], [0, 0, 1, 1], [], []>} : vector<8x72xbf16>, vector<72x2048xbf16>, vector<8x2048xf32> -> vector<8x2048xf32>
    %cst_3 = arith.constant dense<0.000000e+00> : vector<8xf32>
    %3 = vector.multi_reduction <add>, %2, %cst_3 [1] : vector<8x2048xf32> to vector<8xf32>
    %4 = vector.shape_cast %3 : vector<8xf32> to vector<8x1xf32>
    %cst_4 = arith.constant 2.048000e+03 : f32
    %5 = vector.broadcast %cst_4 : f32 to vector<8x1xf32>
    %6 = arith.divf %4, %5 : vector<8x1xf32>
    %7 = vector.broadcast %6 : vector<8x1xf32> to vector<8x2048xf32>
    %8 = arith.subf %2, %7 : vector<8x2048xf32>
    %9 = vector.broadcast %6 : vector<8x1xf32> to vector<8x2048xf32>
    %10 = arith.subf %2, %9 : vector<8x2048xf32>
    %11 = arith.mulf %8, %10 : vector<8x2048xf32>
    %cst_5 = arith.constant dense<0.000000e+00> : vector<8xf32>
    %12 = vector.multi_reduction <add>, %11, %cst_5 [1] : vector<8x2048xf32> to vector<8xf32>
    %13 = vector.shape_cast %12 : vector<8xf32> to vector<8x1xf32>
    %cst_6 = arith.constant 2.048000e+03 : f32
    %14 = vector.broadcast %cst_6 : f32 to vector<8x1xf32>
    %15 = arith.divf %13, %14 : vector<8x1xf32>
    %16 = vector.broadcast %6 : vector<8x1xf32> to vector<8x2048xf32>
    %17 = arith.subf %2, %16 : vector<8x2048xf32>
    %cst_7 = arith.constant 9.99999974E-6 : f32
    %18 = vector.broadcast %cst_7 : f32 to vector<8x1xf32>
    %19 = arith.addf %15, %18 : vector<8x1xf32>
    %20 = math.rsqrt %19 : vector<8x1xf32>
    %21 = vector.broadcast %20 : vector<8x1xf32> to vector<8x2048xf32>
    %22 = arith.mulf %17, %21 : vector<8x2048xf32>
    %cst_8 = arith.constant 0.000000e+00 : f32
    %23 = vector.broadcast %cst_8 : f32 to vector<8x2048xf32>
    %24 = arith.cmpf oge, %22, %23 : vector<8x2048xf32>
    %cst_9 = arith.constant 2.000000e-01 : f32
    %25 = vector.broadcast %cst_9 : f32 to vector<8x2048xf32>
    %26 = arith.mulf %25, %22 : vector<8x2048xf32>
    %27 = arith.select %24, %22, %26 : vector<8x2048xi1>, vector<8x2048xf32>
    %28 = arith.truncf %27 : vector<8x2048xf32> to vector<8x2048xbf16>
    %c0_10 = arith.constant 0 : index
    %c0_11 = arith.constant 0 : index
    %29 = vector.load %arg3[%c0_10, %c0_11] : memref<8x2048xbf16, #tpu.memory_space<vmem>>, vector<8x2048xbf16>
    tpu.vector_store %arg3[%c0_10, %c0_11], %28 {strides = array<i32>} : memref<8x2048xbf16, #tpu.memory_space<vmem>>, vector<8x2048xbf16>,
    return
  }
  func.func @transform_0(%arg0: i32) -> (i32, i32) {
    %c0_i32 = arith.constant 0 : i32
    %c0_i32_0 = arith.constant 0 : i32
    return %c0_i32, %arg0 : i32, i32
  }
  func.func @transform_1(%arg0: i32) -> (i32, i32) {
    %c0_i32 = arith.constant 0 : i32
    %c0_i32_0 = arith.constant 0 : i32
    %c0_i32_1 = arith.constant 0 : i32
    return %c0_i32, %c0_i32_0 : i32, i32
  }
  func.func @transform_2(%arg0: i32) -> (i32, i32) {
    %c0_i32 = arith.constant 0 : i32
    %c0_i32_0 = arith.constant 0 : i32
    %c0_i32_1 = arith.constant 0 : i32
    return %c0_i32, %c0_i32_0 : i32, i32
  }
}

module attributes {stable_mosaic.version = 11 : i64} {
  func.func @_concat_conv_conv_bn_kernel(%arg0: i32, %arg1: memref<72x2048xbf16, #tpu.memory_space<vmem>>, %arg2: memref<36x2048xbf16, #tpu.memory_space<vmem>>, %arg3: memref<8x72xbf16, #tpu.memory_space<vmem>>, %arg4: memref<8x36xbf16, #tpu.memory_space<vmem>>, %arg5: memref<8x8xbf16, #tpu.memory_space<vmem>>, %arg6: memref<8x2048xbf16, #tpu.memory_space<vmem>>) attributes {dimension_semantics = [#tpu.dimension_semantics<arbitrary>], iteration_bounds = array<i64: 1>, scalar_prefetch = 0 : i64, scratch_operands = 0 : i64, tpu.core_type = #tpu.core_type<tc>, window_params = [{pipeline_mode = #tpu.pipeline_mode<synchronous>, transform_indices = @transform_0, window_bounds = array<i64: 72, 2048>}, {pipeline_mode = #tpu.pipeline_mode<synchronous>, transform_indices = @transform_1, window_bounds = array<i64: 36, 2048>}, {pipeline_mode = #tpu.pipeline_mode<synchronous>, transform_indices = @transform_2, window_bounds = array<i64: 8, 72>}, {pipeline_mode = #tpu.pipeline_mode<synchronous>, transform_indices = @transform_3, window_bounds = array<i64: 8, 36>}, {pipeline_mode = #tpu.pipeline_mode<synchronous>, transform_indices = @transform_4, window_bounds = array<i64: 8, 8>}, {pipeline_mode = #tpu.pipeline_mode<synchronous>, transform_indices = @transform_5, window_bounds = array<i64: 8, 2048>}]} {
    %c0 = arith.constant 0 : index
    %c0_0 = arith.constant 0 : index
    %0 = vector.load %arg3[%c0, %c0_0] : memref<8x72xbf16, #tpu.memory_space<vmem>>, vector<8x72xbf16>
    %c0_1 = arith.constant 0 : index
    %c0_2 = arith.constant 0 : index
    %1 = vector.load %arg1[%c0_1, %c0_2] : memref<72x2048xbf16, #tpu.memory_space<vmem>>, vector<72x2048xbf16>
    %cst = arith.constant dense<0.000000e+00> : vector<8x2048xf32>
    %2 = tpu.matmul %0, %1, %cst {dimension_numbers = #tpu.dot_dimension_numbers<[1], [0], [0], [1], [0, 0, 1, 1], [], []>} : vector<8x72xbf16>, vector<72x2048xbf16>, vector<8x2048xf32> -> vector<8x2048xf32>
    %c0_3 = arith.constant 0 : index
    %c0_4 = arith.constant 0 : index
    %3 = vector.load %arg4[%c0_3, %c0_4] : memref<8x36xbf16, #tpu.memory_space<vmem>>, vector<8x36xbf16>
    %c0_5 = arith.constant 0 : index
    %c0_6 = arith.constant 0 : index
    %4 = vector.load %arg2[%c0_5, %c0_6] : memref<36x2048xbf16, #tpu.memory_space<vmem>>, vector<36x2048xbf16>
    %cst_7 = arith.constant dense<0.000000e+00> : vector<8x2048xf32>
    %5 = tpu.matmul %3, %4, %cst_7 {dimension_numbers = #tpu.dot_dimension_numbers<[1], [0], [0], [1], [0, 0, 1, 1], [], []>} : vector<8x36xbf16>, vector<36x2048xbf16>, vector<8x2048xf32> -> vector<8x2048xf32>
    %6 = arith.addf %2, %5 : vector<8x2048xf32>
    %cst_8 = arith.constant dense<0.000000e+00> : vector<8xf32>
    %7 = vector.multi_reduction <add>, %6, %cst_8 [1] : vector<8x2048xf32> to vector<8xf32>
    %8 = vector.shape_cast %7 : vector<8xf32> to vector<8x1xf32>
    %cst_9 = arith.constant 2.048000e+03 : f32
    %9 = vector.broadcast %cst_9 : f32 to vector<8x1xf32>
    %10 = arith.divf %8, %9 : vector<8x1xf32>
    %11 = vector.broadcast %10 : vector<8x1xf32> to vector<8x2048xf32>
    %12 = arith.subf %6, %11 : vector<8x2048xf32>
    %13 = vector.broadcast %10 : vector<8x1xf32> to vector<8x2048xf32>
    %14 = arith.subf %6, %13 : vector<8x2048xf32>
    %15 = arith.mulf %12, %14 : vector<8x2048xf32>
    %cst_10 = arith.constant dense<0.000000e+00> : vector<8xf32>
    %16 = vector.multi_reduction <add>, %15, %cst_10 [1] : vector<8x2048xf32> to vector<8xf32>
    %17 = vector.shape_cast %16 : vector<8xf32> to vector<8x1xf32>
    %cst_11 = arith.constant 2.048000e+03 : f32
    %18 = vector.broadcast %cst_11 : f32 to vector<8x1xf32>
    %19 = arith.divf %17, %18 : vector<8x1xf32>
    %20 = vector.broadcast %10 : vector<8x1xf32> to vector<8x2048xf32>
    %21 = arith.subf %6, %20 : vector<8x2048xf32>
    %cst_12 = arith.constant 9.99999974E-6 : f32
    %22 = vector.broadcast %cst_12 : f32 to vector<8x1xf32>
    %23 = arith.addf %19, %22 : vector<8x1xf32>
    %24 = math.rsqrt %23 : vector<8x1xf32>
    %25 = vector.broadcast %24 : vector<8x1xf32> to vector<8x2048xf32>
    %26 = arith.mulf %21, %25 : vector<8x2048xf32>
    %cst_13 = arith.constant 0.000000e+00 : f32
    %27 = vector.broadcast %cst_13 : f32 to vector<8x2048xf32>
    %28 = arith.cmpf oge, %26, %27 : vector<8x2048xf32>
    %cst_14 = arith.constant 2.000000e-01 : f32
    %29 = vector.broadcast %cst_14 : f32 to vector<8x2048xf32>
    %30 = arith.mulf %29, %26 : vector<8x2048xf32>
    %31 = arith.select %28, %26, %30 : vector<8x2048xi1>, vector<8x2048xf32>
    %c0_15 = arith.constant 0 : index
    %c0_16 = arith.constant 0 : index
    %32 = vector.load %arg5[%c0_15, %c0_16] : memref<8x8xbf16, #tpu.memory_space<vmem>>, vector<8x8xbf16>
    %33 = arith.truncf %31 : vector<8x2048xf32> to vector<8x2048xbf16>
    %cst_17 = arith.constant dense<0.000000e+00> : vector<8x2048xf32>
    %34 = tpu.matmul %32, %33, %cst_17 {dimension_numbers = #tpu.dot_dimension_numbers<[1], [0], [0], [1], [0, 0, 1, 1], [], []>} : vector<8x8xbf16>, vector<8x2048xbf16>, vector<8x2048xf32> -> vector<8x2048xf32>
    %cst_18 = arith.constant dense<0.000000e+00> : vector<8xf32>
    %35 = vector.multi_reduction <add>, %34, %cst_18 [1] : vector<8x2048xf32> to vector<8xf32>
    %36 = vector.shape_cast %35 : vector<8xf32> to vector<8x1xf32>
    %cst_19 = arith.constant 2.048000e+03 : f32
    %37 = vector.broadcast %cst_19 : f32 to vector<8x1xf32>
    %38 = arith.divf %36, %37 : vector<8x1xf32>
    %39 = vector.broadcast %38 : vector<8x1xf32> to vector<8x2048xf32>
    %40 = arith.subf %34, %39 : vector<8x2048xf32>
    %41 = vector.broadcast %38 : vector<8x1xf32> to vector<8x2048xf32>
    %42 = arith.subf %34, %41 : vector<8x2048xf32>
    %43 = arith.mulf %40, %42 : vector<8x2048xf32>
    %cst_20 = arith.constant dense<0.000000e+00> : vector<8xf32>
    %44 = vector.multi_reduction <add>, %43, %cst_20 [1] : vector<8x2048xf32> to vector<8xf32>
    %45 = vector.shape_cast %44 : vector<8xf32> to vector<8x1xf32>
    %cst_21 = arith.constant 2.048000e+03 : f32
    %46 = vector.broadcast %cst_21 : f32 to vector<8x1xf32>
    %47 = arith.divf %45, %46 : vector<8x1xf32>
    %48 = vector.broadcast %38 : vector<8x1xf32> to vector<8x2048xf32>
    %49 = arith.subf %34, %48 : vector<8x2048xf32>
    %cst_22 = arith.constant 9.99999974E-6 : f32
    %50 = vector.broadcast %cst_22 : f32 to vector<8x1xf32>
    %51 = arith.addf %47, %50 : vector<8x1xf32>
    %52 = math.rsqrt %51 : vector<8x1xf32>
    %53 = vector.broadcast %52 : vector<8x1xf32> to vector<8x2048xf32>
    %54 = arith.mulf %49, %53 : vector<8x2048xf32>
    %cst_23 = arith.constant 0.000000e+00 : f32
    %55 = vector.broadcast %cst_23 : f32 to vector<8x2048xf32>
    %56 = arith.cmpf oge, %54, %55 : vector<8x2048xf32>
    %cst_24 = arith.constant 2.000000e-01 : f32
    %57 = vector.broadcast %cst_24 : f32 to vector<8x2048xf32>
    %58 = arith.mulf %57, %54 : vector<8x2048xf32>
    %59 = arith.select %56, %54, %58 : vector<8x2048xi1>, vector<8x2048xf32>
    %60 = arith.truncf %59 : vector<8x2048xf32> to vector<8x2048xbf16>
    %c0_25 = arith.constant 0 : index
    %c0_26 = arith.constant 0 : index
    %61 = vector.load %arg6[%c0_25, %c0_26] : memref<8x2048xbf16, #tpu.memory_space<vmem>>, vector<8x2048xbf16>
    tpu.vector_store %arg6[%c0_25, %c0_26], %60 {strides = array<i32>} : memref<8x2048xbf16, #tpu.memory_space<vmem>>, vector<8x2048xbf16>,
    return
  }
  func.func @transform_0(%arg0: i32) -> (i32, i32) {
    %c0_i32 = arith.constant 0 : i32
    %c0_i32_0 = arith.constant 0 : i32
    %c0_i32_1 = arith.constant 0 : i32
    return %c0_i32, %c0_i32_0 : i32, i32
  }
  func.func @transform_1(%arg0: i32) -> (i32, i32) {
    %c0_i32 = arith.constant 0 : i32
    %c0_i32_0 = arith.constant 0 : i32
    %c0_i32_1 = arith.constant 0 : i32
    return %c0_i32, %c0_i32_0 : i32, i32
  }
  func.func @transform_2(%arg0: i32) -> (i32, i32) {
    %c0_i32 = arith.constant 0 : i32
    %c0_i32_0 = arith.constant 0 : i32
    %c0_i32_1 = arith.constant 0 : i32
    return %c0_i32, %c0_i32_0 : i32, i32
  }
  func.func @transform_3(%arg0: i32) -> (i32, i32) {
    %c0_i32 = arith.constant 0 : i32
    %c0_i32_0 = arith.constant 0 : i32
    %c0_i32_1 = arith.constant 0 : i32
    return %c0_i32, %c0_i32_0 : i32, i32
  }
  func.func @transform_4(%arg0: i32) -> (i32, i32) {
    %c0_i32 = arith.constant 0 : i32
    %c0_i32_0 = arith.constant 0 : i32
    %c0_i32_1 = arith.constant 0 : i32
    return %c0_i32, %c0_i32_0 : i32, i32
  }
  func.func @transform_5(%arg0: i32) -> (i32, i32) {
    %c0_i32 = arith.constant 0 : i32
    %c0_i32_0 = arith.constant 0 : i32
    %c0_i32_1 = arith.constant 0 : i32
    return %c0_i32, %c0_i32_0 : i32, i32
  }
}

module attributes {stable_mosaic.version = 11 : i64} {
  func.func @_conv_epi_kernel(%arg0: i32, %arg1: memref<4x2048xbf16, #tpu.memory_space<vmem>>, %arg2: memref<8x4xbf16, #tpu.memory_space<vmem>>, %arg3: memref<8x1xf32, #tpu.memory_space<vmem>>, %arg4: memref<8x2048xf32, #tpu.memory_space<vmem>>) attributes {dimension_semantics = [#tpu.dimension_semantics<arbitrary>], iteration_bounds = array<i64: 1>, scalar_prefetch = 0 : i64, scratch_operands = 0 : i64, tpu.core_type = #tpu.core_type<tc>, window_params = [{transform_indices = @transform_0, window_bounds = array<i64: 4, 2048>}, {pipeline_mode = #tpu.pipeline_mode<synchronous>, transform_indices = @transform_1, window_bounds = array<i64: 8, 4>}, {pipeline_mode = #tpu.pipeline_mode<synchronous>, transform_indices = @transform_2, window_bounds = array<i64: 8, 1>}, {transform_indices = @transform_3, window_bounds = array<i64: 8, 2048>}]} {
    %c0 = arith.constant 0 : index
    %c0_0 = arith.constant 0 : index
    %0 = vector.load %arg2[%c0, %c0_0] : memref<8x4xbf16, #tpu.memory_space<vmem>>, vector<8x4xbf16>
    %c0_1 = arith.constant 0 : index
    %c0_2 = arith.constant 0 : index
    %1 = vector.load %arg1[%c0_1, %c0_2] : memref<4x2048xbf16, #tpu.memory_space<vmem>>, vector<4x2048xbf16>
    %cst = arith.constant dense<0.000000e+00> : vector<8x2048xf32>
    %2 = tpu.matmul %0, %1, %cst {dimension_numbers = #tpu.dot_dimension_numbers<[1], [0], [0], [1], [0, 0, 1, 1], [], []>} : vector<8x4xbf16>, vector<4x2048xbf16>, vector<8x2048xf32> -> vector<8x2048xf32>
    %c0_3 = arith.constant 0 : index
    %c0_4 = arith.constant 0 : index
    %3 = vector.load %arg3[%c0_3, %c0_4] : memref<8x1xf32, #tpu.memory_space<vmem>>, vector<8x1xf32>
    %4 = vector.broadcast %3 : vector<8x1xf32> to vector<8x2048xf32>
    %5 = arith.addf %2, %4 : vector<8x2048xf32>
    %cst_5 = arith.constant 0.000000e+00 : f32
    %6 = vector.broadcast %cst_5 : f32 to vector<8x2048xf32>
    %7 = arith.subf %6, %5 : vector<8x2048xf32>
    %8 = math.exp %7 : vector<8x2048xf32>
    %cst_6 = arith.constant 1.000000e+00 : f32
    %9 = vector.broadcast %cst_6 : f32 to vector<8x2048xf32>
    %10 = arith.addf %9, %8 : vector<8x2048xf32>
    %cst_7 = arith.constant 1.000000e+00 : f32
    %11 = vector.broadcast %cst_7 : f32 to vector<8x2048xf32>
    %12 = arith.divf %11, %10 : vector<8x2048xf32>
    %c0_8 = arith.constant 0 : index
    %c0_9 = arith.constant 0 : index
    %13 = vector.load %arg4[%c0_8, %c0_9] : memref<8x2048xf32, #tpu.memory_space<vmem>>, vector<8x2048xf32>
    tpu.vector_store %arg4[%c0_8, %c0_9], %12 {strides = array<i32>} : memref<8x2048xf32, #tpu.memory_space<vmem>>, vector<8x2048xf32>,
    return
  }
  func.func @transform_0(%arg0: i32) -> (i32, i32) {
    %c0_i32 = arith.constant 0 : i32
    %c0_i32_0 = arith.constant 0 : i32
    return %c0_i32, %arg0 : i32, i32
  }
  func.func @transform_1(%arg0: i32) -> (i32, i32) {
    %c0_i32 = arith.constant 0 : i32
    %c0_i32_0 = arith.constant 0 : i32
    %c0_i32_1 = arith.constant 0 : i32
    return %c0_i32, %c0_i32_0 : i32, i32
  }
  func.func @transform_2(%arg0: i32) -> (i32, i32) {
    %c0_i32 = arith.constant 0 : i32
    %c0_i32_0 = arith.constant 0 : i32
    %c0_i32_1 = arith.constant 0 : i32
    return %c0_i32, %c0_i32_0 : i32, i32
  }
  func.func @transform_3(%arg0: i32) -> (i32, i32) {
    %c0_i32 = arith.constant 0 : i32
    %c0_i32_0 = arith.constant 0 : i32
    return %c0_i32, %arg0 : i32, i32
  }
}

</mosaic_0001>

<bundles_post_ra>
// kernel: tile.4
= control target key start
LH: loop header
LB: loop body
LE: loop exit
PB: predicated region body
PF: predicated region fallthrough
CT: control target
= control target key end

     0   :  { %s66_s8 = smov 125   ;;  %vm7_vm0 = vcmask 7168   ;;  %s67_s11 = smov 126   ;;  %s117_s0 = inlined_call_operand.vmem [shape: f32[4,8], index: 0, kind: input, shape index: {}]   ;;  %s118_s1 = inlined_call_operand.vmem [shape: f32[32,1], index: 1, kind: output, shape index: {}]  }
   0x1   :  { %v4_v0 = vld [vmem:[%s117_s0] sm:$0xf]  ;;  %s65_s0 = smov 127   ;;  %s68_s12 = smov 124  }
   0x2   :  { %5 = vst [vmem:[#allocation0] sm:$0xf] %v4_v0  ;;  %s69_s13 = smov 123   ;;  %s70_s14 = smov 122  }
   0x3   :  { %s71_s15 = smov 121  }
   0x9   :  { %v9_v1 = vld [vmem:[#allocation0] sm:$0xf]  }
   0xa   :  { %v21_v2 = vld [vmem:[#allocation0] sm:$0xf]   ;;  %10 = vrot.lane.b32.xlu0 %v9_v1, %s65_s0 }
   0xb   :  { %22 = vrot.lane.b32.xlu1 %v21_v2, %s66_s8  ;;  %v15_v3 = vld [vmem:[#allocation0] sm:$0xf]  }
   0xc   :  { %v27_v4 = vld [vmem:[#allocation0] sm:$0xf]  }
   0xd   :  { %v6_v5 = vld [vmem:[#allocation0] sm:$0xf]  }
   0xe   :  { %8 = vst.msk [vmem:[%s118_s1] ss:$8 sm:$0xf] %vm7_vm0, %v6_v5   ;;  %16 = vrot.lane.b32.xlu0 %v15_v3, %s67_s11  ;;  %v33_v6 = vld [vmem:[#allocation0] sm:$0xf]  }
   0xf   :  { %28 = vrot.lane.b32.xlu1 %v27_v4, %s68_s12  ;;  %v39_v7 = vld [vmem:[#allocation0] sm:$0xf]  }
  0x10   :  { %v45_v8 = vld [vmem:[#allocation0] sm:$0xf]  }
  0x12   :  { %34 = vrot.lane.b32.xlu0 %v33_v6, %s69_s13 }
  0x13   :  { %40 = vrot.lane.b32.xlu1 %v39_v7, %s70_s14 }
  0x16   :  { %46 = vrot.lane.b32.xlu0 %v45_v8, %s71_s15 }
  0x7c   :  { %v11_v9 = vpop.permute.xlu0 %10  }
  0x7d   :  { %v23_v10 = vpop.permute.xlu1 %22   ;;  %51 = vst.msk [vmem:[%s118_s1 + $0x1] ss:$8 sm:$0xf] %vm7_vm0, %v11_v9  }
  0x7e   :  { %53 = vst.msk [vmem:[%s118_s1 + $0x3] ss:$8 sm:$0xf] %vm7_vm0, %v23_v10  }
  0x80   :  { %v17_v11 = vpop.permute.xlu0 %16  }
  0x81   :  { %v29_v12 = vpop.permute.xlu1 %28   ;;  %52 = vst.msk [vmem:[%s118_s1 + $0x2] ss:$8 sm:$0xf] %vm7_vm0, %v17_v11  }
  0x82   :  { %54 = vst.msk [vmem:[%s118_s1 + $0x4] ss:$8 sm:$0xf] %vm7_vm0, %v29_v12  }
  0x84   :  { %v35_v13 = vpop.permute.xlu0 %34  }
  0x85   :  { %v41_v14 = vpop.permute.xlu1 %40   ;;  %55 = vst.msk [vmem:[%s118_s1 + $0x5] ss:$8 sm:$0xf] %vm7_vm0, %v35_v13  }
  0x86   :  { %56 = vst.msk [vmem:[%s118_s1 + $0x6] ss:$8 sm:$0xf] %vm7_vm0, %v41_v14  }
  0x88   :  { %v47_v15 = vpop.permute.xlu0 %46  }
  0x89   :  { %57 = vst.msk [vmem:[%s118_s1 + $0x7] ss:$8 sm:$0xf] %vm7_vm0, %v47_v15  }

// kernel: tile.38
= control target key start
LH: loop header
LB: loop body
LE: loop exit
PB: predicated region body
PF: predicated region fallthrough
CT: control target
= control target key end

     0   :  { %2 = vsyncpa [#allocation1], 0  ;;  %s44_s6 = smov [#allocation0]   ;;  %s70_s0 = inlined_call_operand.hbm [shape: f32[8], index: 0, kind: input, shape index: {}]   ;;  %s71_s1 = inlined_call_operand.vmem [shape: f32[4,8], index: 1, kind: output, shape index: {}]  }
   0x1   :  { %s9_s7 = sshll.u32 %s44_s6, 4  ;;  %s20_s10 = scalar_lea.hbm %s70_s0, 16  ;;  %s10_s7 = int_to_ptr.vmem [resolvable:$true] %s9_s7 }
   0x2   :  { %p21_p0 = scmp.ne.s32.totalorder %s70_s0, %s20_s10  ;;  %p24_p1 = scmp.lt.u32.totalorder %s20_s10, %s70_s0 }
   0x4   :  { %p26_p2 = pnand %p24_p1, %p21_p0 }
   0x6   :  { %29 = shalt.err (!%p26_p2)
}
   0x7   :  { %s30_s15 = scalar_lea.vmem %s10_s7, 16  ;;  %s34_s16 = scalar_lea.vmem %s10_s7, 32 }
   0x8   :  { %p31_p3 = scmp.ne.s32.totalorder %s10_s7, %s30_s15  ;;  %p35_p4 = scmp.lt.s32.totalorder %s10_s7, %s10_s7 }
   0x9   :  { %p36_p5 = scmp.lt.s32.totalorder %s34_s16, %s30_s15 }
   0xb   :  { %p37_p6 = por %p36_p5, %p35_p4 }
   0xd   :  { %p38_p7 = pnand %p37_p6, %p31_p3 }
   0xf   :  { %41 = shalt.err (!%p38_p7)
}
  0x10   :  { %12 = dma.hbm_to_vmem [thread:$0]  %s70_s0, 16, %s10_s7, [#allocation1]  }
  0x11   :  { %42 = dma.done.wait [#allocation1], 16  }
  0x12   :  { %43 = vsyncadd [#allocation1], 4294967280  ;;  %v16_v0 = vld [vmem:[#allocation0] ss:$0 sm:$0xff] }
  0x13   :  { %17 = vst [vmem:[%s71_s1] sm:$0xf] %v16_v0 }
  0x14   :  { %18 = vsyncpa [#allocation1], 1 }

// kernel: _lambda_.79
= control target key start
LH: loop header
LB: loop body
LE: loop exit
PB: predicated region body
PF: predicated region fallthrough
CT: control target
= control target key end

     0   :  { %7 = vsyncpa [#allocation3], 0  ;;  %s759_s9 = smov [#allocation2]   ;;  %s873_s0 = inlined_call_operand.vmem [shape: bf16[4,2048], index: 0, kind: input, shape index: {}]   ;;  %s874_s1 = inlined_call_operand.hbm [shape: bf16[8,4], index: 1, kind: input, shape index: {}]   ;;  %s875_s2 = inlined_call_operand.vmem [shape: bf16[8,2048], index: 2, kind: output, shape index: {}]  }
   0x1   :  { %s16_s10 = sshll.u32 %s759_s9, 4  ;;  %s735_s13 = scalar_lea.hbm %s874_s1, 64  ;;  %s17_s10 = int_to_ptr.vmem [resolvable:$true] %s16_s10 }
   0x2   :  { %p736_p0 = scmp.ne.s32.totalorder %s874_s1, %s735_s13  ;;  %p739_p1 = scmp.lt.u32.totalorder %s735_s13, %s874_s1 }
   0x4   :  { %p741_p2 = pnand %p739_p1, %p736_p0 }
   0x6   :  { %744 = shalt.err (!%p741_p2)
}
   0x7   :  { %s745_s18 = scalar_lea.vmem %s17_s10, 64  ;;  %p750_p4 = scmp.lt.s32.totalorder %s17_s10, %s17_s10 }
   0x8   :  { %p746_p3 = scmp.ne.s32.totalorder %s17_s10, %s745_s18  ;;  %p751_p5 = scmp.lt.s32.totalorder %s745_s18, %s745_s18 }
   0xa   :  { %p752_p6 = por %p751_p5, %p750_p4 }
   0xc   :  { %p753_p7 = pnand %p752_p6, %p746_p3 }
   0xe   :  { %756 = shalt.err (!%p753_p7)
}
   0xf   :  { %19 = dma.hbm_to_vmem [thread:$0]  %s874_s1, 64, %s17_s10, [#allocation3]  }
  0x10   :  { %757 = dma.done.wait [#allocation3], 64  }
  0x11   :  { %758 = vsyncadd [#allocation3], 4294967232  ;;  %v37_v0 = vlaneseq  ;;  %v760_v1 = vmov 1983009808   ;;  %v761_v3 = vmov 0   ;;  %v25_v7 = vld [vmem:[%s873_s0] sm:$0xff] }
  0x12   :  { %v35_v2 = vunpack.c.l.s4 %v760_v1  ;;  %186 = vmatprep.mubr.bf16.mxu0 %v761_v3  ;;  %227 = vmatprep.mubr.bf16.mxu1 %v761_v3  ;;  %vm105_vm0 = vcmask 1041408   ;;  %v26_v8 = vld [vmem:[%s873_s0 + $0x8] sm:$0xff]  ;;  %v33_v10 = vcombine.high %v25_v7, %v25_v7  ;;  %v27_v13 = vld [vmem:[%s873_s0 + $0x10] sm:$0xff]  ;;  %v24_v24 = vld [vmem:[#allocation2] sm:$0xf]  ;;  %vm101_vm1 = vcmask 31744  }
  0x13   :  { %v38_v4 = vshrl.u32 %v37_v0, 7  ;;  %v50_v12 = vcombine.high %v26_v8, %v26_v8  ;;  %v67_v15 = vcombine.high %v27_v13, %v27_v13  ;;  %v28_v26 = vld [vmem:[%s873_s0 + $0x18] sm:$0xff] }
  0x14   :  { %v36_v5 = vunpack.c.0.s8 %v35_v2  ;;  %v84_v31 = vcombine.high %v28_v26, %v28_v26 }
  0x16   :  { %v39_v6 = vsub.s32 %v36_v5, %v38_v4 }
  0x18   :  { %v40_v9 = vrot.slane %v25_v7, %v39_v6  ;;  %v57_v11 = vrot.slane %v26_v8, %v39_v6  ;;  %v74_v14 = vrot.slane %v27_v13, %v39_v6  ;;  %v47_v18 = vrot.slane %v33_v10, %v39_v6 }
  0x19   :  { %v64_v20 = vrot.slane %v50_v12, %v39_v6  ;;  %v81_v23 = vrot.slane %v67_v15, %v39_v6  ;;  %v91_v32 = vrot.slane %v28_v26, %v39_v6  ;;  %v98_v33 = vrot.slane %v84_v31, %v39_v6 }
  0x1a   :  { %v48_v16 = vcombine.high %v40_v9, %v40_v9  ;;  %v107_v17 = vsel %vm105_vm0, %v40_v9, 0  ;;  %v65_v19 = vcombine.high %v57_v11, %v57_v11  ;;  %v49_v21 = vcombine.high %v47_v18, %v47_v18 }
  0x1b   :  { %v113_v22 = vsel %vm105_vm0, %v47_v18, 0  ;;  %v66_v25 = vcombine.high %v64_v20, %v64_v20  ;;  %v119_v27 = vsel %vm105_vm0, %v57_v11, 0  ;;  %v82_v28 = vcombine.high %v74_v14, %v74_v14 }
  0x1c   :  { %694 = vmatprep.subr.msk.bf16.mxu0 %vm105_vm0, %v48_v16  ;;  %696 = vmatprep.subr.msk.bf16.mxu1 %vm105_vm0, %v49_v21  ;;  %v125_v29 = vsel %vm105_vm0, %v64_v20, 0  ;;  %v83_v30 = vcombine.high %v81_v23, %v81_v23  ;;  %v131_v34 = vsel %vm105_vm0, %v74_v14, 0  ;;  %v99_v35 = vcombine.high %v91_v32, %v91_v32 }
  0x1d   :  { %155 = vmatpush1.bf16.msra.mxu0 %v107_v17  ;;  %196 = vmatpush1.bf16.msra.mxu1 %v113_v22  ;;  %v137_v36 = vsel %vm105_vm0, %v81_v23, 0  ;;  %v100_v37 = vcombine.high %v98_v33, %v98_v33  ;;  %v143_v38 = vsel %vm105_vm0, %v91_v32, 0  ;;  %v149_v39 = vsel %vm105_vm0, %v98_v33, 0 }
  0x1e   :  { %698 = vmatprep.subr.msk.bf16.mxu0 %vm105_vm0, %v65_v19  ;;  %700 = vmatprep.subr.msk.bf16.mxu1 %vm105_vm0, %v66_v25 }
  0x20   :  { %695 = vmatmul.mubr.msk.bf16.vlgmr.msra.gmra.mrb[0].mxu0 %vm101_vm1, %v24_v24  ;;  %697 = vmatmul.mubr.msk.bf16.vlgmr.msra.gmra.mrb[0].mxu1 %vm101_vm1, %v24_v24 }
  0x21   :  { %237 = vmatpush1.bf16.msra.mxu0 %v119_v27  ;;  %268 = vmatprep.mubr.bf16.mxu0 %v761_v3 }
  0x22   :  { %702 = vmatprep.subr.msk.bf16.mxu0 %vm105_vm0, %v82_v28  ;;  %278 = vmatpush1.bf16.msra.mxu1 %v125_v29 }
  0x23   :  { %309 = vmatprep.mubr.bf16.mxu1 %v761_v3  ;;  %704 = vmatprep.subr.msk.bf16.mxu1 %vm105_vm0, %v83_v30 }
  0x28   :  { %699 = vmatmul.mubr.msk.bf16.vlgmr.msra.gmra.mrb[4].mxu0 %vm101_vm1, %v24_v24  ;;  %701 = vmatmul.mubr.msk.bf16.vlgmr.msra.gmra.mrb[4].mxu1 %vm101_vm1, %v24_v24 }
  0x29   :  { %319 = vmatpush1.bf16.msra.mxu0 %v131_v34  ;;  %350 = vmatprep.mubr.bf16.mxu0 %v761_v3 }
  0x2a   :  { %706 = vmatprep.subr.msk.bf16.mxu0 %vm105_vm0, %v99_v35  ;;  %360 = vmatpush1.bf16.msra.mxu1 %v137_v36 }
  0x2b   :  { %391 = vmatprep.mubr.bf16.mxu1 %v761_v3  ;;  %708 = vmatprep.subr.msk.bf16.mxu1 %vm105_vm0, %v100_v37 }
  0x30   :  { %703 = vmatmul.mubr.msk.bf16.vlgmr.msra.gmra.mrb[8].mxu0 %vm101_vm1, %v24_v24  ;;  %705 = vmatmul.mubr.msk.bf16.vlgmr.msra.gmra.mrb[8].mxu1 %vm101_vm1, %v24_v24 }
  0x31   :  { %401 = vmatpush1.bf16.msra.mxu0 %v143_v38  ;;  %432 = vmatprep.mubr.bf16.mxu0 %v761_v3 }
  0x32   :  { %442 = vmatpush1.bf16.msra.mxu1 %v149_v39  ;;  %473 = vmatprep.mubr.bf16.mxu1 %v761_v3 }
  0x38   :  { %707 = vmatmul.mubr.msk.bf16.vlgmr.msra.gmra.mrb[12].mxu0 %vm101_vm1, %v24_v24  ;;  %709 = vmatmul.mubr.msk.bf16.vlgmr.msra.gmra.mrb[12].mxu1 %vm101_vm1, %v24_v24 }
  0xf3   :  { %v188_v40 = vpop.f32.mrb[0].mxu0  ;;  %v229_v44 = vpop.f32.mrb[0].mxu1 }
  0xf4   :  { %v190_v41 = vpop.f32.mrb[1].mxu0  ;;  %v231_v46 = vpop.f32.mrb[1].mxu1 }
  0xf5   :  { %v482_v42 = vadd.f32 %v190_v41, %v188_v40  ;;  %v192_v43 = vpop.f32.mrb[2].mxu0  ;;  %v233_v48 = vpop.f32.mrb[2].mxu1 }
  0xf6   :  { %v193_v45 = vpop.f32.mrb[3].mxu0  ;;  %v234_v49 = vpop.f32.mrb[3].mxu1 }
  0xf7   :  { %v483_v47 = vadd.f32 %v482_v42, %v229_v44 }
  0xf9   :  { %v484_v50 = vadd.f32 %v483_v47, %v231_v46 }
  0xfb   :  { %v270_v51 = vpop.f32.mrb[4].mxu0  ;;  %v311_v55 = vpop.f32.mrb[4].mxu1 }
  0xfc   :  { %v485_v52 = vadd.f32 %v484_v50, %v270_v51  ;;  %v272_v53 = vpop.f32.mrb[5].mxu0  ;;  %v313_v58 = vpop.f32.mrb[5].mxu1 }
  0xfd   :  { %v274_v54 = vpop.f32.mrb[6].mxu0  ;;  %v315_v59 = vpop.f32.mrb[6].mxu1 }
  0xfe   :  { %v486_v56 = vadd.f32 %v485_v52, %v272_v53  ;;  %v275_v57 = vpop.f32.mrb[7].mxu0  ;;  %v316_v61 = vpop.f32.mrb[7].mxu1 }
 0x100   :  { %v487_v60 = vadd.f32 %v486_v56, %v311_v55 }
 0x102   :  { %v488_v62 = vadd.f32 %v487_v60, %v313_v58 }
 0x103   :  { %v352_v63 = vpop.f32.mrb[8].mxu0  ;;  %v393_v3 = vpop.f32.mrb[8].mxu1 }
 0x104   :  { %v489_v0 = vadd.f32 %v488_v62, %v352_v63  ;;  %v354_v1 = vpop.f32.mrb[9].mxu0  ;;  %v395_v6 = vpop.f32.mrb[9].mxu1 }
 0x105   :  { %v356_v2 = vpop.f32.mrb[10].mxu0  ;;  %v397_v7 = vpop.f32.mrb[10].mxu1 }
 0x106   :  { %v490_v4 = vadd.f32 %v489_v0, %v354_v1  ;;  %v357_v5 = vpop.f32.mrb[11].mxu0  ;;  %v398_v9 = vpop.f32.mrb[11].mxu1 }
 0x108   :  { %v491_v8 = vadd.f32 %v490_v4, %v393_v3 }
 0x10a   :  { %v492_v10 = vadd.f32 %v491_v8, %v395_v6 }
 0x10b   :  { %v434_v11 = vpop.f32.mrb[12].mxu0  ;;  %v475_v15 = vpop.f32.mrb[12].mxu1 }
 0x10c   :  { %v493_v12 = vadd.f32 %v492_v10, %v434_v11  ;;  %v436_v13 = vpop.f32.mrb[13].mxu0  ;;  %v477_v18 = vpop.f32.mrb[13].mxu1 }
 0x10d   :  { %v438_v14 = vpop.f32.mrb[14].mxu0  ;;  %v479_v19 = vpop.f32.mrb[14].mxu1 }
 0x10e   :  { %v494_v16 = vadd.f32 %v493_v12, %v436_v13  ;;  %v439_v17 = vpop.f32.mrb[15].mxu0  ;;  %v480_v21 = vpop.f32.mrb[15].mxu1 }
 0x110   :  { %v495_v20 = vadd.f32 %v494_v16, %v475_v15 }
 0x112   :  { %v496_v22 = vadd.f32 %v495_v20, %v477_v18 }
 0x114   :  { %497 = vadd.xlane.f32.xlu0 %v496_v22 }
 0x1a1   :  { %v498_v23 = vpop.xlane.xlu0 %497 }
 0x1a2   :  { %v500_v24 = vmul.f32 0.00048828125, %v498_v23 }
 0x1a4   :  { %v501_v25 = vsub.f32 %v188_v40, %v500_v24  ;;  %v502_v26 = vsub.f32 %v190_v41, %v500_v24  ;;  %v503_v27 = vsub.f32 %v229_v44, %v500_v24  ;;  %v504_v30 = vsub.f32 %v231_v46, %v500_v24 }
 0x1a5   :  { %v505_v31 = vsub.f32 %v270_v51, %v500_v24  ;;  %v506_v34 = vsub.f32 %v272_v53, %v500_v24  ;;  %v507_v37 = vsub.f32 %v311_v55, %v500_v24  ;;  %v508_v42 = vsub.f32 %v313_v58, %v500_v24 }
 0x1a6   :  { %v517_v28 = vmul.f32 %v501_v25, %v501_v25  ;;  %v518_v29 = vmul.f32 %v502_v26, %v502_v26  ;;  %v519_v32 = vmul.f32 %v503_v27, %v503_v27  ;;  %v520_v35 = vmul.f32 %v504_v30, %v504_v30 }
 0x1a7   :  { %v521_v38 = vmul.f32 %v505_v31, %v505_v31  ;;  %v522_v43 = vmul.f32 %v506_v34, %v506_v34  ;;  %v509_v47 = vsub.f32 %v352_v63, %v500_v24  ;;  %v523_v48 = vmul.f32 %v507_v37, %v507_v37 }
 0x1a8   :  { %v533_v33 = vadd.f32 %v518_v29, %v517_v28  ;;  %v510_v41 = vsub.f32 %v354_v1, %v500_v24  ;;  %v524_v44 = vmul.f32 %v508_v42, %v508_v42  ;;  %v511_v50 = vsub.f32 %v393_v3, %v500_v24 }
 0x1a9   :  { %v525_v46 = vmul.f32 %v509_v47, %v509_v47  ;;  %v512_v52 = vsub.f32 %v395_v6, %v500_v24  ;;  %v513_v56 = vsub.f32 %v434_v11, %v500_v24  ;;  %v514_v59 = vsub.f32 %v436_v13, %v500_v24 }
 0x1aa   :  { %v534_v36 = vadd.f32 %v533_v33, %v519_v32  ;;  %v526_v54 = vmul.f32 %v510_v41, %v510_v41  ;;  %v527_v57 = vmul.f32 %v511_v50, %v511_v50  ;;  %v515_v61 = vsub.f32 %v475_v15, %v500_v24 }
 0x1ab   :  { %v528_v60 = vmul.f32 %v512_v52, %v512_v52  ;;  %v529_v62 = vmul.f32 %v513_v56, %v513_v56  ;;  %v516_v0 = vsub.f32 %v477_v18, %v500_v24  ;;  %v530_v2 = vmul.f32 %v514_v59, %v514_v59 }
 0x1ac   :  { %v535_v39 = vadd.f32 %v534_v36, %v520_v35  ;;  %v531_v4 = vmul.f32 %v515_v61, %v515_v61 }
 0x1ad   :  { %v532_v3 = vmul.f32 %v516_v0, %v516_v0 }
 0x1ae   :  { %v536_v45 = vadd.f32 %v535_v39, %v521_v38 }
 0x1b0   :  { %v537_v40 = vadd.f32 %v536_v45, %v522_v43 }
 0x1b2   :  { %v538_v49 = vadd.f32 %v537_v40, %v523_v48 }
 0x1b4   :  { %v539_v51 = vadd.f32 %v538_v49, %v524_v44 }
 0x1b6   :  { %v540_v53 = vadd.f32 %v539_v51, %v525_v46 }
 0x1b8   :  { %v541_v55 = vadd.f32 %v540_v53, %v526_v54 }
 0x1ba   :  { %v542_v58 = vadd.f32 %v541_v55, %v527_v57 }
 0x1bc   :  { %v543_v63 = vadd.f32 %v542_v58, %v528_v60 }
 0x1be   :  { %v544_v1 = vadd.f32 %v543_v63, %v529_v62 }
 0x1c0   :  { %v545_v5 = vadd.f32 %v544_v1, %v530_v2 }
 0x1c2   :  { %v546_v7 = vadd.f32 %v545_v5, %v531_v4 }
 0x1c4   :  { %v547_v8 = vadd.f32 %v546_v7, %v532_v3 }
 0x1c6   :  { %548 = vadd.xlane.f32.xlu0 %v547_v8 }
 0x253   :  { %v549_v6 = vpop.xlane.xlu0 %548 }
 0x254   :  { %v550_v9 = vmul.f32 0.00048828125, %v549_v6 }
 0x256   :  { %v551_v10 = vadd.f32 1e-05, %v550_v9 }
 0x258   :  { %733 = vrsqrt.f32 %v551_v10 }
 0x262   :  { %v734_v11 = vpop.eup %733 }
 0x263   :  { %v553_v12 = vmul.f32 %v734_v11, %v501_v25  ;;  %v554_v13 = vmul.f32 %v734_v11, %v502_v26  ;;  %v555_v14 = vmul.f32 %v734_v11, %v503_v27  ;;  %v556_v15 = vmul.f32 %v734_v11, %v504_v30 }
 0x264   :  { %v557_v16 = vmul.f32 %v734_v11, %v505_v31  ;;  %v558_v17 = vmul.f32 %v734_v11, %v506_v34  ;;  %v559_v18 = vmul.f32 %v734_v11, %v507_v37  ;;  %v560_v19 = vmul.f32 %v734_v11, %v508_v42 }
 0x265   :  { %v561_v20 = vmul.f32 %v734_v11, %v509_v47  ;;  %v562_v21 = vmul.f32 %v734_v11, %v510_v41  ;;  %v563_v22 = vmul.f32 %v734_v11, %v511_v50  ;;  %v564_v23 = vmul.f32 %v734_v11, %v512_v52 }
 0x266   :  { %v565_v24 = vmul.f32 %v734_v11, %v513_v56  ;;  %v566_v28 = vmul.f32 %v734_v11, %v514_v59  ;;  %v567_v29 = vmul.f32 %v734_v11, %v515_v61  ;;  %v568_v32 = vmul.f32 %v734_v11, %v516_v0 }
 0x267   :  { %vm569_vm2 = vcmp.ge.f32.partialorder %v553_v12, 0.0  ;;  %vm570_vm3 = vcmp.ge.f32.partialorder %v554_v13, 0.0  ;;  %vm571_vm4 = vcmp.ge.f32.partialorder %v555_v14, 0.0  ;;  %vm572_vm5 = vcmp.ge.f32.partialorder %v556_v15, 0.0 }
 0x268   :  { %vm573_vm6 = vcmp.ge.f32.partialorder %v557_v16, 0.0  ;;  %vm574_vm7 = vcmp.ge.f32.partialorder %v558_v17, 0.0  ;;  %vm575_vm8 = vcmp.ge.f32.partialorder %v559_v18, 0.0  ;;  %vm576_vm9 = vcmp.ge.f32.partialorder %v560_v19, 0.0 }
 0x269   :  { %vm577_vm10 = vcmp.ge.f32.partialorder %v561_v20, 0.0  ;;  %vm578_vm11 = vcmp.ge.f32.partialorder %v562_v21, 0.0  ;;  %vm579_vm12 = vcmp.ge.f32.partialorder %v563_v22, 0.0  ;;  %vm580_vm13 = vcmp.ge.f32.partialorder %v564_v23, 0.0 }
 0x26a   :  { %vm581_vm14 = vcmp.ge.f32.partialorder %v565_v24, 0.0  ;;  %vm582_vm15 = vcmp.ge.f32.partialorder %v566_v28, 0.0  ;;  %vm583_vm0 = vcmp.ge.f32.partialorder %v567_v29, 0.0  ;;  %vm584_vm1 = vcmp.ge.f32.partialorder %v568_v32, 0.0 }
 0x26b   :  { %v585_v25 = vmul.f32 0.2, %v553_v12  ;;  %v586_v26 = vmul.f32 0.2, %v554_v13  ;;  %v587_v27 = vmul.f32 0.2, %v555_v14 }
 0x26c   :  { %v588_v30 = vmul.f32 0.2, %v556_v15  ;;  %v589_v31 = vmul.f32 0.2, %v557_v16  ;;  %v590_v33 = vmul.f32 0.2, %v558_v17 }
 0x26d   :  { %v591_v34 = vmul.f32 0.2, %v559_v18  ;;  %v592_v35 = vmul.f32 0.2, %v560_v19  ;;  %v593_v36 = vmul.f32 0.2, %v561_v20  ;;  %v601_v37 = vsel %vm569_vm2, %v553_v12, %v585_v25 }
 0x26e   :  { %v594_v38 = vmul.f32 0.2, %v562_v21  ;;  %v595_v39 = vmul.f32 0.2, %v563_v22  ;;  %v596_v42 = vmul.f32 0.2, %v564_v23  ;;  %v602_v43 = vsel %vm570_vm3, %v554_v13, %v586_v26 }
 0x26f   :  { %v597_v45 = vmul.f32 0.2, %v565_v24  ;;  %v598_v47 = vmul.f32 0.2, %v566_v28  ;;  %v599_v48 = vmul.f32 0.2, %v567_v29  ;;  %v603_v40 = vsel %vm571_vm4, %v555_v14, %v587_v27 }
 0x270   :  { %v600_v41 = vmul.f32 0.2, %v568_v32  ;;  %v604_v44 = vsel %vm572_vm5, %v556_v15, %v588_v30  ;;  %v605_v49 = vsel %vm573_vm6, %v557_v16, %v589_v31  ;;  %v606_v50 = vsel %vm574_vm7, %v558_v17, %v590_v33 }
 0x271   :  { %v607_v46 = vsel %vm575_vm8, %v559_v18, %v591_v34  ;;  %v608_v51 = vsel %vm576_vm9, %v560_v19, %v592_v35  ;;  %v609_v52 = vsel %vm577_vm10, %v561_v20, %v593_v36  ;;  %v610_v54 = vsel %vm578_vm11, %v562_v21, %v594_v38 }
 0x272   :  { %v611_v53 = vsel %vm579_vm12, %v563_v22, %v595_v39  ;;  %v612_v56 = vsel %vm580_vm13, %v564_v23, %v596_v42  ;;  %v613_v57 = vsel %vm581_vm14, %v565_v24, %v597_v45  ;;  %v614_v55 = vsel %vm582_vm15, %v566_v28, %v598_v47 }
 0x273   :  { %v615_v59 = vsel %vm583_vm0, %v567_v29, %v599_v48  ;;  %v616_v60 = vsel %vm584_vm1, %v568_v32, %v600_v41  ;;  %v718_v58 = vpack.c.bf16 %v602_v43, %v601_v37  ;;  %v719_v61 = vpack.c.bf16 %v604_v44, %v603_v40 }
 0x274   :  { %v720_v62 = vpack.c.bf16 %v606_v50, %v605_v49  ;;  %v721_v63 = vpack.c.bf16 %v608_v51, %v607_v46  ;;  %v722_v0 = vpack.c.bf16 %v610_v54, %v609_v52  ;;  %v723_v2 = vpack.c.bf16 %v612_v56, %v611_v53 }
 0x275   :  { %v724_v1 = vpack.c.bf16 %v614_v55, %v613_v57  ;;  %v725_v4 = vpack.c.bf16 %v616_v60, %v615_v59  ;;  %681 = vst [vmem:[%s875_s2] sm:$0xff] %v718_v58  ;;  %682 = vst [vmem:[%s875_s2 + $0x8] sm:$0xff] %v719_v61 }
 0x276   :  { %683 = vst [vmem:[%s875_s2 + $0x10] sm:$0xff] %v720_v62  ;;  %684 = vst [vmem:[%s875_s2 + $0x18] sm:$0xff] %v721_v63 }
 0x277   :  { %685 = vst [vmem:[%s875_s2 + $0x20] sm:$0xff] %v722_v0  ;;  %686 = vst [vmem:[%s875_s2 + $0x28] sm:$0xff] %v723_v2 }
 0x278   :  { %687 = vst [vmem:[%s875_s2 + $0x30] sm:$0xff] %v724_v1  ;;  %688 = vst [vmem:[%s875_s2 + $0x38] sm:$0xff] %v725_v4 }
 0x279   :  { %693 = vsyncpa [#allocation3], 1 }

// kernel: _lambda_.41
= control target key start
LH: loop header
LB: loop body
LE: loop exit
PB: predicated region body
PF: predicated region fallthrough
CT: control target
= control target key end

     0   :  { %v944_v3 = vmov 0   ;;  %vm257_vm0 = vcmask 1041408   ;;  %vm253_vm1 = vcmask 293888   ;;  %s1165_s0 = inlined_call_operand.vmem [shape: bf16[36,2048], index: 0, kind: input, shape index: {}]   ;;  %s1166_s1 = inlined_call_operand.vmem [shape: bf16[8,36], index: 1, kind: input, shape index: {}]   ;;  %s1167_s2 = inlined_call_operand.vmem [shape: bf16[8,2048], index: 2, kind: output, shape index: {}]  }
   0x1   :  { %v13_v0 = vld [vmem:[%s1165_s0] sm:$0xff]  ;;  %v14_v2 = vld [vmem:[%s1165_s0 + $0x8] sm:$0xff]  ;;  %338 = vmatprep.mubr.bf16.mxu0 %v944_v3  ;;  %379 = vmatprep.mubr.bf16.mxu1 %v944_v3  ;;  %v15_v23 = vld [vmem:[%s1165_s0 + $0x10] sm:$0xff] }
   0x2   :  { %v21_v1 = vld [vmem:[%s1165_s0 + $0x40] sm:$0xff]  ;;  %v22_v6 = vld [vmem:[%s1165_s0 + $0x48] sm:$0xff]  ;;  %v23_v24 = vld [vmem:[%s1165_s0 + $0x50] sm:$0xff] }
   0x3   :  { %v846_v4 = vcombine.high %v13_v0, %v21_v1  ;;  %v845_v5 = vcombine.low %v13_v0, %v21_v1  ;;  %v29_v7 = vld [vmem:[%s1165_s0 + $0x80] sm:$0xff]  ;;  %v848_v9 = vcombine.high %v14_v2, %v22_v6  ;;  %v847_v10 = vcombine.low %v14_v2, %v22_v6  ;;  %v30_v12 = vld [vmem:[%s1165_s0 + $0x88] sm:$0xff]  ;;  %v16_v25 = vld [vmem:[%s1165_s0 + $0x18] sm:$0xff] }
   0x4   :  { %v37_v8 = vld [vmem:[%s1165_s0 + $0xc0] sm:$0xff]  ;;  %v38_v13 = vld [vmem:[%s1165_s0 + $0xc8] sm:$0xff]  ;;  %v24_v26 = vld [vmem:[%s1165_s0 + $0x58] sm:$0xff]  ;;  %v850_v28 = vcombine.high %v15_v23, %v23_v24  ;;  %v849_v36 = vcombine.low %v15_v23, %v23_v24 }
   0x5   :  { %v862_v11 = vcombine.high %v29_v7, %v37_v8  ;;  %v45_v14 = vld [vmem:[%s1165_s0 + $0x100] sm:$0x33]  ;;  %306 = vmatprep.subr.bf16.mxu0 %v846_v4  ;;  %v864_v15 = vcombine.high %v30_v12, %v38_v13  ;;  %v46_v16 = vld [vmem:[%s1165_s0 + $0x108] sm:$0x33]  ;;  %347 = vmatprep.subr.bf16.mxu1 %v848_v9  ;;  %v861_v17 = vcombine.low %v29_v7, %v37_v8  ;;  %v31_v31 = vld [vmem:[%s1165_s0 + $0x90] sm:$0xff] }
   0x6   :  { %307 = vmatpush1.bf16.msra.mxu0 %v845_v5  ;;  %348 = vmatpush1.bf16.msra.mxu1 %v847_v10  ;;  %v863_v18 = vcombine.low %v30_v12, %v38_v13  ;;  %v878_v19 = vcombine.high %v45_v14, %v45_v14  ;;  %v877_v20 = vcombine.low %v45_v14, %v45_v14  ;;  %v39_v32 = vld [vmem:[%s1165_s0 + $0xd0] sm:$0xff]  ;;  %v32_v33 = vld [vmem:[%s1165_s0 + $0x98] sm:$0xff]  ;;  %v1023_v35 = vld [vmem:[%s1166_s1] sm:$0xf] }
   0x7   :  { %308 = vmatprep.subr.bf16.mxu0 %v862_v11  ;;  %349 = vmatprep.subr.bf16.mxu1 %v864_v15  ;;  %v880_v21 = vcombine.high %v46_v16, %v46_v16  ;;  %v879_v22 = vcombine.low %v46_v16, %v46_v16  ;;  %v852_v30 = vcombine.high %v16_v25, %v24_v26  ;;  %v40_v34 = vld [vmem:[%s1165_s0 + $0xd8] sm:$0xff]  ;;  %v47_v40 = vld [vmem:[%s1165_s0 + $0x110] sm:$0x33]  ;;  %v17_v48 = vld [vmem:[%s1165_s0 + $0x20] sm:$0xff] }
   0x8   :  { %v259_v27 = vsel %vm257_vm0, %v877_v20, 0  ;;  %v851_v37 = vcombine.low %v16_v25, %v24_v26  ;;  %v866_v38 = vcombine.high %v31_v31, %v39_v32  ;;  %v868_v39 = vcombine.high %v32_v33, %v40_v34  ;;  %v48_v41 = vld [vmem:[%s1165_s0 + $0x118] sm:$0x33]  ;;  %v25_v49 = vld [vmem:[%s1165_s0 + $0x60] sm:$0xff]  ;;  %v18_v50 = vld [vmem:[%s1165_s0 + $0x28] sm:$0xff] }
   0x9   :  { %v265_v29 = vsel %vm257_vm0, %v879_v22, 0  ;;  %v865_v42 = vcombine.low %v31_v31, %v39_v32  ;;  %v867_v43 = vcombine.low %v32_v33, %v40_v34  ;;  %v882_v44 = vcombine.high %v47_v40, %v47_v40  ;;  %v26_v51 = vld [vmem:[%s1165_s0 + $0x68] sm:$0xff]  ;;  %v33_v56 = vld [vmem:[%s1165_s0 + $0xa0] sm:$0xff]  ;;  %v19_v9 = vld [vmem:[%s1165_s0 + $0x30] sm:$0xff] }
   0xa   :  { %309 = vmatpush1.bf16.msra.mxu0 %v861_v17  ;;  %350 = vmatpush1.bf16.msra.mxu1 %v863_v18  ;;  %v881_v45 = vcombine.low %v47_v40, %v47_v40  ;;  %v884_v46 = vcombine.high %v48_v41, %v48_v41  ;;  %v883_v47 = vcombine.low %v48_v41, %v48_v41  ;;  %v41_v57 = vld [vmem:[%s1165_s0 + $0xe0] sm:$0xff]  ;;  %v34_v58 = vld [vmem:[%s1165_s0 + $0xa8] sm:$0xff]  ;;  %v27_v10 = vld [vmem:[%s1165_s0 + $0x70] sm:$0xff] }
   0xb   :  { %893 = vmatprep.subr.msk.bf16.mxu0 %vm257_vm0, %v878_v19  ;;  %895 = vmatprep.subr.msk.bf16.mxu1 %vm257_vm0, %v880_v21  ;;  %v854_v53 = vcombine.high %v17_v48, %v25_v49  ;;  %v856_v55 = vcombine.high %v18_v50, %v26_v51  ;;  %v42_v59 = vld [vmem:[%s1165_s0 + $0xe8] sm:$0xff]  ;;  %v853_v60 = vcombine.low %v17_v48, %v25_v49  ;;  %v49_v0 = vld [vmem:[%s1165_s0 + $0x120] sm:$0x33]  ;;  %v20_v11 = vld [vmem:[%s1165_s0 + $0x38] sm:$0xff] }
   0xc   :  { %v271_v52 = vsel %vm257_vm0, %v881_v45, 0  ;;  %v277_v54 = vsel %vm257_vm0, %v883_v47, 0  ;;  %v855_v61 = vcombine.low %v18_v50, %v26_v51  ;;  %v870_v62 = vcombine.high %v33_v56, %v41_v57  ;;  %v50_v1 = vld [vmem:[%s1165_s0 + $0x128] sm:$0x33]  ;;  %v28_v12 = vld [vmem:[%s1165_s0 + $0x78] sm:$0xff]  ;;  %v35_v17 = vld [vmem:[%s1165_s0 + $0xb0] sm:$0xff] }
   0xd   :  { %v872_v63 = vcombine.high %v34_v58, %v42_v59  ;;  %v869_v2 = vcombine.low %v33_v56, %v41_v57  ;;  %v871_v4 = vcombine.low %v34_v58, %v42_v59  ;;  %v886_v5 = vcombine.high %v49_v0, %v49_v0  ;;  %v43_v18 = vld [vmem:[%s1165_s0 + $0xf0] sm:$0xff]  ;;  %v36_v19 = vld [vmem:[%s1165_s0 + $0xb8] sm:$0xff] }
   0xe   :  { %311 = vmatpush1.bf16.msra.mxu0 %v259_v27  ;;  %352 = vmatpush1.bf16.msra.mxu1 %v265_v29  ;;  %v885_v6 = vcombine.low %v49_v0, %v49_v0  ;;  %v888_v7 = vcombine.high %v50_v1, %v50_v1  ;;  %v887_v8 = vcombine.low %v50_v1, %v50_v1  ;;  %v44_v20 = vld [vmem:[%s1165_s0 + $0xf8] sm:$0xff]  ;;  %v51_v25 = vld [vmem:[%s1165_s0 + $0x130] sm:$0x33] }
   0xf   :  { %388 = vmatprep.subr.bf16.mxu0 %v850_v28  ;;  %429 = vmatprep.subr.bf16.mxu1 %v852_v30  ;;  %v858_v14 = vcombine.high %v19_v9, %v27_v10  ;;  %v860_v16 = vcombine.high %v20_v11, %v28_v12  ;;  %v857_v21 = vcombine.low %v19_v9, %v27_v10  ;;  %v52_v26 = vld [vmem:[%s1165_s0 + $0x138] sm:$0x33] }
  0x10   :  { %v283_v13 = vsel %vm257_vm0, %v885_v6, 0  ;;  %v289_v15 = vsel %vm257_vm0, %v887_v8, 0  ;;  %v859_v22 = vcombine.low %v20_v11, %v28_v12  ;;  %v874_v23 = vcombine.high %v35_v17, %v43_v18 }
  0x11   :  { %894 = vmatmul.mubr.msk.bf16.vlgmr.msra.gmra.mrb[0].mxu0 %vm253_vm1, %v1023_v35  ;;  %896 = vmatmul.mubr.msk.bf16.vlgmr.msra.gmra.mrb[0].mxu1 %vm253_vm1, %v1023_v35  ;;  %v876_v24 = vcombine.high %v36_v19, %v44_v20  ;;  %v873_v27 = vcombine.low %v35_v17, %v43_v18  ;;  %v875_v28 = vcombine.low %v36_v19, %v44_v20 }
  0x12   :  { %389 = vmatpush1.bf16.msra.mxu0 %v849_v36  ;;  %430 = vmatpush1.bf16.msra.mxu1 %v851_v37  ;;  %v890_v29 = vcombine.high %v51_v25, %v51_v25  ;;  %v889_v30 = vcombine.low %v51_v25, %v51_v25  ;;  %v892_v31 = vcombine.high %v52_v26, %v52_v26 }
  0x13   :  { %390 = vmatprep.subr.bf16.mxu0 %v866_v38  ;;  %431 = vmatprep.subr.bf16.mxu1 %v868_v39  ;;  %v891_v32 = vcombine.low %v52_v26, %v52_v26 }
  0x14   :  { %420 = vmatprep.mubr.bf16.mxu0 %v944_v3  ;;  %461 = vmatprep.mubr.bf16.mxu1 %v944_v3  ;;  %v295_v33 = vsel %vm257_vm0, %v889_v30, 0 }
  0x15   :  { %v301_v34 = vsel %vm257_vm0, %v891_v32, 0 }
  0x16   :  { %391 = vmatpush1.bf16.msra.mxu0 %v865_v42  ;;  %432 = vmatpush1.bf16.msra.mxu1 %v867_v43 }
  0x17   :  { %897 = vmatprep.subr.msk.bf16.mxu0 %vm257_vm0, %v882_v44  ;;  %899 = vmatprep.subr.msk.bf16.mxu1 %vm257_vm0, %v884_v46 }
  0x1a   :  { %393 = vmatpush1.bf16.msra.mxu0 %v271_v52  ;;  %434 = vmatpush1.bf16.msra.mxu1 %v277_v54 }
  0x1b   :  { %470 = vmatprep.subr.bf16.mxu0 %v854_v53  ;;  %511 = vmatprep.subr.bf16.mxu1 %v856_v55 }
  0x1d   :  { %898 = vmatmul.mubr.msk.bf16.vlgmr.msra.gmra.mrb[4].mxu0 %vm253_vm1, %v1023_v35  ;;  %900 = vmatmul.mubr.msk.bf16.vlgmr.msra.gmra.mrb[4].mxu1 %vm253_vm1, %v1023_v35 }
  0x1e   :  { %471 = vmatpush1.bf16.msra.mxu0 %v853_v60  ;;  %512 = vmatpush1.bf16.msra.mxu1 %v855_v61 }
  0x1f   :  { %472 = vmatprep.subr.bf16.mxu0 %v870_v62  ;;  %513 = vmatprep.subr.bf16.mxu1 %v872_v63 }
  0x20   :  { %502 = vmatprep.mubr.bf16.mxu0 %v944_v3  ;;  %543 = vmatprep.mubr.bf16.mxu1 %v944_v3 }
  0x22   :  { %473 = vmatpush1.bf16.msra.mxu0 %v869_v2  ;;  %514 = vmatpush1.bf16.msra.mxu1 %v871_v4 }
  0x23   :  { %901 = vmatprep.subr.msk.bf16.mxu0 %vm257_vm0, %v886_v5  ;;  %903 = vmatprep.subr.msk.bf16.mxu1 %vm257_vm0, %v888_v7 }
  0x26   :  { %475 = vmatpush1.bf16.msra.mxu0 %v283_v13  ;;  %516 = vmatpush1.bf16.msra.mxu1 %v289_v15 }
  0x27   :  { %552 = vmatprep.subr.bf16.mxu0 %v858_v14  ;;  %593 = vmatprep.subr.bf16.mxu1 %v860_v16 }
  0x29   :  { %902 = vmatmul.mubr.msk.bf16.vlgmr.msra.gmra.mrb[8].mxu0 %vm253_vm1, %v1023_v35  ;;  %904 = vmatmul.mubr.msk.bf16.vlgmr.msra.gmra.mrb[8].mxu1 %vm253_vm1, %v1023_v35 }
  0x2a   :  { %553 = vmatpush1.bf16.msra.mxu0 %v857_v21  ;;  %594 = vmatpush1.bf16.msra.mxu1 %v859_v22 }
  0x2b   :  { %554 = vmatprep.subr.bf16.mxu0 %v874_v23  ;;  %595 = vmatprep.subr.bf16.mxu1 %v876_v24 }
  0x2c   :  { %584 = vmatprep.mubr.bf16.mxu0 %v944_v3  ;;  %625 = vmatprep.mubr.bf16.mxu1 %v944_v3 }
  0x2e   :  { %555 = vmatpush1.bf16.msra.mxu0 %v873_v27  ;;  %596 = vmatpush1.bf16.msra.mxu1 %v875_v28 }
  0x2f   :  { %905 = vmatprep.subr.msk.bf16.mxu0 %vm257_vm0, %v890_v29  ;;  %907 = vmatprep.subr.msk.bf16.mxu1 %vm257_vm0, %v892_v31 }
  0x32   :  { %557 = vmatpush1.bf16.msra.mxu0 %v295_v33  ;;  %598 = vmatpush1.bf16.msra.mxu1 %v301_v34 }
  0x35   :  { %906 = vmatmul.mubr.msk.bf16.vlgmr.msra.gmra.mrb[12].mxu0 %vm253_vm1, %v1023_v35  ;;  %908 = vmatmul.mubr.msk.bf16.vlgmr.msra.gmra.mrb[12].mxu1 %vm253_vm1, %v1023_v35 }
  0xe4   :  { %v340_v36 = vpop.f32.mrb[0].mxu0  ;;  %v381_v37 = vpop.f32.mrb[0].mxu1 }
  0xe5   :  { %v342_v3 = vpop.f32.mrb[1].mxu0  ;;  %v383_v40 = vpop.f32.mrb[1].mxu1 }
  0xe6   :  { %v634_v38 = vadd.f32 %v342_v3, %v340_v36  ;;  %v344_v39 = vpop.f32.mrb[2].mxu0  ;;  %v385_v42 = vpop.f32.mrb[2].mxu1 }
  0xe7   :  { %v345_v41 = vpop.f32.mrb[3].mxu0  ;;  %v386_v44 = vpop.f32.mrb[3].mxu1 }
  0xe8   :  { %v635_v43 = vadd.f32 %v634_v38, %v381_v37 }
  0xea   :  { %v636_v45 = vadd.f32 %v635_v43, %v383_v40 }
  0xf0   :  { %v422_v46 = vpop.f32.mrb[4].mxu0  ;;  %v463_v49 = vpop.f32.mrb[4].mxu1 }
  0xf1   :  { %v637_v47 = vadd.f32 %v636_v45, %v422_v46  ;;  %v424_v48 = vpop.f32.mrb[5].mxu0  ;;  %v465_v51 = vpop.f32.mrb[5].mxu1 }
  0xf2   :  { %v426_v50 = vpop.f32.mrb[6].mxu0  ;;  %v467_v35 = vpop.f32.mrb[6].mxu1 }
  0xf3   :  { %v638_v52 = vadd.f32 %v637_v47, %v424_v48  ;;  %v427_v53 = vpop.f32.mrb[7].mxu0  ;;  %v468_v54 = vpop.f32.mrb[7].mxu1 }
  0xf5   :  { %v639_v55 = vadd.f32 %v638_v52, %v463_v49 }
  0xf7   :  { %v640_v56 = vadd.f32 %v639_v55, %v465_v51 }
  0xfc   :  { %v504_v57 = vpop.f32.mrb[8].mxu0  ;;  %v545_v60 = vpop.f32.mrb[8].mxu1 }
  0xfd   :  { %v641_v58 = vadd.f32 %v640_v56, %v504_v57  ;;  %v506_v59 = vpop.f32.mrb[9].mxu0  ;;  %v547_v62 = vpop.f32.mrb[9].mxu1 }
  0xfe   :  { %v508_v61 = vpop.f32.mrb[10].mxu0  ;;  %v549_v1 = vpop.f32.mrb[10].mxu1 }
  0xff   :  { %v642_v63 = vadd.f32 %v641_v58, %v506_v59  ;;  %v509_v0 = vpop.f32.mrb[11].mxu0  ;;  %v550_v2 = vpop.f32.mrb[11].mxu1 }
 0x101   :  { %v643_v4 = vadd.f32 %v642_v63, %v545_v60 }
 0x103   :  { %v644_v5 = vadd.f32 %v643_v4, %v547_v62 }
 0x108   :  { %v586_v6 = vpop.f32.mrb[12].mxu0  ;;  %v627_v9 = vpop.f32.mrb[12].mxu1 }
 0x109   :  { %v645_v7 = vadd.f32 %v644_v5, %v586_v6  ;;  %v588_v8 = vpop.f32.mrb[13].mxu0  ;;  %v629_v11 = vpop.f32.mrb[13].mxu1 }
 0x10a   :  { %v590_v10 = vpop.f32.mrb[14].mxu0  ;;  %v631_v14 = vpop.f32.mrb[14].mxu1 }
 0x10b   :  { %v646_v12 = vadd.f32 %v645_v7, %v588_v8  ;;  %v591_v13 = vpop.f32.mrb[15].mxu0  ;;  %v632_v15 = vpop.f32.mrb[15].mxu1 }
 0x10d   :  { %v647_v16 = vadd.f32 %v646_v12, %v627_v9 }
 0x10f   :  { %v648_v17 = vadd.f32 %v647_v16, %v629_v11 }
 0x111   :  { %649 = vadd.xlane.f32.xlu0 %v648_v17 }
 0x19e   :  { %v650_v18 = vpop.xlane.xlu0 %649 }
 0x19f   :  { %v652_v19 = vmul.f32 0.00048828125, %v650_v18 }
 0x1a1   :  { %v653_v20 = vsub.f32 %v340_v36, %v652_v19  ;;  %v654_v21 = vsub.f32 %v342_v3, %v652_v19  ;;  %v655_v22 = vsub.f32 %v381_v37, %v652_v19  ;;  %v656_v25 = vsub.f32 %v383_v40, %v652_v19 }
 0x1a2   :  { %v657_v26 = vsub.f32 %v422_v46, %v652_v19  ;;  %v658_v29 = vsub.f32 %v424_v48, %v652_v19  ;;  %v659_v32 = vsub.f32 %v463_v49, %v652_v19  ;;  %v660_v38 = vsub.f32 %v465_v51, %v652_v19 }
 0x1a3   :  { %v669_v23 = vmul.f32 %v653_v20, %v653_v20  ;;  %v670_v24 = vmul.f32 %v654_v21, %v654_v21  ;;  %v671_v27 = vmul.f32 %v655_v22, %v655_v22  ;;  %v672_v30 = vmul.f32 %v656_v25, %v656_v25 }
 0x1a4   :  { %v673_v33 = vmul.f32 %v657_v26, %v657_v26  ;;  %v674_v39 = vmul.f32 %v658_v29, %v658_v29  ;;  %v661_v42 = vsub.f32 %v504_v57, %v652_v19  ;;  %v675_v43 = vmul.f32 %v659_v32, %v659_v32 }
 0x1a5   :  { %v685_v28 = vadd.f32 %v670_v24, %v669_v23  ;;  %v662_v3 = vsub.f32 %v506_v59, %v652_v19  ;;  %v676_v37 = vmul.f32 %v660_v38, %v660_v38  ;;  %v663_v45 = vsub.f32 %v545_v60, %v652_v19 }
 0x1a6   :  { %v677_v40 = vmul.f32 %v661_v42, %v661_v42  ;;  %v664_v47 = vsub.f32 %v547_v62, %v652_v19  ;;  %v665_v52 = vsub.f32 %v586_v6, %v652_v19  ;;  %v666_v35 = vsub.f32 %v588_v8, %v652_v19 }
 0x1a7   :  { %v686_v31 = vadd.f32 %v685_v28, %v671_v27  ;;  %v678_v50 = vmul.f32 %v662_v3, %v662_v3  ;;  %v679_v53 = vmul.f32 %v663_v45, %v663_v45  ;;  %v667_v55 = vsub.f32 %v627_v9, %v652_v19 }
 0x1a8   :  { %v680_v54 = vmul.f32 %v664_v47, %v664_v47  ;;  %v681_v56 = vmul.f32 %v665_v52, %v665_v52  ;;  %v668_v58 = vsub.f32 %v629_v11, %v652_v19  ;;  %v682_v61 = vmul.f32 %v666_v35, %v666_v35 }
 0x1a9   :  { %v687_v34 = vadd.f32 %v686_v31, %v672_v30  ;;  %v683_v63 = vmul.f32 %v667_v55, %v667_v55 }
 0x1aa   :  { %v684_v60 = vmul.f32 %v668_v58, %v668_v58 }
 0x1ab   :  { %v688_v41 = vadd.f32 %v687_v34, %v673_v33 }
 0x1ad   :  { %v689_v36 = vadd.f32 %v688_v41, %v674_v39 }
 0x1af   :  { %v690_v44 = vadd.f32 %v689_v36, %v675_v43 }
 0x1b1   :  { %v691_v46 = vadd.f32 %v690_v44, %v676_v37 }
 0x1b3   :  { %v692_v48 = vadd.f32 %v691_v46, %v677_v40 }
 0x1b5   :  { %v693_v49 = vadd.f32 %v692_v48, %v678_v50 }
 0x1b7   :  { %v694_v51 = vadd.f32 %v693_v49, %v679_v53 }
 0x1b9   :  { %v695_v57 = vadd.f32 %v694_v51, %v680_v54 }
 0x1bb   :  { %v696_v59 = vadd.f32 %v695_v57, %v681_v56 }
 0x1bd   :  { %v697_v0 = vadd.f32 %v696_v59, %v682_v61 }
 0x1bf   :  { %v698_v1 = vadd.f32 %v697_v0, %v683_v63 }
 0x1c1   :  { %v699_v2 = vadd.f32 %v698_v1, %v684_v60 }
 0x1c3   :  { %700 = vadd.xlane.f32.xlu0 %v699_v2 }
 0x250   :  { %v701_v62 = vpop.xlane.xlu0 %700 }
 0x251   :  { %v702_v4 = vmul.f32 0.00048828125, %v701_v62 }
 0x253   :  { %v703_v5 = vadd.f32 1e-05, %v702_v4 }
 0x255   :  { %942 = vrsqrt.f32 %v703_v5 }
 0x25f   :  { %v943_v6 = vpop.eup %942 }
 0x260   :  { %v705_v7 = vmul.f32 %v943_v6, %v653_v20  ;;  %v706_v8 = vmul.f32 %v943_v6, %v654_v21  ;;  %v707_v10 = vmul.f32 %v943_v6, %v655_v22  ;;  %v708_v9 = vmul.f32 %v943_v6, %v656_v25 }
 0x261   :  { %v709_v12 = vmul.f32 %v943_v6, %v657_v26  ;;  %v710_v13 = vmul.f32 %v943_v6, %v658_v29  ;;  %v711_v11 = vmul.f32 %v943_v6, %v659_v32  ;;  %v712_v14 = vmul.f32 %v943_v6, %v660_v38 }
 0x262   :  { %v713_v15 = vmul.f32 %v943_v6, %v661_v42  ;;  %v714_v16 = vmul.f32 %v943_v6, %v662_v3  ;;  %v715_v17 = vmul.f32 %v943_v6, %v663_v45  ;;  %v716_v18 = vmul.f32 %v943_v6, %v664_v47 }
 0x263   :  { %v717_v19 = vmul.f32 %v943_v6, %v665_v52  ;;  %v718_v23 = vmul.f32 %v943_v6, %v666_v35  ;;  %v719_v24 = vmul.f32 %v943_v6, %v667_v55  ;;  %v720_v27 = vmul.f32 %v943_v6, %v668_v58 }
 0x264   :  { %vm721_vm2 = vcmp.ge.f32.partialorder %v705_v7, 0.0  ;;  %vm722_vm3 = vcmp.ge.f32.partialorder %v706_v8, 0.0  ;;  %vm723_vm4 = vcmp.ge.f32.partialorder %v707_v10, 0.0  ;;  %vm724_vm5 = vcmp.ge.f32.partialorder %v708_v9, 0.0 }
 0x265   :  { %vm725_vm6 = vcmp.ge.f32.partialorder %v709_v12, 0.0  ;;  %vm726_vm7 = vcmp.ge.f32.partialorder %v710_v13, 0.0  ;;  %vm727_vm8 = vcmp.ge.f32.partialorder %v711_v11, 0.0  ;;  %vm728_vm9 = vcmp.ge.f32.partialorder %v712_v14, 0.0 }
 0x266   :  { %vm729_vm10 = vcmp.ge.f32.partialorder %v713_v15, 0.0  ;;  %vm730_vm11 = vcmp.ge.f32.partialorder %v714_v16, 0.0  ;;  %vm731_vm12 = vcmp.ge.f32.partialorder %v715_v17, 0.0  ;;  %vm732_vm13 = vcmp.ge.f32.partialorder %v716_v18, 0.0 }
 0x267   :  { %vm733_vm14 = vcmp.ge.f32.partialorder %v717_v19, 0.0  ;;  %vm734_vm15 = vcmp.ge.f32.partialorder %v718_v23, 0.0  ;;  %vm735_vm0 = vcmp.ge.f32.partialorder %v719_v24, 0.0  ;;  %vm736_vm1 = vcmp.ge.f32.partialorder %v720_v27, 0.0 }
 0x268   :  { %v737_v20 = vmul.f32 0.2, %v705_v7  ;;  %v738_v21 = vmul.f32 0.2, %v706_v8  ;;  %v739_v22 = vmul.f32 0.2, %v707_v10 }
 0x269   :  { %v740_v25 = vmul.f32 0.2, %v708_v9  ;;  %v741_v26 = vmul.f32 0.2, %v709_v12  ;;  %v742_v28 = vmul.f32 0.2, %v710_v13 }
 0x26a   :  { %v743_v29 = vmul.f32 0.2, %v711_v11  ;;  %v744_v30 = vmul.f32 0.2, %v712_v14  ;;  %v745_v31 = vmul.f32 0.2, %v713_v15  ;;  %v753_v32 = vsel %vm721_vm2, %v705_v7, %v737_v20 }
 0x26b   :  { %v746_v33 = vmul.f32 0.2, %v714_v16  ;;  %v747_v34 = vmul.f32 0.2, %v715_v17  ;;  %v748_v38 = vmul.f32 0.2, %v716_v18  ;;  %v754_v39 = vsel %vm722_vm3, %v706_v8, %v738_v21 }
 0x26c   :  { %v749_v41 = vmul.f32 0.2, %v717_v19  ;;  %v750_v42 = vmul.f32 0.2, %v718_v23  ;;  %v751_v43 = vmul.f32 0.2, %v719_v24  ;;  %v755_v36 = vsel %vm723_vm4, %v707_v10, %v739_v22 }
 0x26d   :  { %v752_v3 = vmul.f32 0.2, %v720_v27  ;;  %v756_v37 = vsel %vm724_vm5, %v708_v9, %v740_v25  ;;  %v757_v44 = vsel %vm725_vm6, %v709_v12, %v741_v26  ;;  %v758_v45 = vsel %vm726_vm7, %v710_v13, %v742_v28 }
 0x26e   :  { %v759_v40 = vsel %vm727_vm8, %v711_v11, %v743_v29  ;;  %v760_v46 = vsel %vm728_vm9, %v712_v14, %v744_v30  ;;  %v761_v47 = vsel %vm729_vm10, %v713_v15, %v745_v31  ;;  %v762_v50 = vsel %vm730_vm11, %v714_v16, %v746_v33 }
 0x26f   :  { %v763_v48 = vsel %vm731_vm12, %v715_v17, %v747_v34  ;;  %v764_v52 = vsel %vm732_vm13, %v716_v18, %v748_v38  ;;  %v765_v53 = vsel %vm733_vm14, %v717_v19, %v749_v41  ;;  %v766_v49 = vsel %vm734_vm15, %v718_v23, %v750_v42 }
 0x270   :  { %v767_v35 = vsel %vm735_vm0, %v719_v24, %v751_v43  ;;  %v768_v54 = vsel %vm736_vm1, %v720_v27, %v752_v3  ;;  %v917_v51 = vpack.c.bf16 %v754_v39, %v753_v32  ;;  %v918_v55 = vpack.c.bf16 %v756_v37, %v755_v36 }
 0x271   :  { %v919_v56 = vpack.c.bf16 %v758_v45, %v757_v44  ;;  %v920_v57 = vpack.c.bf16 %v760_v46, %v759_v40  ;;  %v921_v58 = vpack.c.bf16 %v762_v50, %v761_v47  ;;  %v922_v61 = vpack.c.bf16 %v764_v52, %v763_v48 }
 0x272   :  { %v923_v59 = vpack.c.bf16 %v766_v49, %v765_v53  ;;  %v924_v63 = vpack.c.bf16 %v768_v54, %v767_v35  ;;  %833 = vst [vmem:[%s1167_s2] sm:$0xff] %v917_v51  ;;  %834 = vst [vmem:[%s1167_s2 + $0x8] sm:$0xff] %v918_v55 }
 0x273   :  { %835 = vst [vmem:[%s1167_s2 + $0x10] sm:$0xff] %v919_v56  ;;  %836 = vst [vmem:[%s1167_s2 + $0x18] sm:$0xff] %v920_v57 }
 0x274   :  { %837 = vst [vmem:[%s1167_s2 + $0x20] sm:$0xff] %v921_v58  ;;  %838 = vst [vmem:[%s1167_s2 + $0x28] sm:$0xff] %v922_v61 }
 0x275   :  { %839 = vst [vmem:[%s1167_s2 + $0x30] sm:$0xff] %v923_v59  ;;  %840 = vst [vmem:[%s1167_s2 + $0x38] sm:$0xff] %v924_v63 }

// kernel: _lambda_.74
= control target key start
LH: loop header
LB: loop body
LE: loop exit
PB: predicated region body
PF: predicated region fallthrough
CT: control target
= control target key end

     0   :  { %vm29_vm0 = vcmask 1043456   ;;  %v204_v2 = vmov 0   ;;  %vm25_vm1 = vcmask 64512   ;;  %s235_s0 = inlined_call_operand.vmem [shape: bf16[8,512], index: 0, kind: input, shape index: {}]   ;;  %s236_s1 = inlined_call_operand.vmem [shape: bf16[8,8], index: 1, kind: input, shape index: {}]   ;;  %s237_s2 = inlined_call_operand.vmem [shape: bf16[8,512], index: 2, kind: output, shape index: {}]  }
   0x1   :  { %v13_v0 = vld [vmem:[%s235_s0] sm:$0xff]  ;;  %v14_v1 = vld [vmem:[%s235_s0 + $0x8] sm:$0xff]  ;;  %74 = vmatprep.mubr.bf16.mxu0 %v204_v2  ;;  %115 = vmatprep.mubr.bf16.mxu1 %v204_v2 }
   0x2   :  { %v186_v3 = vcombine.high %v13_v0, %v13_v0  ;;  %v188_v4 = vcombine.high %v14_v1, %v14_v1  ;;  %v185_v5 = vcombine.low %v13_v0, %v13_v0  ;;  %v187_v6 = vcombine.low %v14_v1, %v14_v1  ;;  %v12_v9 = vld [vmem:[%s236_s1] sm:$0xf] }
   0x4   :  { %189 = vmatprep.subr.msk.bf16.mxu0 %vm29_vm0, %v186_v3  ;;  %191 = vmatprep.subr.msk.bf16.mxu1 %vm29_vm0, %v188_v4  ;;  %v31_v7 = vsel %vm29_vm0, %v185_v5, 0  ;;  %v37_v8 = vsel %vm29_vm0, %v187_v6, 0 }
   0x5   :  { %43 = vmatpush1.bf16.msra.mxu0 %v31_v7  ;;  %84 = vmatpush1.bf16.msra.mxu1 %v37_v8 }
   0x8   :  { %190 = vmatmul.mubr.msk.bf16.vlgmr.msra.gmra.mrb[0].mxu0 %vm25_vm1, %v12_v9  ;;  %192 = vmatmul.mubr.msk.bf16.vlgmr.msra.gmra.mrb[0].mxu1 %vm25_vm1, %v12_v9 }
  0xdb   :  { %v76_v10 = vpop.f32.mrb[0].mxu0  ;;  %v117_v11 = vpop.f32.mrb[0].mxu1 }
  0xdc   :  { %v78_v12 = vpop.f32.mrb[1].mxu0  ;;  %v119_v13 = vpop.f32.mrb[1].mxu1 }
  0xdd   :  { %v124_v14 = vadd.f32 %v78_v12, %v76_v10  ;;  %v80_v15 = vpop.f32.mrb[2].mxu0  ;;  %v121_v16 = vpop.f32.mrb[2].mxu1 }
  0xde   :  { %v81_v17 = vpop.f32.mrb[3].mxu0  ;;  %v122_v18 = vpop.f32.mrb[3].mxu1 }
  0xdf   :  { %v125_v19 = vadd.f32 %v124_v14, %v117_v11 }
  0xe1   :  { %v126_v20 = vadd.f32 %v125_v19, %v119_v13 }
  0xe3   :  { %127 = vadd.xlane.f32.xlu0 %v126_v20 }
 0x170   :  { %v128_v21 = vpop.xlane.xlu0 %127 }
 0x171   :  { %v130_v22 = vmul.f32 0.001953125, %v128_v21 }
 0x173   :  { %v131_v23 = vsub.f32 %v76_v10, %v130_v22  ;;  %v132_v24 = vsub.f32 %v78_v12, %v130_v22  ;;  %v133_v25 = vsub.f32 %v117_v11, %v130_v22  ;;  %v134_v26 = vsub.f32 %v119_v13, %v130_v22 }
 0x175   :  { %v135_v27 = vmul.f32 %v131_v23, %v131_v23  ;;  %v136_v28 = vmul.f32 %v132_v24, %v132_v24  ;;  %v137_v29 = vmul.f32 %v133_v25, %v133_v25  ;;  %v138_v31 = vmul.f32 %v134_v26, %v134_v26 }
 0x177   :  { %v139_v30 = vadd.f32 %v136_v28, %v135_v27 }
 0x179   :  { %v140_v32 = vadd.f32 %v139_v30, %v137_v29 }
 0x17b   :  { %v141_v33 = vadd.f32 %v140_v32, %v138_v31 }
 0x17d   :  { %142 = vadd.xlane.f32.xlu0 %v141_v33 }
 0x20a   :  { %v143_v34 = vpop.xlane.xlu0 %142 }
 0x20b   :  { %v144_v35 = vmul.f32 0.001953125, %v143_v34 }
 0x20d   :  { %v145_v36 = vadd.f32 1e-05, %v144_v35 }
 0x20f   :  { %202 = vrsqrt.f32 %v145_v36 }
 0x219   :  { %v203_v37 = vpop.eup %202 }
 0x21a   :  { %v147_v38 = vmul.f32 %v203_v37, %v131_v23  ;;  %v148_v39 = vmul.f32 %v203_v37, %v132_v24  ;;  %v149_v40 = vmul.f32 %v203_v37, %v133_v25  ;;  %v150_v41 = vmul.f32 %v203_v37, %v134_v26 }
 0x21c   :  { %vm151_vm2 = vcmp.ge.f32.partialorder %v147_v38, 0.0  ;;  %vm152_vm3 = vcmp.ge.f32.partialorder %v148_v39, 0.0  ;;  %vm153_vm4 = vcmp.ge.f32.partialorder %v149_v40, 0.0  ;;  %vm154_vm5 = vcmp.ge.f32.partialorder %v150_v41, 0.0 }
 0x21d   :  { %v155_v42 = vmul.f32 0.2, %v147_v38  ;;  %v156_v43 = vmul.f32 0.2, %v148_v39  ;;  %v157_v44 = vmul.f32 0.2, %v149_v40 }
 0x21e   :  { %v158_v45 = vmul.f32 0.2, %v150_v41 }
 0x21f   :  { %v159_v46 = vsel %vm151_vm2, %v147_v38, %v155_v42  ;;  %v160_v47 = vsel %vm152_vm3, %v148_v39, %v156_v43  ;;  %v161_v48 = vsel %vm153_vm4, %v149_v40, %v157_v44 }
 0x220   :  { %v162_v49 = vsel %vm154_vm5, %v150_v41, %v158_v45  ;;  %v195_v50 = vpack.c.bf16 %v160_v47, %v159_v46 }
 0x221   :  { %v196_v51 = vpack.c.bf16 %v162_v49, %v161_v48 }
 0x222   :  { %179 = vst [vmem:[%s237_s2] sm:$0xff] %v195_v50 }
 0x223   :  { %180 = vst [vmem:[%s237_s2 + $0x8] sm:$0xff] %v196_v51 }

// kernel: _lambda_.43
= control target key start
LH: loop header
LB: loop body
LE: loop exit
PB: predicated region body
PF: predicated region fallthrough
CT: control target
= control target key end

     0   :  { %v241_v1 = vmov 0   ;;  %vm86_vm0 = vcmask 1041408   ;;  %vm82_vm1 = vcmask 293888   ;;  %s308_s0 = inlined_call_operand.vmem [shape: bf16[36,512], index: 0, kind: input, shape index: {}]   ;;  %s309_s2 = inlined_call_operand.vmem [shape: f32[8,1], index: 2, kind: input, shape index: {}]   ;;  %s310_s1 = inlined_call_operand.vmem [shape: bf16[8,36], index: 1, kind: input, shape index: {}]   ;;  %s311_s3 = inlined_call_operand.vmem [shape: bf16[8,512], index: 3, kind: output, shape index: {}]  }
   0x1   :  { %v225_v0 = vld [vmem:[%s308_s0 + $0x4] ss:$16 sps:$4 sm:$0xff]   ;;  %131 = vmatprep.mubr.bf16.mxu0 %v241_v1  ;;  %172 = vmatprep.mubr.bf16.mxu1 %v241_v1  ;;  %v227_v2 = vld [vmem:[%s308_s0 + $0xc] ss:$16 sps:$4 sm:$0xff]   ;;  %v229_v3 = vld [vmem:[%s308_s0] ss:$16 sps:$4 sm:$0xff]  }
   0x2   :  { %224 = vset.pattern.permute.xlu0 %v241_v1  ;;  %99 = vmatprep.subr.bf16.mxu0 %v225_v0  ;;  %v230_v4 = vld [vmem:[%s308_s0 + $0x8] ss:$16 sps:$4 sm:$0xff]   ;;  %v231_v5 = vld [vmem:[%s308_s0 + $0x24] ss:$16 sps:$4 sm:$0xff]   ;;  %v233_v6 = vld [vmem:[%s308_s0 + $0x2c] ss:$16 sps:$4 sm:$0xff]  }
   0x3   :  { %140 = vmatprep.subr.bf16.mxu1 %v227_v2  ;;  %100 = vmatpush1.bf16.msra.mxu0 %v229_v3  ;;  %v235_v7 = vld [vmem:[%s308_s0 + $0x20] ss:$16 sps:$4 sm:$0xff]   ;;  %v236_v8 = vld [vmem:[%s308_s0 + $0x28] ss:$16 sps:$4 sm:$0xff]  }
   0x4   :  { %141 = vmatpush1.bf16.msra.mxu1 %v230_v4  ;;  %101 = vmatprep.subr.bf16.mxu0 %v231_v5  ;;  %v24_v9 = vld [vmem:[%s308_s0 + $0x40] sm:$0x33]  ;;  %v25_v10 = vld [vmem:[%s308_s0 + $0x48] sm:$0x33] }
   0x5   :  { %142 = vmatprep.subr.bf16.mxu1 %v233_v6  ;;  %v212_v11 = vcombine.high %v24_v9, %v24_v9  ;;  %v214_v12 = vcombine.high %v25_v10, %v25_v10  ;;  %v211_v13 = vcombine.low %v24_v9, %v24_v9  ;;  %v213_v14 = vcombine.low %v25_v10, %v25_v10  ;;  %v26_v15 = vld [vmem:[%s309_s2] sm:$0xff] }
   0x6   :  { %29 = vperm.xlu0 %224, %v26_v15   ;;  %v15_v18 = vld [vmem:[%s310_s1] sm:$0xf] }
   0x7   :  { %102 = vmatpush1.bf16.msra.mxu0 %v235_v7  ;;  %v88_v16 = vsel %vm86_vm0, %v211_v13, 0  ;;  %v94_v17 = vsel %vm86_vm0, %v213_v14, 0 }
   0x8   :  { %143 = vmatpush1.bf16.msra.mxu1 %v236_v8  ;;  %215 = vmatprep.subr.msk.bf16.mxu0 %vm86_vm0, %v212_v11 }
   0x9   :  { %217 = vmatprep.subr.msk.bf16.mxu1 %vm86_vm0, %v214_v12 }
   0xb   :  { %104 = vmatpush1.bf16.msra.mxu0 %v88_v16 }
   0xc   :  { %145 = vmatpush1.bf16.msra.mxu1 %v94_v17 }
   0xe   :  { %216 = vmatmul.mubr.msk.bf16.vlgmr.msra.gmra.mrb[0].mxu0 %vm82_vm1, %v15_v18 }
   0xf   :  { %218 = vmatmul.mubr.msk.bf16.vlgmr.msra.gmra.mrb[0].mxu1 %vm82_vm1, %v15_v18 }
  0x85   :  { %v30_v19 = vpop.permute.xlu0 %29 }
  0xe1   :  { %v133_v20 = vpop.f32.mrb[0].mxu0 }
  0xe2   :  { %v174_v21 = vpop.f32.mrb[0].mxu1  ;;  %v134_v22 = vadd.f32 %v133_v20, %v30_v19  ;;  %v135_v24 = vpop.f32.mrb[1].mxu0 }
  0xe3   :  { %v175_v23 = vadd.f32 %v174_v21, %v30_v19  ;;  %v176_v25 = vpop.f32.mrb[1].mxu1  ;;  %v136_v26 = vadd.f32 %v135_v24, %v30_v19  ;;  %v137_v28 = vpop.f32.mrb[2].mxu0 }
  0xe4   :  { %v177_v27 = vadd.f32 %v176_v25, %v30_v19  ;;  %v178_v29 = vpop.f32.mrb[2].mxu1  ;;  %v138_v30 = vpop.f32.mrb[3].mxu0 }
  0xe5   :  { %v179_v31 = vpop.f32.mrb[3].mxu1  ;;  %v221_v32 = vpack.c.bf16 %v136_v26, %v134_v22 }
  0xe6   :  { %v222_v33 = vpack.c.bf16 %v177_v27, %v175_v23 }
  0xe7   :  { %197 = vst [vmem:[%s311_s3] sm:$0xff] %v221_v32 }
  0xe8   :  { %198 = vst [vmem:[%s311_s3 + $0x8] sm:$0xff] %v222_v33 }

// kernel: _lambda_.44
= control target key start
LH: loop header
LB: loop body
LE: loop exit
PB: predicated region body
PF: predicated region fallthrough
CT: control target
= control target key end

     0   :  { %v340_v1 = vmov 0   ;;  %vm125_vm0 = vcmask 1043456   ;;  %vm121_vm1 = vcmask 588800   ;;  %s419_s0 = inlined_call_operand.vmem [shape: bf16[72,512], index: 0, kind: input, shape index: {}]   ;;  %s420_s1 = inlined_call_operand.vmem [shape: bf16[8,72], index: 1, kind: input, shape index: {}]   ;;  %s421_s2 = inlined_call_operand.vmem [shape: bf16[8,512], index: 2, kind: output, shape index: {}]  }
   0x1   :  { %v310_v0 = vld [vmem:[%s419_s0 + $0x4] ss:$16 sps:$4 sm:$0xff]   ;;  %170 = vmatprep.mubr.bf16.mxu0 %v340_v1  ;;  %211 = vmatprep.mubr.bf16.mxu1 %v340_v1  ;;  %v312_v2 = vld [vmem:[%s419_s0 + $0xc] ss:$16 sps:$4 sm:$0xff]   ;;  %v314_v3 = vld [vmem:[%s419_s0] ss:$16 sps:$4 sm:$0xff]  }
   0x2   :  { %138 = vmatprep.subr.bf16.mxu0 %v310_v0  ;;  %v315_v4 = vld [vmem:[%s419_s0 + $0x8] ss:$16 sps:$4 sm:$0xff]   ;;  %179 = vmatprep.subr.bf16.mxu1 %v312_v2  ;;  %v316_v5 = vld [vmem:[%s419_s0 + $0x24] ss:$16 sps:$4 sm:$0xff]   ;;  %v318_v6 = vld [vmem:[%s419_s0 + $0x2c] ss:$16 sps:$4 sm:$0xff]  }
   0x3   :  { %139 = vmatpush1.bf16.msra.mxu0 %v314_v3  ;;  %180 = vmatpush1.bf16.msra.mxu1 %v315_v4  ;;  %v320_v7 = vld [vmem:[%s419_s0 + $0x20] ss:$16 sps:$4 sm:$0xff]   ;;  %v321_v8 = vld [vmem:[%s419_s0 + $0x28] ss:$16 sps:$4 sm:$0xff]   ;;  %v322_v9 = vld [vmem:[%s419_s0 + $0x44] ss:$16 sps:$4 sm:$0xff]  }
   0x4   :  { %140 = vmatprep.subr.bf16.mxu0 %v316_v5  ;;  %181 = vmatprep.subr.bf16.mxu1 %v318_v6  ;;  %v324_v10 = vld [vmem:[%s419_s0 + $0x4c] ss:$16 sps:$4 sm:$0xff]   ;;  %v326_v11 = vld [vmem:[%s419_s0 + $0x40] ss:$16 sps:$4 sm:$0xff]   ;;  %v327_v12 = vld [vmem:[%s419_s0 + $0x48] ss:$16 sps:$4 sm:$0xff]  }
   0x5   :  { %v328_v13 = vld [vmem:[%s419_s0 + $0x64] ss:$16 sps:$4 sm:$0xff]   ;;  %v330_v14 = vld [vmem:[%s419_s0 + $0x6c] ss:$16 sps:$4 sm:$0xff]   ;;  %v332_v17 = vld [vmem:[%s419_s0 + $0x60] ss:$16 sps:$4 sm:$0xff]  }
   0x6   :  { %v29_v15 = vld [vmem:[%s419_s0 + $0x80] sm:$0xff]  ;;  %v30_v16 = vld [vmem:[%s419_s0 + $0x88] sm:$0xff] }
   0x7   :  { %141 = vmatpush1.bf16.msra.mxu0 %v320_v7  ;;  %182 = vmatpush1.bf16.msra.mxu1 %v321_v8  ;;  %v333_v18 = vld [vmem:[%s419_s0 + $0x68] ss:$16 sps:$4 sm:$0xff]   ;;  %v298_v19 = vcombine.high %v29_v15, %v29_v15  ;;  %v300_v20 = vcombine.high %v30_v16, %v30_v16  ;;  %v297_v21 = vcombine.low %v29_v15, %v29_v15  ;;  %v12_v25 = vld [vmem:[%s420_s1] sm:$0xf] }
   0x8   :  { %142 = vmatprep.subr.bf16.mxu0 %v322_v9  ;;  %183 = vmatprep.subr.bf16.mxu1 %v324_v10  ;;  %v299_v22 = vcombine.low %v30_v16, %v30_v16 }
   0x9   :  { %v127_v23 = vsel %vm125_vm0, %v297_v21, 0 }
   0xa   :  { %v133_v24 = vsel %vm125_vm0, %v299_v22, 0 }
   0xb   :  { %143 = vmatpush1.bf16.msra.mxu0 %v326_v11  ;;  %184 = vmatpush1.bf16.msra.mxu1 %v327_v12 }
   0xc   :  { %144 = vmatprep.subr.bf16.mxu0 %v328_v13  ;;  %185 = vmatprep.subr.bf16.mxu1 %v330_v14 }
   0xf   :  { %145 = vmatpush1.bf16.msra.mxu0 %v332_v17  ;;  %186 = vmatpush1.bf16.msra.mxu1 %v333_v18 }
  0x10   :  { %301 = vmatprep.subr.msk.bf16.mxu0 %vm125_vm0, %v298_v19  ;;  %303 = vmatprep.subr.msk.bf16.mxu1 %vm125_vm0, %v300_v20 }
  0x13   :  { %147 = vmatpush1.bf16.msra.mxu0 %v127_v23  ;;  %188 = vmatpush1.bf16.msra.mxu1 %v133_v24 }
  0x16   :  { %302 = vmatmul.mubr.msk.bf16.vlgmr.msra.gmra.mrb[0].mxu0 %vm121_vm1, %v12_v25  ;;  %304 = vmatmul.mubr.msk.bf16.vlgmr.msra.gmra.mrb[0].mxu1 %vm121_vm1, %v12_v25 }
  0xe9   :  { %v172_v26 = vpop.f32.mrb[0].mxu0  ;;  %v213_v27 = vpop.f32.mrb[0].mxu1 }
  0xea   :  { %v174_v28 = vpop.f32.mrb[1].mxu0  ;;  %v215_v29 = vpop.f32.mrb[1].mxu1 }
  0xeb   :  { %v220_v30 = vadd.f32 %v174_v28, %v172_v26  ;;  %v176_v31 = vpop.f32.mrb[2].mxu0  ;;  %v217_v32 = vpop.f32.mrb[2].mxu1 }
  0xec   :  { %v177_v33 = vpop.f32.mrb[3].mxu0  ;;  %v218_v34 = vpop.f32.mrb[3].mxu1 }
  0xed   :  { %v221_v35 = vadd.f32 %v220_v30, %v213_v27 }
  0xef   :  { %v222_v36 = vadd.f32 %v221_v35, %v215_v29 }
  0xf1   :  { %223 = vadd.xlane.f32.xlu0 %v222_v36 }
 0x17e   :  { %v224_v37 = vpop.xlane.xlu0 %223 }
 0x17f   :  { %v226_v38 = vmul.f32 0.001953125, %v224_v37 }
 0x181   :  { %v227_v39 = vsub.f32 %v172_v26, %v226_v38  ;;  %v228_v40 = vsub.f32 %v174_v28, %v226_v38  ;;  %v229_v41 = vsub.f32 %v213_v27, %v226_v38  ;;  %v230_v42 = vsub.f32 %v215_v29, %v226_v38 }
 0x183   :  { %v231_v43 = vmul.f32 %v227_v39, %v227_v39  ;;  %v232_v44 = vmul.f32 %v228_v40, %v228_v40  ;;  %v233_v45 = vmul.f32 %v229_v41, %v229_v41  ;;  %v234_v47 = vmul.f32 %v230_v42, %v230_v42 }
 0x185   :  { %v235_v46 = vadd.f32 %v232_v44, %v231_v43 }
 0x187   :  { %v236_v48 = vadd.f32 %v235_v46, %v233_v45 }
 0x189   :  { %v237_v49 = vadd.f32 %v236_v48, %v234_v47 }
 0x18b   :  { %238 = vadd.xlane.f32.xlu0 %v237_v49 }
 0x218   :  { %v239_v50 = vpop.xlane.xlu0 %238 }
 0x219   :  { %v240_v51 = vmul.f32 0.001953125, %v239_v50 }
 0x21b   :  { %v241_v52 = vadd.f32 1e-05, %v240_v51 }
 0x21d   :  { %338 = vrsqrt.f32 %v241_v52 }
 0x227   :  { %v339_v53 = vpop.eup %338 }
 0x228   :  { %v243_v54 = vmul.f32 %v339_v53, %v227_v39  ;;  %v244_v55 = vmul.f32 %v339_v53, %v228_v40  ;;  %v245_v56 = vmul.f32 %v339_v53, %v229_v41  ;;  %v246_v57 = vmul.f32 %v339_v53, %v230_v42 }
 0x22a   :  { %vm247_vm2 = vcmp.ge.f32.partialorder %v243_v54, 0.0  ;;  %vm248_vm3 = vcmp.ge.f32.partialorder %v244_v55, 0.0  ;;  %vm249_vm4 = vcmp.ge.f32.partialorder %v245_v56, 0.0  ;;  %vm250_vm5 = vcmp.ge.f32.partialorder %v246_v57, 0.0 }
 0x22b   :  { %v251_v58 = vmul.f32 0.2, %v243_v54  ;;  %v252_v59 = vmul.f32 0.2, %v244_v55  ;;  %v253_v60 = vmul.f32 0.2, %v245_v56 }
 0x22c   :  { %v254_v61 = vmul.f32 0.2, %v246_v57 }
 0x22d   :  { %v255_v62 = vsel %vm247_vm2, %v243_v54, %v251_v58  ;;  %v256_v63 = vsel %vm248_vm3, %v244_v55, %v252_v59  ;;  %v257_v0 = vsel %vm249_vm4, %v245_v56, %v253_v60 }
 0x22e   :  { %v258_v1 = vsel %vm250_vm5, %v246_v57, %v254_v61  ;;  %v307_v2 = vpack.c.bf16 %v256_v63, %v255_v62 }
 0x22f   :  { %v308_v3 = vpack.c.bf16 %v258_v1, %v257_v0 }
 0x230   :  { %275 = vst [vmem:[%s421_s2] sm:$0xff] %v307_v2 }
 0x231   :  { %276 = vst [vmem:[%s421_s2 + $0x8] sm:$0xff] %v308_v3 }

// kernel: _lambda_.69
= control target key start
LH: loop header
LB: loop body
LE: loop exit
PB: predicated region body
PF: predicated region fallthrough
CT: control target
= control target key end

     0   :  { %vm18_vm0 = vcmask 1043456   ;;  %v96_v0 = vmov 0.0   ;;  %vm97_vm1 = vmmov 0   ;;  %vm14_vm2 = vcmask 64512   ;;  %s122_s0 = inlined_call_operand.vmem [shape: bf16[8,128], index: 0, kind: input, shape index: {}]   ;;  %s123_s1 = inlined_call_operand.vmem [shape: bf16[8,8], index: 1, kind: input, shape index: {}]   ;;  %s124_s2 = inlined_call_operand.vmem [shape: bf16[8,128], index: 2, kind: output, shape index: {}]  }
   0x1   :  { %86 = vmatprep.subr.bf16.mxu0 %v96_v0  ;;  %v13_v1 = vld [vmem:[%s122_s0] sm:$0xf]  ;;  %88 = vmatprep.mubr.msk.bf16.mxu0 %vm97_vm1, %v96_v0 }
   0x2   :  { %v20_v2 = vsel %vm18_vm0, %v13_v1, 0  ;;  %v12_v3 = vld [vmem:[%s123_s1] sm:$0xf] }
   0x3   :  { %87 = vmatpush3.bf16.msra.mxu0 %v20_v2 }
   0x6   :  { %89 = vmatmul.mubr.msk.bf16.vlgmr.msra.gmra.mrb[0].mxu0 %vm14_vm2, %v12_v3 }
  0xd9   :  { %v56_v4 = vpop.f32.mrb[0].mxu0 }
  0xda   :  { %62 = vadd.xlane.f32.xlu0 %v56_v4  ;;  %v90_v5 = vpop.f32.mrb[1].mxu0 }
  0xdb   :  { %v59_v6 = vpop.f32.mrb[2].mxu0 }
  0xdc   :  { %v91_v7 = vpop.f32.mrb[3].mxu0 }
 0x167   :  { %v63_v8 = vpop.xlane.xlu0 %62 }
 0x168   :  { %v65_v9 = vmul.f32 0.0078125, %v63_v8 }
 0x16a   :  { %v66_v10 = vsub.f32 %v56_v4, %v65_v9 }
 0x16c   :  { %v67_v11 = vmul.f32 %v66_v10, %v66_v10 }
 0x16e   :  { %68 = vadd.xlane.f32.xlu0 %v67_v11 }
 0x1fb   :  { %v69_v12 = vpop.xlane.xlu0 %68 }
 0x1fc   :  { %v70_v13 = vmul.f32 0.0078125, %v69_v12 }
 0x1fe   :  { %v71_v14 = vadd.f32 1e-05, %v70_v13 }
 0x200   :  { %94 = vrsqrt.f32 %v71_v14 }
 0x20a   :  { %v95_v15 = vpop.eup %94 }
 0x20b   :  { %v73_v16 = vmul.f32 %v95_v15, %v66_v10 }
 0x20d   :  { %vm74_vm3 = vcmp.ge.f32.partialorder %v73_v16, 0.0  ;;  %v75_v17 = vmul.f32 0.2, %v73_v16 }
 0x20f   :  { %v76_v18 = vsel %vm74_vm3, %v73_v16, %v75_v17 }
 0x210   :  { %v77_v19 = vpack.c.bf16 %v76_v18, %v76_v18 }
 0x212   :  { %78 = vst [vmem:[%s124_s2] sm:$0xf] %v77_v19 }

// kernel: _lambda_.46
= control target key start
LH: loop header
LB: loop body
LE: loop exit
PB: predicated region body
PF: predicated region fallthrough
CT: control target
= control target key end

     0   :  { %v147_v0 = vmov 0.0   ;;  %vm148_vm0 = vmmov 0   ;;  %v149_v2 = vmov 0   ;;  %vm62_vm1 = vcmask 1043456   ;;  %s194_s0 = inlined_call_operand.vmem [shape: bf16[72,128], index: 0, kind: input, shape index: {}]   ;;  %s195_s2 = inlined_call_operand.vmem [shape: f32[8,1], index: 2, kind: input, shape index: {}]   ;;  %s196_s1 = inlined_call_operand.vmem [shape: bf16[8,72], index: 1, kind: input, shape index: {}]   ;;  %s197_s3 = inlined_call_operand.vmem [shape: bf16[8,128], index: 3, kind: output, shape index: {}]  }
   0x1   :  { %124 = vmatprep.subr.bf16.mxu0 %v147_v0  ;;  %v142_v1 = vld [vmem:[%s194_s0] sm:$0xff]   ;;  %134 = vmatprep.mubr.msk.bf16.mxu0 %vm148_vm0, %v147_v0  ;;  %v143_v3 = vld [vmem:[%s194_s0 + $0x8] sm:$0xff]   ;;  %v144_v5 = vld [vmem:[%s194_s0 + $0x10] sm:$0xff]   ;;  %vm58_vm2 = vcmask 588800  }
   0x2   :  { %141 = vset.pattern.permute.xlu0 %v149_v2  ;;  %125 = vmatpush3.bf16.msra.mxu0 %v142_v1  ;;  %v25_v4 = vld [vmem:[%s195_s2] sm:$0xff]  ;;  %v145_v6 = vld [vmem:[%s194_s0 + $0x18] sm:$0xff]  }
   0x3   :  { %126 = vmatprep.subr.bf16.mxu0 %v147_v0  ;;  %28 = vperm.xlu0 %141, %v25_v4   ;;  %v146_v7 = vld [vmem:[%s194_s0 + $0x20] ss:$0 sps:$4 sm:$0xff]  }
   0x4   :  { %v64_v8 = vsel %vm62_vm1, %v146_v7, 0  ;;  %v15_v9 = vld [vmem:[%s196_s1] sm:$0xf] }
   0x6   :  { %127 = vmatpush3.bf16.msra.mxu0 %v143_v3 }
   0x7   :  { %128 = vmatprep.subr.bf16.mxu0 %v147_v0 }
   0xa   :  { %129 = vmatpush3.bf16.msra.mxu0 %v144_v5 }
   0xb   :  { %130 = vmatprep.subr.bf16.mxu0 %v147_v0 }
   0xe   :  { %131 = vmatpush3.bf16.msra.mxu0 %v145_v6 }
   0xf   :  { %132 = vmatprep.subr.bf16.mxu0 %v147_v0 }
  0x12   :  { %133 = vmatpush3.bf16.msra.mxu0 %v64_v8 }
  0x15   :  { %135 = vmatmul.mubr.msk.bf16.vlgmr.msra.gmra.mrb[0].mxu0 %vm58_vm2, %v15_v9 }
  0x82   :  { %v29_v10 = vpop.permute.xlu0 %28 }
  0xe8   :  { %v100_v11 = vpop.f32.mrb[0].mxu0 }
  0xe9   :  { %v101_v12 = vadd.f32 %v100_v11, %v29_v10  ;;  %v136_v13 = vpop.f32.mrb[1].mxu0 }
  0xea   :  { %v103_v14 = vpop.f32.mrb[2].mxu0 }
  0xeb   :  { %v106_v15 = vpack.c.bf16 %v101_v12, %v101_v12  ;;  %v137_v16 = vpop.f32.mrb[3].mxu0 }
  0xed   :  { %107 = vst [vmem:[%s197_s3] sm:$0xf] %v106_v15 }

// kernel: _lambda_.47
= control target key start
LH: loop header
LB: loop body
LE: loop exit
PB: predicated region body
PF: predicated region fallthrough
CT: control target
= control target key end

     0   :  { %v153_v0 = vmov 0.0   ;;  %vm154_vm0 = vmmov 0   ;;  %vm53_vm1 = vcmask 1043456   ;;  %vm49_vm2 = vcmask 588800   ;;  %s191_s0 = inlined_call_operand.vmem [shape: bf16[72,128], index: 0, kind: input, shape index: {}]   ;;  %s192_s1 = inlined_call_operand.vmem [shape: bf16[8,72], index: 1, kind: input, shape index: {}]   ;;  %s193_s2 = inlined_call_operand.vmem [shape: bf16[8,128], index: 2, kind: output, shape index: {}]  }
   0x1   :  { %130 = vmatprep.subr.bf16.mxu0 %v153_v0  ;;  %v146_v1 = vld [vmem:[%s191_s0] sm:$0xff]   ;;  %140 = vmatprep.mubr.msk.bf16.mxu0 %vm154_vm0, %v153_v0  ;;  %v147_v2 = vld [vmem:[%s191_s0 + $0x8] sm:$0xff]   ;;  %v148_v3 = vld [vmem:[%s191_s0 + $0x10] sm:$0xff]  }
   0x2   :  { %131 = vmatpush3.bf16.msra.mxu0 %v146_v1  ;;  %v149_v4 = vld [vmem:[%s191_s0 + $0x18] sm:$0xff]   ;;  %v150_v5 = vld [vmem:[%s191_s0 + $0x20] ss:$0 sps:$4 sm:$0xff]  }
   0x3   :  { %132 = vmatprep.subr.bf16.mxu0 %v153_v0  ;;  %v55_v6 = vsel %vm53_vm1, %v150_v5, 0  ;;  %v12_v7 = vld [vmem:[%s192_s1] sm:$0xf] }
   0x6   :  { %133 = vmatpush3.bf16.msra.mxu0 %v147_v2 }
   0x7   :  { %134 = vmatprep.subr.bf16.mxu0 %v153_v0 }
   0xa   :  { %135 = vmatpush3.bf16.msra.mxu0 %v148_v3 }
   0xb   :  { %136 = vmatprep.subr.bf16.mxu0 %v153_v0 }
   0xe   :  { %137 = vmatpush3.bf16.msra.mxu0 %v149_v4 }
   0xf   :  { %138 = vmatprep.subr.bf16.mxu0 %v153_v0 }
  0x12   :  { %139 = vmatpush3.bf16.msra.mxu0 %v55_v6 }
  0x15   :  { %141 = vmatmul.mubr.msk.bf16.vlgmr.msra.gmra.mrb[0].mxu0 %vm49_vm2, %v12_v7 }
  0xe8   :  { %v91_v8 = vpop.f32.mrb[0].mxu0 }
  0xe9   :  { %97 = vadd.xlane.f32.xlu0 %v91_v8  ;;  %v142_v9 = vpop.f32.mrb[1].mxu0 }
  0xea   :  { %v94_v10 = vpop.f32.mrb[2].mxu0 }
  0xeb   :  { %v143_v11 = vpop.f32.mrb[3].mxu0 }
 0x176   :  { %v98_v12 = vpop.xlane.xlu0 %97 }
 0x177   :  { %v100_v13 = vmul.f32 0.0078125, %v98_v12 }
 0x179   :  { %v101_v14 = vsub.f32 %v91_v8, %v100_v13 }
 0x17b   :  { %v102_v15 = vmul.f32 %v101_v14, %v101_v14 }
 0x17d   :  { %103 = vadd.xlane.f32.xlu0 %v102_v15 }
 0x20a   :  { %v104_v16 = vpop.xlane.xlu0 %103 }
 0x20b   :  { %v105_v17 = vmul.f32 0.0078125, %v104_v16 }
 0x20d   :  { %v106_v18 = vadd.f32 1e-05, %v105_v17 }
 0x20f   :  { %151 = vrsqrt.f32 %v106_v18 }
 0x219   :  { %v152_v19 = vpop.eup %151 }
 0x21a   :  { %v108_v20 = vmul.f32 %v152_v19, %v101_v14 }
 0x21c   :  { %vm109_vm3 = vcmp.ge.f32.partialorder %v108_v20, 0.0  ;;  %v110_v21 = vmul.f32 0.2, %v108_v20 }
 0x21e   :  { %v111_v22 = vsel %vm109_vm3, %v108_v20, %v110_v21 }
 0x21f   :  { %v112_v23 = vpack.c.bf16 %v111_v22, %v111_v22 }
 0x221   :  { %113 = vst [vmem:[%s193_s2] sm:$0xf] %v112_v23 }

// kernel: _lambda_.49
= control target key start
LH: loop header
LB: loop body
LE: loop exit
PB: predicated region body
PF: predicated region fallthrough
CT: control target
= control target key end

     0   :  { %v147_v0 = vmov 0.0   ;;  %vm148_vm0 = vmmov 0   ;;  %v149_v2 = vmov 0   ;;  %vm62_vm1 = vcmask 1043456   ;;  %s194_s0 = inlined_call_operand.vmem [shape: bf16[72,32], index: 0, kind: input, shape index: {}]   ;;  %s195_s2 = inlined_call_operand.vmem [shape: f32[8,1], index: 2, kind: input, shape index: {}]   ;;  %s196_s1 = inlined_call_operand.vmem [shape: bf16[8,72], index: 1, kind: input, shape index: {}]   ;;  %s197_s3 = inlined_call_operand.vmem [shape: f32[8,32], index: 3, kind: output, shape index: {}]  }
   0x1   :  { %124 = vmatprep.subr.bf16.mxu0 %v147_v0  ;;  %v142_v1 = vld [vmem:[%s194_s0] sm:$0xff]   ;;  %134 = vmatprep.mubr.msk.bf16.mxu0 %vm148_vm0, %v147_v0  ;;  %v143_v3 = vld [vmem:[%s194_s0 + $0x8] sm:$0xff]   ;;  %v144_v5 = vld [vmem:[%s194_s0 + $0x10] sm:$0xff]   ;;  %vm58_vm2 = vcmask 588800   ;;  %vm106_vm3 = vcmask 261120  }
   0x2   :  { %141 = vset.pattern.permute.xlu0 %v149_v2  ;;  %125 = vmatpush3.bf16.msra.mxu0 %v142_v1  ;;  %v25_v4 = vld [vmem:[%s195_s2] sm:$0xff]  ;;  %v145_v6 = vld [vmem:[%s194_s0 + $0x18] sm:$0xff]  }
   0x3   :  { %126 = vmatprep.subr.bf16.mxu0 %v147_v0  ;;  %28 = vperm.xlu0 %141, %v25_v4   ;;  %v146_v7 = vld [vmem:[%s194_s0 + $0x20] ss:$0 sps:$4 sm:$0xff]  }
   0x4   :  { %v64_v8 = vsel %vm62_vm1, %v146_v7, 0  ;;  %v15_v9 = vld [vmem:[%s196_s1] sm:$0xf] }
   0x6   :  { %127 = vmatpush3.bf16.msra.mxu0 %v143_v3 }
   0x7   :  { %128 = vmatprep.subr.bf16.mxu0 %v147_v0 }
   0xa   :  { %129 = vmatpush3.bf16.msra.mxu0 %v144_v5 }
   0xb   :  { %130 = vmatprep.subr.bf16.mxu0 %v147_v0 }
   0xe   :  { %131 = vmatpush3.bf16.msra.mxu0 %v145_v6 }
   0xf   :  { %132 = vmatprep.subr.bf16.mxu0 %v147_v0 }
  0x12   :  { %133 = vmatpush3.bf16.msra.mxu0 %v64_v8 }
  0x15   :  { %135 = vmatmul.mubr.msk.bf16.vlgmr.msra.gmra.mrb[0].mxu0 %vm58_vm2, %v15_v9 }
  0x82   :  { %v29_v10 = vpop.permute.xlu0 %28 }
  0xe8   :  { %v100_v11 = vpop.f32.mrb[0].mxu0 }
  0xe9   :  { %v101_v12 = vadd.f32 %v100_v11, %v29_v10  ;;  %v136_v13 = vpop.f32.mrb[1].mxu0 }
  0xea   :  { %v103_v14 = vpop.f32.mrb[2].mxu0 }
  0xeb   :  { %107 = vst.msk [vmem:[%s197_s3] sm:$0xff] %vm106_vm3, %v101_v12  ;;  %v137_v15 = vpop.f32.mrb[3].mxu0 }

// kernel: _lambda_.64
= control target key start
LH: loop header
LB: loop body
LE: loop exit
PB: predicated region body
PF: predicated region fallthrough
CT: control target
= control target key end

     0   :  { %vm18_vm0 = vcmask 1043456   ;;  %v98_v0 = vmov 0.0   ;;  %vm99_vm1 = vmmov 0   ;;  %vm14_vm2 = vcmask 64512   ;;  %s127_s0 = inlined_call_operand.vmem [shape: bf16[8,32], index: 0, kind: input, shape index: {}]   ;;  %s128_s1 = inlined_call_operand.vmem [shape: bf16[8,8], index: 1, kind: input, shape index: {}]   ;;  %s129_s2 = inlined_call_operand.vmem [shape: f32[8,32], index: 2, kind: output, shape index: {}]  }
   0x1   :  { %88 = vmatprep.subr.bf16.mxu0 %v98_v0  ;;  %v13_v1 = vld [vmem:[%s127_s0] sm:$0xf]  ;;  %90 = vmatprep.mubr.msk.bf16.mxu0 %vm99_vm1, %v98_v0  ;;  %vm62_vm3 = vcmask 261120  }
   0x2   :  { %v20_v2 = vsel %vm18_vm0, %v13_v1, 0  ;;  %v12_v3 = vld [vmem:[%s128_s1] sm:$0xf] }
   0x3   :  { %89 = vmatpush3.bf16.msra.mxu0 %v20_v2 }
   0x6   :  { %91 = vmatmul.mubr.msk.bf16.vlgmr.msra.gmra.mrb[0].mxu0 %vm14_vm2, %v12_v3 }
  0xd9   :  { %v56_v4 = vpop.f32.mrb[0].mxu0 }
  0xda   :  { %v92_v5 = vpop.f32.mrb[1].mxu0  ;;  %v63_v6 = vsel %vm62_vm3, %v56_v4, 0.0 }
  0xdb   :  { %64 = vadd.xlane.f32.xlu0 %v63_v6  ;;  %v59_v7 = vpop.f32.mrb[2].mxu0 }
  0xdc   :  { %v93_v8 = vpop.f32.mrb[3].mxu0 }
 0x168   :  { %v65_v9 = vpop.xlane.xlu0 %64 }
 0x169   :  { %v67_v10 = vmul.f32 0.03125, %v65_v9 }
 0x16b   :  { %v68_v11 = vsub.f32 %v56_v4, %v67_v10 }
 0x16d   :  { %v69_v12 = vmul.f32 %v68_v11, %v68_v11 }
 0x16f   :  { %v70_v13 = vsel %vm62_vm3, %v69_v12, 0.0 }
 0x170   :  { %71 = vadd.xlane.f32.xlu0 %v70_v13 }
 0x1fd   :  { %v72_v14 = vpop.xlane.xlu0 %71 }
 0x1fe   :  { %v73_v15 = vmul.f32 0.03125, %v72_v14 }
 0x200   :  { %v74_v16 = vadd.f32 1e-05, %v73_v15 }
 0x202   :  { %96 = vrsqrt.f32 %v74_v16 }
 0x20c   :  { %v97_v17 = vpop.eup %96 }
 0x20d   :  { %v76_v18 = vmul.f32 %v97_v17, %v68_v11 }
 0x20f   :  { %vm77_vm4 = vcmp.ge.f32.partialorder %v76_v18, 0.0  ;;  %v78_v19 = vmul.f32 0.2, %v76_v18 }
 0x211   :  { %v79_v20 = vsel %vm77_vm4, %v76_v18, %v78_v19 }
 0x212   :  { %80 = vst.msk [vmem:[%s129_s2] sm:$0xff] %vm62_vm3, %v79_v20 }

// kernel: _lambda_.50
= control target key start
LH: loop header
LB: loop body
LE: loop exit
PB: predicated region body
PF: predicated region fallthrough
CT: control target
= control target key end

     0   :  { %v155_v0 = vmov 0.0   ;;  %vm156_vm0 = vmmov 0   ;;  %vm53_vm1 = vcmask 1043456   ;;  %vm49_vm2 = vcmask 588800   ;;  %s196_s0 = inlined_call_operand.vmem [shape: bf16[72,32], index: 0, kind: input, shape index: {}]   ;;  %s197_s1 = inlined_call_operand.vmem [shape: bf16[8,72], index: 1, kind: input, shape index: {}]   ;;  %s198_s2 = inlined_call_operand.vmem [shape: f32[8,32], index: 2, kind: output, shape index: {}]  }
   0x1   :  { %132 = vmatprep.subr.bf16.mxu0 %v155_v0  ;;  %v148_v1 = vld [vmem:[%s196_s0] sm:$0xff]   ;;  %142 = vmatprep.mubr.msk.bf16.mxu0 %vm156_vm0, %v155_v0  ;;  %v149_v2 = vld [vmem:[%s196_s0 + $0x8] sm:$0xff]   ;;  %v150_v3 = vld [vmem:[%s196_s0 + $0x10] sm:$0xff]   ;;  %vm97_vm3 = vcmask 261120  }
   0x2   :  { %133 = vmatpush3.bf16.msra.mxu0 %v148_v1  ;;  %v151_v4 = vld [vmem:[%s196_s0 + $0x18] sm:$0xff]   ;;  %v152_v5 = vld [vmem:[%s196_s0 + $0x20] ss:$0 sps:$4 sm:$0xff]  }
   0x3   :  { %134 = vmatprep.subr.bf16.mxu0 %v155_v0  ;;  %v55_v6 = vsel %vm53_vm1, %v152_v5, 0  ;;  %v12_v7 = vld [vmem:[%s197_s1] sm:$0xf] }
   0x6   :  { %135 = vmatpush3.bf16.msra.mxu0 %v149_v2 }
   0x7   :  { %136 = vmatprep.subr.bf16.mxu0 %v155_v0 }
   0xa   :  { %137 = vmatpush3.bf16.msra.mxu0 %v150_v3 }
   0xb   :  { %138 = vmatprep.subr.bf16.mxu0 %v155_v0 }
   0xe   :  { %139 = vmatpush3.bf16.msra.mxu0 %v151_v4 }
   0xf   :  { %140 = vmatprep.subr.bf16.mxu0 %v155_v0 }
  0x12   :  { %141 = vmatpush3.bf16.msra.mxu0 %v55_v6 }
  0x15   :  { %143 = vmatmul.mubr.msk.bf16.vlgmr.msra.gmra.mrb[0].mxu0 %vm49_vm2, %v12_v7 }
  0xe8   :  { %v91_v8 = vpop.f32.mrb[0].mxu0 }
  0xe9   :  { %v144_v9 = vpop.f32.mrb[1].mxu0  ;;  %v98_v10 = vsel %vm97_vm3, %v91_v8, 0.0 }
  0xea   :  { %99 = vadd.xlane.f32.xlu0 %v98_v10  ;;  %v94_v11 = vpop.f32.mrb[2].mxu0 }
  0xeb   :  { %v145_v12 = vpop.f32.mrb[3].mxu0 }
 0x177   :  { %v100_v13 = vpop.xlane.xlu0 %99 }
 0x178   :  { %v102_v14 = vmul.f32 0.03125, %v100_v13 }
 0x17a   :  { %v103_v15 = vsub.f32 %v91_v8, %v102_v14 }
 0x17c   :  { %v104_v16 = vmul.f32 %v103_v15, %v103_v15 }
 0x17e   :  { %v105_v17 = vsel %vm97_vm3, %v104_v16, 0.0 }
 0x17f   :  { %106 = vadd.xlane.f32.xlu0 %v105_v17 }
 0x20c   :  { %v107_v18 = vpop.xlane.xlu0 %106 }
 0x20d   :  { %v108_v19 = vmul.f32 0.03125, %v107_v18 }
 0x20f   :  { %v109_v20 = vadd.f32 1e-05, %v108_v19 }
 0x211   :  { %153 = vrsqrt.f32 %v109_v20 }
 0x21b   :  { %v154_v21 = vpop.eup %153 }
 0x21c   :  { %v111_v22 = vmul.f32 %v154_v21, %v103_v15 }
 0x21e   :  { %vm112_vm4 = vcmp.ge.f32.partialorder %v111_v22, 0.0  ;;  %v113_v23 = vmul.f32 0.2, %v111_v22 }
 0x220   :  { %v114_v24 = vsel %vm112_vm4, %v111_v22, %v113_v23 }
 0x221   :  { %115 = vst.msk [vmem:[%s198_s2] sm:$0xff] %vm97_vm3, %v114_v24 }

// kernel: _lambda_.52
= control target key start
LH: loop header
LB: loop body
LE: loop exit
PB: predicated region body
PF: predicated region fallthrough
CT: control target
= control target key end

     0   :  { %v147_v0 = vmov 0.0   ;;  %vm148_vm0 = vmmov 0   ;;  %v149_v2 = vmov 0   ;;  %vm62_vm1 = vcmask 1043456   ;;  %s194_s0 = inlined_call_operand.vmem [shape: bf16[72,8], index: 0, kind: input, shape index: {}]   ;;  %s195_s2 = inlined_call_operand.vmem [shape: f32[8,1], index: 2, kind: input, shape index: {}]   ;;  %s196_s1 = inlined_call_operand.vmem [shape: bf16[8,72], index: 1, kind: input, shape index: {}]   ;;  %s197_s3 = inlined_call_operand.vmem [shape: f32[8,8], index: 3, kind: output, shape index: {}]  }
   0x1   :  { %124 = vmatprep.subr.bf16.mxu0 %v147_v0  ;;  %v142_v1 = vld [vmem:[%s194_s0] sm:$0xff]   ;;  %134 = vmatprep.mubr.msk.bf16.mxu0 %vm148_vm0, %v147_v0  ;;  %v143_v3 = vld [vmem:[%s194_s0 + $0x8] sm:$0xff]   ;;  %v144_v5 = vld [vmem:[%s194_s0 + $0x10] sm:$0xff]   ;;  %vm58_vm2 = vcmask 588800   ;;  %vm106_vm3 = vcmask 64512  }
   0x2   :  { %141 = vset.pattern.permute.xlu0 %v149_v2  ;;  %125 = vmatpush3.bf16.msra.mxu0 %v142_v1  ;;  %v25_v4 = vld [vmem:[%s195_s2] sm:$0xff]  ;;  %v145_v6 = vld [vmem:[%s194_s0 + $0x18] sm:$0xff]  }
   0x3   :  { %126 = vmatprep.subr.bf16.mxu0 %v147_v0  ;;  %28 = vperm.xlu0 %141, %v25_v4   ;;  %v146_v7 = vld [vmem:[%s194_s0 + $0x20] ss:$0 sps:$4 sm:$0xff]  }
   0x4   :  { %v64_v8 = vsel %vm62_vm1, %v146_v7, 0  ;;  %v15_v9 = vld [vmem:[%s196_s1] sm:$0xf] }
   0x6   :  { %127 = vmatpush3.bf16.msra.mxu0 %v143_v3 }
   0x7   :  { %128 = vmatprep.subr.bf16.mxu0 %v147_v0 }
   0xa   :  { %129 = vmatpush3.bf16.msra.mxu0 %v144_v5 }
   0xb   :  { %130 = vmatprep.subr.bf16.mxu0 %v147_v0 }
   0xe   :  { %131 = vmatpush3.bf16.msra.mxu0 %v145_v6 }
   0xf   :  { %132 = vmatprep.subr.bf16.mxu0 %v147_v0 }
  0x12   :  { %133 = vmatpush3.bf16.msra.mxu0 %v64_v8 }
  0x15   :  { %135 = vmatmul.mubr.msk.bf16.vlgmr.msra.gmra.mrb[0].mxu0 %vm58_vm2, %v15_v9 }
  0x82   :  { %v29_v10 = vpop.permute.xlu0 %28 }
  0xe8   :  { %v100_v11 = vpop.f32.mrb[0].mxu0 }
  0xe9   :  { %v101_v12 = vadd.f32 %v100_v11, %v29_v10  ;;  %v136_v13 = vpop.f32.mrb[1].mxu0 }
  0xea   :  { %v103_v14 = vpop.f32.mrb[2].mxu0 }
  0xeb   :  { %107 = vst.msk [vmem:[%s197_s3] sm:$0xff] %vm106_vm3, %v101_v12  ;;  %v137_v15 = vpop.f32.mrb[3].mxu0 }

// kernel: _lambda_.59
= control target key start
LH: loop header
LB: loop body
LE: loop exit
PB: predicated region body
PF: predicated region fallthrough
CT: control target
= control target key end

     0   :  { %vm18_vm0 = vcmask 1043456   ;;  %v97_v0 = vmov 0.0   ;;  %vm98_vm1 = vmmov 0   ;;  %vm14_vm2 = vcmask 64512   ;;  %s127_s0 = inlined_call_operand.vmem [shape: bf16[8,8], index: 0, kind: input, shape index: {}]   ;;  %s128_s1 = inlined_call_operand.vmem [shape: bf16[8,8], index: 1, kind: input, shape index: {}]   ;;  %s129_s2 = inlined_call_operand.vmem [shape: f32[8,8], index: 2, kind: output, shape index: {}]  }
   0x1   :  { %87 = vmatprep.subr.bf16.mxu0 %v97_v0  ;;  %v13_v1 = vld [vmem:[%s127_s0] sm:$0xf]  ;;  %89 = vmatprep.mubr.msk.bf16.mxu0 %vm98_vm1, %v97_v0 }
   0x2   :  { %v20_v2 = vsel %vm18_vm0, %v13_v1, 0  ;;  %v12_v3 = vld [vmem:[%s128_s1] sm:$0xf] }
   0x3   :  { %88 = vmatpush3.bf16.msra.mxu0 %v20_v2 }
   0x6   :  { %90 = vmatmul.mubr.msk.bf16.vlgmr.msra.gmra.mrb[0].mxu0 %vm14_vm2, %v12_v3 }
  0xd9   :  { %v56_v4 = vpop.f32.mrb[0].mxu0 }
  0xda   :  { %v91_v5 = vpop.f32.mrb[1].mxu0  ;;  %v62_v6 = vsel %vm14_vm2, %v56_v4, 0.0 }
  0xdb   :  { %63 = vadd.xlane.f32.xlu0 %v62_v6  ;;  %v59_v7 = vpop.f32.mrb[2].mxu0 }
  0xdc   :  { %v92_v8 = vpop.f32.mrb[3].mxu0 }
 0x168   :  { %v64_v9 = vpop.xlane.xlu0 %63 }
 0x169   :  { %v66_v10 = vmul.f32 0.125, %v64_v9 }
 0x16b   :  { %v67_v11 = vsub.f32 %v56_v4, %v66_v10 }
 0x16d   :  { %v68_v12 = vmul.f32 %v67_v11, %v67_v11 }
 0x16f   :  { %v69_v13 = vsel %vm14_vm2, %v68_v12, 0.0 }
 0x170   :  { %70 = vadd.xlane.f32.xlu0 %v69_v13 }
 0x1fd   :  { %v71_v14 = vpop.xlane.xlu0 %70 }
 0x1fe   :  { %v72_v15 = vmul.f32 0.125, %v71_v14 }
 0x200   :  { %v73_v16 = vadd.f32 1e-05, %v72_v15 }
 0x202   :  { %95 = vrsqrt.f32 %v73_v16 }
 0x20c   :  { %v96_v17 = vpop.eup %95 }
 0x20d   :  { %v75_v18 = vmul.f32 %v96_v17, %v67_v11 }
 0x20f   :  { %vm76_vm3 = vcmp.ge.f32.partialorder %v75_v18, 0.0  ;;  %v77_v19 = vmul.f32 0.2, %v75_v18 }
 0x211   :  { %v78_v20 = vsel %vm76_vm3, %v75_v18, %v77_v19 }
 0x212   :  { %79 = vst.msk [vmem:[%s129_s2] sm:$0xff] %vm14_vm2, %v78_v20 }

// kernel: _lambda_.53
= control target key start
LH: loop header
LB: loop body
LE: loop exit
PB: predicated region body
PF: predicated region fallthrough
CT: control target
= control target key end

     0   :  { %v155_v0 = vmov 0.0   ;;  %vm156_vm0 = vmmov 0   ;;  %vm53_vm1 = vcmask 1043456   ;;  %vm49_vm2 = vcmask 588800   ;;  %s196_s0 = inlined_call_operand.vmem [shape: bf16[72,8], index: 0, kind: input, shape index: {}]   ;;  %s197_s1 = inlined_call_operand.vmem [shape: bf16[8,72], index: 1, kind: input, shape index: {}]   ;;  %s198_s2 = inlined_call_operand.vmem [shape: f32[8,8], index: 2, kind: output, shape index: {}]  }
   0x1   :  { %132 = vmatprep.subr.bf16.mxu0 %v155_v0  ;;  %v148_v1 = vld [vmem:[%s196_s0] sm:$0xff]   ;;  %142 = vmatprep.mubr.msk.bf16.mxu0 %vm156_vm0, %v155_v0  ;;  %v149_v2 = vld [vmem:[%s196_s0 + $0x8] sm:$0xff]   ;;  %v150_v3 = vld [vmem:[%s196_s0 + $0x10] sm:$0xff]   ;;  %vm97_vm3 = vcmask 64512  }
   0x2   :  { %133 = vmatpush3.bf16.msra.mxu0 %v148_v1  ;;  %v151_v4 = vld [vmem:[%s196_s0 + $0x18] sm:$0xff]   ;;  %v152_v5 = vld [vmem:[%s196_s0 + $0x20] ss:$0 sps:$4 sm:$0xff]  }
   0x3   :  { %134 = vmatprep.subr.bf16.mxu0 %v155_v0  ;;  %v55_v6 = vsel %vm53_vm1, %v152_v5, 0  ;;  %v12_v7 = vld [vmem:[%s197_s1] sm:$0xf] }
   0x6   :  { %135 = vmatpush3.bf16.msra.mxu0 %v149_v2 }
   0x7   :  { %136 = vmatprep.subr.bf16.mxu0 %v155_v0 }
   0xa   :  { %137 = vmatpush3.bf16.msra.mxu0 %v150_v3 }
   0xb   :  { %138 = vmatprep.subr.bf16.mxu0 %v155_v0 }
   0xe   :  { %139 = vmatpush3.bf16.msra.mxu0 %v151_v4 }
   0xf   :  { %140 = vmatprep.subr.bf16.mxu0 %v155_v0 }
  0x12   :  { %141 = vmatpush3.bf16.msra.mxu0 %v55_v6 }
  0x15   :  { %143 = vmatmul.mubr.msk.bf16.vlgmr.msra.gmra.mrb[0].mxu0 %vm49_vm2, %v12_v7 }
  0xe8   :  { %v91_v8 = vpop.f32.mrb[0].mxu0 }
  0xe9   :  { %v144_v9 = vpop.f32.mrb[1].mxu0  ;;  %v98_v10 = vsel %vm97_vm3, %v91_v8, 0.0 }
  0xea   :  { %99 = vadd.xlane.f32.xlu0 %v98_v10  ;;  %v94_v11 = vpop.f32.mrb[2].mxu0 }
  0xeb   :  { %v145_v12 = vpop.f32.mrb[3].mxu0 }
 0x177   :  { %v100_v13 = vpop.xlane.xlu0 %99 }
 0x178   :  { %v102_v14 = vmul.f32 0.125, %v100_v13 }
 0x17a   :  { %v103_v15 = vsub.f32 %v91_v8, %v102_v14 }
 0x17c   :  { %v104_v16 = vmul.f32 %v103_v15, %v103_v15 }
 0x17e   :  { %v105_v17 = vsel %vm97_vm3, %v104_v16, 0.0 }
 0x17f   :  { %106 = vadd.xlane.f32.xlu0 %v105_v17 }
 0x20c   :  { %v107_v18 = vpop.xlane.xlu0 %106 }
 0x20d   :  { %v108_v19 = vmul.f32 0.125, %v107_v18 }
 0x20f   :  { %v109_v20 = vadd.f32 1e-05, %v108_v19 }
 0x211   :  { %153 = vrsqrt.f32 %v109_v20 }
 0x21b   :  { %v154_v21 = vpop.eup %153 }
 0x21c   :  { %v111_v22 = vmul.f32 %v154_v21, %v103_v15 }
 0x21e   :  { %vm112_vm4 = vcmp.ge.f32.partialorder %v111_v22, 0.0  ;;  %v113_v23 = vmul.f32 0.2, %v111_v22 }
 0x220   :  { %v114_v24 = vsel %vm112_vm4, %v111_v22, %v113_v23 }
 0x221   :  { %115 = vst.msk [vmem:[%s198_s2] sm:$0xff] %vm97_vm3, %v114_v24 }

// kernel: _lambda_.55
= control target key start
LH: loop header
LB: loop body
LE: loop exit
PB: predicated region body
PF: predicated region fallthrough
CT: control target
= control target key end

     0   :  { %v147_v0 = vmov 0.0   ;;  %vm148_vm0 = vmmov 0   ;;  %v149_v2 = vmov 0   ;;  %vm62_vm1 = vcmask 1043456   ;;  %s194_s0 = inlined_call_operand.vmem [shape: bf16[72,2], index: 0, kind: input, shape index: {}]   ;;  %s195_s2 = inlined_call_operand.vmem [shape: f32[8,1], index: 2, kind: input, shape index: {}]   ;;  %s196_s1 = inlined_call_operand.vmem [shape: bf16[8,72], index: 1, kind: input, shape index: {}]   ;;  %s197_s3 = inlined_call_operand.vmem [shape: f32[8,2], index: 3, kind: output, shape index: {}]  }
   0x1   :  { %124 = vmatprep.subr.bf16.mxu0 %v147_v0  ;;  %v142_v1 = vld [vmem:[%s194_s0] sm:$0xff]   ;;  %134 = vmatprep.mubr.msk.bf16.mxu0 %vm148_vm0, %v147_v0  ;;  %v143_v3 = vld [vmem:[%s194_s0 + $0x8] sm:$0xff]   ;;  %v144_v5 = vld [vmem:[%s194_s0 + $0x10] sm:$0xff]   ;;  %vm58_vm2 = vcmask 588800   ;;  %vm106_vm3 = vcmask 15360  }
   0x2   :  { %141 = vset.pattern.permute.xlu0 %v149_v2  ;;  %125 = vmatpush3.bf16.msra.mxu0 %v142_v1  ;;  %v25_v4 = vld [vmem:[%s195_s2] sm:$0xff]  ;;  %v145_v6 = vld [vmem:[%s194_s0 + $0x18] sm:$0xff]  }
   0x3   :  { %126 = vmatprep.subr.bf16.mxu0 %v147_v0  ;;  %28 = vperm.xlu0 %141, %v25_v4   ;;  %v146_v7 = vld [vmem:[%s194_s0 + $0x20] ss:$0 sps:$4 sm:$0xff]  }
   0x4   :  { %v64_v8 = vsel %vm62_vm1, %v146_v7, 0  ;;  %v15_v9 = vld [vmem:[%s196_s1] sm:$0xf] }
   0x6   :  { %127 = vmatpush3.bf16.msra.mxu0 %v143_v3 }
   0x7   :  { %128 = vmatprep.subr.bf16.mxu0 %v147_v0 }
   0xa   :  { %129 = vmatpush3.bf16.msra.mxu0 %v144_v5 }
   0xb   :  { %130 = vmatprep.subr.bf16.mxu0 %v147_v0 }
   0xe   :  { %131 = vmatpush3.bf16.msra.mxu0 %v145_v6 }
   0xf   :  { %132 = vmatprep.subr.bf16.mxu0 %v147_v0 }
  0x12   :  { %133 = vmatpush3.bf16.msra.mxu0 %v64_v8 }
  0x15   :  { %135 = vmatmul.mubr.msk.bf16.vlgmr.msra.gmra.mrb[0].mxu0 %vm58_vm2, %v15_v9 }
  0x82   :  { %v29_v10 = vpop.permute.xlu0 %28 }
  0xe8   :  { %v100_v11 = vpop.f32.mrb[0].mxu0 }
  0xe9   :  { %v101_v12 = vadd.f32 %v100_v11, %v29_v10  ;;  %v136_v13 = vpop.f32.mrb[1].mxu0 }
  0xea   :  { %v103_v14 = vpop.f32.mrb[2].mxu0 }
  0xeb   :  { %107 = vst.msk [vmem:[%s197_s3] sm:$0xff] %vm106_vm3, %v101_v12  ;;  %v137_v15 = vpop.f32.mrb[3].mxu0 }

// kernel: _lambda_.56
= control target key start
LH: loop header
LB: loop body
LE: loop exit
PB: predicated region body
PF: predicated region fallthrough
CT: control target
= control target key end

     0   :  { %v159_v1 = vmov 0   ;;  %vm69_vm0 = vcmask 261120   ;;  %vm125_vm1 = vcmask 15360   ;;  %s218_s0 = inlined_call_operand.vmem [shape: bf16[32,2], index: 0, kind: input, shape index: {}]   ;;  %s219_s1 = inlined_call_operand.vmem [shape: bf16[32,32], index: 1, kind: input, shape index: {}]   ;;  %s220_s2 = inlined_call_operand.vmem [shape: f32[32,1], index: 2, kind: input, shape index: {}]   ;;  %s221_s3 = inlined_call_operand.vmem [shape: f32[32,2], index: 3, kind: output, shape index: {}]  }
   0x1   :  { %v155_v0 = vld [vmem:[%s218_s0] sm:$0xff]   ;;  %154 = vset.pattern.permute.xlu1 %v159_v1  ;;  %153 = vset.pattern.permute.xlu0 %v159_v1  ;;  %v156_v2 = vld [vmem:[%s218_s0 + $0x8] sm:$0xff]   ;;  %v25_v4 = vld [vmem:[%s220_s2 + $0x10] sm:$0xff] }
   0x2   :  { %144 = vmatprep.subr.bf16.mxu0 %v155_v0  ;;  %v157_v3 = vld [vmem:[%s219_s1] sm:$0xff]   ;;  %39 = vperm.xlu1 %154, %v25_v4   ;;  %v158_v6 = vld [vmem:[%s219_s1 + $0x8] sm:$0xff]   ;;  %v26_v7 = vld [vmem:[%s220_s2 + $0x18] sm:$0xff] }
   0x3   :  { %145 = vmatpush3.bf16.msra.mxu0 %v155_v0  ;;  %148 = vmatprep.mubr.msk.bf16.mxu0 %vm69_vm0, %v157_v3  ;;  %v23_v5 = vld [vmem:[%s220_s2] sm:$0xff]  ;;  %v24_v8 = vld [vmem:[%s220_s2 + $0x8] sm:$0xff] }
   0x4   :  { %146 = vmatprep.subr.bf16.mxu0 %v156_v2  ;;  %29 = vperm.xlu0 %153, %v23_v5  }
   0x6   :  { %44 = vperm.xlu1 %154, %v26_v7  }
   0x7   :  { %147 = vmatpush3.bf16.msra.mxu0 %v156_v2 }
   0x8   :  { %34 = vperm.xlu0 %153, %v24_v8  }
   0xa   :  { %149 = vmatmul.mubr.msk.bf16.vlgmr.msra.gmra.mrb[0].mxu0 %vm69_vm0, %v158_v6 }
  0x81   :  { %v40_v9 = vpop.permute.xlu1 %39 }
  0x83   :  { %v30_v10 = vpop.permute.xlu0 %29 }
  0x85   :  { %v45_v14 = vpop.permute.xlu1 %44 }
  0x87   :  { %v35_v17 = vpop.permute.xlu0 %34 }
  0xdd   :  { %v150_v11 = vpop.f32.mrb[0].mxu0 }
  0xde   :  { %v119_v12 = vadd.f32 %v150_v11, %v40_v9  ;;  %v110_v13 = vpop.f32.mrb[1].mxu0 }
  0xdf   :  { %v111_v15 = vadd.f32 %v110_v13, %v30_v10  ;;  %v151_v16 = vpop.f32.mrb[2].mxu0 }
  0xe0   :  { %128 = vst.msk [vmem:[%s221_s3 + $0x10] sm:$0xff] %vm125_vm1, %v119_v12  ;;  %v122_v18 = vadd.f32 %v151_v16, %v45_v14  ;;  %v113_v19 = vpop.f32.mrb[3].mxu0 }
  0xe1   :  { %126 = vst.msk [vmem:[%s221_s3] sm:$0xff] %vm125_vm1, %v111_v15  ;;  %v114_v20 = vadd.f32 %v113_v19, %v35_v17 }
  0xe2   :  { %129 = vst.msk [vmem:[%s221_s3 + $0x18] sm:$0xff] %vm125_vm1, %v122_v18 }
  0xe3   :  { %127 = vst.msk [vmem:[%s221_s3 + $0x8] sm:$0xff] %vm125_vm1, %v114_v20 }

// kernel: _lambda_.60
= control target key start
LH: loop header
LB: loop body
LE: loop exit
PB: predicated region body
PF: predicated region fallthrough
CT: control target
= control target key end

     0   :  { %v330_v0 = vmov 0.0   ;;  %vm331_vm0 = vmmov 0   ;;  %vm56_vm1 = vcmask 1041408   ;;  %vm52_vm2 = vcmask 293888   ;;  %s409_s0 = inlined_call_operand.vmem [shape: bf16[72,8], index: 0, kind: input, shape index: {}]   ;;  %s410_s1 = inlined_call_operand.vmem [shape: bf16[36,8], index: 1, kind: input, shape index: {}]   ;;  %s411_s3 = inlined_call_operand.vmem [shape: bf16[8,36], index: 3, kind: input, shape index: {}]   ;;  %s412_s2 = inlined_call_operand.vmem [shape: bf16[8,72], index: 2, kind: input, shape index: {}]   ;;  %s413_s4 = inlined_call_operand.vmem [shape: bf16[8,8], index: 4, kind: input, shape index: {}]   ;;  %s414_s5 = inlined_call_operand.vmem [shape: f32[8,8], index: 5, kind: output, shape index: {}]  }
   0x1   :  { %295 = vmatprep.subr.bf16.mxu0 %v330_v0  ;;  %v318_v1 = vld [vmem:[%s409_s0] sm:$0xff]   ;;  %285 = vmatprep.subr.bf16.mxu1 %v330_v0  ;;  %v319_v2 = vld [vmem:[%s409_s0 + $0x8] sm:$0xff]   ;;  %v321_v5 = vld [vmem:[%s409_s0 + $0x10] sm:$0xff]   ;;  %vm131_vm3 = vcmask 1043456   ;;  %vm127_vm4 = vcmask 588800   ;;  %vm175_vm5 = vcmask 64512  }
   0x2   :  { %291 = vmatprep.mubr.msk.bf16.mxu1 %vm331_vm0, %v330_v0  ;;  %305 = vmatprep.mubr.msk.bf16.mxu0 %vm331_vm0, %v330_v0  ;;  %v320_v3 = vld [vmem:[%s410_s1] sm:$0xff]   ;;  %v322_v4 = vld [vmem:[%s410_s1 + $0x8] sm:$0xff]   ;;  %v324_v6 = vld [vmem:[%s410_s1 + $0x10] ss:$0 sps:$4 sm:$0x33]  }
   0x3   :  { %296 = vmatpush3.bf16.msra.mxu0 %v318_v1  ;;  %286 = vmatpush3.bf16.msra.mxu1 %v320_v3  ;;  %v58_v7 = vsel %vm56_vm1, %v324_v6, 0  ;;  %v323_v8 = vld [vmem:[%s409_s0 + $0x18] sm:$0xff]   ;;  %v325_v9 = vld [vmem:[%s409_s0 + $0x20] ss:$0 sps:$4 sm:$0xff]  }
   0x4   :  { %297 = vmatprep.subr.bf16.mxu0 %v330_v0  ;;  %287 = vmatprep.subr.bf16.mxu1 %v330_v0  ;;  %v31_v10 = vld [vmem:[%s411_s3] sm:$0xf]  ;;  %v133_v11 = vsel %vm131_vm3, %v325_v9, 0 }
   0x5   :  { %v21_v12 = vld [vmem:[%s412_s2] sm:$0xf] }
   0x6   :  { %v193_v37 = vld [vmem:[%s413_s4] sm:$0xf] }
   0x7   :  { %298 = vmatpush3.bf16.msra.mxu0 %v319_v2  ;;  %288 = vmatpush3.bf16.msra.mxu1 %v322_v4 }
   0x8   :  { %299 = vmatprep.subr.bf16.mxu0 %v330_v0  ;;  %289 = vmatprep.subr.bf16.mxu1 %v330_v0 }
   0xb   :  { %300 = vmatpush3.bf16.msra.mxu0 %v321_v5  ;;  %290 = vmatpush3.bf16.msra.mxu1 %v58_v7 }
   0xc   :  { %301 = vmatprep.subr.bf16.mxu0 %v330_v0  ;;  %309 = vmatprep.subr.bf16.mxu1 %v330_v0 }
   0xe   :  { %292 = vmatmul.mubr.msk.bf16.vlgmr.msra.gmra.mrb[0].mxu1 %vm52_vm2, %v31_v10 }
   0xf   :  { %302 = vmatpush3.bf16.msra.mxu0 %v323_v8  ;;  %311 = vmatprep.mubr.msk.bf16.mxu1 %vm331_vm0, %v330_v0 }
  0x10   :  { %303 = vmatprep.subr.bf16.mxu0 %v330_v0 }
  0x13   :  { %304 = vmatpush3.bf16.msra.mxu0 %v133_v11 }
  0x16   :  { %306 = vmatmul.mubr.msk.bf16.vlgmr.msra.gmra.mrb[0].mxu0 %vm127_vm4, %v21_v12 }
  0xe1   :  { %v94_v13 = vpop.f32.mrb[0].mxu1 }
  0xe2   :  { %v293_v14 = vpop.f32.mrb[1].mxu1 }
  0xe3   :  { %v97_v15 = vpop.f32.mrb[2].mxu1 }
  0xe4   :  { %v294_v16 = vpop.f32.mrb[3].mxu1 }
  0xe9   :  { %v169_v17 = vpop.f32.mrb[0].mxu0 }
  0xea   :  { %v170_v18 = vadd.f32 %v169_v17, %v94_v13  ;;  %v307_v19 = vpop.f32.mrb[1].mxu0 }
  0xeb   :  { %v172_v20 = vpop.f32.mrb[2].mxu0 }
  0xec   :  { %v308_v21 = vpop.f32.mrb[3].mxu0  ;;  %v176_v22 = vsel %vm175_vm5, %v170_v18, 0.0 }
  0xed   :  { %177 = vadd.xlane.f32.xlu0 %v176_v22 }
 0x17a   :  { %v178_v23 = vpop.xlane.xlu0 %177 }
 0x17b   :  { %v180_v24 = vmul.f32 0.125, %v178_v23 }
 0x17d   :  { %v181_v25 = vsub.f32 %v170_v18, %v180_v24 }
 0x17f   :  { %v182_v26 = vmul.f32 %v181_v25, %v181_v25 }
 0x181   :  { %v183_v27 = vsel %vm175_vm5, %v182_v26, 0.0 }
 0x182   :  { %184 = vadd.xlane.f32.xlu0 %v183_v27 }
 0x20f   :  { %v185_v28 = vpop.xlane.xlu0 %184 }
 0x210   :  { %v186_v29 = vmul.f32 0.125, %v185_v28 }
 0x212   :  { %v187_v30 = vadd.f32 1e-05, %v186_v29 }
 0x214   :  { %326 = vrsqrt.f32 %v187_v30 }
 0x21e   :  { %v327_v31 = vpop.eup %326 }
 0x21f   :  { %v189_v32 = vmul.f32 %v327_v31, %v181_v25 }
 0x221   :  { %vm190_vm6 = vcmp.ge.f32.partialorder %v189_v32, 0.0  ;;  %v191_v33 = vmul.f32 0.2, %v189_v32 }
 0x223   :  { %v192_v34 = vsel %vm190_vm6, %v189_v32, %v191_v33 }
 0x224   :  { %v194_v35 = vpack.c.bf16 %v192_v34, %v192_v34 }
 0x226   :  { %v199_v36 = vsel %vm131_vm3, %v194_v35, 0 }
 0x227   :  { %310 = vmatpush3.bf16.msra.mxu1 %v199_v36 }
 0x22a   :  { %312 = vmatmul.mubr.msk.bf16.vlgmr.msra.gmra.mrb[4].mxu1 %vm175_vm5, %v193_v37 }
 0x2fd   :  { %v235_v38 = vpop.f32.mrb[4].mxu1 }
 0x2fe   :  { %v241_v39 = vsel %vm175_vm5, %v235_v38, 0.0  ;;  %v313_v40 = vpop.f32.mrb[5].mxu1 }
 0x2ff   :  { %242 = vadd.xlane.f32.xlu1 %v241_v39  ;;  %v238_v41 = vpop.f32.mrb[6].mxu1 }
 0x300   :  { %v314_v42 = vpop.f32.mrb[7].mxu1 }
 0x38c   :  { %v243_v43 = vpop.xlane.xlu1 %242 }
 0x38d   :  { %v244_v44 = vmul.f32 0.125, %v243_v43 }
 0x38f   :  { %v245_v45 = vsub.f32 %v235_v38, %v244_v44 }
 0x391   :  { %v246_v46 = vmul.f32 %v245_v45, %v245_v45 }
 0x393   :  { %v247_v47 = vsel %vm175_vm5, %v246_v46, 0.0 }
 0x394   :  { %248 = vadd.xlane.f32.xlu1 %v247_v47 }
 0x421   :  { %v249_v48 = vpop.xlane.xlu1 %248 }
 0x422   :  { %v250_v49 = vmul.f32 0.125, %v249_v48 }
 0x424   :  { %v251_v50 = vadd.f32 1e-05, %v250_v49 }
 0x426   :  { %328 = vrsqrt.f32 %v251_v50 }
 0x430   :  { %v329_v51 = vpop.eup %328 }
 0x431   :  { %v253_v52 = vmul.f32 %v329_v51, %v245_v45 }
 0x433   :  { %vm254_vm7 = vcmp.ge.f32.partialorder %v253_v52, 0.0  ;;  %v255_v53 = vmul.f32 0.2, %v253_v52 }
 0x435   :  { %v256_v54 = vsel %vm254_vm7, %v253_v52, %v255_v53 }
 0x436   :  { %257 = vst.msk [vmem:[%s414_s5] sm:$0xff] %vm175_vm5, %v256_v54 }

// kernel: _lambda_.61
= control target key start
LH: loop header
LB: loop body
LE: loop exit
PB: predicated region body
PF: predicated region fallthrough
CT: control target
= control target key end

     0   :  { %v159_v1 = vmov 0   ;;  %vm69_vm0 = vcmask 261120   ;;  %vm125_vm1 = vcmask 64512   ;;  %s218_s0 = inlined_call_operand.vmem [shape: bf16[32,8], index: 0, kind: input, shape index: {}]   ;;  %s219_s1 = inlined_call_operand.vmem [shape: bf16[32,32], index: 1, kind: input, shape index: {}]   ;;  %s220_s2 = inlined_call_operand.vmem [shape: f32[32,1], index: 2, kind: input, shape index: {}]   ;;  %s221_s3 = inlined_call_operand.vmem [shape: f32[32,8], index: 3, kind: output, shape index: {}]  }
   0x1   :  { %v155_v0 = vld [vmem:[%s218_s0] sm:$0xff]   ;;  %154 = vset.pattern.permute.xlu1 %v159_v1  ;;  %153 = vset.pattern.permute.xlu0 %v159_v1  ;;  %v156_v2 = vld [vmem:[%s218_s0 + $0x8] sm:$0xff]   ;;  %v25_v4 = vld [vmem:[%s220_s2 + $0x10] sm:$0xff] }
   0x2   :  { %144 = vmatprep.subr.bf16.mxu0 %v155_v0  ;;  %v157_v3 = vld [vmem:[%s219_s1] sm:$0xff]   ;;  %39 = vperm.xlu1 %154, %v25_v4   ;;  %v158_v6 = vld [vmem:[%s219_s1 + $0x8] sm:$0xff]   ;;  %v26_v7 = vld [vmem:[%s220_s2 + $0x18] sm:$0xff] }
   0x3   :  { %145 = vmatpush3.bf16.msra.mxu0 %v155_v0  ;;  %148 = vmatprep.mubr.msk.bf16.mxu0 %vm69_vm0, %v157_v3  ;;  %v23_v5 = vld [vmem:[%s220_s2] sm:$0xff]  ;;  %v24_v8 = vld [vmem:[%s220_s2 + $0x8] sm:$0xff] }
   0x4   :  { %146 = vmatprep.subr.bf16.mxu0 %v156_v2  ;;  %29 = vperm.xlu0 %153, %v23_v5  }
   0x6   :  { %44 = vperm.xlu1 %154, %v26_v7  }
   0x7   :  { %147 = vmatpush3.bf16.msra.mxu0 %v156_v2 }
   0x8   :  { %34 = vperm.xlu0 %153, %v24_v8  }
   0xa   :  { %149 = vmatmul.mubr.msk.bf16.vlgmr.msra.gmra.mrb[0].mxu0 %vm69_vm0, %v158_v6 }
  0x81   :  { %v40_v9 = vpop.permute.xlu1 %39 }
  0x83   :  { %v30_v10 = vpop.permute.xlu0 %29 }
  0x85   :  { %v45_v14 = vpop.permute.xlu1 %44 }
  0x87   :  { %v35_v17 = vpop.permute.xlu0 %34 }
  0xdd   :  { %v150_v11 = vpop.f32.mrb[0].mxu0 }
  0xde   :  { %v119_v12 = vadd.f32 %v150_v11, %v40_v9  ;;  %v110_v13 = vpop.f32.mrb[1].mxu0 }
  0xdf   :  { %v111_v15 = vadd.f32 %v110_v13, %v30_v10  ;;  %v151_v16 = vpop.f32.mrb[2].mxu0 }
  0xe0   :  { %128 = vst.msk [vmem:[%s221_s3 + $0x10] sm:$0xff] %vm125_vm1, %v119_v12  ;;  %v122_v18 = vadd.f32 %v151_v16, %v45_v14  ;;  %v113_v19 = vpop.f32.mrb[3].mxu0 }
  0xe1   :  { %126 = vst.msk [vmem:[%s221_s3] sm:$0xff] %vm125_vm1, %v111_v15  ;;  %v114_v20 = vadd.f32 %v113_v19, %v35_v17 }
  0xe2   :  { %129 = vst.msk [vmem:[%s221_s3 + $0x18] sm:$0xff] %vm125_vm1, %v122_v18 }
  0xe3   :  { %127 = vst.msk [vmem:[%s221_s3 + $0x8] sm:$0xff] %vm125_vm1, %v114_v20 }

// kernel: _lambda_.65
= control target key start
LH: loop header
LB: loop body
LE: loop exit
PB: predicated region body
PF: predicated region fallthrough
CT: control target
= control target key end

     0   :  { %v331_v0 = vmov 0.0   ;;  %vm332_vm0 = vmmov 0   ;;  %vm56_vm1 = vcmask 1041408   ;;  %vm52_vm2 = vcmask 293888   ;;  %s409_s0 = inlined_call_operand.vmem [shape: bf16[72,32], index: 0, kind: input, shape index: {}]   ;;  %s410_s1 = inlined_call_operand.vmem [shape: bf16[36,32], index: 1, kind: input, shape index: {}]   ;;  %s411_s3 = inlined_call_operand.vmem [shape: bf16[8,36], index: 3, kind: input, shape index: {}]   ;;  %s412_s2 = inlined_call_operand.vmem [shape: bf16[8,72], index: 2, kind: input, shape index: {}]   ;;  %s413_s4 = inlined_call_operand.vmem [shape: bf16[8,8], index: 4, kind: input, shape index: {}]   ;;  %s414_s5 = inlined_call_operand.vmem [shape: f32[8,32], index: 5, kind: output, shape index: {}]  }
   0x1   :  { %296 = vmatprep.subr.bf16.mxu0 %v331_v0  ;;  %v319_v1 = vld [vmem:[%s409_s0] sm:$0xff]   ;;  %286 = vmatprep.subr.bf16.mxu1 %v331_v0  ;;  %v320_v2 = vld [vmem:[%s409_s0 + $0x8] sm:$0xff]   ;;  %v322_v5 = vld [vmem:[%s409_s0 + $0x10] sm:$0xff]   ;;  %vm131_vm3 = vcmask 1043456   ;;  %vm127_vm4 = vcmask 588800   ;;  %vm175_vm5 = vcmask 261120  }
   0x2   :  { %292 = vmatprep.mubr.msk.bf16.mxu1 %vm332_vm0, %v331_v0  ;;  %306 = vmatprep.mubr.msk.bf16.mxu0 %vm332_vm0, %v331_v0  ;;  %v321_v3 = vld [vmem:[%s410_s1] sm:$0xff]   ;;  %v323_v4 = vld [vmem:[%s410_s1 + $0x8] sm:$0xff]   ;;  %v325_v6 = vld [vmem:[%s410_s1 + $0x10] ss:$0 sps:$4 sm:$0x33]   ;;  %vm195_vm7 = vcmask 64512  }
   0x3   :  { %297 = vmatpush3.bf16.msra.mxu0 %v319_v1  ;;  %287 = vmatpush3.bf16.msra.mxu1 %v321_v3  ;;  %v58_v7 = vsel %vm56_vm1, %v325_v6, 0  ;;  %v324_v8 = vld [vmem:[%s409_s0 + $0x18] sm:$0xff]   ;;  %v326_v9 = vld [vmem:[%s409_s0 + $0x20] ss:$0 sps:$4 sm:$0xff]  }
   0x4   :  { %298 = vmatprep.subr.bf16.mxu0 %v331_v0  ;;  %288 = vmatprep.subr.bf16.mxu1 %v331_v0  ;;  %v31_v10 = vld [vmem:[%s411_s3] sm:$0xf]  ;;  %v133_v11 = vsel %vm131_vm3, %v326_v9, 0 }
   0x5   :  { %v21_v12 = vld [vmem:[%s412_s2] sm:$0xf] }
   0x6   :  { %v193_v37 = vld [vmem:[%s413_s4] sm:$0xf] }
   0x7   :  { %299 = vmatpush3.bf16.msra.mxu0 %v320_v2  ;;  %289 = vmatpush3.bf16.msra.mxu1 %v323_v4 }
   0x8   :  { %300 = vmatprep.subr.bf16.mxu0 %v331_v0  ;;  %290 = vmatprep.subr.bf16.mxu1 %v331_v0 }
   0xb   :  { %301 = vmatpush3.bf16.msra.mxu0 %v322_v5  ;;  %291 = vmatpush3.bf16.msra.mxu1 %v58_v7 }
   0xc   :  { %302 = vmatprep.subr.bf16.mxu0 %v331_v0  ;;  %310 = vmatprep.subr.bf16.mxu1 %v331_v0 }
   0xe   :  { %293 = vmatmul.mubr.msk.bf16.vlgmr.msra.gmra.mrb[0].mxu1 %vm52_vm2, %v31_v10 }
   0xf   :  { %303 = vmatpush3.bf16.msra.mxu0 %v324_v8  ;;  %312 = vmatprep.mubr.msk.bf16.mxu1 %vm332_vm0, %v331_v0 }
  0x10   :  { %304 = vmatprep.subr.bf16.mxu0 %v331_v0 }
  0x13   :  { %305 = vmatpush3.bf16.msra.mxu0 %v133_v11 }
  0x16   :  { %307 = vmatmul.mubr.msk.bf16.vlgmr.msra.gmra.mrb[0].mxu0 %vm127_vm4, %v21_v12 }
  0xe1   :  { %v94_v13 = vpop.f32.mrb[0].mxu1 }
  0xe2   :  { %v294_v14 = vpop.f32.mrb[1].mxu1 }
  0xe3   :  { %v97_v15 = vpop.f32.mrb[2].mxu1 }
  0xe4   :  { %v295_v16 = vpop.f32.mrb[3].mxu1 }
  0xe9   :  { %v169_v17 = vpop.f32.mrb[0].mxu0 }
  0xea   :  { %v170_v18 = vadd.f32 %v169_v17, %v94_v13  ;;  %v308_v19 = vpop.f32.mrb[1].mxu0 }
  0xeb   :  { %v172_v20 = vpop.f32.mrb[2].mxu0 }
  0xec   :  { %v309_v21 = vpop.f32.mrb[3].mxu0  ;;  %v176_v22 = vsel %vm175_vm5, %v170_v18, 0.0 }
  0xed   :  { %177 = vadd.xlane.f32.xlu0 %v176_v22 }
 0x17a   :  { %v178_v23 = vpop.xlane.xlu0 %177 }
 0x17b   :  { %v180_v24 = vmul.f32 0.03125, %v178_v23 }
 0x17d   :  { %v181_v25 = vsub.f32 %v170_v18, %v180_v24 }
 0x17f   :  { %v182_v26 = vmul.f32 %v181_v25, %v181_v25 }
 0x181   :  { %v183_v27 = vsel %vm175_vm5, %v182_v26, 0.0 }
 0x182   :  { %184 = vadd.xlane.f32.xlu0 %v183_v27 }
 0x20f   :  { %v185_v28 = vpop.xlane.xlu0 %184 }
 0x210   :  { %v186_v29 = vmul.f32 0.03125, %v185_v28 }
 0x212   :  { %v187_v30 = vadd.f32 1e-05, %v186_v29 }
 0x214   :  { %327 = vrsqrt.f32 %v187_v30 }
 0x21e   :  { %v328_v31 = vpop.eup %327 }
 0x21f   :  { %v189_v32 = vmul.f32 %v328_v31, %v181_v25 }
 0x221   :  { %vm190_vm6 = vcmp.ge.f32.partialorder %v189_v32, 0.0  ;;  %v191_v33 = vmul.f32 0.2, %v189_v32 }
 0x223   :  { %v192_v34 = vsel %vm190_vm6, %v189_v32, %v191_v33 }
 0x224   :  { %v194_v35 = vpack.c.bf16 %v192_v34, %v192_v34 }
 0x226   :  { %v200_v36 = vsel %vm131_vm3, %v194_v35, 0 }
 0x227   :  { %311 = vmatpush3.bf16.msra.mxu1 %v200_v36 }
 0x22a   :  { %313 = vmatmul.mubr.msk.bf16.vlgmr.msra.gmra.mrb[4].mxu1 %vm195_vm7, %v193_v37 }
 0x2fd   :  { %v236_v38 = vpop.f32.mrb[4].mxu1 }
 0x2fe   :  { %v242_v39 = vsel %vm175_vm5, %v236_v38, 0.0  ;;  %v314_v40 = vpop.f32.mrb[5].mxu1 }
 0x2ff   :  { %243 = vadd.xlane.f32.xlu1 %v242_v39  ;;  %v239_v41 = vpop.f32.mrb[6].mxu1 }
 0x300   :  { %v315_v42 = vpop.f32.mrb[7].mxu1 }
 0x38c   :  { %v244_v43 = vpop.xlane.xlu1 %243 }
 0x38d   :  { %v245_v44 = vmul.f32 0.03125, %v244_v43 }
 0x38f   :  { %v246_v45 = vsub.f32 %v236_v38, %v245_v44 }
 0x391   :  { %v247_v46 = vmul.f32 %v246_v45, %v246_v45 }
 0x393   :  { %v248_v47 = vsel %vm175_vm5, %v247_v46, 0.0 }
 0x394   :  { %249 = vadd.xlane.f32.xlu1 %v248_v47 }
 0x421   :  { %v250_v48 = vpop.xlane.xlu1 %249 }
 0x422   :  { %v251_v49 = vmul.f32 0.03125, %v250_v48 }
 0x424   :  { %v252_v50 = vadd.f32 1e-05, %v251_v49 }
 0x426   :  { %329 = vrsqrt.f32 %v252_v50 }
 0x430   :  { %v330_v51 = vpop.eup %329 }
 0x431   :  { %v254_v52 = vmul.f32 %v330_v51, %v246_v45 }
 0x433   :  { %vm255_vm8 = vcmp.ge.f32.partialorder %v254_v52, 0.0  ;;  %v256_v53 = vmul.f32 0.2, %v254_v52 }
 0x435   :  { %v257_v54 = vsel %vm255_vm8, %v254_v52, %v256_v53 }
 0x436   :  { %258 = vst.msk [vmem:[%s414_s5] sm:$0xff] %vm175_vm5, %v257_v54 }

// kernel: _lambda_.66
= control target key start
LH: loop header
LB: loop body
LE: loop exit
PB: predicated region body
PF: predicated region fallthrough
CT: control target
= control target key end

     0   :  { %v158_v1 = vmov 0   ;;  %vm69_vm0 = vcmask 261120   ;;  %s221_s0 = inlined_call_operand.vmem [shape: bf16[32,32], index: 0, kind: input, shape index: {}]   ;;  %s222_s1 = inlined_call_operand.vmem [shape: bf16[32,32], index: 1, kind: input, shape index: {}]   ;;  %s223_s2 = inlined_call_operand.vmem [shape: f32[32,1], index: 2, kind: input, shape index: {}]   ;;  %s224_s3 = inlined_call_operand.vmem [shape: f32[32,32], index: 3, kind: output, shape index: {}]  }
   0x1   :  { %v154_v0 = vld [vmem:[%s221_s0] sm:$0xff]   ;;  %153 = vset.pattern.permute.xlu1 %v158_v1  ;;  %152 = vset.pattern.permute.xlu0 %v158_v1  ;;  %v155_v2 = vld [vmem:[%s221_s0 + $0x8] sm:$0xff]   ;;  %v25_v4 = vld [vmem:[%s223_s2 + $0x10] sm:$0xff] }
   0x2   :  { %143 = vmatprep.subr.bf16.mxu0 %v154_v0  ;;  %v156_v3 = vld [vmem:[%s222_s1] sm:$0xff]   ;;  %39 = vperm.xlu1 %153, %v25_v4   ;;  %v157_v6 = vld [vmem:[%s222_s1 + $0x8] sm:$0xff]   ;;  %v26_v7 = vld [vmem:[%s223_s2 + $0x18] sm:$0xff] }
   0x3   :  { %144 = vmatpush3.bf16.msra.mxu0 %v154_v0  ;;  %147 = vmatprep.mubr.msk.bf16.mxu0 %vm69_vm0, %v156_v3  ;;  %v23_v5 = vld [vmem:[%s223_s2] sm:$0xff]  ;;  %v24_v8 = vld [vmem:[%s223_s2 + $0x8] sm:$0xff] }
   0x4   :  { %145 = vmatprep.subr.bf16.mxu0 %v155_v2  ;;  %29 = vperm.xlu0 %152, %v23_v5  }
   0x6   :  { %44 = vperm.xlu1 %153, %v26_v7  }
   0x7   :  { %146 = vmatpush3.bf16.msra.mxu0 %v155_v2 }
   0x8   :  { %34 = vperm.xlu0 %152, %v24_v8  }
   0xa   :  { %148 = vmatmul.mubr.msk.bf16.vlgmr.msra.gmra.mrb[0].mxu0 %vm69_vm0, %v157_v6 }
  0x81   :  { %v40_v9 = vpop.permute.xlu1 %39 }
  0x83   :  { %v30_v10 = vpop.permute.xlu0 %29 }
  0x85   :  { %v45_v14 = vpop.permute.xlu1 %44 }
  0x87   :  { %v35_v17 = vpop.permute.xlu0 %34 }
  0xdd   :  { %v149_v11 = vpop.f32.mrb[0].mxu0 }
  0xde   :  { %v119_v12 = vadd.f32 %v149_v11, %v40_v9  ;;  %v110_v13 = vpop.f32.mrb[1].mxu0 }
  0xdf   :  { %v111_v15 = vadd.f32 %v110_v13, %v30_v10  ;;  %v150_v16 = vpop.f32.mrb[2].mxu0 }
  0xe0   :  { %127 = vst.msk [vmem:[%s224_s3 + $0x10] sm:$0xff] %vm69_vm0, %v119_v12  ;;  %v122_v18 = vadd.f32 %v150_v16, %v45_v14  ;;  %v113_v19 = vpop.f32.mrb[3].mxu0 }
  0xe1   :  { %125 = vst.msk [vmem:[%s224_s3] sm:$0xff] %vm69_vm0, %v111_v15  ;;  %v114_v20 = vadd.f32 %v113_v19, %v35_v17 }
  0xe2   :  { %128 = vst.msk [vmem:[%s224_s3 + $0x18] sm:$0xff] %vm69_vm0, %v122_v18 }
  0xe3   :  { %126 = vst.msk [vmem:[%s224_s3 + $0x8] sm:$0xff] %vm69_vm0, %v114_v20 }

// kernel: _lambda_.70
= control target key start
LH: loop header
LB: loop body
LE: loop exit
PB: predicated region body
PF: predicated region fallthrough
CT: control target
= control target key end

     0   :  { %v327_v0 = vmov 0.0   ;;  %vm328_vm0 = vmmov 0   ;;  %vm56_vm1 = vcmask 1041408   ;;  %vm52_vm2 = vcmask 293888   ;;  %s400_s0 = inlined_call_operand.vmem [shape: bf16[72,128], index: 0, kind: input, shape index: {}]   ;;  %s401_s1 = inlined_call_operand.vmem [shape: bf16[36,128], index: 1, kind: input, shape index: {}]   ;;  %s402_s3 = inlined_call_operand.vmem [shape: bf16[8,36], index: 3, kind: input, shape index: {}]   ;;  %s403_s2 = inlined_call_operand.vmem [shape: bf16[8,72], index: 2, kind: input, shape index: {}]   ;;  %s404_s4 = inlined_call_operand.vmem [shape: bf16[8,8], index: 4, kind: input, shape index: {}]   ;;  %s405_s5 = inlined_call_operand.vmem [shape: bf16[8,128], index: 5, kind: output, shape index: {}]  }
   0x1   :  { %292 = vmatprep.subr.bf16.mxu0 %v327_v0  ;;  %v315_v1 = vld [vmem:[%s400_s0] sm:$0xff]   ;;  %282 = vmatprep.subr.bf16.mxu1 %v327_v0  ;;  %v316_v2 = vld [vmem:[%s400_s0 + $0x8] sm:$0xff]   ;;  %v318_v5 = vld [vmem:[%s400_s0 + $0x10] sm:$0xff]   ;;  %vm131_vm3 = vcmask 1043456   ;;  %vm127_vm4 = vcmask 588800   ;;  %vm192_vm6 = vcmask 64512  }
   0x2   :  { %288 = vmatprep.mubr.msk.bf16.mxu1 %vm328_vm0, %v327_v0  ;;  %302 = vmatprep.mubr.msk.bf16.mxu0 %vm328_vm0, %v327_v0  ;;  %v317_v3 = vld [vmem:[%s401_s1] sm:$0xff]   ;;  %v319_v4 = vld [vmem:[%s401_s1 + $0x8] sm:$0xff]   ;;  %v321_v6 = vld [vmem:[%s401_s1 + $0x10] ss:$0 sps:$4 sm:$0x33]  }
   0x3   :  { %293 = vmatpush3.bf16.msra.mxu0 %v315_v1  ;;  %283 = vmatpush3.bf16.msra.mxu1 %v317_v3  ;;  %v58_v7 = vsel %vm56_vm1, %v321_v6, 0  ;;  %v320_v8 = vld [vmem:[%s400_s0 + $0x18] sm:$0xff]   ;;  %v322_v9 = vld [vmem:[%s400_s0 + $0x20] ss:$0 sps:$4 sm:$0xff]  }
   0x4   :  { %294 = vmatprep.subr.bf16.mxu0 %v327_v0  ;;  %284 = vmatprep.subr.bf16.mxu1 %v327_v0  ;;  %v31_v10 = vld [vmem:[%s402_s3] sm:$0xf]  ;;  %v133_v11 = vsel %vm131_vm3, %v322_v9, 0 }
   0x5   :  { %v21_v12 = vld [vmem:[%s403_s2] sm:$0xf] }
   0x6   :  { %v190_v35 = vld [vmem:[%s404_s4] sm:$0xf] }
   0x7   :  { %295 = vmatpush3.bf16.msra.mxu0 %v316_v2  ;;  %285 = vmatpush3.bf16.msra.mxu1 %v319_v4 }
   0x8   :  { %296 = vmatprep.subr.bf16.mxu0 %v327_v0  ;;  %286 = vmatprep.subr.bf16.mxu1 %v327_v0 }
   0xb   :  { %297 = vmatpush3.bf16.msra.mxu0 %v318_v5  ;;  %287 = vmatpush3.bf16.msra.mxu1 %v58_v7 }
   0xc   :  { %298 = vmatprep.subr.bf16.mxu0 %v327_v0  ;;  %306 = vmatprep.subr.bf16.mxu1 %v327_v0 }
   0xe   :  { %289 = vmatmul.mubr.msk.bf16.vlgmr.msra.gmra.mrb[0].mxu1 %vm52_vm2, %v31_v10 }
   0xf   :  { %299 = vmatpush3.bf16.msra.mxu0 %v320_v8  ;;  %308 = vmatprep.mubr.msk.bf16.mxu1 %vm328_vm0, %v327_v0 }
  0x10   :  { %300 = vmatprep.subr.bf16.mxu0 %v327_v0 }
  0x13   :  { %301 = vmatpush3.bf16.msra.mxu0 %v133_v11 }
  0x16   :  { %303 = vmatmul.mubr.msk.bf16.vlgmr.msra.gmra.mrb[0].mxu0 %vm127_vm4, %v21_v12 }
  0xe1   :  { %v94_v13 = vpop.f32.mrb[0].mxu1 }
  0xe2   :  { %v290_v14 = vpop.f32.mrb[1].mxu1 }
  0xe3   :  { %v97_v15 = vpop.f32.mrb[2].mxu1 }
  0xe4   :  { %v291_v16 = vpop.f32.mrb[3].mxu1 }
  0xe9   :  { %v169_v17 = vpop.f32.mrb[0].mxu0 }
  0xea   :  { %v170_v18 = vadd.f32 %v169_v17, %v94_v13  ;;  %v304_v19 = vpop.f32.mrb[1].mxu0 }
  0xeb   :  { %v172_v20 = vpop.f32.mrb[2].mxu0 }
  0xec   :  { %175 = vadd.xlane.f32.xlu0 %v170_v18  ;;  %v305_v21 = vpop.f32.mrb[3].mxu0 }
 0x179   :  { %v176_v22 = vpop.xlane.xlu0 %175 }
 0x17a   :  { %v178_v23 = vmul.f32 0.0078125, %v176_v22 }
 0x17c   :  { %v179_v24 = vsub.f32 %v170_v18, %v178_v23 }
 0x17e   :  { %v180_v25 = vmul.f32 %v179_v24, %v179_v24 }
 0x180   :  { %181 = vadd.xlane.f32.xlu0 %v180_v25 }
 0x20d   :  { %v182_v26 = vpop.xlane.xlu0 %181 }
 0x20e   :  { %v183_v27 = vmul.f32 0.0078125, %v182_v26 }
 0x210   :  { %v184_v28 = vadd.f32 1e-05, %v183_v27 }
 0x212   :  { %323 = vrsqrt.f32 %v184_v28 }
 0x21c   :  { %v324_v29 = vpop.eup %323 }
 0x21d   :  { %v186_v30 = vmul.f32 %v324_v29, %v179_v24 }
 0x21f   :  { %vm187_vm5 = vcmp.ge.f32.partialorder %v186_v30, 0.0  ;;  %v188_v31 = vmul.f32 0.2, %v186_v30 }
 0x221   :  { %v189_v32 = vsel %vm187_vm5, %v186_v30, %v188_v31 }
 0x222   :  { %v191_v33 = vpack.c.bf16 %v189_v32, %v189_v32 }
 0x224   :  { %v197_v34 = vsel %vm131_vm3, %v191_v33, 0 }
 0x225   :  { %307 = vmatpush3.bf16.msra.mxu1 %v197_v34 }
 0x228   :  { %309 = vmatmul.mubr.msk.bf16.vlgmr.msra.gmra.mrb[4].mxu1 %vm192_vm6, %v190_v35 }
 0x2fb   :  { %v233_v36 = vpop.f32.mrb[4].mxu1 }
 0x2fc   :  { %239 = vadd.xlane.f32.xlu1 %v233_v36  ;;  %v310_v37 = vpop.f32.mrb[5].mxu1 }
 0x2fd   :  { %v236_v38 = vpop.f32.mrb[6].mxu1 }
 0x2fe   :  { %v311_v39 = vpop.f32.mrb[7].mxu1 }
 0x389   :  { %v240_v40 = vpop.xlane.xlu1 %239 }
 0x38a   :  { %v241_v41 = vmul.f32 0.0078125, %v240_v40 }
 0x38c   :  { %v242_v42 = vsub.f32 %v233_v36, %v241_v41 }
 0x38e   :  { %v243_v43 = vmul.f32 %v242_v42, %v242_v42 }
 0x390   :  { %244 = vadd.xlane.f32.xlu1 %v243_v43 }
 0x41d   :  { %v245_v44 = vpop.xlane.xlu1 %244 }
 0x41e   :  { %v246_v45 = vmul.f32 0.0078125, %v245_v44 }
 0x420   :  { %v247_v46 = vadd.f32 1e-05, %v246_v45 }
 0x422   :  { %325 = vrsqrt.f32 %v247_v46 }
 0x42c   :  { %v326_v47 = vpop.eup %325 }
 0x42d   :  { %v249_v48 = vmul.f32 %v326_v47, %v242_v42 }
 0x42f   :  { %vm250_vm7 = vcmp.ge.f32.partialorder %v249_v48, 0.0  ;;  %v251_v49 = vmul.f32 0.2, %v249_v48 }
 0x431   :  { %v252_v50 = vsel %vm250_vm7, %v249_v48, %v251_v49 }
 0x432   :  { %v253_v51 = vpack.c.bf16 %v252_v50, %v252_v50 }
 0x434   :  { %254 = vst [vmem:[%s405_s5] sm:$0xf] %v253_v51 }

// kernel: _lambda_.71
= control target key start
LH: loop header
LB: loop body
LE: loop exit
PB: predicated region body
PF: predicated region fallthrough
CT: control target
= control target key end

     0   :  { %v193_v1 = vmov 0   ;;  %vm69_vm0 = vcmask 261120   ;;  %s246_s0 = inlined_call_operand.vmem [shape: bf16[32,128], index: 0, kind: input, shape index: {}]   ;;  %s247_s1 = inlined_call_operand.vmem [shape: bf16[32,32], index: 1, kind: input, shape index: {}]   ;;  %s248_s2 = inlined_call_operand.vmem [shape: f32[32,1], index: 2, kind: input, shape index: {}]   ;;  %s249_s3 = inlined_call_operand.vmem [shape: bf16[32,128], index: 3, kind: output, shape index: {}]  }
   0x1   :  { %v189_v0 = vld [vmem:[%s246_s0] sm:$0xff]   ;;  %188 = vset.pattern.permute.xlu1 %v193_v1  ;;  %187 = vset.pattern.permute.xlu0 %v193_v1  ;;  %v190_v2 = vld [vmem:[%s246_s0 + $0x8] sm:$0xff]   ;;  %v25_v4 = vld [vmem:[%s248_s2 + $0x10] sm:$0xff] }
   0x2   :  { %178 = vmatprep.subr.bf16.mxu0 %v189_v0  ;;  %v191_v3 = vld [vmem:[%s247_s1] sm:$0xff]   ;;  %39 = vperm.xlu1 %188, %v25_v4   ;;  %v192_v6 = vld [vmem:[%s247_s1 + $0x8] sm:$0xff]   ;;  %v26_v7 = vld [vmem:[%s248_s2 + $0x18] sm:$0xff] }
   0x3   :  { %179 = vmatpush3.bf16.msra.mxu0 %v189_v0  ;;  %182 = vmatprep.mubr.msk.bf16.mxu0 %vm69_vm0, %v191_v3  ;;  %v23_v5 = vld [vmem:[%s248_s2] sm:$0xff]  ;;  %v24_v8 = vld [vmem:[%s248_s2 + $0x8] sm:$0xff] }
   0x4   :  { %180 = vmatprep.subr.bf16.mxu0 %v190_v2  ;;  %29 = vperm.xlu0 %187, %v23_v5  }
   0x6   :  { %44 = vperm.xlu1 %188, %v26_v7  }
   0x7   :  { %181 = vmatpush3.bf16.msra.mxu0 %v190_v2 }
   0x8   :  { %34 = vperm.xlu0 %187, %v24_v8  }
   0xa   :  { %183 = vmatmul.mubr.msk.bf16.vlgmr.msra.gmra.mrb[0].mxu0 %vm69_vm0, %v192_v6 }
  0x81   :  { %v40_v9 = vpop.permute.xlu1 %39 }
  0x83   :  { %v30_v10 = vpop.permute.xlu0 %29 }
  0x85   :  { %v45_v13 = vpop.permute.xlu1 %44 }
  0x87   :  { %v35_v15 = vpop.permute.xlu0 %34 }
  0xdd   :  { %v184_v11 = vpop.f32.mrb[0].mxu0 }
  0xde   :  { %v110_v12 = vpop.f32.mrb[1].mxu0  ;;  %v119_v16 = vadd.f32 %v184_v11, %v40_v9 }
  0xdf   :  { %v185_v14 = vpop.f32.mrb[2].mxu0  ;;  %v111_v19 = vadd.f32 %v110_v12, %v30_v10 }
  0xe0   :  { %v122_v17 = vadd.f32 %v185_v14, %v45_v13  ;;  %v113_v18 = vpop.f32.mrb[3].mxu0 }
  0xe1   :  { %v114_v20 = vadd.f32 %v113_v18, %v35_v15 }
  0xe2   :  { %v171_v21 = vpack.c.bf16 %v122_v17, %v119_v16 }
  0xe3   :  { %v166_v22 = vpack.c.bf16 %v114_v20, %v111_v19 }
  0xe4   :  { %173 = vst [vmem:[%s249_s3 + $0x8] sm:$0xff] %v171_v21  }
  0xe5   :  { %167 = vst [vmem:[%s249_s3] sm:$0xff] %v166_v22  }

// kernel: _lambda_.75
= control target key start
LH: loop header
LB: loop body
LE: loop exit
PB: predicated region body
PF: predicated region fallthrough
CT: control target
= control target key end

     0   :  { %v696_v1 = vmov 0   ;;  %vm105_vm0 = vcmask 1041408   ;;  %vm101_vm1 = vcmask 293888   ;;  %vm294_vm2 = vcmask 1043456   ;;  %s844_s1 = inlined_call_operand.vmem [shape: bf16[36,512], index: 1, kind: input, shape index: {}]   ;;  %s845_s0 = inlined_call_operand.vmem [shape: bf16[72,512], index: 0, kind: input, shape index: {}]   ;;  %s846_s3 = inlined_call_operand.vmem [shape: bf16[8,36], index: 3, kind: input, shape index: {}]   ;;  %s847_s2 = inlined_call_operand.vmem [shape: bf16[8,72], index: 2, kind: input, shape index: {}]   ;;  %s848_s4 = inlined_call_operand.vmem [shape: bf16[8,8], index: 4, kind: input, shape index: {}]   ;;  %s849_s5 = inlined_call_operand.vmem [shape: bf16[8,512], index: 5, kind: output, shape index: {}]  }
   0x1   :  { %v648_v0 = vld [vmem:[%s844_s1 + $0x4] ss:$16 sps:$4 sm:$0xff]   ;;  %150 = vmatprep.mubr.bf16.mxu0 %v696_v1  ;;  %191 = vmatprep.mubr.bf16.mxu1 %v696_v1  ;;  %v650_v2 = vld [vmem:[%s844_s1 + $0xc] ss:$16 sps:$4 sm:$0xff]   ;;  %v652_v3 = vld [vmem:[%s844_s1] ss:$16 sps:$4 sm:$0xff]  }
   0x2   :  { %118 = vmatprep.subr.bf16.mxu0 %v648_v0  ;;  %v653_v4 = vld [vmem:[%s844_s1 + $0x8] ss:$16 sps:$4 sm:$0xff]   ;;  %159 = vmatprep.subr.bf16.mxu1 %v650_v2  ;;  %v654_v5 = vld [vmem:[%s844_s1 + $0x24] ss:$16 sps:$4 sm:$0xff]   ;;  %v656_v6 = vld [vmem:[%s844_s1 + $0x2c] ss:$16 sps:$4 sm:$0xff]  }
   0x3   :  { %119 = vmatpush1.bf16.msra.mxu0 %v652_v3  ;;  %160 = vmatpush1.bf16.msra.mxu1 %v653_v4  ;;  %v658_v7 = vld [vmem:[%s844_s1 + $0x20] ss:$16 sps:$4 sm:$0xff]   ;;  %v659_v8 = vld [vmem:[%s844_s1 + $0x28] ss:$16 sps:$4 sm:$0xff]   ;;  %v666_v15 = vld [vmem:[%s845_s0 + $0x4] ss:$16 sps:$4 sm:$0xff]  }
   0x4   :  { %120 = vmatprep.subr.bf16.mxu0 %v654_v5  ;;  %v49_v9 = vld [vmem:[%s844_s1 + $0x40] sm:$0x33]  ;;  %v50_v10 = vld [vmem:[%s844_s1 + $0x48] sm:$0x33]  ;;  %161 = vmatprep.subr.bf16.mxu1 %v656_v6  ;;  %vm290_vm3 = vcmask 588800   ;;  %vm433_vm8 = vcmask 64512  }
   0x5   :  { %v600_v11 = vcombine.high %v49_v9, %v49_v9  ;;  %v602_v12 = vcombine.high %v50_v10, %v50_v10  ;;  %v599_v13 = vcombine.low %v49_v9, %v49_v9  ;;  %v601_v14 = vcombine.low %v50_v10, %v50_v10  ;;  %v669_v18 = vld [vmem:[%s845_s0 + $0xc] ss:$16 sps:$4 sm:$0xff]   ;;  %v664_v19 = vld [vmem:[%s845_s0] ss:$16 sps:$4 sm:$0xff]   ;;  %v667_v20 = vld [vmem:[%s845_s0 + $0x8] ss:$16 sps:$4 sm:$0xff]  }
   0x6   :  { %v40_v21 = vld [vmem:[%s846_s3] sm:$0xf]  ;;  %v672_v22 = vld [vmem:[%s845_s0 + $0x24] ss:$16 sps:$4 sm:$0xff]   ;;  %v675_v23 = vld [vmem:[%s845_s0 + $0x2c] ss:$16 sps:$4 sm:$0xff]  }
   0x7   :  { %121 = vmatpush1.bf16.msra.mxu0 %v658_v7  ;;  %162 = vmatpush1.bf16.msra.mxu1 %v659_v8  ;;  %v107_v16 = vsel %vm105_vm0, %v599_v13, 0  ;;  %v113_v17 = vsel %vm105_vm0, %v601_v14, 0  ;;  %v670_v24 = vld [vmem:[%s845_s0 + $0x20] ss:$16 sps:$4 sm:$0xff]   ;;  %v673_v25 = vld [vmem:[%s845_s0 + $0x28] ss:$16 sps:$4 sm:$0xff]  }
   0x8   :  { %603 = vmatprep.subr.msk.bf16.mxu0 %vm105_vm0, %v600_v11  ;;  %605 = vmatprep.subr.msk.bf16.mxu1 %vm105_vm0, %v602_v12  ;;  %v678_v26 = vld [vmem:[%s845_s0 + $0x44] ss:$16 sps:$4 sm:$0xff]   ;;  %v681_v27 = vld [vmem:[%s845_s0 + $0x4c] ss:$16 sps:$4 sm:$0xff]   ;;  %v676_v28 = vld [vmem:[%s845_s0 + $0x40] ss:$16 sps:$4 sm:$0xff]  }
   0x9   :  { %v679_v29 = vld [vmem:[%s845_s0 + $0x48] ss:$16 sps:$4 sm:$0xff]   ;;  %v684_v30 = vld [vmem:[%s845_s0 + $0x64] ss:$16 sps:$4 sm:$0xff]   ;;  %v687_v31 = vld [vmem:[%s845_s0 + $0x6c] ss:$16 sps:$4 sm:$0xff]  }
   0xa   :  { %v38_v32 = vld [vmem:[%s845_s0 + $0x80] sm:$0xff]  ;;  %v39_v33 = vld [vmem:[%s845_s0 + $0x88] sm:$0xff] }
   0xb   :  { %123 = vmatpush1.bf16.msra.mxu0 %v107_v16  ;;  %164 = vmatpush1.bf16.msra.mxu1 %v113_v17  ;;  %v682_v34 = vld [vmem:[%s845_s0 + $0x60] ss:$16 sps:$4 sm:$0xff]   ;;  %v685_v35 = vld [vmem:[%s845_s0 + $0x68] ss:$16 sps:$4 sm:$0xff]   ;;  %v624_v36 = vcombine.high %v38_v32, %v38_v32  ;;  %v626_v37 = vcombine.high %v39_v33, %v39_v33  ;;  %v623_v38 = vcombine.low %v38_v32, %v38_v32 }
   0xc   :  { %307 = vmatprep.subr.bf16.mxu0 %v666_v15  ;;  %348 = vmatprep.subr.bf16.mxu1 %v669_v18  ;;  %v625_v39 = vcombine.low %v39_v33, %v39_v33  ;;  %v21_v42 = vld [vmem:[%s847_s2] sm:$0xf] }
   0xd   :  { %v296_v40 = vsel %vm294_vm2, %v623_v38, 0 }
   0xe   :  { %604 = vmatmul.mubr.msk.bf16.vlgmr.msra.gmra.mrb[0].mxu0 %vm101_vm1, %v40_v21  ;;  %606 = vmatmul.mubr.msk.bf16.vlgmr.msra.gmra.mrb[0].mxu1 %vm101_vm1, %v40_v21  ;;  %v302_v41 = vsel %vm294_vm2, %v625_v39, 0 }
   0xf   :  { %308 = vmatpush1.bf16.msra.mxu0 %v664_v19  ;;  %349 = vmatpush1.bf16.msra.mxu1 %v667_v20 }
  0x10   :  { %309 = vmatprep.subr.bf16.mxu0 %v672_v22  ;;  %350 = vmatprep.subr.bf16.mxu1 %v675_v23 }
  0x11   :  { %339 = vmatprep.mubr.bf16.mxu0 %v696_v1  ;;  %380 = vmatprep.mubr.bf16.mxu1 %v696_v1 }
  0x13   :  { %310 = vmatpush1.bf16.msra.mxu0 %v670_v24  ;;  %351 = vmatpush1.bf16.msra.mxu1 %v673_v25  ;;  %v428_v25 = vld [vmem:[%s848_s4] sm:$0xf] }
  0x14   :  { %311 = vmatprep.subr.bf16.mxu0 %v678_v26  ;;  %352 = vmatprep.subr.bf16.mxu1 %v681_v27 }
  0x17   :  { %312 = vmatpush1.bf16.msra.mxu0 %v676_v28  ;;  %353 = vmatpush1.bf16.msra.mxu1 %v679_v29 }
  0x18   :  { %313 = vmatprep.subr.bf16.mxu0 %v684_v30  ;;  %354 = vmatprep.subr.bf16.mxu1 %v687_v31 }
  0x1b   :  { %314 = vmatpush1.bf16.msra.mxu0 %v682_v34  ;;  %355 = vmatpush1.bf16.msra.mxu1 %v685_v35 }
  0x1c   :  { %627 = vmatprep.subr.msk.bf16.mxu0 %vm294_vm2, %v624_v36  ;;  %629 = vmatprep.subr.msk.bf16.mxu1 %vm294_vm2, %v626_v37 }
  0x1f   :  { %316 = vmatpush1.bf16.msra.mxu0 %v296_v40  ;;  %357 = vmatpush1.bf16.msra.mxu1 %v302_v41 }
  0x22   :  { %628 = vmatmul.mubr.msk.bf16.vlgmr.msra.gmra.mrb[0].mxu0 %vm290_vm3, %v21_v42  ;;  %630 = vmatmul.mubr.msk.bf16.vlgmr.msra.gmra.mrb[0].mxu1 %vm290_vm3, %v21_v42 }
  0x23   :  { %481 = vmatprep.mubr.bf16.mxu0 %v696_v1  ;;  %522 = vmatprep.mubr.bf16.mxu1 %v696_v1 }
  0xf5   :  { %v341_v43 = vpop.f32.mrb[0].mxu0  ;;  %v382_v44 = vpop.f32.mrb[0].mxu1 }
  0xf6   :  { %v343_v45 = vpop.f32.mrb[1].mxu0  ;;  %v384_v46 = vpop.f32.mrb[1].mxu1 }
  0xf7   :  { %v389_v47 = vadd.f32 %v343_v45, %v341_v43  ;;  %v345_v48 = vpop.f32.mrb[2].mxu0  ;;  %v386_v49 = vpop.f32.mrb[2].mxu1 }
  0xf8   :  { %v346_v50 = vpop.f32.mrb[3].mxu0  ;;  %v387_v51 = vpop.f32.mrb[3].mxu1 }
  0xf9   :  { %v390_v52 = vadd.f32 %v389_v47, %v382_v44 }
  0xfb   :  { %v391_v53 = vadd.f32 %v390_v52, %v384_v46 }
  0xfd   :  { %392 = vadd.xlane.f32.xlu0 %v391_v53 }
 0x18a   :  { %v393_v54 = vpop.xlane.xlu0 %392 }
 0x18b   :  { %v395_v55 = vmul.f32 0.001953125, %v393_v54 }
 0x18d   :  { %v396_v56 = vsub.f32 %v341_v43, %v395_v55  ;;  %v397_v57 = vsub.f32 %v343_v45, %v395_v55  ;;  %v398_v58 = vsub.f32 %v382_v44, %v395_v55  ;;  %v399_v59 = vsub.f32 %v384_v46, %v395_v55 }
 0x18f   :  { %v400_v60 = vmul.f32 %v396_v56, %v396_v56  ;;  %v401_v61 = vmul.f32 %v397_v57, %v397_v57  ;;  %v402_v62 = vmul.f32 %v398_v58, %v398_v58  ;;  %v403_v0 = vmul.f32 %v399_v59, %v399_v59 }
 0x191   :  { %v404_v63 = vadd.f32 %v401_v61, %v400_v60 }
 0x193   :  { %v405_v1 = vadd.f32 %v404_v63, %v402_v62 }
 0x195   :  { %v406_v2 = vadd.f32 %v405_v1, %v403_v0 }
 0x197   :  { %407 = vadd.xlane.f32.xlu0 %v406_v2 }
 0x224   :  { %v408_v3 = vpop.xlane.xlu0 %407 }
 0x225   :  { %v409_v4 = vmul.f32 0.001953125, %v408_v3 }
 0x227   :  { %v410_v5 = vadd.f32 1e-05, %v409_v4 }
 0x229   :  { %692 = vrsqrt.f32 %v410_v5 }
 0x233   :  { %v693_v6 = vpop.eup %692 }
 0x234   :  { %v413_v7 = vmul.f32 %v693_v6, %v397_v57  ;;  %v415_v8 = vmul.f32 %v693_v6, %v399_v59  ;;  %v412_v9 = vmul.f32 %v693_v6, %v396_v56  ;;  %v414_v10 = vmul.f32 %v693_v6, %v398_v58 }
 0x236   :  { %vm417_vm4 = vcmp.ge.f32.partialorder %v413_v7, 0.0  ;;  %v421_v11 = vmul.f32 0.2, %v413_v7  ;;  %vm419_vm5 = vcmp.ge.f32.partialorder %v415_v8, 0.0  ;;  %v423_v12 = vmul.f32 0.2, %v415_v8 }
 0x237   :  { %vm416_vm6 = vcmp.ge.f32.partialorder %v412_v9, 0.0  ;;  %v420_v13 = vmul.f32 0.2, %v412_v9  ;;  %vm418_vm7 = vcmp.ge.f32.partialorder %v414_v10, 0.0  ;;  %v422_v14 = vmul.f32 0.2, %v414_v10 }
 0x238   :  { %v425_v15 = vsel %vm417_vm4, %v413_v7, %v421_v11  ;;  %v427_v16 = vsel %vm419_vm5, %v415_v8, %v423_v12 }
 0x239   :  { %v430_v17 = vpack.c.bf16 %v425_v15, %v425_v15  ;;  %v432_v18 = vpack.c.bf16 %v427_v16, %v427_v16  ;;  %v424_v19 = vsel %vm416_vm6, %v412_v9, %v420_v13  ;;  %v426_v20 = vsel %vm418_vm7, %v414_v10, %v422_v14 }
 0x23a   :  { %v429_v21 = vpack.c.bf16 %v424_v19, %v424_v19  ;;  %v431_v22 = vpack.c.bf16 %v426_v20, %v426_v20 }
 0x23b   :  { %631 = vmatprep.subr.msk.bf16.mxu0 %vm294_vm2, %v430_v17  ;;  %633 = vmatprep.subr.msk.bf16.mxu1 %vm294_vm2, %v432_v18 }
 0x23c   :  { %v438_v23 = vsel %vm294_vm2, %v429_v21, 0  ;;  %v444_v24 = vsel %vm294_vm2, %v431_v22, 0 }
 0x23d   :  { %450 = vmatpush1.bf16.msra.mxu0 %v438_v23  ;;  %491 = vmatpush1.bf16.msra.mxu1 %v444_v24 }
 0x240   :  { %632 = vmatmul.mubr.msk.bf16.vlgmr.msra.gmra.mrb[4].mxu0 %vm433_vm8, %v428_v25  ;;  %634 = vmatmul.mubr.msk.bf16.vlgmr.msra.gmra.mrb[4].mxu1 %vm433_vm8, %v428_v25 }
 0x313   :  { %v483_v26 = vpop.f32.mrb[4].mxu0  ;;  %v524_v27 = vpop.f32.mrb[4].mxu1 }
 0x314   :  { %v485_v28 = vpop.f32.mrb[5].mxu0  ;;  %v526_v29 = vpop.f32.mrb[5].mxu1 }
 0x315   :  { %v531_v30 = vadd.f32 %v485_v28, %v483_v26  ;;  %v487_v31 = vpop.f32.mrb[6].mxu0  ;;  %v528_v32 = vpop.f32.mrb[6].mxu1 }
 0x316   :  { %v488_v33 = vpop.f32.mrb[7].mxu0  ;;  %v529_v34 = vpop.f32.mrb[7].mxu1 }
 0x317   :  { %v532_v35 = vadd.f32 %v531_v30, %v524_v27 }
 0x319   :  { %v533_v36 = vadd.f32 %v532_v35, %v526_v29 }
 0x31b   :  { %534 = vadd.xlane.f32.xlu1 %v533_v36 }
 0x3a8   :  { %v535_v37 = vpop.xlane.xlu1 %534 }
 0x3a9   :  { %v536_v38 = vmul.f32 0.001953125, %v535_v37 }
 0x3ab   :  { %v537_v39 = vsub.f32 %v483_v26, %v536_v38  ;;  %v538_v40 = vsub.f32 %v485_v28, %v536_v38  ;;  %v539_v41 = vsub.f32 %v524_v27, %v536_v38  ;;  %v540_v42 = vsub.f32 %v526_v29, %v536_v38 }
 0x3ad   :  { %v541_v43 = vmul.f32 %v537_v39, %v537_v39  ;;  %v542_v44 = vmul.f32 %v538_v40, %v538_v40  ;;  %v543_v45 = vmul.f32 %v539_v41, %v539_v41  ;;  %v544_v47 = vmul.f32 %v540_v42, %v540_v42 }
 0x3af   :  { %v545_v46 = vadd.f32 %v542_v44, %v541_v43 }
 0x3b1   :  { %v546_v48 = vadd.f32 %v545_v46, %v543_v45 }
 0x3b3   :  { %v547_v49 = vadd.f32 %v546_v48, %v544_v47 }
 0x3b5   :  { %548 = vadd.xlane.f32.xlu1 %v547_v49 }
 0x442   :  { %v549_v50 = vpop.xlane.xlu1 %548 }
 0x443   :  { %v550_v51 = vmul.f32 0.001953125, %v549_v50 }
 0x445   :  { %v551_v52 = vadd.f32 1e-05, %v550_v51 }
 0x447   :  { %694 = vrsqrt.f32 %v551_v52 }
 0x451   :  { %v695_v53 = vpop.eup %694 }
 0x452   :  { %v553_v54 = vmul.f32 %v695_v53, %v537_v39  ;;  %v554_v55 = vmul.f32 %v695_v53, %v538_v40  ;;  %v555_v56 = vmul.f32 %v695_v53, %v539_v41  ;;  %v556_v57 = vmul.f32 %v695_v53, %v540_v42 }
 0x454   :  { %vm557_vm9 = vcmp.ge.f32.partialorder %v553_v54, 0.0  ;;  %vm558_vm10 = vcmp.ge.f32.partialorder %v554_v55, 0.0  ;;  %vm559_vm11 = vcmp.ge.f32.partialorder %v555_v56, 0.0  ;;  %vm560_vm12 = vcmp.ge.f32.partialorder %v556_v57, 0.0 }
 0x455   :  { %v561_v58 = vmul.f32 0.2, %v553_v54  ;;  %v562_v59 = vmul.f32 0.2, %v554_v55  ;;  %v563_v60 = vmul.f32 0.2, %v555_v56 }
 0x456   :  { %v564_v61 = vmul.f32 0.2, %v556_v57 }
 0x457   :  { %v565_v62 = vsel %vm557_vm9, %v553_v54, %v561_v58  ;;  %v566_v63 = vsel %vm558_vm10, %v554_v55, %v562_v59  ;;  %v567_v0 = vsel %vm559_vm11, %v555_v56, %v563_v60 }
 0x458   :  { %v568_v1 = vsel %vm560_vm12, %v556_v57, %v564_v61  ;;  %v637_v2 = vpack.c.bf16 %v566_v63, %v565_v62 }
 0x459   :  { %v638_v3 = vpack.c.bf16 %v568_v1, %v567_v0 }
 0x45a   :  { %585 = vst [vmem:[%s849_s5] sm:$0xff] %v637_v2 }
 0x45b   :  { %586 = vst [vmem:[%s849_s5 + $0x8] sm:$0xff] %v638_v3 }

// kernel: _lambda_.76
= control target key start
LH: loop header
LB: loop body
LE: loop exit
PB: predicated region body
PF: predicated region fallthrough
CT: control target
= control target key end

     0   :  { %v321_v1 = vmov 0   ;;  %vm101_vm0 = vcmask 261120   ;;  %s408_s0 = inlined_call_operand.vmem [shape: bf16[32,512], index: 0, kind: input, shape index: {}]   ;;  %s409_s1 = inlined_call_operand.vmem [shape: bf16[32,32], index: 1, kind: input, shape index: {}]   ;;  %s410_s2 = inlined_call_operand.vmem [shape: f32[32,1], index: 2, kind: input, shape index: {}]   ;;  %s411_s3 = inlined_call_operand.vmem [shape: bf16[32,512], index: 3, kind: output, shape index: {}]  }
   0x1   :  { %v307_v0 = vld [vmem:[%s408_s0 + $0x4] ss:$16 sps:$4 sm:$0xff]   ;;  %140 = vmatprep.mubr.bf16.mxu0 %v321_v1  ;;  %193 = vmatprep.mubr.bf16.mxu1 %v321_v1  ;;  %v309_v2 = vld [vmem:[%s408_s0 + $0xc] ss:$16 sps:$4 sm:$0xff]   ;;  %v311_v3 = vld [vmem:[%s408_s0] ss:$16 sps:$4 sm:$0xff]  }
   0x2   :  { %305 = vset.pattern.permute.xlu0 %v321_v1  ;;  %306 = vset.pattern.permute.xlu1 %v321_v1  ;;  %v312_v4 = vld [vmem:[%s408_s0 + $0x8] ss:$16 sps:$4 sm:$0xff]   ;;  %v313_v5 = vld [vmem:[%s408_s0 + $0x24] ss:$16 sps:$4 sm:$0xff]   ;;  %v315_v6 = vld [vmem:[%s408_s0 + $0x2c] ss:$16 sps:$4 sm:$0xff]  }
   0x3   :  { %108 = vmatprep.subr.bf16.mxu0 %v307_v0  ;;  %161 = vmatprep.subr.bf16.mxu1 %v309_v2  ;;  %v317_v7 = vld [vmem:[%s408_s0 + $0x20] ss:$16 sps:$4 sm:$0xff]   ;;  %v318_v8 = vld [vmem:[%s408_s0 + $0x28] ss:$16 sps:$4 sm:$0xff]  }
   0x4   :  { %109 = vmatpush1.bf16.msra.mxu0 %v311_v3  ;;  %162 = vmatpush1.bf16.msra.mxu1 %v312_v4  ;;  %v319_v9 = vld [vmem:[%s409_s1] sm:$0xff]   ;;  %v29_v11 = vld [vmem:[%s410_s2 + $0x10] sm:$0xff]  ;;  %v28_v12 = vld [vmem:[%s410_s2 + $0x8] sm:$0xff] }
   0x5   :  { %110 = vmatprep.subr.bf16.mxu0 %v313_v5  ;;  %163 = vmatprep.subr.bf16.mxu1 %v315_v6  ;;  %v27_v10 = vld [vmem:[%s410_s2] sm:$0xff]  ;;  %v30_v13 = vld [vmem:[%s410_s2 + $0x18] sm:$0xff]  ;;  %v320_v14 = vld [vmem:[%s409_s1 + $0x8] sm:$0xff]  }
   0x6   :  { %33 = vperm.xlu0 %305, %v27_v10   ;;  %43 = vperm.xlu1 %306, %v29_v11  }
   0x8   :  { %111 = vmatpush1.bf16.msra.mxu0 %v317_v7  ;;  %164 = vmatpush1.bf16.msra.mxu1 %v318_v8 }
   0xa   :  { %38 = vperm.xlu0 %305, %v28_v12   ;;  %48 = vperm.xlu1 %306, %v30_v13  }
   0xb   :  { %284 = vmatmul.mubr.msk.bf16.vlgmr.msra.gmra.mrb[0].mxu0 %vm101_vm0, %v319_v9  ;;  %286 = vmatmul.mubr.msk.bf16.vlgmr.msra.gmra.mrb[0].mxu1 %vm101_vm0, %v319_v9 }
   0xc   :  { %150 = vmatprep.mubr.bf16.mxu0 %v321_v1  ;;  %203 = vmatprep.mubr.bf16.mxu1 %v321_v1 }
  0x13   :  { %285 = vmatmul.mubr.msk.bf16.gmra.mrb[4].mxu0 %vm101_vm0, %v320_v14  ;;  %287 = vmatmul.mubr.msk.bf16.gmra.mrb[4].mxu1 %vm101_vm0, %v320_v14 }
  0x85   :  { %v34_v15 = vpop.permute.xlu0 %33  ;;  %v44_v17 = vpop.permute.xlu1 %43 }
  0x89   :  { %v39_v16 = vpop.permute.xlu0 %38  ;;  %v49_v38 = vpop.permute.xlu1 %48 }
  0xde   :  { %v142_v18 = vpop.f32.mrb[0].mxu0  ;;  %v195_v19 = vpop.f32.mrb[0].mxu1 }
  0xdf   :  { %v143_v20 = vadd.f32 %v142_v18, %v34_v15  ;;  %v196_v21 = vadd.f32 %v195_v19, %v34_v15  ;;  %v144_v22 = vpop.f32.mrb[1].mxu0  ;;  %v197_v23 = vpop.f32.mrb[1].mxu1 }
  0xe0   :  { %v145_v24 = vadd.f32 %v144_v22, %v34_v15  ;;  %v198_v25 = vadd.f32 %v197_v23, %v34_v15  ;;  %v146_v26 = vpop.f32.mrb[2].mxu0  ;;  %v199_v27 = vpop.f32.mrb[2].mxu1 }
  0xe1   :  { %v147_v28 = vadd.f32 %v146_v26, %v39_v16  ;;  %v200_v29 = vadd.f32 %v199_v27, %v39_v16  ;;  %v148_v30 = vpop.f32.mrb[3].mxu0  ;;  %v201_v31 = vpop.f32.mrb[3].mxu1 }
  0xe2   :  { %v296_v32 = vpack.c.bf16 %v145_v24, %v143_v20  ;;  %v297_v33 = vpack.c.bf16 %v198_v25, %v196_v21  ;;  %v149_v34 = vadd.f32 %v148_v30, %v39_v16  ;;  %v202_v35 = vadd.f32 %v201_v31, %v39_v16 }
  0xe4   :  { %262 = vst [vmem:[%s411_s3] sm:$0xff] %v296_v32  ;;  %263 = vst [vmem:[%s411_s3 + $0x8] sm:$0xff] %v297_v33  ;;  %v298_v36 = vpack.c.bf16 %v149_v34, %v147_v28  ;;  %v299_v37 = vpack.c.bf16 %v202_v35, %v200_v29 }
  0xe6   :  { %264 = vst [vmem:[%s411_s3 + $0x10] sm:$0xff] %v298_v36  ;;  %265 = vst [vmem:[%s411_s3 + $0x18] sm:$0xff] %v299_v37  ;;  %v152_v39 = vpop.f32.mrb[4].mxu0  ;;  %v205_v40 = vpop.f32.mrb[4].mxu1 }
  0xe7   :  { %v153_v41 = vadd.f32 %v152_v39, %v44_v17  ;;  %v206_v42 = vadd.f32 %v205_v40, %v44_v17  ;;  %v154_v43 = vpop.f32.mrb[5].mxu0  ;;  %v207_v44 = vpop.f32.mrb[5].mxu1 }
  0xe8   :  { %v155_v45 = vadd.f32 %v154_v43, %v44_v17  ;;  %v208_v46 = vadd.f32 %v207_v44, %v44_v17  ;;  %v156_v47 = vpop.f32.mrb[6].mxu0  ;;  %v209_v48 = vpop.f32.mrb[6].mxu1 }
  0xe9   :  { %v157_v49 = vadd.f32 %v156_v47, %v49_v38  ;;  %v210_v50 = vadd.f32 %v209_v48, %v49_v38  ;;  %v158_v51 = vpop.f32.mrb[7].mxu0  ;;  %v211_v52 = vpop.f32.mrb[7].mxu1 }
  0xea   :  { %v300_v53 = vpack.c.bf16 %v155_v45, %v153_v41  ;;  %v301_v54 = vpack.c.bf16 %v208_v46, %v206_v42  ;;  %v159_v55 = vadd.f32 %v158_v51, %v49_v38  ;;  %v212_v56 = vadd.f32 %v211_v52, %v49_v38 }
  0xec   :  { %266 = vst [vmem:[%s411_s3 + $0x20] sm:$0xff] %v300_v53  ;;  %267 = vst [vmem:[%s411_s3 + $0x28] sm:$0xff] %v301_v54  ;;  %v302_v57 = vpack.c.bf16 %v159_v55, %v157_v49  ;;  %v303_v58 = vpack.c.bf16 %v212_v56, %v210_v50 }
  0xee   :  { %268 = vst [vmem:[%s411_s3 + $0x30] sm:$0xff] %v302_v57  ;;  %269 = vst [vmem:[%s411_s3 + $0x38] sm:$0xff] %v303_v58 }

// kernel: _lambda_.77
= control target key start
LH: loop header
LB: loop body
LE: loop exit
PB: predicated region body
PF: predicated region fallthrough
CT: control target
= control target key end

     0   :  { %v1168_v3 = vmov 0   ;;  %vm449_vm0 = vcmask 1043456   ;;  %vm445_vm1 = vcmask 588800   ;;  %s1485_s0 = inlined_call_operand.vmem [shape: bf16[72,2048], index: 0, kind: input, shape index: {}]   ;;  %s1486_s1 = inlined_call_operand.vmem [shape: bf16[8,72], index: 1, kind: input, shape index: {}]   ;;  %s1487_s2 = inlined_call_operand.vmem [shape: bf16[8,2048], index: 2, kind: output, shape index: {}]  }
   0x1   :  { %v13_v0 = vld [vmem:[%s1485_s0] sm:$0xff]  ;;  %v14_v2 = vld [vmem:[%s1485_s0 + $0x8] sm:$0xff]  ;;  %530 = vmatprep.mubr.bf16.mxu0 %v1168_v3  ;;  %571 = vmatprep.mubr.bf16.mxu1 %v1168_v3  ;;  %v15_v39 = vld [vmem:[%s1485_s0 + $0x10] sm:$0xff] }
   0x2   :  { %v21_v1 = vld [vmem:[%s1485_s0 + $0x40] sm:$0xff]  ;;  %v22_v6 = vld [vmem:[%s1485_s0 + $0x48] sm:$0xff]  ;;  %v23_v40 = vld [vmem:[%s1485_s0 + $0x50] sm:$0xff] }
   0x3   :  { %v1038_v4 = vcombine.high %v13_v0, %v21_v1  ;;  %v1037_v5 = vcombine.low %v13_v0, %v21_v1  ;;  %v29_v7 = vld [vmem:[%s1485_s0 + $0x80] sm:$0xff]  ;;  %v1040_v9 = vcombine.high %v14_v2, %v22_v6  ;;  %v1039_v10 = vcombine.low %v14_v2, %v22_v6  ;;  %v30_v12 = vld [vmem:[%s1485_s0 + $0x88] sm:$0xff]  ;;  %v16_v41 = vld [vmem:[%s1485_s0 + $0x18] sm:$0xff] }
   0x4   :  { %v37_v8 = vld [vmem:[%s1485_s0 + $0xc0] sm:$0xff]  ;;  %v38_v13 = vld [vmem:[%s1485_s0 + $0xc8] sm:$0xff]  ;;  %v24_v42 = vld [vmem:[%s1485_s0 + $0x58] sm:$0xff]  ;;  %v1042_v44 = vcombine.high %v15_v39, %v23_v40  ;;  %v1041_v52 = vcombine.low %v15_v39, %v23_v40 }
   0x5   :  { %v1054_v11 = vcombine.high %v29_v7, %v37_v8  ;;  %v45_v14 = vld [vmem:[%s1485_s0 + $0x100] sm:$0xff]  ;;  %498 = vmatprep.subr.bf16.mxu0 %v1038_v4  ;;  %v1056_v15 = vcombine.high %v30_v12, %v38_v13  ;;  %v46_v17 = vld [vmem:[%s1485_s0 + $0x108] sm:$0xff]  ;;  %539 = vmatprep.subr.bf16.mxu1 %v1040_v9  ;;  %v1053_v19 = vcombine.low %v29_v7, %v37_v8  ;;  %v31_v47 = vld [vmem:[%s1485_s0 + $0x90] sm:$0xff] }
   0x6   :  { %v53_v16 = vld [vmem:[%s1485_s0 + $0x140] sm:$0xff]  ;;  %v54_v18 = vld [vmem:[%s1485_s0 + $0x148] sm:$0xff]  ;;  %499 = vmatpush1.bf16.msra.mxu0 %v1037_v5  ;;  %540 = vmatpush1.bf16.msra.mxu1 %v1039_v10  ;;  %v1055_v20 = vcombine.low %v30_v12, %v38_v13  ;;  %v1044_v46 = vcombine.high %v16_v41, %v24_v42  ;;  %v39_v48 = vld [vmem:[%s1485_s0 + $0xd0] sm:$0xff]  ;;  %v1043_v53 = vcombine.low %v16_v41, %v24_v42 }
   0x7   :  { %500 = vmatprep.subr.bf16.mxu0 %v1054_v11  ;;  %v1070_v21 = vcombine.high %v45_v14, %v53_v16  ;;  %541 = vmatprep.subr.bf16.mxu1 %v1056_v15  ;;  %v1072_v22 = vcombine.high %v46_v17, %v54_v18  ;;  %v61_v23 = vld [vmem:[%s1485_s0 + $0x180] sm:$0xff]  ;;  %v62_v25 = vld [vmem:[%s1485_s0 + $0x188] sm:$0xff]  ;;  %v1069_v27 = vcombine.low %v45_v14, %v53_v16  ;;  %v32_v49 = vld [vmem:[%s1485_s0 + $0x98] sm:$0xff] }
   0x8   :  { %v69_v24 = vld [vmem:[%s1485_s0 + $0x1c0] sm:$0xff]  ;;  %v70_v26 = vld [vmem:[%s1485_s0 + $0x1c8] sm:$0xff]  ;;  %v1071_v28 = vcombine.low %v46_v17, %v54_v18  ;;  %v40_v50 = vld [vmem:[%s1485_s0 + $0xd8] sm:$0xff]  ;;  %v1058_v54 = vcombine.high %v31_v47, %v39_v48  ;;  %v1057_v60 = vcombine.low %v31_v47, %v39_v48 }
   0x9   :  { %v1086_v29 = vcombine.high %v61_v23, %v69_v24  ;;  %v1088_v30 = vcombine.high %v62_v25, %v70_v26  ;;  %v77_v31 = vld [vmem:[%s1485_s0 + $0x200] sm:$0xff]  ;;  %v78_v32 = vld [vmem:[%s1485_s0 + $0x208] sm:$0xff]  ;;  %v1085_v33 = vcombine.low %v61_v23, %v69_v24  ;;  %v1087_v34 = vcombine.low %v62_v25, %v70_v26  ;;  %v47_v56 = vld [vmem:[%s1485_s0 + $0x110] sm:$0xff] }
   0xa   :  { %501 = vmatpush1.bf16.msra.mxu0 %v1053_v19  ;;  %542 = vmatpush1.bf16.msra.mxu1 %v1055_v20  ;;  %v1102_v35 = vcombine.high %v77_v31, %v77_v31  ;;  %v1101_v36 = vcombine.low %v77_v31, %v77_v31  ;;  %v1104_v37 = vcombine.high %v78_v32, %v78_v32  ;;  %v1271_v51 = vld [vmem:[%s1486_s1] sm:$0xf]  ;;  %v55_v57 = vld [vmem:[%s1485_s0 + $0x150] sm:$0xff]  ;;  %v48_v58 = vld [vmem:[%s1485_s0 + $0x118] sm:$0xff] }
   0xb   :  { %502 = vmatprep.subr.bf16.mxu0 %v1070_v21  ;;  %543 = vmatprep.subr.bf16.mxu1 %v1072_v22  ;;  %v1103_v38 = vcombine.low %v78_v32, %v78_v32  ;;  %v1060_v55 = vcombine.high %v32_v49, %v40_v50  ;;  %v56_v59 = vld [vmem:[%s1485_s0 + $0x158] sm:$0xff]  ;;  %v1059_v61 = vcombine.low %v32_v49, %v40_v50  ;;  %v63_v0 = vld [vmem:[%s1485_s0 + $0x190] sm:$0xff]  ;;  %v17_v17 = vld [vmem:[%s1485_s0 + $0x20] sm:$0xff] }
   0xc   :  { %v451_v43 = vsel %vm449_vm0, %v1101_v36, 0  ;;  %v1074_v62 = vcombine.high %v47_v56, %v55_v57  ;;  %v1076_v63 = vcombine.high %v48_v58, %v56_v59  ;;  %v71_v1 = vld [vmem:[%s1485_s0 + $0x1d0] sm:$0xff]  ;;  %v64_v2 = vld [vmem:[%s1485_s0 + $0x198] sm:$0xff]  ;;  %v1073_v5 = vcombine.low %v47_v56, %v55_v57  ;;  %v25_v18 = vld [vmem:[%s1485_s0 + $0x60] sm:$0xff] }
   0xd   :  { %v457_v45 = vsel %vm449_vm0, %v1103_v38, 0  ;;  %v72_v4 = vld [vmem:[%s1485_s0 + $0x1d8] sm:$0xff]  ;;  %v1075_v6 = vcombine.low %v48_v58, %v56_v59  ;;  %v1090_v7 = vcombine.high %v63_v0, %v71_v1  ;;  %v79_v9 = vld [vmem:[%s1485_s0 + $0x210] sm:$0xff]  ;;  %v1089_v11 = vcombine.low %v63_v0, %v71_v1  ;;  %v18_v19 = vld [vmem:[%s1485_s0 + $0x28] sm:$0xff] }
   0xe   :  { %503 = vmatpush1.bf16.msra.mxu0 %v1069_v27  ;;  %544 = vmatpush1.bf16.msra.mxu1 %v1071_v28  ;;  %v1092_v8 = vcombine.high %v64_v2, %v72_v4  ;;  %v80_v10 = vld [vmem:[%s1485_s0 + $0x218] sm:$0xff]  ;;  %v1091_v12 = vcombine.low %v64_v2, %v72_v4  ;;  %v1106_v13 = vcombine.high %v79_v9, %v79_v9  ;;  %v26_v20 = vld [vmem:[%s1485_s0 + $0x68] sm:$0xff]  ;;  %v33_v25 = vld [vmem:[%s1485_s0 + $0xa0] sm:$0xff] }
   0xf   :  { %504 = vmatprep.subr.bf16.mxu0 %v1086_v29  ;;  %545 = vmatprep.subr.bf16.mxu1 %v1088_v30  ;;  %v1105_v14 = vcombine.low %v79_v9, %v79_v9  ;;  %v1108_v15 = vcombine.high %v80_v10, %v80_v10  ;;  %v1107_v16 = vcombine.low %v80_v10, %v80_v10  ;;  %v41_v26 = vld [vmem:[%s1485_s0 + $0xe0] sm:$0xff]  ;;  %v34_v27 = vld [vmem:[%s1485_s0 + $0xa8] sm:$0xff]  ;;  %v19_v58 = vld [vmem:[%s1485_s0 + $0x30] sm:$0xff] }
  0x10   :  { %v1046_v22 = vcombine.high %v17_v17, %v25_v18  ;;  %v1048_v24 = vcombine.high %v18_v19, %v26_v20  ;;  %v42_v28 = vld [vmem:[%s1485_s0 + $0xe8] sm:$0xff]  ;;  %v1045_v29 = vcombine.low %v17_v17, %v25_v18  ;;  %v1047_v30 = vcombine.low %v18_v19, %v26_v20  ;;  %v65_v41 = vld [vmem:[%s1485_s0 + $0x1a0] sm:$0xff]  ;;  %v27_v59 = vld [vmem:[%s1485_s0 + $0x70] sm:$0xff] }
  0x11   :  { %v463_v21 = vsel %vm449_vm0, %v1105_v14, 0  ;;  %v469_v23 = vsel %vm449_vm0, %v1107_v16, 0  ;;  %v1062_v31 = vcombine.high %v33_v25, %v41_v26  ;;  %v1064_v32 = vcombine.high %v34_v27, %v42_v28  ;;  %v58_v36 = vld [vmem:[%s1485_s0 + $0x168] sm:$0xff]  ;;  %v73_v42 = vld [vmem:[%s1485_s0 + $0x1e0] sm:$0xff]  ;;  %v35_v2 = vld [vmem:[%s1485_s0 + $0xb0] sm:$0xff] }
  0x12   :  { %505 = vmatpush1.bf16.msra.mxu0 %v1085_v33  ;;  %546 = vmatpush1.bf16.msra.mxu1 %v1087_v34  ;;  %v49_v33 = vld [vmem:[%s1485_s0 + $0x120] sm:$0xff]  ;;  %v1063_v38 = vcombine.low %v34_v27, %v42_v28  ;;  %v1094_v47 = vcombine.high %v65_v41, %v73_v42  ;;  %v82_v50 = vld [vmem:[%s1485_s0 + $0x228] sm:$0xff]  ;;  %v43_v4 = vld [vmem:[%s1485_s0 + $0xf0] sm:$0xff] }
  0x13   :  { %1117 = vmatprep.subr.msk.bf16.mxu0 %vm449_vm0, %v1102_v35  ;;  %1119 = vmatprep.subr.msk.bf16.mxu1 %vm449_vm0, %v1104_v37  ;;  %v57_v34 = vld [vmem:[%s1485_s0 + $0x160] sm:$0xff]  ;;  %v50_v35 = vld [vmem:[%s1485_s0 + $0x128] sm:$0xff]  ;;  %v1061_v37 = vcombine.low %v33_v25, %v41_v26  ;;  %v1112_v56 = vcombine.high %v82_v50, %v82_v50  ;;  %v1111_v57 = vcombine.low %v82_v50, %v82_v50  ;;  %v60_v14 = vld [vmem:[%s1485_s0 + $0x178] sm:$0xff] }
  0x14   :  { %v1078_v39 = vcombine.high %v49_v33, %v57_v34  ;;  %v1080_v40 = vcombine.high %v50_v35, %v58_v36  ;;  %v81_v49 = vld [vmem:[%s1485_s0 + $0x220] sm:$0xff]  ;;  %v1066_v9 = vcombine.high %v35_v2, %v43_v4  ;;  %v67_v19 = vld [vmem:[%s1485_s0 + $0x1b0] sm:$0xff]  ;;  %v84_v28 = vld [vmem:[%s1485_s0 + $0x238] sm:$0xff] }
  0x15   :  { %v481_v0 = vsel %vm449_vm0, %v1111_v57, 0  ;;  %v75_v20 = vld [vmem:[%s1485_s0 + $0x1f0] sm:$0xff] }
  0x16   :  { %507 = vmatpush1.bf16.msra.mxu0 %v451_v43  ;;  %548 = vmatpush1.bf16.msra.mxu1 %v457_v45  ;;  %v66_v43 = vld [vmem:[%s1485_s0 + $0x1a8] sm:$0xff]  ;;  %v1077_v45 = vcombine.low %v49_v33, %v57_v34  ;;  %v1098_v25 = vcombine.high %v67_v19, %v75_v20  ;;  %v83_v27 = vld [vmem:[%s1485_s0 + $0x230] sm:$0xff]  ;;  %v1115_v33 = vcombine.low %v84_v28, %v84_v28 }
  0x17   :  { %580 = vmatprep.subr.bf16.mxu0 %v1042_v44  ;;  %621 = vmatprep.subr.bf16.mxu1 %v1044_v46  ;;  %v74_v44 = vld [vmem:[%s1485_s0 + $0x1e8] sm:$0xff]  ;;  %v1079_v46 = vcombine.low %v50_v35, %v58_v36 }
  0x18   :  { %v1096_v48 = vcombine.high %v66_v43, %v74_v44  ;;  %v493_v35 = vsel %vm449_vm0, %v1115_v33, 0 }
  0x19   :  { %1118 = vmatmul.mubr.msk.bf16.vlgmr.msra.gmra.mrb[0].mxu0 %vm445_vm1, %v1271_v51  ;;  %1120 = vmatmul.mubr.msk.bf16.vlgmr.msra.gmra.mrb[0].mxu1 %vm445_vm1, %v1271_v51 }
  0x1a   :  { %581 = vmatpush1.bf16.msra.mxu0 %v1041_v52  ;;  %622 = vmatpush1.bf16.msra.mxu1 %v1043_v53  ;;  %v1093_v52 = vcombine.low %v65_v41, %v73_v42  ;;  %v1095_v53 = vcombine.low %v66_v43, %v74_v44 }
  0x1b   :  { %582 = vmatprep.subr.bf16.mxu0 %v1058_v54  ;;  %623 = vmatprep.subr.bf16.mxu1 %v1060_v55  ;;  %v1110_v54 = vcombine.high %v81_v49, %v81_v49  ;;  %v1109_v55 = vcombine.low %v81_v49, %v81_v49 }
  0x1c   :  { %612 = vmatprep.mubr.bf16.mxu0 %v1168_v3  ;;  %653 = vmatprep.mubr.bf16.mxu1 %v1168_v3 }
  0x1e   :  { %583 = vmatpush1.bf16.msra.mxu0 %v1057_v60  ;;  %624 = vmatpush1.bf16.msra.mxu1 %v1059_v61  ;;  %v20_v60 = vld [vmem:[%s1485_s0 + $0x38] sm:$0xff] }
  0x1f   :  { %584 = vmatprep.subr.bf16.mxu0 %v1074_v62  ;;  %625 = vmatprep.subr.bf16.mxu1 %v1076_v63  ;;  %v28_v61 = vld [vmem:[%s1485_s0 + $0x78] sm:$0xff]  ;;  %v475_v62 = vsel %vm449_vm0, %v1109_v55, 0  ;;  %v1050_v63 = vcombine.high %v19_v58, %v27_v59 }
  0x20   :  { %v1052_v1 = vcombine.high %v20_v60, %v28_v61 }
  0x22   :  { %585 = vmatpush1.bf16.msra.mxu0 %v1073_v5  ;;  %626 = vmatpush1.bf16.msra.mxu1 %v1075_v6  ;;  %v36_v5 = vld [vmem:[%s1485_s0 + $0xb8] sm:$0xff] }
  0x23   :  { %586 = vmatprep.subr.bf16.mxu0 %v1090_v7  ;;  %627 = vmatprep.subr.bf16.mxu1 %v1092_v8  ;;  %v44_v6 = vld [vmem:[%s1485_s0 + $0xf8] sm:$0xff]  ;;  %v1049_v7 = vcombine.low %v19_v58, %v27_v59  ;;  %v1051_v8 = vcombine.low %v20_v60, %v28_v61 }
  0x24   :  { %v1068_v10 = vcombine.high %v36_v5, %v44_v6  ;;  %v1067_v16 = vcombine.low %v36_v5, %v44_v6 }
  0x26   :  { %587 = vmatpush1.bf16.msra.mxu0 %v1089_v11  ;;  %628 = vmatpush1.bf16.msra.mxu1 %v1091_v12  ;;  %v51_v11 = vld [vmem:[%s1485_s0 + $0x130] sm:$0xff] }
  0x27   :  { %1121 = vmatprep.subr.msk.bf16.mxu0 %vm449_vm0, %v1106_v13  ;;  %1123 = vmatprep.subr.msk.bf16.mxu1 %vm449_vm0, %v1108_v15  ;;  %v59_v12 = vld [vmem:[%s1485_s0 + $0x170] sm:$0xff]  ;;  %v52_v13 = vld [vmem:[%s1485_s0 + $0x138] sm:$0xff]  ;;  %v1065_v15 = vcombine.low %v35_v2, %v43_v4 }
  0x28   :  { %v1082_v17 = vcombine.high %v51_v11, %v59_v12  ;;  %v1084_v18 = vcombine.high %v52_v13, %v60_v14 }
  0x2a   :  { %589 = vmatpush1.bf16.msra.mxu0 %v463_v21  ;;  %630 = vmatpush1.bf16.msra.mxu1 %v469_v23  ;;  %v68_v21 = vld [vmem:[%s1485_s0 + $0x1b8] sm:$0xff]  ;;  %v1081_v23 = vcombine.low %v51_v11, %v59_v12 }
  0x2b   :  { %662 = vmatprep.subr.bf16.mxu0 %v1046_v22  ;;  %703 = vmatprep.subr.bf16.mxu1 %v1048_v24  ;;  %v76_v22 = vld [vmem:[%s1485_s0 + $0x1f8] sm:$0xff]  ;;  %v1083_v24 = vcombine.low %v52_v13, %v60_v14 }
  0x2c   :  { %v1100_v26 = vcombine.high %v68_v21, %v76_v22 }
  0x2d   :  { %1122 = vmatmul.mubr.msk.bf16.vlgmr.msra.gmra.mrb[4].mxu0 %vm445_vm1, %v1271_v51  ;;  %1124 = vmatmul.mubr.msk.bf16.vlgmr.msra.gmra.mrb[4].mxu1 %vm445_vm1, %v1271_v51 }
  0x2e   :  { %663 = vmatpush1.bf16.msra.mxu0 %v1045_v29  ;;  %704 = vmatpush1.bf16.msra.mxu1 %v1047_v30  ;;  %v1097_v29 = vcombine.low %v67_v19, %v75_v20  ;;  %v1114_v30 = vcombine.high %v83_v27, %v83_v27 }
  0x2f   :  { %664 = vmatprep.subr.bf16.mxu0 %v1062_v31  ;;  %705 = vmatprep.subr.bf16.mxu1 %v1064_v32  ;;  %v1113_v31 = vcombine.low %v83_v27, %v83_v27  ;;  %v1116_v32 = vcombine.high %v84_v28, %v84_v28 }
  0x30   :  { %694 = vmatprep.mubr.bf16.mxu0 %v1168_v3  ;;  %735 = vmatprep.mubr.bf16.mxu1 %v1168_v3 }
  0x31   :  { %v487_v34 = vsel %vm449_vm0, %v1113_v31, 0 }
  0x32   :  { %665 = vmatpush1.bf16.msra.mxu0 %v1061_v37  ;;  %706 = vmatpush1.bf16.msra.mxu1 %v1063_v38 }
  0x33   :  { %666 = vmatprep.subr.bf16.mxu0 %v1078_v39  ;;  %707 = vmatprep.subr.bf16.mxu1 %v1080_v40 }
  0x36   :  { %667 = vmatpush1.bf16.msra.mxu0 %v1077_v45  ;;  %708 = vmatpush1.bf16.msra.mxu1 %v1079_v46 }
  0x37   :  { %668 = vmatprep.subr.bf16.mxu0 %v1094_v47  ;;  %709 = vmatprep.subr.bf16.mxu1 %v1096_v48 }
  0x3a   :  { %669 = vmatpush1.bf16.msra.mxu0 %v1093_v52  ;;  %710 = vmatpush1.bf16.msra.mxu1 %v1095_v53 }
  0x3b   :  { %1125 = vmatprep.subr.msk.bf16.mxu0 %vm449_vm0, %v1110_v54  ;;  %1127 = vmatprep.subr.msk.bf16.mxu1 %vm449_vm0, %v1112_v56 }
  0x3e   :  { %671 = vmatpush1.bf16.msra.mxu0 %v475_v62  ;;  %712 = vmatpush1.bf16.msra.mxu1 %v481_v0 }
  0x3f   :  { %744 = vmatprep.subr.bf16.mxu0 %v1050_v63  ;;  %785 = vmatprep.subr.bf16.mxu1 %v1052_v1 }
  0x41   :  { %1126 = vmatmul.mubr.msk.bf16.vlgmr.msra.gmra.mrb[8].mxu0 %vm445_vm1, %v1271_v51  ;;  %1128 = vmatmul.mubr.msk.bf16.vlgmr.msra.gmra.mrb[8].mxu1 %vm445_vm1, %v1271_v51 }
  0x42   :  { %745 = vmatpush1.bf16.msra.mxu0 %v1049_v7  ;;  %786 = vmatpush1.bf16.msra.mxu1 %v1051_v8 }
  0x43   :  { %746 = vmatprep.subr.bf16.mxu0 %v1066_v9  ;;  %787 = vmatprep.subr.bf16.mxu1 %v1068_v10 }
  0x44   :  { %776 = vmatprep.mubr.bf16.mxu0 %v1168_v3  ;;  %817 = vmatprep.mubr.bf16.mxu1 %v1168_v3  ;;  %v1099_v3 = vcombine.low %v68_v21, %v76_v22 }
  0x46   :  { %747 = vmatpush1.bf16.msra.mxu0 %v1065_v15  ;;  %788 = vmatpush1.bf16.msra.mxu1 %v1067_v16 }
  0x47   :  { %748 = vmatprep.subr.bf16.mxu0 %v1082_v17  ;;  %789 = vmatprep.subr.bf16.mxu1 %v1084_v18 }
  0x4a   :  { %749 = vmatpush1.bf16.msra.mxu0 %v1081_v23  ;;  %790 = vmatpush1.bf16.msra.mxu1 %v1083_v24 }
  0x4b   :  { %750 = vmatprep.subr.bf16.mxu0 %v1098_v25  ;;  %791 = vmatprep.subr.bf16.mxu1 %v1100_v26 }
  0x4e   :  { %751 = vmatpush1.bf16.msra.mxu0 %v1097_v29  ;;  %792 = vmatpush1.bf16.msra.mxu1 %v1099_v3 }
  0x4f   :  { %1129 = vmatprep.subr.msk.bf16.mxu0 %vm449_vm0, %v1114_v30  ;;  %1131 = vmatprep.subr.msk.bf16.mxu1 %vm449_vm0, %v1116_v32 }
  0x52   :  { %753 = vmatpush1.bf16.msra.mxu0 %v487_v34  ;;  %794 = vmatpush1.bf16.msra.mxu1 %v493_v35 }
  0x55   :  { %1130 = vmatmul.mubr.msk.bf16.vlgmr.msra.gmra.mrb[12].mxu0 %vm445_vm1, %v1271_v51  ;;  %1132 = vmatmul.mubr.msk.bf16.vlgmr.msra.gmra.mrb[12].mxu1 %vm445_vm1, %v1271_v51 }
  0xec   :  { %v532_v36 = vpop.f32.mrb[0].mxu0  ;;  %v573_v38 = vpop.f32.mrb[0].mxu1 }
  0xed   :  { %v534_v37 = vpop.f32.mrb[1].mxu0  ;;  %v575_v41 = vpop.f32.mrb[1].mxu1 }
  0xee   :  { %v826_v39 = vadd.f32 %v534_v37, %v532_v36  ;;  %v536_v40 = vpop.f32.mrb[2].mxu0  ;;  %v577_v43 = vpop.f32.mrb[2].mxu1 }
  0xef   :  { %v537_v42 = vpop.f32.mrb[3].mxu0  ;;  %v578_v45 = vpop.f32.mrb[3].mxu1 }
  0xf0   :  { %v827_v44 = vadd.f32 %v826_v39, %v573_v38 }
  0xf2   :  { %v828_v46 = vadd.f32 %v827_v44, %v575_v41 }
 0x100   :  { %v614_v47 = vpop.f32.mrb[4].mxu0  ;;  %v655_v50 = vpop.f32.mrb[4].mxu1 }
 0x101   :  { %v829_v48 = vadd.f32 %v828_v46, %v614_v47  ;;  %v616_v49 = vpop.f32.mrb[5].mxu0  ;;  %v657_v53 = vpop.f32.mrb[5].mxu1 }
 0x102   :  { %v618_v52 = vpop.f32.mrb[6].mxu0  ;;  %v659_v51 = vpop.f32.mrb[6].mxu1 }
 0x103   :  { %v830_v54 = vadd.f32 %v829_v48, %v616_v49  ;;  %v619_v55 = vpop.f32.mrb[7].mxu0  ;;  %v660_v56 = vpop.f32.mrb[7].mxu1 }
 0x105   :  { %v831_v57 = vadd.f32 %v830_v54, %v655_v50 }
 0x107   :  { %v832_v58 = vadd.f32 %v831_v57, %v657_v53 }
 0x114   :  { %v696_v59 = vpop.f32.mrb[8].mxu0  ;;  %v737_v62 = vpop.f32.mrb[8].mxu1 }
 0x115   :  { %v833_v60 = vadd.f32 %v832_v58, %v696_v59  ;;  %v698_v61 = vpop.f32.mrb[9].mxu0  ;;  %v739_v0 = vpop.f32.mrb[9].mxu1 }
 0x116   :  { %v700_v63 = vpop.f32.mrb[10].mxu0  ;;  %v741_v4 = vpop.f32.mrb[10].mxu1 }
 0x117   :  { %v834_v1 = vadd.f32 %v833_v60, %v698_v61  ;;  %v701_v2 = vpop.f32.mrb[11].mxu0  ;;  %v742_v5 = vpop.f32.mrb[11].mxu1 }
 0x119   :  { %v835_v6 = vadd.f32 %v834_v1, %v737_v62 }
 0x11b   :  { %v836_v7 = vadd.f32 %v835_v6, %v739_v0 }
 0x128   :  { %v778_v8 = vpop.f32.mrb[12].mxu0  ;;  %v819_v11 = vpop.f32.mrb[12].mxu1 }
 0x129   :  { %v837_v9 = vadd.f32 %v836_v7, %v778_v8  ;;  %v780_v10 = vpop.f32.mrb[13].mxu0  ;;  %v821_v13 = vpop.f32.mrb[13].mxu1 }
 0x12a   :  { %v782_v12 = vpop.f32.mrb[14].mxu0  ;;  %v823_v16 = vpop.f32.mrb[14].mxu1 }
 0x12b   :  { %v838_v14 = vadd.f32 %v837_v9, %v780_v10  ;;  %v783_v15 = vpop.f32.mrb[15].mxu0  ;;  %v824_v17 = vpop.f32.mrb[15].mxu1 }
 0x12d   :  { %v839_v18 = vadd.f32 %v838_v14, %v819_v11 }
 0x12f   :  { %v840_v19 = vadd.f32 %v839_v18, %v821_v13 }
 0x131   :  { %841 = vadd.xlane.f32.xlu0 %v840_v19 }
 0x1be   :  { %v842_v20 = vpop.xlane.xlu0 %841 }
 0x1bf   :  { %v844_v21 = vmul.f32 0.00048828125, %v842_v20 }
 0x1c1   :  { %v845_v22 = vsub.f32 %v532_v36, %v844_v21  ;;  %v846_v23 = vsub.f32 %v534_v37, %v844_v21  ;;  %v847_v24 = vsub.f32 %v573_v38, %v844_v21  ;;  %v848_v27 = vsub.f32 %v575_v41, %v844_v21 }
 0x1c2   :  { %v849_v28 = vsub.f32 %v614_v47, %v844_v21  ;;  %v850_v30 = vsub.f32 %v616_v49, %v844_v21  ;;  %v851_v33 = vsub.f32 %v655_v50, %v844_v21  ;;  %v852_v39 = vsub.f32 %v657_v53, %v844_v21 }
 0x1c3   :  { %v861_v25 = vmul.f32 %v845_v22, %v845_v22  ;;  %v862_v26 = vmul.f32 %v846_v23, %v846_v23  ;;  %v863_v29 = vmul.f32 %v847_v24, %v847_v24  ;;  %v864_v31 = vmul.f32 %v848_v27, %v848_v27 }
 0x1c4   :  { %v865_v34 = vmul.f32 %v849_v28, %v849_v28  ;;  %v866_v40 = vmul.f32 %v850_v30, %v850_v30  ;;  %v853_v43 = vsub.f32 %v696_v59, %v844_v21  ;;  %v867_v44 = vmul.f32 %v851_v33, %v851_v33 }
 0x1c5   :  { %v877_v3 = vadd.f32 %v862_v26, %v861_v25  ;;  %v854_v37 = vsub.f32 %v698_v61, %v844_v21  ;;  %v868_v38 = vmul.f32 %v852_v39, %v852_v39  ;;  %v855_v46 = vsub.f32 %v737_v62, %v844_v21 }
 0x1c6   :  { %v869_v41 = vmul.f32 %v853_v43, %v853_v43  ;;  %v856_v48 = vsub.f32 %v739_v0, %v844_v21  ;;  %v857_v54 = vsub.f32 %v778_v8, %v844_v21  ;;  %v858_v51 = vsub.f32 %v780_v10, %v844_v21 }
 0x1c7   :  { %v878_v32 = vadd.f32 %v877_v3, %v863_v29  ;;  %v870_v52 = vmul.f32 %v854_v37, %v854_v37  ;;  %v871_v55 = vmul.f32 %v855_v46, %v855_v46  ;;  %v859_v57 = vsub.f32 %v819_v11, %v844_v21 }
 0x1c8   :  { %v872_v56 = vmul.f32 %v856_v48, %v856_v48  ;;  %v873_v58 = vmul.f32 %v857_v54, %v857_v54  ;;  %v860_v60 = vsub.f32 %v821_v13, %v844_v21  ;;  %v874_v63 = vmul.f32 %v858_v51, %v858_v51 }
 0x1c9   :  { %v879_v35 = vadd.f32 %v878_v32, %v864_v31  ;;  %v875_v1 = vmul.f32 %v859_v57, %v859_v57 }
 0x1ca   :  { %v876_v62 = vmul.f32 %v860_v60, %v860_v60 }
 0x1cb   :  { %v880_v42 = vadd.f32 %v879_v35, %v865_v34 }
 0x1cd   :  { %v881_v36 = vadd.f32 %v880_v42, %v866_v40 }
 0x1cf   :  { %v882_v45 = vadd.f32 %v881_v36, %v867_v44 }
 0x1d1   :  { %v883_v47 = vadd.f32 %v882_v45, %v868_v38 }
 0x1d3   :  { %v884_v49 = vadd.f32 %v883_v47, %v869_v41 }
 0x1d5   :  { %v885_v50 = vadd.f32 %v884_v49, %v870_v52 }
 0x1d7   :  { %v886_v53 = vadd.f32 %v885_v50, %v871_v55 }
 0x1d9   :  { %v887_v59 = vadd.f32 %v886_v53, %v872_v56 }
 0x1db   :  { %v888_v61 = vadd.f32 %v887_v59, %v873_v58 }
 0x1dd   :  { %v889_v2 = vadd.f32 %v888_v61, %v874_v63 }
 0x1df   :  { %v890_v4 = vadd.f32 %v889_v2, %v875_v1 }
 0x1e1   :  { %v891_v5 = vadd.f32 %v890_v4, %v876_v62 }
 0x1e3   :  { %892 = vadd.xlane.f32.xlu0 %v891_v5 }
 0x270   :  { %v893_v0 = vpop.xlane.xlu0 %892 }
 0x271   :  { %v894_v6 = vmul.f32 0.00048828125, %v893_v0 }
 0x273   :  { %v895_v7 = vadd.f32 1e-05, %v894_v6 }
 0x275   :  { %1166 = vrsqrt.f32 %v895_v7 }
 0x27f   :  { %v1167_v8 = vpop.eup %1166 }
 0x280   :  { %v897_v9 = vmul.f32 %v1167_v8, %v845_v22  ;;  %v898_v10 = vmul.f32 %v1167_v8, %v846_v23  ;;  %v899_v12 = vmul.f32 %v1167_v8, %v847_v24  ;;  %v900_v11 = vmul.f32 %v1167_v8, %v848_v27 }
 0x281   :  { %v901_v14 = vmul.f32 %v1167_v8, %v849_v28  ;;  %v902_v15 = vmul.f32 %v1167_v8, %v850_v30  ;;  %v903_v13 = vmul.f32 %v1167_v8, %v851_v33  ;;  %v904_v16 = vmul.f32 %v1167_v8, %v852_v39 }
 0x282   :  { %v905_v17 = vmul.f32 %v1167_v8, %v853_v43  ;;  %v906_v18 = vmul.f32 %v1167_v8, %v854_v37  ;;  %v907_v19 = vmul.f32 %v1167_v8, %v855_v46  ;;  %v908_v20 = vmul.f32 %v1167_v8, %v856_v48 }
 0x283   :  { %v909_v21 = vmul.f32 %v1167_v8, %v857_v54  ;;  %v910_v25 = vmul.f32 %v1167_v8, %v858_v51  ;;  %v911_v26 = vmul.f32 %v1167_v8, %v859_v57  ;;  %v912_v29 = vmul.f32 %v1167_v8, %v860_v60 }
 0x284   :  { %vm913_vm2 = vcmp.ge.f32.partialorder %v897_v9, 0.0  ;;  %vm914_vm3 = vcmp.ge.f32.partialorder %v898_v10, 0.0  ;;  %vm915_vm4 = vcmp.ge.f32.partialorder %v899_v12, 0.0  ;;  %vm916_vm5 = vcmp.ge.f32.partialorder %v900_v11, 0.0 }
 0x285   :  { %vm917_vm6 = vcmp.ge.f32.partialorder %v901_v14, 0.0  ;;  %vm918_vm7 = vcmp.ge.f32.partialorder %v902_v15, 0.0  ;;  %vm919_vm8 = vcmp.ge.f32.partialorder %v903_v13, 0.0  ;;  %vm920_vm9 = vcmp.ge.f32.partialorder %v904_v16, 0.0 }
 0x286   :  { %vm921_vm10 = vcmp.ge.f32.partialorder %v905_v17, 0.0  ;;  %vm922_vm11 = vcmp.ge.f32.partialorder %v906_v18, 0.0  ;;  %vm923_vm12 = vcmp.ge.f32.partialorder %v907_v19, 0.0  ;;  %vm924_vm13 = vcmp.ge.f32.partialorder %v908_v20, 0.0 }
 0x287   :  { %vm925_vm14 = vcmp.ge.f32.partialorder %v909_v21, 0.0  ;;  %vm926_vm15 = vcmp.ge.f32.partialorder %v910_v25, 0.0  ;;  %vm927_vm0 = vcmp.ge.f32.partialorder %v911_v26, 0.0  ;;  %vm928_vm1 = vcmp.ge.f32.partialorder %v912_v29, 0.0 }
 0x288   :  { %v929_v22 = vmul.f32 0.2, %v897_v9  ;;  %v930_v23 = vmul.f32 0.2, %v898_v10  ;;  %v931_v24 = vmul.f32 0.2, %v899_v12 }
 0x289   :  { %v932_v27 = vmul.f32 0.2, %v900_v11  ;;  %v933_v28 = vmul.f32 0.2, %v901_v14  ;;  %v934_v3 = vmul.f32 0.2, %v902_v15 }
 0x28a   :  { %v935_v30 = vmul.f32 0.2, %v903_v13  ;;  %v936_v31 = vmul.f32 0.2, %v904_v16  ;;  %v937_v32 = vmul.f32 0.2, %v905_v17  ;;  %v945_v33 = vsel %vm913_vm2, %v897_v9, %v929_v22 }
 0x28b   :  { %v938_v34 = vmul.f32 0.2, %v906_v18  ;;  %v939_v35 = vmul.f32 0.2, %v907_v19  ;;  %v940_v39 = vmul.f32 0.2, %v908_v20  ;;  %v946_v40 = vsel %vm914_vm3, %v898_v10, %v930_v23 }
 0x28c   :  { %v941_v42 = vmul.f32 0.2, %v909_v21  ;;  %v942_v43 = vmul.f32 0.2, %v910_v25  ;;  %v943_v44 = vmul.f32 0.2, %v911_v26  ;;  %v947_v36 = vsel %vm915_vm4, %v899_v12, %v931_v24 }
 0x28d   :  { %v944_v37 = vmul.f32 0.2, %v912_v29  ;;  %v948_v38 = vsel %vm916_vm5, %v900_v11, %v932_v27  ;;  %v949_v45 = vsel %vm917_vm6, %v901_v14, %v933_v28  ;;  %v950_v46 = vsel %vm918_vm7, %v902_v15, %v934_v3 }
 0x28e   :  { %v951_v41 = vsel %vm919_vm8, %v903_v13, %v935_v30  ;;  %v952_v47 = vsel %vm920_vm9, %v904_v16, %v936_v31  ;;  %v953_v48 = vsel %vm921_vm10, %v905_v17, %v937_v32  ;;  %v954_v52 = vsel %vm922_vm11, %v906_v18, %v938_v34 }
 0x28f   :  { %v955_v49 = vsel %vm923_vm12, %v907_v19, %v939_v35  ;;  %v956_v54 = vsel %vm924_vm13, %v908_v20, %v940_v39  ;;  %v957_v55 = vsel %vm925_vm14, %v909_v21, %v941_v42  ;;  %v958_v50 = vsel %vm926_vm15, %v910_v25, %v942_v43 }
 0x290   :  { %v959_v51 = vsel %vm927_vm0, %v911_v26, %v943_v44  ;;  %v960_v56 = vsel %vm928_vm1, %v912_v29, %v944_v37  ;;  %v1141_v53 = vpack.c.bf16 %v946_v40, %v945_v33  ;;  %v1142_v57 = vpack.c.bf16 %v948_v38, %v947_v36 }
 0x291   :  { %v1143_v58 = vpack.c.bf16 %v950_v46, %v949_v45  ;;  %v1144_v59 = vpack.c.bf16 %v952_v47, %v951_v41  ;;  %v1145_v60 = vpack.c.bf16 %v954_v52, %v953_v48  ;;  %v1146_v63 = vpack.c.bf16 %v956_v54, %v955_v49 }
 0x292   :  { %v1147_v61 = vpack.c.bf16 %v958_v50, %v957_v55  ;;  %v1148_v1 = vpack.c.bf16 %v960_v56, %v959_v51  ;;  %1025 = vst [vmem:[%s1487_s2] sm:$0xff] %v1141_v53  ;;  %1026 = vst [vmem:[%s1487_s2 + $0x8] sm:$0xff] %v1142_v57 }
 0x293   :  { %1027 = vst [vmem:[%s1487_s2 + $0x10] sm:$0xff] %v1143_v58  ;;  %1028 = vst [vmem:[%s1487_s2 + $0x18] sm:$0xff] %v1144_v59 }
 0x294   :  { %1029 = vst [vmem:[%s1487_s2 + $0x20] sm:$0xff] %v1145_v60  ;;  %1030 = vst [vmem:[%s1487_s2 + $0x28] sm:$0xff] %v1146_v63 }
 0x295   :  { %1031 = vst [vmem:[%s1487_s2 + $0x30] sm:$0xff] %v1147_v61  ;;  %1032 = vst [vmem:[%s1487_s2 + $0x38] sm:$0xff] %v1148_v1 }

// kernel: _lambda_.81
= control target key start
LH: loop header
LB: loop body
LE: loop exit
PB: predicated region body
PF: predicated region fallthrough
CT: control target
= control target key end

     0   :  { %v34_v0 = vlaneseq  ;;  %v682_v2 = vmov 1983009808   ;;  %v683_v4 = vmov 0   ;;  %vm102_vm0 = vcmask 1041408   ;;  %s821_s0 = inlined_call_operand.vmem [shape: bf16[4,2048], index: 0, kind: input, shape index: {}]   ;;  %s822_s2 = inlined_call_operand.vmem [shape: f32[8,1], index: 2, kind: input, shape index: {}]   ;;  %s823_s1 = inlined_call_operand.vmem [shape: bf16[8,4], index: 1, kind: input, shape index: {}]   ;;  %s824_s3 = inlined_call_operand.vmem [shape: f32[8,2048], index: 3, kind: output, shape index: {}]  }
   0x1   :  { %v16_v1 = vld [vmem:[%s821_s0] sm:$0xff]  ;;  %v32_v3 = vunpack.c.l.s4 %v682_v2  ;;  %183 = vmatprep.mubr.bf16.mxu0 %v683_v4  ;;  %224 = vmatprep.mubr.bf16.mxu1 %v683_v4  ;;  %v17_v5 = vld [vmem:[%s821_s0 + $0x8] sm:$0xff]  ;;  %v18_v11 = vld [vmem:[%s821_s0 + $0x10] sm:$0xff]  ;;  %vm98_vm1 = vcmask 31744  }
   0x2   :  { %v35_v6 = vshrl.u32 %v34_v0, 7  ;;  %613 = vset.pattern.permute.xlu0 %v683_v4  ;;  %v20_v7 = vld [vmem:[%s822_s2] sm:$0xff]  ;;  %v30_v9 = vcombine.high %v16_v1, %v16_v1  ;;  %v47_v10 = vcombine.high %v17_v5, %v17_v5  ;;  %v64_v13 = vcombine.high %v18_v11, %v18_v11  ;;  %v19_v26 = vld [vmem:[%s821_s0 + $0x18] sm:$0xff] }
   0x3   :  { %v33_v8 = vunpack.c.0.s8 %v32_v3  ;;  %23 = vperm.xlu0 %613, %v20_v7   ;;  %v15_v27 = vld [vmem:[%s823_s1] sm:$0xf]  ;;  %v81_v32 = vcombine.high %v19_v26, %v19_v26 }
   0x5   :  { %v36_v12 = vsub.s32 %v33_v8, %v35_v6 }
   0x7   :  { %v37_v14 = vrot.slane %v16_v1, %v36_v12  ;;  %v44_v15 = vrot.slane %v30_v9, %v36_v12  ;;  %v54_v16 = vrot.slane %v17_v5, %v36_v12  ;;  %v61_v17 = vrot.slane %v47_v10, %v36_v12 }
   0x8   :  { %v71_v24 = vrot.slane %v18_v11, %v36_v12  ;;  %v78_v25 = vrot.slane %v64_v13, %v36_v12  ;;  %v88_v33 = vrot.slane %v19_v26, %v36_v12  ;;  %v95_v34 = vrot.slane %v81_v32, %v36_v12 }
   0x9   :  { %v45_v18 = vcombine.high %v37_v14, %v37_v14  ;;  %v46_v19 = vcombine.high %v44_v15, %v44_v15  ;;  %v104_v20 = vsel %vm102_vm0, %v37_v14, 0  ;;  %v110_v21 = vsel %vm102_vm0, %v44_v15, 0 }
   0xa   :  { %v62_v22 = vcombine.high %v54_v16, %v54_v16  ;;  %v63_v23 = vcombine.high %v61_v17, %v61_v17  ;;  %v116_v28 = vsel %vm102_vm0, %v54_v16, 0  ;;  %v122_v29 = vsel %vm102_vm0, %v61_v17, 0 }
   0xb   :  { %595 = vmatprep.subr.msk.bf16.mxu0 %vm102_vm0, %v45_v18  ;;  %597 = vmatprep.subr.msk.bf16.mxu1 %vm102_vm0, %v46_v19  ;;  %v79_v30 = vcombine.high %v71_v24, %v71_v24  ;;  %v80_v31 = vcombine.high %v78_v25, %v78_v25  ;;  %v128_v35 = vsel %vm102_vm0, %v71_v24, 0  ;;  %v134_v36 = vsel %vm102_vm0, %v78_v25, 0 }
   0xc   :  { %152 = vmatpush1.bf16.msra.mxu0 %v104_v20  ;;  %193 = vmatpush1.bf16.msra.mxu1 %v110_v21  ;;  %v96_v37 = vcombine.high %v88_v33, %v88_v33  ;;  %v97_v38 = vcombine.high %v95_v34, %v95_v34  ;;  %v140_v39 = vsel %vm102_vm0, %v88_v33, 0  ;;  %v146_v40 = vsel %vm102_vm0, %v95_v34, 0 }
   0xd   :  { %599 = vmatprep.subr.msk.bf16.mxu0 %vm102_vm0, %v62_v22  ;;  %601 = vmatprep.subr.msk.bf16.mxu1 %vm102_vm0, %v63_v23 }
   0xf   :  { %596 = vmatmul.mubr.msk.bf16.vlgmr.msra.gmra.mrb[0].mxu0 %vm98_vm1, %v15_v27  ;;  %598 = vmatmul.mubr.msk.bf16.vlgmr.msra.gmra.mrb[0].mxu1 %vm98_vm1, %v15_v27 }
  0x10   :  { %234 = vmatpush1.bf16.msra.mxu0 %v116_v28  ;;  %275 = vmatpush1.bf16.msra.mxu1 %v122_v29 }
  0x11   :  { %265 = vmatprep.mubr.bf16.mxu0 %v683_v4  ;;  %306 = vmatprep.mubr.bf16.mxu1 %v683_v4 }
  0x12   :  { %603 = vmatprep.subr.msk.bf16.mxu0 %vm102_vm0, %v79_v30  ;;  %605 = vmatprep.subr.msk.bf16.mxu1 %vm102_vm0, %v80_v31 }
  0x17   :  { %600 = vmatmul.mubr.msk.bf16.vlgmr.msra.gmra.mrb[4].mxu0 %vm98_vm1, %v15_v27  ;;  %602 = vmatmul.mubr.msk.bf16.vlgmr.msra.gmra.mrb[4].mxu1 %vm98_vm1, %v15_v27 }
  0x18   :  { %316 = vmatpush1.bf16.msra.mxu0 %v128_v35  ;;  %357 = vmatpush1.bf16.msra.mxu1 %v134_v36 }
  0x19   :  { %347 = vmatprep.mubr.bf16.mxu0 %v683_v4  ;;  %388 = vmatprep.mubr.bf16.mxu1 %v683_v4 }
  0x1a   :  { %607 = vmatprep.subr.msk.bf16.mxu0 %vm102_vm0, %v96_v37  ;;  %609 = vmatprep.subr.msk.bf16.mxu1 %vm102_vm0, %v97_v38 }
  0x1f   :  { %604 = vmatmul.mubr.msk.bf16.vlgmr.msra.gmra.mrb[8].mxu0 %vm98_vm1, %v15_v27  ;;  %606 = vmatmul.mubr.msk.bf16.vlgmr.msra.gmra.mrb[8].mxu1 %vm98_vm1, %v15_v27 }
  0x20   :  { %398 = vmatpush1.bf16.msra.mxu0 %v140_v39  ;;  %439 = vmatpush1.bf16.msra.mxu1 %v146_v40 }
  0x21   :  { %429 = vmatprep.mubr.bf16.mxu0 %v683_v4  ;;  %470 = vmatprep.mubr.bf16.mxu1 %v683_v4 }
  0x27   :  { %608 = vmatmul.mubr.msk.bf16.vlgmr.msra.gmra.mrb[12].mxu0 %vm98_vm1, %v15_v27  ;;  %610 = vmatmul.mubr.msk.bf16.vlgmr.msra.gmra.mrb[12].mxu1 %vm98_vm1, %v15_v27 }
  0x82   :  { %v755_v41 = vpop.permute.xlu0 %23 }
  0xe2   :  { %v185_v42 = vpop.f32.mrb[0].mxu0  ;;  %v226_v43 = vpop.f32.mrb[0].mxu1 }
  0xe3   :  { %v186_v44 = vadd.f32 %v185_v42, %v755_v41  ;;  %v227_v45 = vadd.f32 %v226_v43, %v755_v41  ;;  %v187_v46 = vpop.f32.mrb[1].mxu0  ;;  %v228_v47 = vpop.f32.mrb[1].mxu1 }
  0xe4   :  { %v188_v48 = vadd.f32 %v187_v46, %v755_v41  ;;  %v229_v49 = vadd.f32 %v228_v47, %v755_v41  ;;  %v189_v50 = vpop.f32.mrb[2].mxu0  ;;  %v230_v51 = vpop.f32.mrb[2].mxu1 }
  0xe5   :  { %v479_v52 = vsub.f32 0.0, %v186_v44  ;;  %v481_v53 = vsub.f32 0.0, %v227_v45  ;;  %v190_v54 = vpop.f32.mrb[3].mxu0  ;;  %v231_v55 = vpop.f32.mrb[3].mxu1 }
  0xe6   :  { %v480_v56 = vsub.f32 0.0, %v188_v48  ;;  %v482_v57 = vsub.f32 0.0, %v229_v49 }
  0xe7   :  { %v495_v58 = vmul.f32 1.442695, %v479_v52  ;;  %v499_v59 = vmul.f32 1.442695, %v481_v53 }
  0xe8   :  { %v497_v60 = vmul.f32 1.442695, %v480_v56  ;;  %v501_v61 = vmul.f32 1.442695, %v482_v57 }
  0xe9   :  { %618 = vpow2.f32 %v495_v58 }
  0xea   :  { %620 = vpow2.f32 %v499_v59  ;;  %v267_v62 = vpop.f32.mrb[4].mxu0  ;;  %v308_v63 = vpop.f32.mrb[4].mxu1 }
  0xeb   :  { %622 = vpow2.f32 %v497_v60  ;;  %v268_v0 = vadd.f32 %v267_v62, %v755_v41  ;;  %v309_v1 = vadd.f32 %v308_v63, %v755_v41  ;;  %v269_v2 = vpop.f32.mrb[5].mxu0  ;;  %v310_v3 = vpop.f32.mrb[5].mxu1 }
  0xec   :  { %624 = vpow2.f32 %v501_v61  ;;  %v270_v4 = vadd.f32 %v269_v2, %v755_v41  ;;  %v311_v5 = vadd.f32 %v310_v3, %v755_v41  ;;  %v271_v6 = vpop.f32.mrb[6].mxu0  ;;  %v312_v7 = vpop.f32.mrb[6].mxu1 }
  0xed   :  { %v483_v8 = vsub.f32 0.0, %v268_v0  ;;  %v485_v9 = vsub.f32 0.0, %v309_v1  ;;  %v272_v10 = vpop.f32.mrb[7].mxu0  ;;  %v313_v11 = vpop.f32.mrb[7].mxu1 }
  0xee   :  { %v484_v12 = vsub.f32 0.0, %v270_v4  ;;  %v486_v13 = vsub.f32 0.0, %v311_v5 }
  0xef   :  { %v503_v14 = vmul.f32 1.442695, %v483_v8  ;;  %v507_v15 = vmul.f32 1.442695, %v485_v9 }
  0xf0   :  { %v505_v16 = vmul.f32 1.442695, %v484_v12  ;;  %v509_v17 = vmul.f32 1.442695, %v486_v13 }
  0xf1   :  { %626 = vpow2.f32 %v503_v14 }
  0xf2   :  { %628 = vpow2.f32 %v507_v15  ;;  %v349_v18 = vpop.f32.mrb[8].mxu0  ;;  %v390_v19 = vpop.f32.mrb[8].mxu1 }
  0xf3   :  { %v619_v20 = vpop.eup %618  ;;  %630 = vpow2.f32 %v505_v16  ;;  %v350_v21 = vadd.f32 %v349_v18, %v755_v41  ;;  %v391_v22 = vadd.f32 %v390_v19, %v755_v41  ;;  %v351_v23 = vpop.f32.mrb[9].mxu0 }
  0xf4   :  { %v392_v24 = vpop.f32.mrb[9].mxu1  ;;  %v621_v25 = vpop.eup %620  ;;  %v527_v26 = vadd.f32 1.0, %v619_v20  ;;  %632 = vpow2.f32 %v509_v17  ;;  %v352_v27 = vadd.f32 %v351_v23, %v755_v41 }
  0xf5   :  { %v393_v28 = vadd.f32 %v392_v24, %v755_v41  ;;  %v353_v29 = vpop.f32.mrb[10].mxu0  ;;  %v394_v30 = vpop.f32.mrb[10].mxu1  ;;  %v529_v32 = vadd.f32 1.0, %v621_v25  ;;  %v487_v33 = vsub.f32 0.0, %v350_v21  ;;  %v489_v34 = vsub.f32 0.0, %v391_v22 }
  0xf6   :  { %v623_v31 = vpop.eup %622  ;;  %v354_v35 = vpop.f32.mrb[11].mxu0  ;;  %634 = vrcp.f32 %v527_v26  ;;  %v488_v39 = vsub.f32 0.0, %v352_v27 }
  0xf7   :  { %v395_v36 = vpop.f32.mrb[11].mxu1  ;;  %v625_v37 = vpop.eup %624  ;;  %v528_v38 = vadd.f32 1.0, %v623_v31  ;;  %v490_v40 = vsub.f32 0.0, %v393_v28  ;;  %636 = vrcp.f32 %v529_v32  ;;  %v511_v43 = vmul.f32 1.442695, %v487_v33 }
  0xf8   :  { %v530_v42 = vadd.f32 1.0, %v625_v37  ;;  %v515_v44 = vmul.f32 1.442695, %v489_v34  ;;  %v513_v45 = vmul.f32 1.442695, %v488_v39 }
  0xf9   :  { %638 = vrcp.f32 %v528_v38  ;;  %v517_v46 = vmul.f32 1.442695, %v490_v40 }
  0xfa   :  { %640 = vrcp.f32 %v530_v42  ;;  %v431_v47 = vpop.f32.mrb[12].mxu0  ;;  %v472_v48 = vpop.f32.mrb[12].mxu1 }
  0xfb   :  { %642 = vpow2.f32 %v511_v43  ;;  %v627_v49 = vpop.eup %626  ;;  %v432_v50 = vadd.f32 %v431_v47, %v755_v41  ;;  %v473_v51 = vadd.f32 %v472_v48, %v755_v41  ;;  %v433_v52 = vpop.f32.mrb[13].mxu0 }
  0xfc   :  { %644 = vpow2.f32 %v515_v44  ;;  %v474_v53 = vpop.f32.mrb[13].mxu1  ;;  %v629_v54 = vpop.eup %628  ;;  %v531_v55 = vadd.f32 1.0, %v627_v49  ;;  %v434_v56 = vadd.f32 %v433_v52, %v755_v41 }
  0xfd   :  { %646 = vpow2.f32 %v513_v45  ;;  %v475_v57 = vadd.f32 %v474_v53, %v755_v41  ;;  %v435_v58 = vpop.f32.mrb[14].mxu0  ;;  %v476_v59 = vpop.f32.mrb[14].mxu1  ;;  %v533_v61 = vadd.f32 1.0, %v629_v54  ;;  %v491_v62 = vsub.f32 0.0, %v432_v50 }
  0xfe   :  { %v631_v60 = vpop.eup %630  ;;  %648 = vpow2.f32 %v517_v46  ;;  %v493_v63 = vsub.f32 0.0, %v473_v51  ;;  %v436_v0 = vpop.f32.mrb[15].mxu0  ;;  %v492_v4 = vsub.f32 0.0, %v434_v56 }
  0xff   :  { %v477_v1 = vpop.f32.mrb[15].mxu1  ;;  %v633_v2 = vpop.eup %632  ;;  %650 = vrcp.f32 %v531_v55  ;;  %v532_v3 = vadd.f32 1.0, %v631_v60  ;;  %v494_v5 = vsub.f32 0.0, %v475_v57  ;;  %v519_v7 = vmul.f32 1.442695, %v491_v62 }
 0x100   :  { %652 = vrcp.f32 %v533_v61  ;;  %v534_v6 = vadd.f32 1.0, %v633_v2  ;;  %v523_v8 = vmul.f32 1.442695, %v493_v63  ;;  %v635_v9 = vpop.eup %634  ;;  %v521_v41 = vmul.f32 1.442695, %v492_v4 }
 0x101   :  { %654 = vrcp.f32 %v532_v3  ;;  %v637_v10 = vpop.eup %636  ;;  %575 = vst [vmem:[%s824_s3] sm:$0xff] %v635_v9  ;;  %v525_v11 = vmul.f32 1.442695, %v494_v5 }
 0x102   :  { %656 = vrcp.f32 %v534_v6  ;;  %577 = vst [vmem:[%s824_s3 + $0x10] sm:$0xff] %v637_v10 }
 0x103   :  { %v639_v12 = vpop.eup %638  ;;  %658 = vpow2.f32 %v519_v7 }
 0x104   :  { %v641_v13 = vpop.eup %640  ;;  %576 = vst [vmem:[%s824_s3 + $0x8] sm:$0xff] %v639_v12  ;;  %660 = vpow2.f32 %v523_v8 }
 0x105   :  { %v643_v14 = vpop.eup %642  ;;  %578 = vst [vmem:[%s824_s3 + $0x18] sm:$0xff] %v641_v13  ;;  %662 = vpow2.f32 %v521_v41 }
 0x106   :  { %v645_v15 = vpop.eup %644  ;;  %v535_v16 = vadd.f32 1.0, %v643_v14  ;;  %664 = vpow2.f32 %v525_v11 }
 0x107   :  { %v647_v17 = vpop.eup %646  ;;  %v537_v18 = vadd.f32 1.0, %v645_v15 }
 0x108   :  { %v649_v19 = vpop.eup %648  ;;  %666 = vrcp.f32 %v535_v16  ;;  %v536_v20 = vadd.f32 1.0, %v647_v17 }
 0x109   :  { %v651_v21 = vpop.eup %650  ;;  %668 = vrcp.f32 %v537_v18  ;;  %v538_v22 = vadd.f32 1.0, %v649_v19 }
 0x10a   :  { %v653_v23 = vpop.eup %652  ;;  %579 = vst [vmem:[%s824_s3 + $0x20] sm:$0xff] %v651_v21  ;;  %670 = vrcp.f32 %v536_v20 }
 0x10b   :  { %v655_v24 = vpop.eup %654  ;;  %581 = vst [vmem:[%s824_s3 + $0x30] sm:$0xff] %v653_v23  ;;  %672 = vrcp.f32 %v538_v22 }
 0x10c   :  { %v657_v25 = vpop.eup %656  ;;  %580 = vst [vmem:[%s824_s3 + $0x28] sm:$0xff] %v655_v24 }
 0x10d   :  { %v659_v26 = vpop.eup %658  ;;  %582 = vst [vmem:[%s824_s3 + $0x38] sm:$0xff] %v657_v25 }
 0x10e   :  { %v661_v27 = vpop.eup %660  ;;  %v539_v28 = vadd.f32 1.0, %v659_v26 }
 0x10f   :  { %v663_v29 = vpop.eup %662  ;;  %v541_v30 = vadd.f32 1.0, %v661_v27 }
 0x110   :  { %v665_v31 = vpop.eup %664  ;;  %674 = vrcp.f32 %v539_v28  ;;  %v540_v32 = vadd.f32 1.0, %v663_v29 }
 0x111   :  { %676 = vrcp.f32 %v541_v30  ;;  %v542_v33 = vadd.f32 1.0, %v665_v31 }
 0x112   :  { %v667_v34 = vpop.eup %666  ;;  %678 = vrcp.f32 %v540_v32 }
 0x113   :  { %v669_v35 = vpop.eup %668  ;;  %583 = vst [vmem:[%s824_s3 + $0x40] sm:$0xff] %v667_v34  ;;  %680 = vrcp.f32 %v542_v33 }
 0x114   :  { %v671_v36 = vpop.eup %670  ;;  %585 = vst [vmem:[%s824_s3 + $0x50] sm:$0xff] %v669_v35 }
 0x115   :  { %v673_v37 = vpop.eup %672  ;;  %584 = vst [vmem:[%s824_s3 + $0x48] sm:$0xff] %v671_v36 }
 0x116   :  { %586 = vst [vmem:[%s824_s3 + $0x58] sm:$0xff] %v673_v37 }
 0x11a   :  { %v675_v38 = vpop.eup %674 }
 0x11b   :  { %v677_v39 = vpop.eup %676  ;;  %587 = vst [vmem:[%s824_s3 + $0x60] sm:$0xff] %v675_v38 }
 0x11c   :  { %v679_v40 = vpop.eup %678  ;;  %589 = vst [vmem:[%s824_s3 + $0x70] sm:$0xff] %v677_v39 }
 0x11d   :  { %v681_v42 = vpop.eup %680  ;;  %588 = vst [vmem:[%s824_s3 + $0x68] sm:$0xff] %v679_v40 }
 0x11e   :  { %590 = vst [vmem:[%s824_s3 + $0x78] sm:$0xff] %v681_v42 }

// kernel: _lambda_.80
= control target key start
LH: loop header
LB: loop body
LE: loop exit
PB: predicated region body
PF: predicated region fallthrough
CT: control target
= control target key end

     0   :  { %v2460_v3 = vmov 0   ;;  %vm339_vm0 = vcmask 1041408   ;;  %vm335_vm1 = vcmask 293888   ;;  %vm1080_vm2 = vcmask 1043456   ;;  %s3060_s1 = inlined_call_operand.vmem [shape: bf16[36,2048], index: 1, kind: input, shape index: {}]   ;;  %s3061_s3 = inlined_call_operand.vmem [shape: bf16[8,36], index: 3, kind: input, shape index: {}]   ;;  %s3062_s0 = inlined_call_operand.vmem [shape: bf16[72,2048], index: 0, kind: input, shape index: {}]   ;;  %s3063_s2 = inlined_call_operand.vmem [shape: bf16[8,72], index: 2, kind: input, shape index: {}]   ;;  %s3064_s4 = inlined_call_operand.vmem [shape: bf16[8,8], index: 4, kind: input, shape index: {}]   ;;  %s3065_s5 = inlined_call_operand.vmem [shape: bf16[8,2048], index: 5, kind: output, shape index: {}]  }
   0x1   :  { %v95_v0 = vld [vmem:[%s3060_s1] sm:$0xff]  ;;  %v96_v2 = vld [vmem:[%s3060_s1 + $0x8] sm:$0xff]  ;;  %420 = vmatprep.mubr.bf16.mxu0 %v2460_v3  ;;  %461 = vmatprep.mubr.bf16.mxu1 %v2460_v3  ;;  %v97_v23 = vld [vmem:[%s3060_s1 + $0x10] sm:$0xff]  ;;  %vm1076_vm3 = vcmask 588800   ;;  %vm1609_vm12 = vcmask 64512  }
   0x2   :  { %v103_v1 = vld [vmem:[%s3060_s1 + $0x40] sm:$0xff]  ;;  %v104_v5 = vld [vmem:[%s3060_s1 + $0x48] sm:$0xff]  ;;  %v105_v24 = vld [vmem:[%s3060_s1 + $0x50] sm:$0xff] }
   0x3   :  { %v2200_v4 = vcombine.high %v95_v0, %v103_v1  ;;  %v2199_v6 = vcombine.low %v95_v0, %v103_v1  ;;  %v111_v7 = vld [vmem:[%s3060_s1 + $0x80] sm:$0xff]  ;;  %v2202_v9 = vcombine.high %v96_v2, %v104_v5  ;;  %v2201_v10 = vcombine.low %v96_v2, %v104_v5  ;;  %v112_v12 = vld [vmem:[%s3060_s1 + $0x88] sm:$0xff]  ;;  %v98_v25 = vld [vmem:[%s3060_s1 + $0x18] sm:$0xff] }
   0x4   :  { %v119_v8 = vld [vmem:[%s3060_s1 + $0xc0] sm:$0xff]  ;;  %v120_v13 = vld [vmem:[%s3060_s1 + $0xc8] sm:$0xff]  ;;  %v106_v26 = vld [vmem:[%s3060_s1 + $0x58] sm:$0xff]  ;;  %v2204_v28 = vcombine.high %v97_v23, %v105_v24  ;;  %v2203_v35 = vcombine.low %v97_v23, %v105_v24 }
   0x5   :  { %v2216_v11 = vcombine.high %v111_v7, %v119_v8  ;;  %v127_v14 = vld [vmem:[%s3060_s1 + $0x100] sm:$0x33]  ;;  %388 = vmatprep.subr.bf16.mxu0 %v2200_v4  ;;  %v2218_v15 = vcombine.high %v112_v12, %v120_v13  ;;  %v128_v16 = vld [vmem:[%s3060_s1 + $0x108] sm:$0x33]  ;;  %429 = vmatprep.subr.bf16.mxu1 %v2202_v9  ;;  %v2215_v17 = vcombine.low %v111_v7, %v119_v8  ;;  %v113_v31 = vld [vmem:[%s3060_s1 + $0x90] sm:$0xff] }
   0x6   :  { %389 = vmatpush1.bf16.msra.mxu0 %v2199_v6  ;;  %430 = vmatpush1.bf16.msra.mxu1 %v2201_v10  ;;  %v2217_v18 = vcombine.low %v112_v12, %v120_v13  ;;  %v2232_v19 = vcombine.high %v127_v14, %v127_v14  ;;  %v2231_v20 = vcombine.low %v127_v14, %v127_v14  ;;  %v121_v32 = vld [vmem:[%s3060_s1 + $0xd0] sm:$0xff]  ;;  %v114_v33 = vld [vmem:[%s3060_s1 + $0x98] sm:$0xff]  ;;  %v2554_v36 = vld [vmem:[%s3061_s3] sm:$0xf] }
   0x7   :  { %390 = vmatprep.subr.bf16.mxu0 %v2216_v11  ;;  %431 = vmatprep.subr.bf16.mxu1 %v2218_v15  ;;  %v2234_v21 = vcombine.high %v128_v16, %v128_v16  ;;  %v2233_v22 = vcombine.low %v128_v16, %v128_v16  ;;  %v2206_v30 = vcombine.high %v98_v25, %v106_v26  ;;  %v122_v34 = vld [vmem:[%s3060_s1 + $0xd8] sm:$0xff]  ;;  %v129_v40 = vld [vmem:[%s3060_s1 + $0x110] sm:$0x33]  ;;  %v99_v48 = vld [vmem:[%s3060_s1 + $0x20] sm:$0xff] }
   0x8   :  { %v341_v27 = vsel %vm339_vm0, %v2231_v20, 0  ;;  %v2205_v37 = vcombine.low %v98_v25, %v106_v26  ;;  %v2220_v38 = vcombine.high %v113_v31, %v121_v32  ;;  %v2222_v39 = vcombine.high %v114_v33, %v122_v34  ;;  %v130_v41 = vld [vmem:[%s3060_s1 + $0x118] sm:$0x33]  ;;  %v107_v49 = vld [vmem:[%s3060_s1 + $0x60] sm:$0xff]  ;;  %v100_v50 = vld [vmem:[%s3060_s1 + $0x28] sm:$0xff] }
   0x9   :  { %v347_v29 = vsel %vm339_vm0, %v2233_v22, 0  ;;  %v2219_v42 = vcombine.low %v113_v31, %v121_v32  ;;  %v2221_v43 = vcombine.low %v114_v33, %v122_v34  ;;  %v2236_v44 = vcombine.high %v129_v40, %v129_v40  ;;  %v108_v51 = vld [vmem:[%s3060_s1 + $0x68] sm:$0xff]  ;;  %v115_v56 = vld [vmem:[%s3060_s1 + $0xa0] sm:$0xff]  ;;  %v101_v9 = vld [vmem:[%s3060_s1 + $0x30] sm:$0xff] }
   0xa   :  { %391 = vmatpush1.bf16.msra.mxu0 %v2215_v17  ;;  %432 = vmatpush1.bf16.msra.mxu1 %v2217_v18  ;;  %v2235_v45 = vcombine.low %v129_v40, %v129_v40  ;;  %v2238_v46 = vcombine.high %v130_v41, %v130_v41  ;;  %v2237_v47 = vcombine.low %v130_v41, %v130_v41  ;;  %v123_v57 = vld [vmem:[%s3060_s1 + $0xe0] sm:$0xff]  ;;  %v116_v58 = vld [vmem:[%s3060_s1 + $0xa8] sm:$0xff]  ;;  %v109_v10 = vld [vmem:[%s3060_s1 + $0x70] sm:$0xff] }
   0xb   :  { %2247 = vmatprep.subr.msk.bf16.mxu0 %vm339_vm0, %v2232_v19  ;;  %2249 = vmatprep.subr.msk.bf16.mxu1 %vm339_vm0, %v2234_v21  ;;  %v2208_v53 = vcombine.high %v99_v48, %v107_v49  ;;  %v2210_v55 = vcombine.high %v100_v50, %v108_v51  ;;  %v124_v59 = vld [vmem:[%s3060_s1 + $0xe8] sm:$0xff]  ;;  %v2207_v60 = vcombine.low %v99_v48, %v107_v49  ;;  %v131_v0 = vld [vmem:[%s3060_s1 + $0x120] sm:$0x33]  ;;  %v102_v11 = vld [vmem:[%s3060_s1 + $0x38] sm:$0xff] }
   0xc   :  { %v353_v52 = vsel %vm339_vm0, %v2235_v45, 0  ;;  %v359_v54 = vsel %vm339_vm0, %v2237_v47, 0  ;;  %v2209_v61 = vcombine.low %v100_v50, %v108_v51  ;;  %v2224_v62 = vcombine.high %v115_v56, %v123_v57  ;;  %v132_v1 = vld [vmem:[%s3060_s1 + $0x128] sm:$0x33]  ;;  %v110_v12 = vld [vmem:[%s3060_s1 + $0x78] sm:$0xff]  ;;  %v117_v17 = vld [vmem:[%s3060_s1 + $0xb0] sm:$0xff] }
   0xd   :  { %v2226_v63 = vcombine.high %v116_v58, %v124_v59  ;;  %v2223_v2 = vcombine.low %v115_v56, %v123_v57  ;;  %v2225_v4 = vcombine.low %v116_v58, %v124_v59  ;;  %v2240_v5 = vcombine.high %v131_v0, %v131_v0  ;;  %v125_v18 = vld [vmem:[%s3060_s1 + $0xf0] sm:$0xff]  ;;  %v118_v19 = vld [vmem:[%s3060_s1 + $0xb8] sm:$0xff]  ;;  %v22_v33 = vld [vmem:[%s3062_s0] sm:$0xff] }
   0xe   :  { %393 = vmatpush1.bf16.msra.mxu0 %v341_v27  ;;  %434 = vmatpush1.bf16.msra.mxu1 %v347_v29  ;;  %v2239_v6 = vcombine.low %v131_v0, %v131_v0  ;;  %v2242_v7 = vcombine.high %v132_v1, %v132_v1  ;;  %v2241_v8 = vcombine.low %v132_v1, %v132_v1  ;;  %v126_v20 = vld [vmem:[%s3060_s1 + $0xf8] sm:$0xff]  ;;  %v133_v25 = vld [vmem:[%s3060_s1 + $0x130] sm:$0x33]  ;;  %v30_v34 = vld [vmem:[%s3062_s0 + $0x40] sm:$0xff] }
   0xf   :  { %470 = vmatprep.subr.bf16.mxu0 %v2204_v28  ;;  %511 = vmatprep.subr.bf16.mxu1 %v2206_v30  ;;  %v2212_v14 = vcombine.high %v101_v9, %v109_v10  ;;  %v2214_v16 = vcombine.high %v102_v11, %v110_v12  ;;  %v2211_v21 = vcombine.low %v101_v9, %v109_v10  ;;  %v134_v26 = vld [vmem:[%s3060_s1 + $0x138] sm:$0x33]  ;;  %v47_v45 = vld [vmem:[%s3062_s0 + $0xc8] sm:$0xff]  ;;  %v54_v50 = vld [vmem:[%s3062_s0 + $0x100] sm:$0xff] }
  0x10   :  { %v365_v13 = vsel %vm339_vm0, %v2239_v6, 0  ;;  %v371_v15 = vsel %vm339_vm0, %v2241_v8, 0  ;;  %v2213_v22 = vcombine.low %v102_v11, %v110_v12  ;;  %v2228_v23 = vcombine.high %v117_v17, %v125_v18  ;;  %v62_v51 = vld [vmem:[%s3062_s0 + $0x140] sm:$0xff]  ;;  %v24_v10 = vld [vmem:[%s3062_s0 + $0x10] sm:$0xff]  ;;  %v25_v12 = vld [vmem:[%s3062_s0 + $0x18] sm:$0xff] }
  0x11   :  { %2248 = vmatmul.mubr.msk.bf16.vlgmr.msra.gmra.mrb[0].mxu0 %vm335_vm1, %v2554_v36  ;;  %2250 = vmatmul.mubr.msk.bf16.vlgmr.msra.gmra.mrb[0].mxu1 %vm335_vm1, %v2554_v36  ;;  %v2230_v24 = vcombine.high %v118_v19, %v126_v20  ;;  %v2227_v27 = vcombine.low %v117_v17, %v125_v18  ;;  %v2229_v28 = vcombine.low %v118_v19, %v126_v20  ;;  %v70_v58 = vld [vmem:[%s3062_s0 + $0x180] sm:$0xff]  ;;  %v32_v11 = vld [vmem:[%s3062_s0 + $0x50] sm:$0xff]  ;;  %v41_v20 = vld [vmem:[%s3062_s0 + $0x98] sm:$0xff] }
  0x12   :  { %471 = vmatpush1.bf16.msra.mxu0 %v2203_v35  ;;  %512 = vmatpush1.bf16.msra.mxu1 %v2205_v37  ;;  %v2244_v29 = vcombine.high %v133_v25, %v133_v25  ;;  %v2243_v30 = vcombine.low %v133_v25, %v133_v25  ;;  %v2246_v31 = vcombine.high %v134_v26, %v134_v26  ;;  %v23_v35 = vld [vmem:[%s3062_s0 + $0x8] sm:$0xff]  ;;  %v78_v59 = vld [vmem:[%s3062_s0 + $0x1c0] sm:$0xff]  ;;  %v40_v18 = vld [vmem:[%s3062_s0 + $0x90] sm:$0xff] }
  0x13   :  { %472 = vmatprep.subr.bf16.mxu0 %v2220_v38  ;;  %513 = vmatprep.subr.bf16.mxu1 %v2222_v39  ;;  %v2245_v32 = vcombine.low %v134_v26, %v134_v26  ;;  %v31_v37 = vld [vmem:[%s3062_s0 + $0x48] sm:$0xff]  ;;  %v2264_v39 = vcombine.high %v22_v33, %v30_v34  ;;  %v2296_v56 = vcombine.high %v54_v50, %v62_v51  ;;  %v86_v1 = vld [vmem:[%s3062_s0 + $0x200] sm:$0xff]  ;;  %v48_v19 = vld [vmem:[%s3062_s0 + $0xd0] sm:$0xff] }
  0x14   :  { %502 = vmatprep.mubr.bf16.mxu0 %v2460_v3  ;;  %543 = vmatprep.mubr.bf16.mxu1 %v2460_v3  ;;  %v377_v38 = vsel %vm339_vm0, %v2243_v30, 0  ;;  %v2266_v41 = vcombine.high %v23_v35, %v31_v37  ;;  %v2265_v47 = vcombine.low %v23_v35, %v31_v37  ;;  %v2328_v6 = vcombine.high %v86_v1, %v86_v1  ;;  %v65_v30 = vld [vmem:[%s3062_s0 + $0x158] sm:$0xff]  ;;  %v72_v35 = vld [vmem:[%s3062_s0 + $0x190] sm:$0xff] }
  0x15   :  { %v383_v40 = vsel %vm339_vm0, %v2245_v32, 0  ;;  %v2284_v25 = vcombine.high %v40_v18, %v48_v19  ;;  %v80_v37 = vld [vmem:[%s3062_s0 + $0x1d0] sm:$0xff] }
  0x16   :  { %473 = vmatpush1.bf16.msra.mxu0 %v2219_v42  ;;  %514 = vmatpush1.bf16.msra.mxu1 %v2221_v43  ;;  %v38_v42 = vld [vmem:[%s3062_s0 + $0x80] sm:$0xff] }
  0x17   :  { %2251 = vmatprep.subr.msk.bf16.mxu0 %vm339_vm0, %v2236_v44  ;;  %2253 = vmatprep.subr.msk.bf16.mxu1 %vm339_vm0, %v2238_v46  ;;  %v46_v43 = vld [vmem:[%s3062_s0 + $0xc0] sm:$0xff]  ;;  %v39_v44 = vld [vmem:[%s3062_s0 + $0x88] sm:$0xff]  ;;  %v2263_v46 = vcombine.low %v22_v33, %v30_v34 }
  0x18   :  { %v2280_v48 = vcombine.high %v38_v42, %v46_v43  ;;  %v2282_v49 = vcombine.high %v39_v44, %v47_v45 }
  0x1a   :  { %475 = vmatpush1.bf16.msra.mxu0 %v353_v52  ;;  %516 = vmatpush1.bf16.msra.mxu1 %v359_v54  ;;  %v55_v52 = vld [vmem:[%s3062_s0 + $0x108] sm:$0xff]  ;;  %v2279_v54 = vcombine.low %v38_v42, %v46_v43  ;;  %v2316_v42 = vcombine.high %v72_v35, %v80_v37 }
  0x1b   :  { %552 = vmatprep.subr.bf16.mxu0 %v2208_v53  ;;  %593 = vmatprep.subr.bf16.mxu1 %v2210_v55  ;;  %v63_v53 = vld [vmem:[%s3062_s0 + $0x148] sm:$0xff]  ;;  %v2281_v55 = vcombine.low %v39_v44, %v47_v45  ;;  %v88_v44 = vld [vmem:[%s3062_s0 + $0x210] sm:$0xff]  ;;  %v89_v45 = vld [vmem:[%s3062_s0 + $0x218] sm:$0xff] }
  0x1c   :  { %v2298_v57 = vcombine.high %v55_v52, %v63_v53 }
  0x1d   :  { %2252 = vmatmul.mubr.msk.bf16.vlgmr.msra.gmra.mrb[4].mxu0 %vm335_vm1, %v2554_v36  ;;  %2254 = vmatmul.mubr.msk.bf16.vlgmr.msra.gmra.mrb[4].mxu1 %vm335_vm1, %v2554_v36 }
  0x1e   :  { %553 = vmatpush1.bf16.msra.mxu0 %v2207_v60  ;;  %594 = vmatpush1.bf16.msra.mxu1 %v2209_v61  ;;  %v79_v60 = vld [vmem:[%s3062_s0 + $0x1c8] sm:$0xff]  ;;  %v2295_v61 = vcombine.low %v54_v50, %v62_v51  ;;  %v2334_v50 = vcombine.high %v89_v45, %v89_v45  ;;  %v2333_v51 = vcombine.low %v89_v45, %v89_v45 }
  0x1f   :  { %554 = vmatprep.subr.bf16.mxu0 %v2224_v62  ;;  %595 = vmatprep.subr.bf16.mxu1 %v2226_v63  ;;  %v2297_v62 = vcombine.low %v55_v52, %v63_v53  ;;  %v2312_v63 = vcombine.high %v70_v58, %v78_v59  ;;  %v26_v52 = vld [vmem:[%s3062_s0 + $0x20] sm:$0xff] }
  0x20   :  { %584 = vmatprep.mubr.bf16.mxu0 %v2460_v3  ;;  %625 = vmatprep.mubr.bf16.mxu1 %v2460_v3  ;;  %v34_v53 = vld [vmem:[%s3062_s0 + $0x60] sm:$0xff] }
  0x22   :  { %555 = vmatpush1.bf16.msra.mxu0 %v2223_v2  ;;  %596 = vmatpush1.bf16.msra.mxu1 %v2225_v4  ;;  %v87_v2 = vld [vmem:[%s3062_s0 + $0x208] sm:$0xff]  ;;  %v2311_v4 = vcombine.low %v70_v58, %v78_v59  ;;  %v1100_v58 = vsel %vm1080_vm2, %v2333_v51, 0 }
  0x23   :  { %2255 = vmatprep.subr.msk.bf16.mxu0 %vm339_vm0, %v2240_v5  ;;  %2257 = vmatprep.subr.msk.bf16.mxu1 %vm339_vm0, %v2242_v7  ;;  %v2327_v7 = vcombine.low %v86_v1, %v86_v1  ;;  %v2330_v8 = vcombine.high %v87_v2, %v87_v2  ;;  %v2329_v9 = vcombine.low %v87_v2, %v87_v2 }
  0x26   :  { %557 = vmatpush1.bf16.msra.mxu0 %v365_v13  ;;  %598 = vmatpush1.bf16.msra.mxu1 %v371_v15  ;;  %v33_v13 = vld [vmem:[%s3062_s0 + $0x58] sm:$0xff]  ;;  %v2268_v15 = vcombine.high %v24_v10, %v32_v11 }
  0x27   :  { %634 = vmatprep.subr.bf16.mxu0 %v2212_v14  ;;  %675 = vmatprep.subr.bf16.mxu1 %v2214_v16  ;;  %v1082_v14 = vsel %vm1080_vm2, %v2327_v7, 0  ;;  %v1088_v16 = vsel %vm1080_vm2, %v2329_v9, 0  ;;  %v2270_v17 = vcombine.high %v25_v12, %v33_v13  ;;  %v67_v7 = vld [vmem:[%s3062_s0 + $0x168] sm:$0xff] }
  0x29   :  { %2256 = vmatmul.mubr.msk.bf16.vlgmr.msra.gmra.mrb[8].mxu0 %vm335_vm1, %v2554_v36  ;;  %2258 = vmatmul.mubr.msk.bf16.vlgmr.msra.gmra.mrb[8].mxu1 %vm335_vm1, %v2554_v36 }
  0x2a   :  { %635 = vmatpush1.bf16.msra.mxu0 %v2211_v21  ;;  %676 = vmatpush1.bf16.msra.mxu1 %v2213_v22  ;;  %v49_v21 = vld [vmem:[%s3062_s0 + $0xd8] sm:$0xff]  ;;  %v2743_v22 = vld [vmem:[%s3063_s2] sm:$0xf] }
  0x2b   :  { %636 = vmatprep.subr.bf16.mxu0 %v2228_v23  ;;  %677 = vmatprep.subr.bf16.mxu1 %v2230_v24  ;;  %v2267_v23 = vcombine.low %v24_v10, %v32_v11  ;;  %v2269_v24 = vcombine.low %v25_v12, %v33_v13  ;;  %v2286_v26 = vcombine.high %v41_v20, %v49_v21  ;;  %v74_v12 = vld [vmem:[%s3062_s0 + $0x1a0] sm:$0xff] }
  0x2c   :  { %666 = vmatprep.mubr.bf16.mxu0 %v2460_v3  ;;  %707 = vmatprep.mubr.bf16.mxu1 %v2460_v3  ;;  %v2285_v32 = vcombine.low %v41_v20, %v49_v21  ;;  %v82_v13 = vld [vmem:[%s3062_s0 + $0x1e0] sm:$0xff]  ;;  %v91_v21 = vld [vmem:[%s3062_s0 + $0x228] sm:$0xff] }
  0x2d   :  { %v90_v20 = vld [vmem:[%s3062_s0 + $0x220] sm:$0xff] }
  0x2e   :  { %637 = vmatpush1.bf16.msra.mxu0 %v2227_v27  ;;  %678 = vmatpush1.bf16.msra.mxu1 %v2229_v28  ;;  %v56_v27 = vld [vmem:[%s3062_s0 + $0x110] sm:$0xff] }
  0x2f   :  { %2259 = vmatprep.subr.msk.bf16.mxu0 %vm339_vm0, %v2244_v29  ;;  %2261 = vmatprep.subr.msk.bf16.mxu1 %vm339_vm0, %v2246_v31  ;;  %v64_v28 = vld [vmem:[%s3062_s0 + $0x150] sm:$0xff]  ;;  %v57_v29 = vld [vmem:[%s3062_s0 + $0x118] sm:$0xff]  ;;  %v2283_v31 = vcombine.low %v40_v18, %v48_v19  ;;  %v2320_v18 = vcombine.high %v74_v12, %v82_v13 }
  0x30   :  { %v2300_v33 = vcombine.high %v56_v27, %v64_v28  ;;  %v2302_v34 = vcombine.high %v57_v29, %v65_v30 }
  0x32   :  { %639 = vmatpush1.bf16.msra.mxu0 %v377_v38  ;;  %680 = vmatpush1.bf16.msra.mxu1 %v383_v40  ;;  %v73_v38 = vld [vmem:[%s3062_s0 + $0x198] sm:$0xff]  ;;  %v2299_v40 = vcombine.low %v56_v27, %v64_v28  ;;  %v2338_v27 = vcombine.high %v91_v21, %v91_v21  ;;  %v2337_v28 = vcombine.low %v91_v21, %v91_v21 }
  0x33   :  { %1129 = vmatprep.subr.bf16.mxu0 %v2264_v39  ;;  %1170 = vmatprep.subr.bf16.mxu1 %v2266_v41  ;;  %v81_v39 = vld [vmem:[%s3062_s0 + $0x1d8] sm:$0xff]  ;;  %v2301_v41 = vcombine.low %v57_v29, %v65_v30  ;;  %v28_v29 = vld [vmem:[%s3062_s0 + $0x30] sm:$0xff] }
  0x34   :  { %v2318_v43 = vcombine.high %v73_v38, %v81_v39  ;;  %v36_v30 = vld [vmem:[%s3062_s0 + $0x70] sm:$0xff] }
  0x35   :  { %2260 = vmatmul.mubr.msk.bf16.vlgmr.msra.gmra.mrb[12].mxu0 %vm335_vm1, %v2554_v36  ;;  %2262 = vmatmul.mubr.msk.bf16.vlgmr.msra.gmra.mrb[12].mxu1 %vm335_vm1, %v2554_v36  ;;  %v71_v36 = vld [vmem:[%s3062_s0 + $0x188] sm:$0xff] }
  0x36   :  { %1130 = vmatpush1.bf16.msra.mxu0 %v2263_v46  ;;  %1171 = vmatpush1.bf16.msra.mxu1 %v2265_v47  ;;  %v2314_v0 = vcombine.high %v71_v36, %v79_v60  ;;  %v2313_v5 = vcombine.low %v71_v36, %v79_v60  ;;  %v2315_v46 = vcombine.low %v72_v35, %v80_v37  ;;  %v42_v36 = vld [vmem:[%s3062_s0 + $0xa0] sm:$0xff]  ;;  %v1112_v35 = vsel %vm1080_vm2, %v2337_v28, 0 }
  0x37   :  { %1131 = vmatprep.subr.bf16.mxu0 %v2280_v48  ;;  %1172 = vmatprep.subr.bf16.mxu1 %v2282_v49  ;;  %v2317_v47 = vcombine.low %v73_v38, %v81_v39  ;;  %v2332_v48 = vcombine.high %v88_v44, %v88_v44  ;;  %v2331_v49 = vcombine.low %v88_v44, %v88_v44  ;;  %v50_v60 = vld [vmem:[%s3062_s0 + $0xe0] sm:$0xff]  ;;  %v44_v38 = vld [vmem:[%s3062_s0 + $0xb0] sm:$0xff] }
  0x38   :  { %1161 = vmatprep.mubr.bf16.mxu0 %v2460_v3  ;;  %1202 = vmatprep.mubr.bf16.mxu1 %v2460_v3  ;;  %v2288_v1 = vcombine.high %v42_v36, %v50_v60  ;;  %v52_v39 = vld [vmem:[%s3062_s0 + $0xf0] sm:$0xff] }
  0x39   :  { %v2292_v44 = vcombine.high %v44_v38, %v52_v39 }
  0x3a   :  { %1132 = vmatpush1.bf16.msra.mxu0 %v2279_v54  ;;  %1173 = vmatpush1.bf16.msra.mxu1 %v2281_v55  ;;  %v27_v54 = vld [vmem:[%s3062_s0 + $0x28] sm:$0xff] }
  0x3b   :  { %1133 = vmatprep.subr.bf16.mxu0 %v2296_v56  ;;  %1174 = vmatprep.subr.bf16.mxu1 %v2298_v57  ;;  %v35_v55 = vld [vmem:[%s3062_s0 + $0x68] sm:$0xff]  ;;  %v1094_v56 = vsel %vm1080_vm2, %v2331_v49, 0  ;;  %v2272_v57 = vcombine.high %v26_v52, %v34_v53  ;;  %v69_v49 = vld [vmem:[%s3062_s0 + $0x178] sm:$0xff] }
  0x3c   :  { %v2274_v59 = vcombine.high %v27_v54, %v35_v55 }
  0x3e   :  { %1134 = vmatpush1.bf16.msra.mxu0 %v2295_v61  ;;  %1175 = vmatpush1.bf16.msra.mxu1 %v2297_v62  ;;  %v43_v61 = vld [vmem:[%s3062_s0 + $0xa8] sm:$0xff] }
  0x3f   :  { %1135 = vmatprep.subr.bf16.mxu0 %v2312_v63  ;;  %1176 = vmatprep.subr.bf16.mxu1 %v2314_v0  ;;  %v51_v62 = vld [vmem:[%s3062_s0 + $0xe8] sm:$0xff]  ;;  %v2271_v63 = vcombine.low %v26_v52, %v34_v53  ;;  %v2273_v0 = vcombine.low %v27_v54, %v35_v55  ;;  %v76_v54 = vld [vmem:[%s3062_s0 + $0x1b0] sm:$0xff] }
  0x40   :  { %v2290_v2 = vcombine.high %v43_v61, %v51_v62  ;;  %v2289_v9 = vcombine.low %v43_v61, %v51_v62  ;;  %v84_v55 = vld [vmem:[%s3062_s0 + $0x1f0] sm:$0xff]  ;;  %v93_v62 = vld [vmem:[%s3062_s0 + $0x238] sm:$0xff] }
  0x41   :  { %v92_v61 = vld [vmem:[%s3062_s0 + $0x230] sm:$0xff] }
  0x42   :  { %1136 = vmatpush1.bf16.msra.mxu0 %v2311_v4  ;;  %1177 = vmatpush1.bf16.msra.mxu1 %v2313_v5  ;;  %v58_v4 = vld [vmem:[%s3062_s0 + $0x120] sm:$0xff] }
  0x43   :  { %2343 = vmatprep.subr.msk.bf16.mxu0 %vm1080_vm2, %v2328_v6  ;;  %2345 = vmatprep.subr.msk.bf16.mxu1 %vm1080_vm2, %v2330_v8  ;;  %v66_v5 = vld [vmem:[%s3062_s0 + $0x160] sm:$0xff]  ;;  %v59_v6 = vld [vmem:[%s3062_s0 + $0x128] sm:$0xff]  ;;  %v2287_v8 = vcombine.low %v42_v36, %v50_v60  ;;  %v2324_v36 = vcombine.high %v76_v54, %v84_v55 }
  0x44   :  { %v2304_v10 = vcombine.high %v58_v4, %v66_v5  ;;  %v2306_v11 = vcombine.high %v59_v6, %v67_v7 }
  0x46   :  { %1138 = vmatpush1.bf16.msra.mxu0 %v1082_v14  ;;  %1179 = vmatpush1.bf16.msra.mxu1 %v1088_v16  ;;  %v75_v14 = vld [vmem:[%s3062_s0 + $0x1a8] sm:$0xff]  ;;  %v2303_v16 = vcombine.low %v58_v4, %v66_v5  ;;  %v2342_v4 = vcombine.high %v93_v62, %v93_v62  ;;  %v2341_v5 = vcombine.low %v93_v62, %v93_v62 }
  0x47   :  { %1211 = vmatprep.subr.bf16.mxu0 %v2268_v15  ;;  %1252 = vmatprep.subr.bf16.mxu1 %v2270_v17  ;;  %v83_v15 = vld [vmem:[%s3062_s0 + $0x1e8] sm:$0xff]  ;;  %v2305_v17 = vcombine.low %v59_v6, %v67_v7 }
  0x48   :  { %v2322_v19 = vcombine.high %v75_v14, %v83_v15  ;;  %v1124_v7 = vsel %vm1080_vm2, %v2341_v5, 0 }
  0x49   :  { %2344 = vmatmul.mubr.msk.bf16.vlgmr.msra.gmra.mrb[0].mxu0 %vm1076_vm3, %v2743_v22  ;;  %2346 = vmatmul.mubr.msk.bf16.vlgmr.msra.gmra.mrb[0].mxu1 %vm1076_vm3, %v2743_v22 }
  0x4a   :  { %1212 = vmatpush1.bf16.msra.mxu0 %v2267_v23  ;;  %1253 = vmatpush1.bf16.msra.mxu1 %v2269_v24  ;;  %v2319_v23 = vcombine.low %v74_v12, %v82_v13  ;;  %v2321_v24 = vcombine.low %v75_v14, %v83_v15 }
  0x4b   :  { %1213 = vmatprep.subr.bf16.mxu0 %v2284_v25  ;;  %1254 = vmatprep.subr.bf16.mxu1 %v2286_v26  ;;  %v2336_v25 = vcombine.high %v90_v20, %v90_v20  ;;  %v2335_v26 = vcombine.low %v90_v20, %v90_v20 }
  0x4c   :  { %1243 = vmatprep.mubr.bf16.mxu0 %v2460_v3  ;;  %1284 = vmatprep.mubr.bf16.mxu1 %v2460_v3 }
  0x4e   :  { %1214 = vmatpush1.bf16.msra.mxu0 %v2283_v31  ;;  %1255 = vmatpush1.bf16.msra.mxu1 %v2285_v32  ;;  %v29_v31 = vld [vmem:[%s3062_s0 + $0x38] sm:$0xff] }
  0x4f   :  { %1215 = vmatprep.subr.bf16.mxu0 %v2300_v33  ;;  %1256 = vmatprep.subr.bf16.mxu1 %v2302_v34  ;;  %v37_v32 = vld [vmem:[%s3062_s0 + $0x78] sm:$0xff]  ;;  %v1106_v33 = vsel %vm1080_vm2, %v2335_v26, 0  ;;  %v2276_v34 = vcombine.high %v28_v29, %v36_v30 }
  0x50   :  { %v2278_v37 = vcombine.high %v29_v31, %v37_v32 }
  0x52   :  { %1216 = vmatpush1.bf16.msra.mxu0 %v2299_v40  ;;  %1257 = vmatpush1.bf16.msra.mxu1 %v2301_v41  ;;  %v45_v40 = vld [vmem:[%s3062_s0 + $0xb8] sm:$0xff] }
  0x53   :  { %1217 = vmatprep.subr.bf16.mxu0 %v2316_v42  ;;  %1258 = vmatprep.subr.bf16.mxu1 %v2318_v43  ;;  %v53_v41 = vld [vmem:[%s3062_s0 + $0xf8] sm:$0xff]  ;;  %v2275_v42 = vcombine.low %v28_v29, %v36_v30  ;;  %v2277_v43 = vcombine.low %v29_v31, %v37_v32 }
  0x54   :  { %v2294_v45 = vcombine.high %v45_v40, %v53_v41  ;;  %v2293_v51 = vcombine.low %v45_v40, %v53_v41 }
  0x56   :  { %1218 = vmatpush1.bf16.msra.mxu0 %v2315_v46  ;;  %1259 = vmatpush1.bf16.msra.mxu1 %v2317_v47  ;;  %v60_v46 = vld [vmem:[%s3062_s0 + $0x130] sm:$0xff] }
  0x57   :  { %2347 = vmatprep.subr.msk.bf16.mxu0 %vm1080_vm2, %v2332_v48  ;;  %2349 = vmatprep.subr.msk.bf16.mxu1 %vm1080_vm2, %v2334_v50  ;;  %v68_v47 = vld [vmem:[%s3062_s0 + $0x170] sm:$0xff]  ;;  %v61_v48 = vld [vmem:[%s3062_s0 + $0x138] sm:$0xff]  ;;  %v2291_v50 = vcombine.low %v44_v38, %v52_v39 }
  0x58   :  { %v2308_v52 = vcombine.high %v60_v46, %v68_v47  ;;  %v2310_v53 = vcombine.high %v61_v48, %v69_v49 }
  0x5a   :  { %1220 = vmatpush1.bf16.msra.mxu0 %v1094_v56  ;;  %1261 = vmatpush1.bf16.msra.mxu1 %v1100_v58  ;;  %v77_v56 = vld [vmem:[%s3062_s0 + $0x1b8] sm:$0xff]  ;;  %v2307_v58 = vcombine.low %v60_v46, %v68_v47 }
  0x5b   :  { %1293 = vmatprep.subr.bf16.mxu0 %v2272_v57  ;;  %1334 = vmatprep.subr.bf16.mxu1 %v2274_v59  ;;  %v85_v57 = vld [vmem:[%s3062_s0 + $0x1f8] sm:$0xff]  ;;  %v2309_v59 = vcombine.low %v61_v48, %v69_v49 }
  0x5c   :  { %v2326_v60 = vcombine.high %v77_v56, %v85_v57 }
  0x5d   :  { %2348 = vmatmul.mubr.msk.bf16.vlgmr.msra.gmra.mrb[4].mxu0 %vm1076_vm3, %v2743_v22  ;;  %2350 = vmatmul.mubr.msk.bf16.vlgmr.msra.gmra.mrb[4].mxu1 %vm1076_vm3, %v2743_v22 }
  0x5e   :  { %1294 = vmatpush1.bf16.msra.mxu0 %v2271_v63  ;;  %1335 = vmatpush1.bf16.msra.mxu1 %v2273_v0  ;;  %v2323_v63 = vcombine.low %v76_v54, %v84_v55  ;;  %v2325_v0 = vcombine.low %v77_v56, %v85_v57 }
  0x5f   :  { %1295 = vmatprep.subr.bf16.mxu0 %v2288_v1  ;;  %1336 = vmatprep.subr.bf16.mxu1 %v2290_v2  ;;  %v2340_v1 = vcombine.high %v92_v61, %v92_v61  ;;  %v2339_v2 = vcombine.low %v92_v61, %v92_v61 }
  0x60   :  { %1325 = vmatprep.mubr.bf16.mxu0 %v2460_v3  ;;  %1366 = vmatprep.mubr.bf16.mxu1 %v2460_v3 }
  0x61   :  { %v1118_v6 = vsel %vm1080_vm2, %v2339_v2, 0 }
  0x62   :  { %1296 = vmatpush1.bf16.msra.mxu0 %v2287_v8  ;;  %1337 = vmatpush1.bf16.msra.mxu1 %v2289_v9 }
  0x63   :  { %1297 = vmatprep.subr.bf16.mxu0 %v2304_v10  ;;  %1338 = vmatprep.subr.bf16.mxu1 %v2306_v11 }
  0x66   :  { %1298 = vmatpush1.bf16.msra.mxu0 %v2303_v16  ;;  %1339 = vmatpush1.bf16.msra.mxu1 %v2305_v17 }
  0x67   :  { %1299 = vmatprep.subr.bf16.mxu0 %v2320_v18  ;;  %1340 = vmatprep.subr.bf16.mxu1 %v2322_v19 }
  0x6a   :  { %1300 = vmatpush1.bf16.msra.mxu0 %v2319_v23  ;;  %1341 = vmatpush1.bf16.msra.mxu1 %v2321_v24 }
  0x6b   :  { %2351 = vmatprep.subr.msk.bf16.mxu0 %vm1080_vm2, %v2336_v25  ;;  %2353 = vmatprep.subr.msk.bf16.mxu1 %vm1080_vm2, %v2338_v27 }
  0x6e   :  { %1302 = vmatpush1.bf16.msra.mxu0 %v1106_v33  ;;  %1343 = vmatpush1.bf16.msra.mxu1 %v1112_v35 }
  0x6f   :  { %1375 = vmatprep.subr.bf16.mxu0 %v2276_v34  ;;  %1416 = vmatprep.subr.bf16.mxu1 %v2278_v37 }
  0x71   :  { %2352 = vmatmul.mubr.msk.bf16.vlgmr.msra.gmra.mrb[8].mxu0 %vm1076_vm3, %v2743_v22  ;;  %2354 = vmatmul.mubr.msk.bf16.vlgmr.msra.gmra.mrb[8].mxu1 %vm1076_vm3, %v2743_v22 }
  0x72   :  { %1376 = vmatpush1.bf16.msra.mxu0 %v2275_v42  ;;  %1417 = vmatpush1.bf16.msra.mxu1 %v2277_v43 }
  0x73   :  { %1377 = vmatprep.subr.bf16.mxu0 %v2292_v44  ;;  %1418 = vmatprep.subr.bf16.mxu1 %v2294_v45 }
  0x74   :  { %1407 = vmatprep.mubr.bf16.mxu0 %v2460_v3  ;;  %1448 = vmatprep.mubr.bf16.mxu1 %v2460_v3 }
  0x76   :  { %1378 = vmatpush1.bf16.msra.mxu0 %v2291_v50  ;;  %1419 = vmatpush1.bf16.msra.mxu1 %v2293_v51 }
  0x77   :  { %1379 = vmatprep.subr.bf16.mxu0 %v2308_v52  ;;  %1420 = vmatprep.subr.bf16.mxu1 %v2310_v53 }
  0x7a   :  { %1380 = vmatpush1.bf16.msra.mxu0 %v2307_v58  ;;  %1421 = vmatpush1.bf16.msra.mxu1 %v2309_v59 }
  0x7b   :  { %1381 = vmatprep.subr.bf16.mxu0 %v2324_v36  ;;  %1422 = vmatprep.subr.bf16.mxu1 %v2326_v60 }
  0x7e   :  { %1382 = vmatpush1.bf16.msra.mxu0 %v2323_v63  ;;  %1423 = vmatpush1.bf16.msra.mxu1 %v2325_v0 }
  0x7f   :  { %2355 = vmatprep.subr.msk.bf16.mxu0 %vm1080_vm2, %v2340_v1  ;;  %2357 = vmatprep.subr.msk.bf16.mxu1 %vm1080_vm2, %v2342_v4 }
  0x82   :  { %1384 = vmatpush1.bf16.msra.mxu0 %v1118_v6  ;;  %1425 = vmatpush1.bf16.msra.mxu1 %v1124_v7 }
  0x85   :  { %2356 = vmatmul.mubr.msk.bf16.vlgmr.msra.gmra.mrb[12].mxu0 %vm1076_vm3, %v2743_v22  ;;  %2358 = vmatmul.mubr.msk.bf16.vlgmr.msra.gmra.mrb[12].mxu1 %vm1076_vm3, %v2743_v22 }
  0x86   :  { %1693 = vmatprep.mubr.bf16.mxu0 %v2460_v3  ;;  %1734 = vmatprep.mubr.bf16.mxu1 %v2460_v3 }
 0x11c   :  { %v1163_v8 = vpop.f32.mrb[0].mxu0  ;;  %v1204_v9 = vpop.f32.mrb[0].mxu1 }
 0x11d   :  { %v1165_v10 = vpop.f32.mrb[1].mxu0  ;;  %v1206_v12 = vpop.f32.mrb[1].mxu1 }
 0x11e   :  { %v1457_v11 = vadd.f32 %v1165_v10, %v1163_v8  ;;  %v1167_v13 = vpop.f32.mrb[2].mxu0  ;;  %v1208_v14 = vpop.f32.mrb[2].mxu1 }
 0x11f   :  { %v1168_v15 = vpop.f32.mrb[3].mxu0  ;;  %v1209_v17 = vpop.f32.mrb[3].mxu1 }
 0x120   :  { %v1458_v16 = vadd.f32 %v1457_v11, %v1204_v9 }
 0x122   :  { %v1459_v18 = vadd.f32 %v1458_v16, %v1206_v12 }
 0x130   :  { %v1245_v19 = vpop.f32.mrb[4].mxu0  ;;  %v1286_v21 = vpop.f32.mrb[4].mxu1 }
 0x131   :  { %v1460_v20 = vadd.f32 %v1459_v18, %v1245_v19  ;;  %v1247_v23 = vpop.f32.mrb[5].mxu0  ;;  %v1288_v22 = vpop.f32.mrb[5].mxu1 }
 0x132   :  { %v1249_v24 = vpop.f32.mrb[6].mxu0  ;;  %v1290_v26 = vpop.f32.mrb[6].mxu1 }
 0x133   :  { %v1461_v25 = vadd.f32 %v1460_v20, %v1247_v23  ;;  %v1250_v27 = vpop.f32.mrb[7].mxu0  ;;  %v1291_v28 = vpop.f32.mrb[7].mxu1 }
 0x135   :  { %v1462_v29 = vadd.f32 %v1461_v25, %v1286_v21 }
 0x137   :  { %v1463_v30 = vadd.f32 %v1462_v29, %v1288_v22 }
 0x144   :  { %v1327_v31 = vpop.f32.mrb[8].mxu0  ;;  %v1368_v33 = vpop.f32.mrb[8].mxu1 }
 0x145   :  { %v1464_v32 = vadd.f32 %v1463_v30, %v1327_v31  ;;  %v1329_v34 = vpop.f32.mrb[9].mxu0  ;;  %v1370_v35 = vpop.f32.mrb[9].mxu1 }
 0x146   :  { %v1331_v37 = vpop.f32.mrb[10].mxu0  ;;  %v1372_v39 = vpop.f32.mrb[10].mxu1 }
 0x147   :  { %v1465_v38 = vadd.f32 %v1464_v32, %v1329_v34  ;;  %v1332_v40 = vpop.f32.mrb[11].mxu0  ;;  %v1373_v41 = vpop.f32.mrb[11].mxu1 }
 0x149   :  { %v1466_v42 = vadd.f32 %v1465_v38, %v1368_v33 }
 0x14b   :  { %v1467_v43 = vadd.f32 %v1466_v42, %v1370_v35 }
 0x158   :  { %v1409_v44 = vpop.f32.mrb[12].mxu0  ;;  %v1450_v46 = vpop.f32.mrb[12].mxu1 }
 0x159   :  { %v1468_v45 = vadd.f32 %v1467_v43, %v1409_v44  ;;  %v1411_v47 = vpop.f32.mrb[13].mxu0  ;;  %v1452_v48 = vpop.f32.mrb[13].mxu1 }
 0x15a   :  { %v1413_v49 = vpop.f32.mrb[14].mxu0  ;;  %v1454_v51 = vpop.f32.mrb[14].mxu1 }
 0x15b   :  { %v1469_v50 = vadd.f32 %v1468_v45, %v1411_v47  ;;  %v1414_v52 = vpop.f32.mrb[15].mxu0  ;;  %v1455_v53 = vpop.f32.mrb[15].mxu1 }
 0x15d   :  { %v1470_v54 = vadd.f32 %v1469_v50, %v1450_v46 }
 0x15f   :  { %v1471_v55 = vadd.f32 %v1470_v54, %v1452_v48 }
 0x161   :  { %1472 = vadd.xlane.f32.xlu0 %v1471_v55 }
 0x1ee   :  { %v1473_v56 = vpop.xlane.xlu0 %1472 }
 0x1ef   :  { %v1475_v57 = vmul.f32 0.00048828125, %v1473_v56 }
 0x1f1   :  { %v1476_v58 = vsub.f32 %v1163_v8, %v1475_v57  ;;  %v1477_v59 = vsub.f32 %v1165_v10, %v1475_v57  ;;  %v1478_v36 = vsub.f32 %v1204_v9, %v1475_v57  ;;  %v1479_v62 = vsub.f32 %v1206_v12, %v1475_v57 }
 0x1f2   :  { %v1480_v63 = vsub.f32 %v1245_v19, %v1475_v57  ;;  %v1481_v2 = vsub.f32 %v1247_v23, %v1475_v57  ;;  %v1482_v6 = vsub.f32 %v1286_v21, %v1475_v57  ;;  %v1483_v13 = vsub.f32 %v1288_v22, %v1475_v57 }
 0x1f3   :  { %v1492_v60 = vmul.f32 %v1476_v58, %v1476_v58  ;;  %v1493_v61 = vmul.f32 %v1477_v59, %v1477_v59  ;;  %v1494_v0 = vmul.f32 %v1478_v36, %v1478_v36  ;;  %v1495_v4 = vmul.f32 %v1479_v62, %v1479_v62 }
 0x1f4   :  { %v1496_v7 = vmul.f32 %v1480_v63, %v1480_v63  ;;  %v1497_v14 = vmul.f32 %v1481_v2, %v1481_v2  ;;  %v2919_v16 = vsub.f32 %v1327_v31, %v1475_v57  ;;  %v1498_v8 = vmul.f32 %v1482_v6, %v1482_v6 }
 0x1f5   :  { %v1508_v1 = vadd.f32 %v1493_v61, %v1492_v60  ;;  %v2921_v9 = vsub.f32 %v1329_v34, %v1475_v57  ;;  %v1499_v17 = vmul.f32 %v1483_v13, %v1483_v13  ;;  %v2923_v18 = vsub.f32 %v1368_v33, %v1475_v57 }
 0x1f6   :  { %v1500_v19 = vmul.f32 %v2919_v16, %v2919_v16  ;;  %v2927_v21 = vsub.f32 %v1370_v35, %v1475_v57  ;;  %v2931_v24 = vsub.f32 %v1409_v44, %v1475_v57  ;;  %v2935_v27 = vsub.f32 %v1411_v47, %v1475_v57 }
 0x1f7   :  { %v1509_v5 = vadd.f32 %v1508_v1, %v1494_v0  ;;  %v1501_v23 = vmul.f32 %v2921_v9, %v2921_v9  ;;  %v1502_v25 = vmul.f32 %v2923_v18, %v2923_v18  ;;  %v2939_v30 = vsub.f32 %v1450_v46, %v1475_v57 }
 0x1f8   :  { %v1503_v28 = vmul.f32 %v2927_v21, %v2927_v21  ;;  %v1504_v31 = vmul.f32 %v2931_v24, %v2931_v24  ;;  %v2943_v33 = vsub.f32 %v1452_v48, %v1475_v57  ;;  %v1505_v34 = vmul.f32 %v2935_v27, %v2935_v27 }
 0x1f9   :  { %v1510_v11 = vadd.f32 %v1509_v5, %v1495_v4  ;;  %v1506_v37 = vmul.f32 %v2939_v30, %v2939_v30 }
 0x1fa   :  { %v1507_v39 = vmul.f32 %v2943_v33, %v2943_v33 }
 0x1fb   :  { %v1511_v15 = vadd.f32 %v1510_v11, %v1496_v7 }
 0x1fd   :  { %v1512_v10 = vadd.f32 %v1511_v15, %v1497_v14  ;;  %v2968_v15 = vld [vmem:[%s3064_s4] sm:$0xf] }
 0x1ff   :  { %v1513_v12 = vadd.f32 %v1512_v10, %v1498_v8 }
 0x201   :  { %v1514_v20 = vadd.f32 %v1513_v12, %v1499_v17 }
 0x203   :  { %v1515_v22 = vadd.f32 %v1514_v20, %v1500_v19 }
 0x205   :  { %v1516_v26 = vadd.f32 %v1515_v22, %v1501_v23 }
 0x207   :  { %v1517_v29 = vadd.f32 %v1516_v26, %v1502_v25 }
 0x209   :  { %v1518_v32 = vadd.f32 %v1517_v29, %v1503_v28 }
 0x20b   :  { %v1519_v35 = vadd.f32 %v1518_v32, %v1504_v31 }
 0x20d   :  { %v1520_v38 = vadd.f32 %v1519_v35, %v1505_v34 }
 0x20f   :  { %v1521_v40 = vadd.f32 %v1520_v38, %v1506_v37 }
 0x211   :  { %v1522_v41 = vadd.f32 %v1521_v40, %v1507_v39 }
 0x213   :  { %1523 = vadd.xlane.f32.xlu0 %v1522_v41 }
 0x2a0   :  { %v1524_v42 = vpop.xlane.xlu0 %1523 }
 0x2a1   :  { %v1525_v43 = vmul.f32 0.00048828125, %v1524_v42 }
 0x2a3   :  { %v1526_v44 = vadd.f32 1e-05, %v1525_v43 }
 0x2a5   :  { %2456 = vrsqrt.f32 %v1526_v44 }
 0x2af   :  { %v2951_v45 = vpop.eup %2456 }
 0x2b0   :  { %v1529_v46 = vmul.f32 %v2951_v45, %v1477_v59  ;;  %v1531_v47 = vmul.f32 %v2951_v45, %v1479_v62  ;;  %v1528_v48 = vmul.f32 %v2951_v45, %v1476_v58  ;;  %v1530_v49 = vmul.f32 %v2951_v45, %v1478_v36 }
 0x2b1   :  { %v1533_v50 = vmul.f32 %v2951_v45, %v1481_v2  ;;  %v1535_v51 = vmul.f32 %v2951_v45, %v1483_v13  ;;  %v1532_v52 = vmul.f32 %v2951_v45, %v1480_v63  ;;  %v1534_v53 = vmul.f32 %v2951_v45, %v1482_v6 }
 0x2b2   :  { %vm1545_vm4 = vcmp.ge.f32.partialorder %v1529_v46, 0.0  ;;  %v1561_v54 = vmul.f32 0.2, %v1529_v46  ;;  %vm1547_vm5 = vcmp.ge.f32.partialorder %v1531_v47, 0.0  ;;  %v1563_v55 = vmul.f32 0.2, %v1531_v47 }
 0x2b3   :  { %vm1544_vm6 = vcmp.ge.f32.partialorder %v1528_v48, 0.0  ;;  %v1560_v56 = vmul.f32 0.2, %v1528_v48  ;;  %vm1546_vm7 = vcmp.ge.f32.partialorder %v1530_v49, 0.0  ;;  %v1562_v57 = vmul.f32 0.2, %v1530_v49 }
 0x2b4   :  { %v1577_v59 = vsel %vm1545_vm4, %v1529_v46, %v1561_v54  ;;  %v1579_v58 = vsel %vm1547_vm5, %v1531_v47, %v1563_v55  ;;  %vm1549_vm8 = vcmp.ge.f32.partialorder %v1533_v50, 0.0  ;;  %v1565_v36 = vmul.f32 0.2, %v1533_v50 }
 0x2b5   :  { %v1594_v60 = vpack.c.bf16 %v1577_v59, %v1577_v59  ;;  %v1596_v61 = vpack.c.bf16 %v1579_v58, %v1579_v58  ;;  %v1576_v62 = vsel %vm1544_vm6, %v1528_v48, %v1560_v56  ;;  %v1578_v0 = vsel %vm1546_vm7, %v1530_v49, %v1562_v57 }
 0x2b6   :  { %v1593_v1 = vpack.c.bf16 %v1576_v62, %v1576_v62  ;;  %v1595_v63 = vpack.c.bf16 %v1578_v0, %v1578_v0  ;;  %v1581_v2 = vsel %vm1549_vm8, %v1533_v50, %v1565_v36  ;;  %vm1551_vm9 = vcmp.ge.f32.partialorder %v1535_v51, 0.0 }
 0x2b7   :  { %2359 = vmatprep.subr.msk.bf16.mxu0 %vm1080_vm2, %v1594_v60  ;;  %2361 = vmatprep.subr.msk.bf16.mxu1 %vm1080_vm2, %v1596_v61  ;;  %v1598_v4 = vpack.c.bf16 %v1581_v2, %v1581_v2  ;;  %v1567_v5 = vmul.f32 0.2, %v1535_v51  ;;  %vm1548_vm10 = vcmp.ge.f32.partialorder %v1532_v52, 0.0  ;;  %v1564_v6 = vmul.f32 0.2, %v1532_v52 }
 0x2b8   :  { %v1614_v7 = vsel %vm1080_vm2, %v1593_v1, 0  ;;  %v1620_v11 = vsel %vm1080_vm2, %v1595_v63, 0  ;;  %vm1550_vm11 = vcmp.ge.f32.partialorder %v1534_v53, 0.0  ;;  %v1566_v13 = vmul.f32 0.2, %v1534_v53 }
 0x2b9   :  { %1662 = vmatpush1.bf16.msra.mxu0 %v1614_v7  ;;  %1703 = vmatpush1.bf16.msra.mxu1 %v1620_v11  ;;  %v1583_v14 = vsel %vm1551_vm9, %v1535_v51, %v1567_v5  ;;  %v1580_v8 = vsel %vm1548_vm10, %v1532_v52, %v1564_v6  ;;  %v1537_v10 = vmul.f32 %v2951_v45, %v2921_v9 }
 0x2ba   :  { %2363 = vmatprep.subr.msk.bf16.mxu0 %vm1080_vm2, %v1598_v4  ;;  %v1600_v17 = vpack.c.bf16 %v1583_v14, %v1583_v14  ;;  %v1597_v12 = vpack.c.bf16 %v1580_v8, %v1580_v8  ;;  %v1582_v19 = vsel %vm1550_vm11, %v1534_v53, %v1566_v13  ;;  %v1539_v20 = vmul.f32 %v2951_v45, %v2927_v21 }
 0x2bb   :  { %v1599_v23 = vpack.c.bf16 %v1582_v19, %v1582_v19  ;;  %vm1553_vm13 = vcmp.ge.f32.partialorder %v1537_v10, 0.0  ;;  %v1569_v22 = vmul.f32 0.2, %v1537_v10  ;;  %v1536_v25 = vmul.f32 %v2951_v45, %v2919_v16 }
 0x2bc   :  { %2365 = vmatprep.subr.msk.bf16.mxu1 %vm1080_vm2, %v1600_v17  ;;  %2360 = vmatmul.mubr.msk.bf16.vlgmr.msra.gmra.mrb[16].mxu0 %vm1609_vm12, %v2968_v15  ;;  %v1626_v9 = vsel %vm1080_vm2, %v1597_v12, 0  ;;  %vm1555_vm14 = vcmp.ge.f32.partialorder %v1539_v20, 0.0  ;;  %v1571_v26 = vmul.f32 0.2, %v1539_v20  ;;  %v1538_v28 = vmul.f32 %v2951_v45, %v2923_v18 }
 0x2bd   :  { %2362 = vmatmul.mubr.msk.bf16.vlgmr.msra.gmra.mrb[16].mxu1 %vm1609_vm12, %v2968_v15  ;;  %1744 = vmatpush1.bf16.msra.mxu0 %v1626_v9  ;;  %v1632_v21 = vsel %vm1080_vm2, %v1599_v23, 0  ;;  %v1585_v29 = vsel %vm1553_vm13, %v1537_v10, %v1569_v22  ;;  %vm1552_vm15 = vcmp.ge.f32.partialorder %v1536_v25, 0.0  ;;  %v1568_v16 = vmul.f32 0.2, %v1536_v25 }
 0x2be   :  { %1785 = vmatpush1.bf16.msra.mxu1 %v1632_v21  ;;  %v1602_v31 = vpack.c.bf16 %v1585_v29, %v1585_v29  ;;  %v1587_v32 = vsel %vm1555_vm14, %v1539_v20, %v1571_v26  ;;  %1775 = vmatprep.mubr.bf16.mxu0 %v2460_v3  ;;  %vm1554_vm0 = vcmp.ge.f32.partialorder %v1538_v28, 0.0  ;;  %v1570_v34 = vmul.f32 0.2, %v1538_v28 }
 0x2bf   :  { %v1604_v35 = vpack.c.bf16 %v1587_v32, %v1587_v32  ;;  %1816 = vmatprep.mubr.bf16.mxu1 %v2460_v3  ;;  %v1584_v18 = vsel %vm1552_vm15, %v1536_v25, %v1568_v16  ;;  %v1541_v37 = vmul.f32 %v2951_v45, %v2935_v27  ;;  %v1543_v38 = vmul.f32 %v2951_v45, %v2943_v33 }
 0x2c0   :  { %2367 = vmatprep.subr.msk.bf16.mxu0 %vm1080_vm2, %v1602_v31  ;;  %v1601_v39 = vpack.c.bf16 %v1584_v18, %v1584_v18  ;;  %v1586_v40 = vsel %vm1554_vm0, %v1538_v28, %v1570_v34  ;;  %v1540_v41 = vmul.f32 %v2951_v45, %v2931_v24  ;;  %v1542_v42 = vmul.f32 %v2951_v45, %v2939_v30 }
 0x2c1   :  { %2369 = vmatprep.subr.msk.bf16.mxu1 %vm1080_vm2, %v1604_v35  ;;  %v1603_v43 = vpack.c.bf16 %v1586_v40, %v1586_v40  ;;  %vm1557_vm1 = vcmp.ge.f32.partialorder %v1541_v37, 0.0  ;;  %v1573_v44 = vmul.f32 0.2, %v1541_v37  ;;  %vm1559_vm3 = vcmp.ge.f32.partialorder %v1543_v38, 0.0 }
 0x2c2   :  { %v1575_v27 = vmul.f32 0.2, %v1543_v38  ;;  %vm1556_vm4 = vcmp.ge.f32.partialorder %v1540_v41, 0.0  ;;  %v1572_v46 = vmul.f32 0.2, %v1540_v41  ;;  %vm1558_vm5 = vcmp.ge.f32.partialorder %v1542_v42, 0.0 }
 0x2c3   :  { %v1589_v33 = vsel %vm1557_vm1, %v1541_v37, %v1573_v44  ;;  %v1574_v47 = vmul.f32 0.2, %v1542_v42  ;;  %v1638_v24 = vsel %vm1080_vm2, %v1601_v39, 0  ;;  %v1644_v30 = vsel %vm1080_vm2, %v1603_v43, 0 }
 0x2c4   :  { %2364 = vmatmul.mubr.msk.bf16.vlgmr.msra.gmra.mrb[20].mxu0 %vm1609_vm12, %v2968_v15  ;;  %v1606_v48 = vpack.c.bf16 %v1589_v33, %v1589_v33  ;;  %v1591_v49 = vsel %vm1559_vm3, %v1543_v38, %v1575_v27  ;;  %v1588_v50 = vsel %vm1556_vm4, %v1540_v41, %v1572_v46 }
 0x2c5   :  { %2366 = vmatmul.mubr.msk.bf16.vlgmr.msra.gmra.mrb[20].mxu1 %vm1609_vm12, %v2968_v15  ;;  %1826 = vmatpush1.bf16.msra.mxu0 %v1638_v24  ;;  %v1608_v45 = vpack.c.bf16 %v1591_v49, %v1591_v49  ;;  %v1590_v51 = vsel %vm1558_vm5, %v1542_v42, %v1574_v47  ;;  %v1605_v52 = vpack.c.bf16 %v1588_v50, %v1588_v50 }
 0x2c6   :  { %1867 = vmatpush1.bf16.msra.mxu1 %v1644_v30  ;;  %2371 = vmatprep.subr.msk.bf16.mxu0 %vm1080_vm2, %v1606_v48  ;;  %v1607_v53 = vpack.c.bf16 %v1590_v51, %v1590_v51 }
 0x2c7   :  { %2373 = vmatprep.subr.msk.bf16.mxu1 %vm1080_vm2, %v1608_v45  ;;  %1857 = vmatprep.mubr.bf16.mxu0 %v2460_v3  ;;  %v1650_v54 = vsel %vm1080_vm2, %v1605_v52, 0 }
 0x2c8   :  { %1898 = vmatprep.mubr.bf16.mxu1 %v2460_v3  ;;  %v1656_v55 = vsel %vm1080_vm2, %v1607_v53, 0 }
 0x2cc   :  { %2368 = vmatmul.mubr.msk.bf16.vlgmr.msra.gmra.mrb[24].mxu0 %vm1609_vm12, %v2968_v15 }
 0x2cd   :  { %2370 = vmatmul.mubr.msk.bf16.vlgmr.msra.gmra.mrb[24].mxu1 %vm1609_vm12, %v2968_v15  ;;  %1908 = vmatpush1.bf16.msra.mxu0 %v1650_v54 }
 0x2ce   :  { %1949 = vmatpush1.bf16.msra.mxu1 %v1656_v55  ;;  %1939 = vmatprep.mubr.bf16.mxu0 %v2460_v3 }
 0x2cf   :  { %1980 = vmatprep.mubr.bf16.mxu1 %v2460_v3 }
 0x2d4   :  { %2372 = vmatmul.mubr.msk.bf16.vlgmr.msra.gmra.mrb[28].mxu0 %vm1609_vm12, %v2968_v15 }
 0x2d5   :  { %2374 = vmatmul.mubr.msk.bf16.vlgmr.msra.gmra.mrb[28].mxu1 %vm1609_vm12, %v2968_v15 }
 0x38f   :  { %v1695_v56 = vpop.f32.mrb[16].mxu0 }
 0x390   :  { %v1697_v57 = vpop.f32.mrb[17].mxu0  ;;  %v1736_v59 = vpop.f32.mrb[16].mxu1 }
 0x391   :  { %v1989_v58 = vadd.f32 %v1697_v57, %v1695_v56  ;;  %v1699_v36 = vpop.f32.mrb[18].mxu0  ;;  %v1738_v60 = vpop.f32.mrb[17].mxu1 }
 0x392   :  { %v1700_v61 = vpop.f32.mrb[19].mxu0  ;;  %v1740_v62 = vpop.f32.mrb[18].mxu1 }
 0x393   :  { %v1990_v0 = vadd.f32 %v1989_v58, %v1736_v59  ;;  %v1741_v1 = vpop.f32.mrb[19].mxu1 }
 0x395   :  { %v1991_v63 = vadd.f32 %v1990_v0, %v1738_v60 }
 0x397   :  { %v1777_v2 = vpop.f32.mrb[20].mxu0 }
 0x398   :  { %v1992_v4 = vadd.f32 %v1991_v63, %v1777_v2  ;;  %v1779_v3 = vpop.f32.mrb[21].mxu0  ;;  %v1818_v5 = vpop.f32.mrb[20].mxu1 }
 0x399   :  { %v1781_v6 = vpop.f32.mrb[22].mxu0  ;;  %v1820_v7 = vpop.f32.mrb[21].mxu1 }
 0x39a   :  { %v1993_v11 = vadd.f32 %v1992_v4, %v1779_v3  ;;  %v1782_v13 = vpop.f32.mrb[23].mxu0  ;;  %v1822_v14 = vpop.f32.mrb[22].mxu1 }
 0x39b   :  { %v1823_v15 = vpop.f32.mrb[23].mxu1 }
 0x39c   :  { %v1994_v8 = vadd.f32 %v1993_v11, %v1818_v5 }
 0x39e   :  { %v1995_v10 = vadd.f32 %v1994_v8, %v1820_v7 }
 0x39f   :  { %v1859_v17 = vpop.f32.mrb[24].mxu0 }
 0x3a0   :  { %v1996_v12 = vadd.f32 %v1995_v10, %v1859_v17  ;;  %v1861_v19 = vpop.f32.mrb[25].mxu0  ;;  %v1900_v20 = vpop.f32.mrb[24].mxu1 }
 0x3a1   :  { %v1863_v23 = vpop.f32.mrb[26].mxu0  ;;  %v1902_v22 = vpop.f32.mrb[25].mxu1 }
 0x3a2   :  { %v1997_v25 = vadd.f32 %v1996_v12, %v1861_v19  ;;  %v1864_v9 = vpop.f32.mrb[27].mxu0  ;;  %v1904_v26 = vpop.f32.mrb[26].mxu1 }
 0x3a3   :  { %v1905_v28 = vpop.f32.mrb[27].mxu1 }
 0x3a4   :  { %v1998_v21 = vadd.f32 %v1997_v25, %v1900_v20 }
 0x3a6   :  { %v1999_v29 = vadd.f32 %v1998_v21, %v1902_v22 }
 0x3a7   :  { %v1941_v16 = vpop.f32.mrb[28].mxu0 }
 0x3a8   :  { %v2000_v31 = vadd.f32 %v1999_v29, %v1941_v16  ;;  %v1943_v32 = vpop.f32.mrb[29].mxu0  ;;  %v1982_v34 = vpop.f32.mrb[28].mxu1 }
 0x3a9   :  { %v1945_v35 = vpop.f32.mrb[30].mxu0  ;;  %v1984_v18 = vpop.f32.mrb[29].mxu1 }
 0x3aa   :  { %v2001_v37 = vadd.f32 %v2000_v31, %v1943_v32  ;;  %v1946_v38 = vpop.f32.mrb[31].mxu0  ;;  %v1986_v39 = vpop.f32.mrb[30].mxu1 }
 0x3ab   :  { %v1987_v40 = vpop.f32.mrb[31].mxu1 }
 0x3ac   :  { %v2002_v41 = vadd.f32 %v2001_v37, %v1982_v34 }
 0x3ae   :  { %v2003_v42 = vadd.f32 %v2002_v41, %v1984_v18 }
 0x3b0   :  { %2004 = vadd.xlane.f32.xlu1 %v2003_v42 }
 0x43d   :  { %v2005_v43 = vpop.xlane.xlu1 %2004 }
 0x43e   :  { %v2006_v44 = vmul.f32 0.00048828125, %v2005_v43 }
 0x440   :  { %v2007_v27 = vsub.f32 %v1695_v56, %v2006_v44  ;;  %v2008_v46 = vsub.f32 %v1697_v57, %v2006_v44  ;;  %v2009_v33 = vsub.f32 %v1736_v59, %v2006_v44  ;;  %v2010_v48 = vsub.f32 %v1738_v60, %v2006_v44 }
 0x441   :  { %v2011_v49 = vsub.f32 %v1777_v2, %v2006_v44  ;;  %v2012_v50 = vsub.f32 %v1779_v3, %v2006_v44  ;;  %v2013_v53 = vsub.f32 %v1818_v5, %v2006_v44  ;;  %v2014_v58 = vsub.f32 %v1820_v7, %v2006_v44 }
 0x442   :  { %v2023_v47 = vmul.f32 %v2007_v27, %v2007_v27  ;;  %v2024_v24 = vmul.f32 %v2008_v46, %v2008_v46  ;;  %v2025_v30 = vmul.f32 %v2009_v33, %v2009_v33  ;;  %v2026_v51 = vmul.f32 %v2010_v48, %v2010_v48 }
 0x443   :  { %v2027_v54 = vmul.f32 %v2011_v49, %v2011_v49  ;;  %v2028_v36 = vmul.f32 %v2012_v50, %v2012_v50  ;;  %v2015_v62 = vsub.f32 %v1859_v17, %v2006_v44  ;;  %v2029_v0 = vmul.f32 %v2013_v53, %v2013_v53 }
 0x444   :  { %v2039_v45 = vadd.f32 %v2024_v24, %v2023_v47  ;;  %v2016_v57 = vsub.f32 %v1861_v19, %v2006_v44  ;;  %v2030_v59 = vmul.f32 %v2014_v58, %v2014_v58  ;;  %v2017_v63 = vsub.f32 %v1900_v20, %v2006_v44 }
 0x445   :  { %v2031_v60 = vmul.f32 %v2015_v62, %v2015_v62  ;;  %v2018_v4 = vsub.f32 %v1902_v22, %v2006_v44  ;;  %v2019_v11 = vsub.f32 %v1941_v16, %v2006_v44  ;;  %v2020_v14 = vsub.f32 %v1943_v32, %v2006_v44 }
 0x446   :  { %v2040_v52 = vadd.f32 %v2039_v45, %v2025_v30  ;;  %v2032_v6 = vmul.f32 %v2016_v57, %v2016_v57  ;;  %v2033_v13 = vmul.f32 %v2017_v63, %v2017_v63  ;;  %v2021_v8 = vsub.f32 %v1982_v34, %v2006_v44 }
 0x447   :  { %v2034_v15 = vmul.f32 %v2018_v4, %v2018_v4  ;;  %v2035_v10 = vmul.f32 %v2019_v11, %v2019_v11  ;;  %v2022_v12 = vsub.f32 %v1984_v18, %v2006_v44  ;;  %v2036_v23 = vmul.f32 %v2020_v14, %v2020_v14 }
 0x448   :  { %v2041_v55 = vadd.f32 %v2040_v52, %v2026_v51  ;;  %v2037_v25 = vmul.f32 %v2021_v8, %v2021_v8 }
 0x449   :  { %v2038_v20 = vmul.f32 %v2022_v12, %v2022_v12 }
 0x44a   :  { %v2042_v61 = vadd.f32 %v2041_v55, %v2027_v54 }
 0x44c   :  { %v2043_v56 = vadd.f32 %v2042_v61, %v2028_v36 }
 0x44e   :  { %v2044_v1 = vadd.f32 %v2043_v56, %v2029_v0 }
 0x450   :  { %v2045_v2 = vadd.f32 %v2044_v1, %v2030_v59 }
 0x452   :  { %v2046_v3 = vadd.f32 %v2045_v2, %v2031_v60 }
 0x454   :  { %v2047_v5 = vadd.f32 %v2046_v3, %v2032_v6 }
 0x456   :  { %v2048_v7 = vadd.f32 %v2047_v5, %v2033_v13 }
 0x458   :  { %v2049_v17 = vadd.f32 %v2048_v7, %v2034_v15 }
 0x45a   :  { %v2050_v19 = vadd.f32 %v2049_v17, %v2035_v10 }
 0x45c   :  { %v2051_v9 = vadd.f32 %v2050_v19, %v2036_v23 }
 0x45e   :  { %v2052_v26 = vadd.f32 %v2051_v9, %v2037_v25 }
 0x460   :  { %v2053_v28 = vadd.f32 %v2052_v26, %v2038_v20 }
 0x462   :  { %2054 = vadd.xlane.f32.xlu1 %v2053_v28 }
 0x4ef   :  { %v2055_v22 = vpop.xlane.xlu1 %2054 }
 0x4f0   :  { %v2056_v21 = vmul.f32 0.00048828125, %v2055_v22 }
 0x4f2   :  { %v2057_v29 = vadd.f32 1e-05, %v2056_v21 }
 0x4f4   :  { %2458 = vrsqrt.f32 %v2057_v29 }
 0x4fe   :  { %v2459_v16 = vpop.eup %2458 }
 0x4ff   :  { %v2059_v31 = vmul.f32 %v2459_v16, %v2007_v27  ;;  %v2060_v32 = vmul.f32 %v2459_v16, %v2008_v46  ;;  %v2061_v35 = vmul.f32 %v2459_v16, %v2009_v33  ;;  %v2062_v34 = vmul.f32 %v2459_v16, %v2010_v48 }
 0x500   :  { %v2063_v37 = vmul.f32 %v2459_v16, %v2011_v49  ;;  %v2064_v38 = vmul.f32 %v2459_v16, %v2012_v50  ;;  %v2065_v18 = vmul.f32 %v2459_v16, %v2013_v53  ;;  %v2066_v39 = vmul.f32 %v2459_v16, %v2014_v58 }
 0x501   :  { %v2067_v40 = vmul.f32 %v2459_v16, %v2015_v62  ;;  %v2068_v41 = vmul.f32 %v2459_v16, %v2016_v57  ;;  %v2069_v42 = vmul.f32 %v2459_v16, %v2017_v63  ;;  %v2070_v43 = vmul.f32 %v2459_v16, %v2018_v4 }
 0x502   :  { %v2071_v44 = vmul.f32 %v2459_v16, %v2019_v11  ;;  %v2072_v47 = vmul.f32 %v2459_v16, %v2020_v14  ;;  %v2073_v24 = vmul.f32 %v2459_v16, %v2021_v8  ;;  %v2074_v30 = vmul.f32 %v2459_v16, %v2022_v12 }
 0x503   :  { %vm2075_vm2 = vcmp.ge.f32.partialorder %v2059_v31, 0.0  ;;  %vm2076_vm6 = vcmp.ge.f32.partialorder %v2060_v32, 0.0  ;;  %vm2077_vm7 = vcmp.ge.f32.partialorder %v2061_v35, 0.0  ;;  %vm2078_vm8 = vcmp.ge.f32.partialorder %v2062_v34, 0.0 }
 0x504   :  { %vm2079_vm9 = vcmp.ge.f32.partialorder %v2063_v37, 0.0  ;;  %vm2080_vm10 = vcmp.ge.f32.partialorder %v2064_v38, 0.0  ;;  %vm2081_vm11 = vcmp.ge.f32.partialorder %v2065_v18, 0.0  ;;  %vm2082_vm12 = vcmp.ge.f32.partialorder %v2066_v39, 0.0 }
 0x505   :  { %vm2083_vm13 = vcmp.ge.f32.partialorder %v2067_v40, 0.0  ;;  %vm2084_vm14 = vcmp.ge.f32.partialorder %v2068_v41, 0.0  ;;  %vm2085_vm15 = vcmp.ge.f32.partialorder %v2069_v42, 0.0  ;;  %vm2086_vm0 = vcmp.ge.f32.partialorder %v2070_v43, 0.0 }
 0x506   :  { %vm2087_vm1 = vcmp.ge.f32.partialorder %v2071_v44, 0.0  ;;  %vm2088_vm3 = vcmp.ge.f32.partialorder %v2072_v47, 0.0  ;;  %vm2089_vm4 = vcmp.ge.f32.partialorder %v2073_v24, 0.0  ;;  %vm2090_vm5 = vcmp.ge.f32.partialorder %v2074_v30, 0.0 }
 0x507   :  { %v2091_v27 = vmul.f32 0.2, %v2059_v31  ;;  %v2092_v46 = vmul.f32 0.2, %v2060_v32  ;;  %v2093_v33 = vmul.f32 0.2, %v2061_v35 }
 0x508   :  { %v2094_v48 = vmul.f32 0.2, %v2062_v34  ;;  %v2095_v49 = vmul.f32 0.2, %v2063_v37  ;;  %v2096_v45 = vmul.f32 0.2, %v2064_v38 }
 0x509   :  { %v2097_v50 = vmul.f32 0.2, %v2065_v18  ;;  %v2098_v51 = vmul.f32 0.2, %v2066_v39  ;;  %v2099_v52 = vmul.f32 0.2, %v2067_v40  ;;  %v2107_v53 = vsel %vm2075_vm2, %v2059_v31, %v2091_v27 }
 0x50a   :  { %v2100_v54 = vmul.f32 0.2, %v2068_v41  ;;  %v2101_v55 = vmul.f32 0.2, %v2069_v42  ;;  %v2102_v58 = vmul.f32 0.2, %v2070_v43  ;;  %v2108_v36 = vsel %vm2076_vm6, %v2060_v32, %v2092_v46 }
 0x50b   :  { %v2103_v61 = vmul.f32 0.2, %v2071_v44  ;;  %v2104_v62 = vmul.f32 0.2, %v2072_v47  ;;  %v2105_v0 = vmul.f32 0.2, %v2073_v24  ;;  %v2109_v56 = vsel %vm2077_vm7, %v2061_v35, %v2093_v33 }
 0x50c   :  { %v2106_v57 = vmul.f32 0.2, %v2074_v30  ;;  %v2110_v59 = vsel %vm2078_vm8, %v2062_v34, %v2094_v48  ;;  %v2111_v1 = vsel %vm2079_vm9, %v2063_v37, %v2095_v49  ;;  %v2112_v63 = vsel %vm2080_vm10, %v2064_v38, %v2096_v45 }
 0x50d   :  { %v2113_v60 = vsel %vm2081_vm11, %v2065_v18, %v2097_v50  ;;  %v2114_v2 = vsel %vm2082_vm12, %v2066_v39, %v2098_v51  ;;  %v2115_v4 = vsel %vm2083_vm13, %v2067_v40, %v2099_v52  ;;  %v2116_v6 = vsel %vm2084_vm14, %v2068_v41, %v2100_v54 }
 0x50e   :  { %v2117_v3 = vsel %vm2085_vm15, %v2069_v42, %v2101_v55  ;;  %v2118_v11 = vsel %vm2086_vm0, %v2070_v43, %v2102_v58  ;;  %v2119_v13 = vsel %vm2087_vm1, %v2071_v44, %v2103_v61  ;;  %v2120_v5 = vsel %vm2088_vm3, %v2072_v47, %v2104_v62 }
 0x50f   :  { %v2121_v14 = vsel %vm2089_vm4, %v2073_v24, %v2105_v0  ;;  %v2122_v15 = vsel %vm2090_vm5, %v2074_v30, %v2106_v57  ;;  %v2383_v7 = vpack.c.bf16 %v2108_v36, %v2107_v53  ;;  %v2384_v8 = vpack.c.bf16 %v2110_v59, %v2109_v56 }
 0x510   :  { %v2385_v10 = vpack.c.bf16 %v2112_v63, %v2111_v1  ;;  %v2386_v17 = vpack.c.bf16 %v2114_v2, %v2113_v60  ;;  %v2387_v12 = vpack.c.bf16 %v2116_v6, %v2115_v4  ;;  %v2388_v23 = vpack.c.bf16 %v2118_v11, %v2117_v3 }
 0x511   :  { %v2389_v19 = vpack.c.bf16 %v2120_v5, %v2119_v13  ;;  %v2390_v25 = vpack.c.bf16 %v2122_v15, %v2121_v14  ;;  %2187 = vst [vmem:[%s3065_s5] sm:$0xff] %v2383_v7  ;;  %2188 = vst [vmem:[%s3065_s5 + $0x8] sm:$0xff] %v2384_v8 }
 0x512   :  { %2189 = vst [vmem:[%s3065_s5 + $0x10] sm:$0xff] %v2385_v10  ;;  %2190 = vst [vmem:[%s3065_s5 + $0x18] sm:$0xff] %v2386_v17 }
 0x513   :  { %2191 = vst [vmem:[%s3065_s5 + $0x20] sm:$0xff] %v2387_v12  ;;  %2192 = vst [vmem:[%s3065_s5 + $0x28] sm:$0xff] %v2388_v23 }
 0x514   :  { %2193 = vst [vmem:[%s3065_s5 + $0x30] sm:$0xff] %v2389_v19  ;;  %2194 = vst [vmem:[%s3065_s5 + $0x38] sm:$0xff] %v2390_v25 }

</bundles_post_ra>
